<compile_context>
chip_gen: v5e
topology: v5e:2x2
jax: 0.10.0
libtpu: 0.0.40
codegen_flags: <defaults>
</compile_context>

<pallas_src>
import functools

import numpy as np

import jax
import jax.numpy as jnp
from jax.experimental import pallas as pl
from jax.experimental.pallas import tpu as pltpu


_LRELU_SLOPE = 0.02     # module uses nn.LeakyReLU(0.02) everywhere
_BN_EPS = 1e-5


# ----------------------------------------------------------------------------
# In-kernel helpers
# ----------------------------------------------------------------------------
def _lrelu(v):
    return jnp.where(v > 0, v, _LRELU_SLOPE * v)


def _col_masks(HW, W):
    """f32 (1, HW) masks built in-kernel.  cm_last zeroes column W-1 (used by
    the dw=-1 source slab), cm_first zeroes column 0 (dw=+1 slab)."""
    col = jax.lax.broadcasted_iota(jnp.int32, (1, HW), 1) % W
    cm_last = (col != (W - 1)).astype(jnp.float32)
    cm_first = (col != 0).astype(jnp.float32)
    return cm_last, cm_first


def _zero_margins(pad_ref, HW, W):
    """(Re)zero the two (rows, W+1) margins of the padded scratch.  Cheap, and
    done unconditionally every grid step so it stays correct when the batch
    grid axis is partitioned across TensorCores (per-core scratch is
    uninitialised)."""
    m0 = W + 1
    rows = pad_ref.shape[0]
    z = jnp.zeros((rows, m0), pad_ref.dtype)
    pad_ref[:, 0:m0] = z
    pad_ref[:, m0 + HW:m0 + HW + m0] = z


def _to_pad3(pad_ref, act, cm_last, cm_first, cin, cmax, HW, W):
    """Write an f32 (cin, HW) activation into the interiors of the three
    pre-masked bf16 slabs (dw=-1 / dw=0 / dw=+1).  Masks are applied in f32
    (v5e has no bf16 VALU); the bf16 cast happens exactly once per slab.
    Margins stay zero (only the interior is written here)."""
    m0 = W + 1
    dt = pad_ref.dtype
    pad_ref[0 * cmax:0 * cmax + cin, m0:m0 + HW] = (act * cm_last).astype(dt)
    pad_ref[1 * cmax:1 * cmax + cin, m0:m0 + HW] = act.astype(dt)
    pad_ref[2 * cmax:2 * cmax + cin, m0:m0 + HW] = (act * cm_first).astype(dt)


def _conv3x3(pad_ref, col_ref, w_ref, cin, cmax, HW, W):
    """Fused 3x3 'same' conv: gather the 9 statically shifted taps into the
    (9*cin, HW) bf16 im2col scratch, then ONE (Cout, 9*cin) x (9*cin, HW)
    bf16 MXU matmul with f32 accumulation.  Boundary correctness: row wrap
    lands in the zero margins; column wrap lands on the pre-zeroed column of
    the dw=-1 / dw=+1 slabs (those columns are never read validly by the
    corresponding taps)."""
    m0 = W + 1
    for kh in range(3):
        for kw in range(3):
            t = kh * 3 + kw
            s = (kh - 1) * W + (kw - 1)
            src = kw * cmax               # slab 0: dw=-1, 1: dw=0, 2: dw=+1
            col_ref[t * cin:(t + 1) * cin, :] = (
                pad_ref[src:src + cin, m0 + s:m0 + s + HW])
    return jnp.dot(w_ref[...], col_ref[0:9 * cin, :],
                   preferred_element_type=jnp.float32)


# ----------------------------------------------------------------------------
# Stage kernels (one pallas_call per resolution stage)
# ----------------------------------------------------------------------------
def _stage1_kernel(x_ref, w_ref, sc_ref, sh_ref, o_ref, pad_ref, col_ref,
                   *, C, H, W):
    HW = H * W
    _zero_margins(pad_ref, HW, W)
    cm_last, cm_first = _col_masks(HW, W)
    _to_pad3(pad_ref, x_ref[...].astype(jnp.float32), cm_last, cm_first,
             C, C, HW, W)
    acc = _conv3x3(pad_ref, col_ref, w_ref, C, C, HW, W)
    y = _lrelu(acc * sc_ref[...] + sh_ref[...])
    o_ref[...] = y.astype(o_ref.dtype)


def _stage2_kernel(x_ref, bn0s_ref, bn0h_ref,
                   wa_ref, asc_ref, ash_ref, wb_ref, bsc_ref, bsh_ref,
                   o_ref, pad_ref, col_ref, *, C, H, W):
    HW = H * W
    _zero_margins(pad_ref, HW, W)
    cm_last, cm_first = _col_masks(HW, W)
    x = x_ref[...].astype(jnp.float32)
    # rn1 is applied twice with shared parameters (as in the PyTorch forward).
    for _ in range(2):
        t = _lrelu(x * bn0s_ref[...] + bn0h_ref[...])
        _to_pad3(pad_ref, t, cm_last, cm_first, C, C, HW, W)
        a = _conv3x3(pad_ref, col_ref, wa_ref, C, C, HW, W)
        a = _lrelu(a * asc_ref[...] + ash_ref[...])
        _to_pad3(pad_ref, a, cm_last, cm_first, C, C, HW, W)
        b = _conv3x3(pad_ref, col_ref, wb_ref, C, C, HW, W)
        b = b * bsc_ref[...] + bsh_ref[...]
        x = b + x                  # residual (bypass = identity)
    o_ref[...] = x.astype(o_ref.dtype)


def _stage3_kernel(x_ref, w2_ref, s2s_ref, s2h_ref,
                   w3_ref, s3s_ref, s3h_ref, w4_ref, s4s_ref, s4h_ref,
                   o_ref, pad_ref, col_ref, *, C1, C2, C3, H, W):
    HW = H * W
    _zero_margins(pad_ref, HW, W)
    cm_last, cm_first = _col_masks(HW, W)
    _to_pad3(pad_ref, x_ref[...].astype(jnp.float32), cm_last, cm_first,
             C1, C1, HW, W)
    a = _conv3x3(pad_ref, col_ref, w2_ref, C1, C1, HW, W)
    a = _lrelu(a * s2s_ref[...] + s2h_ref[...])
    _to_pad3(pad_ref, a, cm_last, cm_first, C1, C1, HW, W)
    b = _conv3x3(pad_ref, col_ref, w3_ref, C1, C1, HW, W)
    b = _lrelu(b * s3s_ref[...] + s3h_ref[...])
    _to_pad3(pad_ref, b, cm_last, cm_first, C2, C1, HW, W)
    c = _conv3x3(pad_ref, col_ref, w4_ref, C2, C1, HW, W)
    c = jnp.tanh(c * s4s_ref[...] + s4h_ref[...])
    o_ref[...] = c.astype(o_ref.dtype)


# ----------------------------------------------------------------------------
# pallas_call wrappers
# ----------------------------------------------------------------------------
def _bcast_spec(shape):
    return pl.BlockSpec(shape, lambda n: (0,) * len(shape))


def _batched_spec(c, hw):
    return pl.BlockSpec((None, c, hw), lambda n: (n, 0, 0))


def _vmem_limit_bytes():
    """Per-generation VMEM budget (v7x has 64 MiB vs 128 MiB on v5e/v6e)."""
    try:
        cap = getattr(pltpu.get_tpu_info(), "vmem_capacity_bytes", None)
        if cap:
            return int(max(16 << 20, min((int(cap) * 3) // 4, 100 << 20)))
    except Exception:
        pass
    return 48 << 20


def _compiler_params():
    return pltpu.CompilerParams(dimension_semantics=("parallel",),
                                vmem_limit_bytes=_vmem_limit_bytes())


def _stage1_call(x3, w_cat, sc, sh, *, H, W):
    N, C, HW = x3.shape
    padw = HW + 2 * (W + 1)
    kernel = functools.partial(_stage1_kernel, C=C, H=H, W=W)
    flops = 2 * N * HW * C * (9 * C)
    bytes_acc = 4 * x3.size + 2 * N * C * HW + 2 * w_cat.size
    return pl.pallas_call(
        kernel,
        grid=(N,),
        in_specs=[
            _batched_spec(C, HW),
            _bcast_spec((C, 9 * C)),
            _bcast_spec((C, 1)),
            _bcast_spec((C, 1)),
        ],
        out_specs=_batched_spec(C, HW),
        out_shape=jax.ShapeDtypeStruct((N, C, HW), jnp.bfloat16),
        scratch_shapes=[pltpu.VMEM((3 * C, padw), jnp.bfloat16),
                        pltpu.VMEM((9 * C, HW), jnp.bfloat16)],
        compiler_params=_compiler_params(),
        cost_estimate=pl.CostEstimate(flops=int(flops), transcendentals=0,
                                      bytes_accessed=int(bytes_acc)),
    )(x3, w_cat, sc, sh)


def _stage2_call(x3, bn0s, bn0h, wa, asc, ash, wb, bsc, bsh, *, H, W):
    N, C, HW = x3.shape
    padw = HW + 2 * (W + 1)
    kernel = functools.partial(_stage2_kernel, C=C, H=H, W=W)
    flops = 2 * N * HW * C * (9 * C) * 4
    bytes_acc = 2 * (2 * x3.size) + 2 * (wa.size + wb.size)
    return pl.pallas_call(
        kernel,
        grid=(N,),
        in_specs=[
            _batched_spec(C, HW),
            _bcast_spec((C, 1)), _bcast_spec((C, 1)),
            _bcast_spec((C, 9 * C)), _bcast_spec((C, 1)), _bcast_spec((C, 1)),
            _bcast_spec((C, 9 * C)), _bcast_spec((C, 1)), _bcast_spec((C, 1)),
        ],
        out_specs=_batched_spec(C, HW),
        out_shape=jax.ShapeDtypeStruct((N, C, HW), jnp.bfloat16),
        scratch_shapes=[pltpu.VMEM((3 * C, padw), jnp.bfloat16),
                        pltpu.VMEM((9 * C, HW), jnp.bfloat16)],
        compiler_params=_compiler_params(),
        cost_estimate=pl.CostEstimate(flops=int(flops), transcendentals=0,
                                      bytes_accessed=int(bytes_acc)),
    )(x3, bn0s, bn0h, wa, asc, ash, wb, bsc, bsh)


def _stage3_call(x3, w2, s2s, s2h, w3, s3s, s3h, w4, s4s, s4h,
                 *, C2, C3, H, W):
    N, C1, HW = x3.shape
    padw = HW + 2 * (W + 1)
    kernel = functools.partial(_stage3_kernel, C1=C1, C2=C2, C3=C3, H=H, W=W)
    flops = 2 * N * HW * 9 * (C1 * C1 + C1 * C2 + C2 * C3)
    bytes_acc = 2 * x3.size + 4 * N * C3 * HW + 2 * (w2.size + w3.size + w4.size)
    return pl.pallas_call(
        kernel,
        grid=(N,),
        in_specs=[
            _batched_spec(C1, HW),
            _bcast_spec((C1, 9 * C1)), _bcast_spec((C1, 1)), _bcast_spec((C1, 1)),
            _bcast_spec((C2, 9 * C1)), _bcast_spec((C2, 1)), _bcast_spec((C2, 1)),
            _bcast_spec((C3, 9 * C2)), _bcast_spec((C3, 1)), _bcast_spec((C3, 1)),
        ],
        out_specs=_batched_spec(C3, HW),
        out_shape=jax.ShapeDtypeStruct((N, C3, HW), jnp.float32),
        scratch_shapes=[pltpu.VMEM((3 * C1, padw), jnp.bfloat16),
                        pltpu.VMEM((9 * C1, HW), jnp.bfloat16)],
        compiler_params=_compiler_params(),
        cost_estimate=pl.CostEstimate(flops=int(flops),
                                      transcendentals=int(N * HW * C3),
                                      bytes_accessed=int(bytes_acc)),
    )(x3, w2, s2s, s2h, w3, s3s, s3h, w4, s4s, s4h)


# ----------------------------------------------------------------------------
# Parameter folding glue (tiny; plain JAX, outside the hot loop)
# ----------------------------------------------------------------------------
def _l2normalize(v, eps=1e-12):
    return v / (jnp.linalg.norm(v) + eps)


def _sn_weight(w_bar, u):
    """One spectral-norm power iteration, exactly as the PyTorch module
    (height = w.shape[0] = in_channels for ConvTranspose2d)."""
    h = w_bar.shape[0]
    wm = w_bar.reshape(h, -1)
    v = _l2normalize(wm.T @ u)
    u_new = _l2normalize(wm @ v)
    sigma = jnp.dot(u_new, jnp.dot(wm, v))
    return w_bar / sigma


def _prep_taps_cat(w_t):
    """ConvTranspose2d weight (Cin, Cout, 3, 3) -> concatenated regular-conv
    tap matrix (Cout, 9*Cin) bf16, column index t*Cin + cin with t = kh*3+kw
    (spatial flip + channel swap -> equivalent 'same' convolution)."""
    w_conv = jnp.transpose(jnp.flip(w_t, axis=(2, 3)), (1, 0, 2, 3))
    cout, cin = w_conv.shape[0], w_conv.shape[1]
    w_cat = jnp.transpose(w_conv, (0, 2, 3, 1)).reshape(cout, 9 * cin)
    return w_cat.astype(jnp.bfloat16)


def _affine_from_bn(bn):
    s = bn["gamma"] / jnp.sqrt(bn["var"] + _BN_EPS)
    sc = s.reshape(-1, 1).astype(jnp.float32)
    sh = (bn["beta"] - bn["mean"] * s).reshape(-1, 1).astype(jnp.float32)
    return sc, sh


def _affine_from_bias_bn(bias, bn):
    s = bn["gamma"] / jnp.sqrt(bn["var"] + _BN_EPS)
    sc = s.reshape(-1, 1).astype(jnp.float32)
    sh = ((bias - bn["mean"]) * s + bn["beta"]).reshape(-1, 1).astype(jnp.float32)
    return sc, sh


def _upsample2x_bilinear_nchw(x):
    """Exact 2x bilinear upsample with align_corners=False (PyTorch semantics),
    separable along H then W.  Math in f32, result in the input dtype."""
    dt = x.dtype
    x = x.astype(jnp.float32)
    N, C, H, W = x.shape
    prev = jnp.concatenate([x[:, :, :1, :], x[:, :, :-1, :]], axis=2)
    nxt = jnp.concatenate([x[:, :, 1:, :], x[:, :, -1:, :]], axis=2)
    even = 0.25 * prev + 0.75 * x
    odd = 0.75 * x + 0.25 * nxt
    x = jnp.stack([even, odd], axis=3).reshape(N, C, 2 * H, W)
    prev = jnp.concatenate([x[:, :, :, :1], x[:, :, :, :-1]], axis=3)
    nxt = jnp.concatenate([x[:, :, :, 1:], x[:, :, :, -1:]], axis=3)
    even = 0.25 * prev + 0.75 * x
    odd = 0.75 * x + 0.25 * nxt
    return jnp.stack([even, odd], axis=4).reshape(N, C, 2 * H, 2 * W).astype(dt)


# ----------------------------------------------------------------------------
# GeneratorX2_interpolate forward
# ----------------------------------------------------------------------------
def generator_x2_interpolate_forward(x, params):
    N, C, H, W = x.shape          # C == zd1

    # ---- stage 1: SN-conv1 + LeakyReLU ------------------------------------
    p1 = params["conv1"]
    w1_cat = _prep_taps_cat(_sn_weight(p1["w_bar"], p1["u"]))
    sc1 = jnp.ones((C, 1), jnp.float32)
    sh1 = p1["b"].reshape(-1, 1).astype(jnp.float32)
    y = _stage1_call(x.reshape(N, C, H * W), w1_cat, sc1, sh1,
                     H=H, W=W).reshape(N, C, H, W)
    y = _upsample2x_bilinear_nchw(y)

    # ---- stage 2: ResBlockTranspose applied twice --------------------------
    H2, W2 = 2 * H, 2 * W
    rb = params["rn1"]
    bn0s, bn0h = _affine_from_bn(rb["bn0"])
    wa_cat = _prep_taps_cat(rb["conv_a"]["w"])
    asc, ash = _affine_from_bias_bn(rb["conv_a"]["b"], rb["bn_a"])
    wb_cat = _prep_taps_cat(rb["conv_b"]["w"])
    bsc, bsh = _affine_from_bias_bn(rb["conv_b"]["b"], rb["bn_b"])
    y = _stage2_call(y.reshape(N, C, H2 * W2),
                     bn0s, bn0h, wa_cat, asc, ash, wb_cat, bsc, bsh,
                     H=H2, W=W2).reshape(N, C, H2, W2)
    y = _upsample2x_bilinear_nchw(y)

    # ---- stage 3: SN-conv2+BN+LReLU, SN-conv3+BN+LReLU, SN-conv4+tanh ------
    H4, W4 = 4 * H, 4 * W
    p2, p3, p4 = params["conv2"], params["conv3"], params["conv4"]
    C2 = p3["w_bar"].shape[1]     # zd1 // 2
    C3 = p4["w_bar"].shape[1]     # ch
    w2_cat = _prep_taps_cat(_sn_weight(p2["w_bar"], p2["u"]))
    s2s, s2h = _affine_from_bias_bn(p2["b"], params["bn2"])
    w3_cat = _prep_taps_cat(_sn_weight(p3["w_bar"], p3["u"]))
    s3s, s3h = _affine_from_bias_bn(p3["b"], params["bn3"])
    w4_cat = _prep_taps_cat(_sn_weight(p4["w_bar"], p4["u"]))
    s4s = jnp.ones((C3, 1), jnp.float32)
    s4h = p4["b"].reshape(-1, 1).astype(jnp.float32)
    y = _stage3_call(y.reshape(N, C, H4 * W4),
                     w2_cat, s2s, s2h, w3_cat, s3s, s3h, w4_cat, s4s, s4h,
                     C2=C2, C3=C3, H=H4, W=W4)
    return y.reshape(N, C3, H4, W4)


# ----------------------------------------------------------------------------
# Deterministic parameter construction (shapes from the module's __init__)
# ----------------------------------------------------------------------------
def _init_ct(key, cin, cout, k=3, spectral=False):
    ks = jax.random.split(key, 4)
    bound = 1.0 / np.sqrt(cin * k * k)
    w = jax.random.uniform(ks[0], (cin, cout, k, k), jnp.float32, -bound, bound)
    b = jax.random.uniform(ks[1], (cout,), jnp.float32, -bound, bound)
    if spectral:
        return {"w_bar": w, "b": b,
                "u": _l2normalize(jax.random.normal(ks[2], (cin,), jnp.float32)),
                "v": _l2normalize(jax.random.normal(ks[3], (cout * k * k,),
                                                    jnp.float32))}
    return {"w": w, "b": b}


def _init_bn(c):
    return {"gamma": jnp.ones((c,), jnp.float32),
            "beta": jnp.zeros((c,), jnp.float32),
            "mean": jnp.zeros((c,), jnp.float32),
            "var": jnp.ones((c,), jnp.float32)}


def make_params(key, zd1=64, ch=1):
    ks = jax.random.split(key, 6)
    return {
        "conv1": _init_ct(ks[0], zd1, zd1, spectral=True),
        "rn1": {
            "bn0": _init_bn(zd1),
            "conv_a": _init_ct(ks[1], zd1, zd1),
            "bn_a": _init_bn(zd1),
            "conv_b": _init_ct(ks[2], zd1, zd1),
            "bn_b": _init_bn(zd1),
        },
        "conv2": _init_ct(ks[3], zd1, zd1, spectral=True),
        "bn2": _init_bn(zd1),
        "conv3": _init_ct(ks[4], zd1, zd1 // 2, spectral=True),
        "bn3": _init_bn(zd1 // 2),
        "conv4": _init_ct(ks[5], zd1 // 2, ch, spectral=True),
    }


if __name__ == "__main__":
    # Small, module-consistent shapes: zd1=16, ch=1; input is (N, zd1, H, W).
    zd1, ch = 16, 1
    N, H, W = 2, 8, 8

    key = jax.random.PRNGKey(0)
    kx, kp = jax.random.split(key)
    x = jax.random.normal(kx, (N, zd1, H, W), jnp.float32)   # NCHW
    params = make_params(kp, zd1=zd1, ch=ch)

    fwd = jax.jit(generator_x2_interpolate_forward)
    out = fwd(x, params)
    jax.block_until_ready(out)

    # 8x8 input -> conv1 (same) -> 16x16 -> resblocks -> 32x32 -> tail convs
    assert out.shape == (N, ch, 4 * H, 4 * W), out.shape
    assert bool(jnp.all(jnp.isfinite(out))), "non-finite output"
    print("KERNEL_OK")
</pallas_src>

<mosaic_0001>
module attributes {stable_mosaic.version = 11 : i64} {
  func.func @_stage1_kernel(%arg0: i32, %arg1: memref<1x16x64xf32, #tpu.memory_space<vmem>>, %arg2: memref<16x144xbf16, #tpu.memory_space<vmem>>, %arg3: memref<16x1xf32, #tpu.memory_space<vmem>>, %arg4: memref<16x1xf32, #tpu.memory_space<vmem>>, %arg5: memref<1x16x64xbf16, #tpu.memory_space<vmem>>, %arg6: memref<48x82xbf16, #tpu.memory_space<vmem>>, %arg7: memref<144x64xbf16, #tpu.memory_space<vmem>>) attributes {dimension_semantics = [#tpu.dimension_semantics<parallel>], iteration_bounds = array<i64: 2>, scalar_prefetch = 0 : i64, scratch_operands = 2 : i64, tpu.core_type = #tpu.core_type<tc>, window_params = [{transform_indices = @transform_0, window_bounds = array<i64: 1, 16, 64>}, {pipeline_mode = #tpu.pipeline_mode<synchronous>, transform_indices = @transform_1, window_bounds = array<i64: 16, 144>}, {pipeline_mode = #tpu.pipeline_mode<synchronous>, transform_indices = @transform_2, window_bounds = array<i64: 16, 1>}, {pipeline_mode = #tpu.pipeline_mode<synchronous>, transform_indices = @transform_3, window_bounds = array<i64: 16, 1>}, {transform_indices = @transform_4, window_bounds = array<i64: 1, 16, 64>}]} {
    %cst = arith.constant 0.000000e+00 : bf16
    %0 = vector.broadcast %cst : bf16 to vector<48x9xbf16>
    %c0 = arith.constant 0 : index
    %c0_0 = arith.constant 0 : index
    %1 = vector.load %arg6[%c0, %c0_0] : memref<48x82xbf16, #tpu.memory_space<vmem>>, vector<48x9xbf16>
    tpu.vector_store %arg6[%c0, %c0_0], %0 {strides = array<i32>} : memref<48x82xbf16, #tpu.memory_space<vmem>>, vector<48x9xbf16>,
    %c0_1 = arith.constant 0 : index
    %c73 = arith.constant 73 : index
    %2 = vector.load %arg6[%c0_1, %c73] : memref<48x82xbf16, #tpu.memory_space<vmem>>, vector<48x9xbf16>
    tpu.vector_store %arg6[%c0_1, %c73], %0 {strides = array<i32>} : memref<48x82xbf16, #tpu.memory_space<vmem>>, vector<48x9xbf16>,
    %3 = tpu.iota {dimensions = array<i32: 1>} : vector<1x64xi32>
    %c8_i32 = arith.constant 8 : i32
    %c0_i32 = arith.constant 0 : i32
    %4 = arith.cmpi eq, %c8_i32, %c0_i32 : i32
    %c1_i32 = arith.constant 1 : i32
    %5 = arith.select %4, %c1_i32, %c8_i32 : i32
    %6 = vector.broadcast %5 : i32 to vector<1x64xi32>
    %7 = arith.remsi %3, %6 : vector<1x64xi32>
    %c0_i32_2 = arith.constant 0 : i32
    %8 = vector.broadcast %c0_i32_2 : i32 to vector<1x64xi32>
    %9 = arith.cmpi ne, %7, %8 : vector<1x64xi32>
    %c0_i32_3 = arith.constant 0 : i32
    %10 = vector.broadcast %c0_i32_3 : i32 to vector<1x64xi32>
    %11 = arith.cmpi slt, %7, %10 : vector<1x64xi32>
    %c0_i32_4 = arith.constant 0 : i32
    %12 = arith.cmpi slt, %5, %c0_i32_4 : i32
    %13 = vector.broadcast %12 : i1 to vector<1x64xi1>
    %14 = vector.broadcast %13 : vector<1x64xi1> to vector<1x64xi1>
    %15 = arith.xori %11, %14 : vector<1x64xi1>
    %16 = arith.andi %15, %9 : vector<1x64xi1>
    %17 = vector.broadcast %5 : i32 to vector<1x64xi32>
    %18 = arith.addi %7, %17 : vector<1x64xi32>
    %19 = arith.select %16, %18, %7 : vector<1x64xi1>, vector<1x64xi32>
    %c7_i32 = arith.constant 7 : i32
    %20 = vector.broadcast %c7_i32 : i32 to vector<1x64xi32>
    %21 = arith.cmpi ne, %19, %20 : vector<1x64xi32>
    %22 = arith.extui %21 : vector<1x64xi1> to vector<1x64xi32>
    %23 = arith.sitofp %22 : vector<1x64xi32> to vector<1x64xf32>
    %c0_i32_5 = arith.constant 0 : i32
    %24 = vector.broadcast %c0_i32_5 : i32 to vector<1x64xi32>
    %25 = arith.cmpi ne, %19, %24 : vector<1x64xi32>
    %26 = arith.extui %25 : vector<1x64xi1> to vector<1x64xi32>
    %27 = arith.sitofp %26 : vector<1x64xi32> to vector<1x64xf32>
    %c0_6 = arith.constant 0 : index
    %c0_7 = arith.constant 0 : index
    %c0_8 = arith.constant 0 : index
    %28 = vector.load %arg1[%c0_6, %c0_7, %c0_8] : memref<1x16x64xf32, #tpu.memory_space<vmem>>, vector<1x16x64xf32>
    %29 = vector.shape_cast %28 : vector<1x16x64xf32> to vector<16x64xf32>
    %30 = vector.broadcast %23 : vector<1x64xf32> to vector<16x64xf32>
    %31 = arith.mulf %29, %30 : vector<16x64xf32>
    %32 = arith.truncf %31 : vector<16x64xf32> to vector<16x64xbf16>
    %c0_9 = arith.constant 0 : index
    %c9 = arith.constant 9 : index
    %33 = vector.load %arg6[%c0_9, %c9] : memref<48x82xbf16, #tpu.memory_space<vmem>>, vector<16x64xbf16>
    tpu.vector_store %arg6[%c0_9, %c9], %32 {strides = array<i32>} : memref<48x82xbf16, #tpu.memory_space<vmem>>, vector<16x64xbf16>,
    %34 = arith.truncf %29 : vector<16x64xf32> to vector<16x64xbf16>
    %c16 = arith.constant 16 : index
    %c9_10 = arith.constant 9 : index
    %35 = vector.load %arg6[%c16, %c9_10] : memref<48x82xbf16, #tpu.memory_space<vmem>>, vector<16x64xbf16>
    tpu.vector_store %arg6[%c16, %c9_10], %34 {strides = array<i32>} : memref<48x82xbf16, #tpu.memory_space<vmem>>, vector<16x64xbf16>,
    %36 = vector.broadcast %27 : vector<1x64xf32> to vector<16x64xf32>
    %37 = arith.mulf %29, %36 : vector<16x64xf32>
    %38 = arith.truncf %37 : vector<16x64xf32> to vector<16x64xbf16>
    %c32 = arith.constant 32 : index
    %c9_11 = arith.constant 9 : index
    %39 = vector.load %arg6[%c32, %c9_11] : memref<48x82xbf16, #tpu.memory_space<vmem>>, vector<16x64xbf16>
    tpu.vector_store %arg6[%c32, %c9_11], %38 {strides = array<i32>} : memref<48x82xbf16, #tpu.memory_space<vmem>>, vector<16x64xbf16>,
    %c0_12 = arith.constant 0 : index
    %c0_13 = arith.constant 0 : index
    %40 = vector.load %arg6[%c0_12, %c0_13] : memref<48x82xbf16, #tpu.memory_space<vmem>>, vector<16x64xbf16>
    %c0_14 = arith.constant 0 : index
    %c0_15 = arith.constant 0 : index
    %41 = vector.load %arg7[%c0_14, %c0_15] : memref<144x64xbf16, #tpu.memory_space<vmem>>, vector<16x64xbf16>
    tpu.vector_store %arg7[%c0_14, %c0_15], %40 {strides = array<i32>} : memref<144x64xbf16, #tpu.memory_space<vmem>>, vector<16x64xbf16>,
    %c16_16 = arith.constant 16 : index
    %c1 = arith.constant 1 : index
    %42 = vector.load %arg6[%c16_16, %c1] : memref<48x82xbf16, #tpu.memory_space<vmem>>, vector<16x64xbf16>
    %c16_17 = arith.constant 16 : index
    %c0_18 = arith.constant 0 : index
    %43 = vector.load %arg7[%c16_17, %c0_18] : memref<144x64xbf16, #tpu.memory_space<vmem>>, vector<16x64xbf16>
    tpu.vector_store %arg7[%c16_17, %c0_18], %42 {strides = array<i32>} : memref<144x64xbf16, #tpu.memory_space<vmem>>, vector<16x64xbf16>,
    %c32_19 = arith.constant 32 : index
    %c2 = arith.constant 2 : index
    %44 = vector.load %arg6[%c32_19, %c2] : memref<48x82xbf16, #tpu.memory_space<vmem>>, vector<16x64xbf16>
    %c32_20 = arith.constant 32 : index
    %c0_21 = arith.constant 0 : index
    %45 = vector.load %arg7[%c32_20, %c0_21] : memref<144x64xbf16, #tpu.memory_space<vmem>>, vector<16x64xbf16>
    tpu.vector_store %arg7[%c32_20, %c0_21], %44 {strides = array<i32>} : memref<144x64xbf16, #tpu.memory_space<vmem>>, vector<16x64xbf16>,
    %c0_22 = arith.constant 0 : index
    %c8 = arith.constant 8 : index
    %46 = vector.load %arg6[%c0_22, %c8] : memref<48x82xbf16, #tpu.memory_space<vmem>>, vector<16x64xbf16>
    %c48 = arith.constant 48 : index
    %c0_23 = arith.constant 0 : index
    %47 = vector.load %arg7[%c48, %c0_23] : memref<144x64xbf16, #tpu.memory_space<vmem>>, vector<16x64xbf16>
    tpu.vector_store %arg7[%c48, %c0_23], %46 {strides = array<i32>} : memref<144x64xbf16, #tpu.memory_space<vmem>>, vector<16x64xbf16>,
    %c16_24 = arith.constant 16 : index
    %c9_25 = arith.constant 9 : index
    %48 = vector.load %arg6[%c16_24, %c9_25] : memref<48x82xbf16, #tpu.memory_space<vmem>>, vector<16x64xbf16>
    %c64 = arith.constant 64 : index
    %c0_26 = arith.constant 0 : index
    %49 = vector.load %arg7[%c64, %c0_26] : memref<144x64xbf16, #tpu.memory_space<vmem>>, vector<16x64xbf16>
    tpu.vector_store %arg7[%c64, %c0_26], %48 {strides = array<i32>} : memref<144x64xbf16, #tpu.memory_space<vmem>>, vector<16x64xbf16>,
    %c32_27 = arith.constant 32 : index
    %c10 = arith.constant 10 : index
    %50 = vector.load %arg6[%c32_27, %c10] : memref<48x82xbf16, #tpu.memory_space<vmem>>, vector<16x64xbf16>
    %c80 = arith.constant 80 : index
    %c0_28 = arith.constant 0 : index
    %51 = vector.load %arg7[%c80, %c0_28] : memref<144x64xbf16, #tpu.memory_space<vmem>>, vector<16x64xbf16>
    tpu.vector_store %arg7[%c80, %c0_28], %50 {strides = array<i32>} : memref<144x64xbf16, #tpu.memory_space<vmem>>, vector<16x64xbf16>,
    %c0_29 = arith.constant 0 : index
    %c16_30 = arith.constant 16 : index
    %52 = vector.load %arg6[%c0_29, %c16_30] : memref<48x82xbf16, #tpu.memory_space<vmem>>, vector<16x64xbf16>
    %c96 = arith.constant 96 : index
    %c0_31 = arith.constant 0 : index
    %53 = vector.load %arg7[%c96, %c0_31] : memref<144x64xbf16, #tpu.memory_space<vmem>>, vector<16x64xbf16>
    tpu.vector_store %arg7[%c96, %c0_31], %52 {strides = array<i32>} : memref<144x64xbf16, #tpu.memory_space<vmem>>, vector<16x64xbf16>,
    %c16_32 = arith.constant 16 : index
    %c17 = arith.constant 17 : index
    %54 = vector.load %arg6[%c16_32, %c17] : memref<48x82xbf16, #tpu.memory_space<vmem>>, vector<16x64xbf16>
    %c112 = arith.constant 112 : index
    %c0_33 = arith.constant 0 : index
    %55 = vector.load %arg7[%c112, %c0_33] : memref<144x64xbf16, #tpu.memory_space<vmem>>, vector<16x64xbf16>
    tpu.vector_store %arg7[%c112, %c0_33], %54 {strides = array<i32>} : memref<144x64xbf16, #tpu.memory_space<vmem>>, vector<16x64xbf16>,
    %c32_34 = arith.constant 32 : index
    %c18 = arith.constant 18 : index
    %56 = vector.load %arg6[%c32_34, %c18] : memref<48x82xbf16, #tpu.memory_space<vmem>>, vector<16x64xbf16>
    %c128 = arith.constant 128 : index
    %c0_35 = arith.constant 0 : index
    %57 = vector.load %arg7[%c128, %c0_35] : memref<144x64xbf16, #tpu.memory_space<vmem>>, vector<16x64xbf16>
    tpu.vector_store %arg7[%c128, %c0_35], %56 {strides = array<i32>} : memref<144x64xbf16, #tpu.memory_space<vmem>>, vector<16x64xbf16>,
    %c0_36 = arith.constant 0 : index
    %c0_37 = arith.constant 0 : index
    %58 = vector.load %arg2[%c0_36, %c0_37] : memref<16x144xbf16, #tpu.memory_space<vmem>>, vector<16x144xbf16>
    %c0_38 = arith.constant 0 : index
    %c0_39 = arith.constant 0 : index
    %59 = vector.load %arg7[%c0_38, %c0_39] : memref<144x64xbf16, #tpu.memory_space<vmem>>, vector<144x64xbf16>
    %cst_40 = arith.constant dense<0.000000e+00> : vector<16x64xf32>
    %60 = tpu.matmul %58, %59, %cst_40 {dimension_numbers = #tpu.dot_dimension_numbers<[1], [0], [0], [1], [0, 0, 1, 1], [], []>} : vector<16x144xbf16>, vector<144x64xbf16>, vector<16x64xf32> -> vector<16x64xf32>
    %c0_41 = arith.constant 0 : index
    %c0_42 = arith.constant 0 : index
    %61 = vector.load %arg3[%c0_41, %c0_42] : memref<16x1xf32, #tpu.memory_space<vmem>>, vector<16x1xf32>
    %62 = vector.broadcast %61 : vector<16x1xf32> to vector<16x64xf32>
    %63 = arith.mulf %60, %62 : vector<16x64xf32>
    %c0_43 = arith.constant 0 : index
    %c0_44 = arith.constant 0 : index
    %64 = vector.load %arg4[%c0_43, %c0_44] : memref<16x1xf32, #tpu.memory_space<vmem>>, vector<16x1xf32>
    %65 = vector.broadcast %64 : vector<16x1xf32> to vector<16x64xf32>
    %66 = arith.addf %63, %65 : vector<16x64xf32>
    %cst_45 = arith.constant 0.000000e+00 : f32
    %67 = vector.broadcast %cst_45 : f32 to vector<16x64xf32>
    %68 = arith.cmpf ogt, %66, %67 : vector<16x64xf32>
    %cst_46 = arith.constant 2.000000e-02 : f32
    %69 = vector.broadcast %cst_46 : f32 to vector<16x64xf32>
    %70 = arith.mulf %69, %66 : vector<16x64xf32>
    %71 = arith.select %68, %66, %70 : vector<16x64xi1>, vector<16x64xf32>
    %72 = arith.truncf %71 : vector<16x64xf32> to vector<16x64xbf16>
    %c0_47 = arith.constant 0 : index
    %c0_48 = arith.constant 0 : index
    %c0_49 = arith.constant 0 : index
    %73 = vector.load %arg5[%c0_47, %c0_48, %c0_49] : memref<1x16x64xbf16, #tpu.memory_space<vmem>>, vector<1x16x64xbf16>
    %74 = vector.shape_cast %73 : vector<1x16x64xbf16> to vector<16x64xbf16>
    %75 = vector.shape_cast %72 : vector<16x64xbf16> to vector<1x16x64xbf16>
    tpu.vector_store %arg5[%c0_47, %c0_48, %c0_49], %75 {strides = array<i32>} : memref<1x16x64xbf16, #tpu.memory_space<vmem>>, vector<1x16x64xbf16>,
    return
  }
  func.func @transform_0(%arg0: i32) -> (i32, i32, i32) {
    %c0_i32 = arith.constant 0 : i32
    %c0_i32_0 = arith.constant 0 : i32
    %c0_i32_1 = arith.constant 0 : i32
    return %arg0, %c0_i32, %c0_i32_0 : i32, i32, i32
  }
  func.func @transform_1(%arg0: i32) -> (i32, i32) {
    %c0_i32 = arith.constant 0 : i32
    %c0_i32_0 = arith.constant 0 : i32
    %c0_i32_1 = arith.constant 0 : i32
    return %c0_i32, %c0_i32_0 : i32, i32
  }
  func.func @transform_2(%arg0: i32) -> (i32, i32) {
    %c0_i32 = arith.constant 0 : i32
    %c0_i32_0 = arith.constant 0 : i32
    %c0_i32_1 = arith.constant 0 : i32
    return %c0_i32, %c0_i32_0 : i32, i32
  }
  func.func @transform_3(%arg0: i32) -> (i32, i32) {
    %c0_i32 = arith.constant 0 : i32
    %c0_i32_0 = arith.constant 0 : i32
    %c0_i32_1 = arith.constant 0 : i32
    return %c0_i32, %c0_i32_0 : i32, i32
  }
  func.func @transform_4(%arg0: i32) -> (i32, i32, i32) {
    %c0_i32 = arith.constant 0 : i32
    %c0_i32_0 = arith.constant 0 : i32
    %c0_i32_1 = arith.constant 0 : i32
    return %arg0, %c0_i32, %c0_i32_0 : i32, i32, i32
  }
}

module attributes {stable_mosaic.version = 11 : i64} {
  func.func @_stage2_kernel(%arg0: i32, %arg1: memref<1x16x256xbf16, #tpu.memory_space<vmem>>, %arg2: memref<16x1xf32, #tpu.memory_space<vmem>>, %arg3: memref<16x1xf32, #tpu.memory_space<vmem>>, %arg4: memref<16x144xbf16, #tpu.memory_space<vmem>>, %arg5: memref<16x1xf32, #tpu.memory_space<vmem>>, %arg6: memref<16x1xf32, #tpu.memory_space<vmem>>, %arg7: memref<16x144xbf16, #tpu.memory_space<vmem>>, %arg8: memref<16x1xf32, #tpu.memory_space<vmem>>, %arg9: memref<16x1xf32, #tpu.memory_space<vmem>>, %arg10: memref<1x16x256xbf16, #tpu.memory_space<vmem>>, %arg11: memref<48x290xbf16, #tpu.memory_space<vmem>>, %arg12: memref<144x256xbf16, #tpu.memory_space<vmem>>) attributes {dimension_semantics = [#tpu.dimension_semantics<parallel>], iteration_bounds = array<i64: 2>, scalar_prefetch = 0 : i64, scratch_operands = 2 : i64, tpu.core_type = #tpu.core_type<tc>, window_params = [{transform_indices = @transform_0, window_bounds = array<i64: 1, 16, 256>}, {pipeline_mode = #tpu.pipeline_mode<synchronous>, transform_indices = @transform_1, window_bounds = array<i64: 16, 1>}, {pipeline_mode = #tpu.pipeline_mode<synchronous>, transform_indices = @transform_2, window_bounds = array<i64: 16, 1>}, {pipeline_mode = #tpu.pipeline_mode<synchronous>, transform_indices = @transform_3, window_bounds = array<i64: 16, 144>}, {pipeline_mode = #tpu.pipeline_mode<synchronous>, transform_indices = @transform_4, window_bounds = array<i64: 16, 1>}, {pipeline_mode = #tpu.pipeline_mode<synchronous>, transform_indices = @transform_5, window_bounds = array<i64: 16, 1>}, {pipeline_mode = #tpu.pipeline_mode<synchronous>, transform_indices = @transform_6, window_bounds = array<i64: 16, 144>}, {pipeline_mode = #tpu.pipeline_mode<synchronous>, transform_indices = @transform_7, window_bounds = array<i64: 16, 1>}, {pipeline_mode = #tpu.pipeline_mode<synchronous>, transform_indices = @transform_8, window_bounds = array<i64: 16, 1>}, {transform_indices = @transform_9, window_bounds = array<i64: 1, 16, 256>}]} {
    %cst = arith.constant 0.000000e+00 : bf16
    %0 = vector.broadcast %cst : bf16 to vector<48x17xbf16>
    %c0 = arith.constant 0 : index
    %c0_0 = arith.constant 0 : index
    %1 = vector.load %arg11[%c0, %c0_0] : memref<48x290xbf16, #tpu.memory_space<vmem>>, vector<48x17xbf16>
    tpu.vector_store %arg11[%c0, %c0_0], %0 {strides = array<i32>} : memref<48x290xbf16, #tpu.memory_space<vmem>>, vector<48x17xbf16>,
    %c0_1 = arith.constant 0 : index
    %c273 = arith.constant 273 : index
    %2 = vector.load %arg11[%c0_1, %c273] : memref<48x290xbf16, #tpu.memory_space<vmem>>, vector<48x17xbf16>
    tpu.vector_store %arg11[%c0_1, %c273], %0 {strides = array<i32>} : memref<48x290xbf16, #tpu.memory_space<vmem>>, vector<48x17xbf16>,
    %3 = tpu.iota {dimensions = array<i32: 1>} : vector<1x256xi32>
    %c16_i32 = arith.constant 16 : i32
    %c0_i32 = arith.constant 0 : i32
    %4 = arith.cmpi eq, %c16_i32, %c0_i32 : i32
    %c1_i32 = arith.constant 1 : i32
    %5 = arith.select %4, %c1_i32, %c16_i32 : i32
    %6 = vector.broadcast %5 : i32 to vector<1x256xi32>
    %7 = arith.remsi %3, %6 : vector<1x256xi32>
    %c0_i32_2 = arith.constant 0 : i32
    %8 = vector.broadcast %c0_i32_2 : i32 to vector<1x256xi32>
    %9 = arith.cmpi ne, %7, %8 : vector<1x256xi32>
    %c0_i32_3 = arith.constant 0 : i32
    %10 = vector.broadcast %c0_i32_3 : i32 to vector<1x256xi32>
    %11 = arith.cmpi slt, %7, %10 : vector<1x256xi32>
    %c0_i32_4 = arith.constant 0 : i32
    %12 = arith.cmpi slt, %5, %c0_i32_4 : i32
    %13 = vector.broadcast %12 : i1 to vector<1x256xi1>
    %14 = vector.broadcast %13 : vector<1x256xi1> to vector<1x256xi1>
    %15 = arith.xori %11, %14 : vector<1x256xi1>
    %16 = arith.andi %15, %9 : vector<1x256xi1>
    %17 = vector.broadcast %5 : i32 to vector<1x256xi32>
    %18 = arith.addi %7, %17 : vector<1x256xi32>
    %19 = arith.select %16, %18, %7 : vector<1x256xi1>, vector<1x256xi32>
    %c15_i32 = arith.constant 15 : i32
    %20 = vector.broadcast %c15_i32 : i32 to vector<1x256xi32>
    %21 = arith.cmpi ne, %19, %20 : vector<1x256xi32>
    %22 = arith.extui %21 : vector<1x256xi1> to vector<1x256xi32>
    %23 = arith.sitofp %22 : vector<1x256xi32> to vector<1x256xf32>
    %c0_i32_5 = arith.constant 0 : i32
    %24 = vector.broadcast %c0_i32_5 : i32 to vector<1x256xi32>
    %25 = arith.cmpi ne, %19, %24 : vector<1x256xi32>
    %26 = arith.extui %25 : vector<1x256xi1> to vector<1x256xi32>
    %27 = arith.sitofp %26 : vector<1x256xi32> to vector<1x256xf32>
    %c0_6 = arith.constant 0 : index
    %c0_7 = arith.constant 0 : index
    %c0_8 = arith.constant 0 : index
    %28 = vector.load %arg1[%c0_6, %c0_7, %c0_8] : memref<1x16x256xbf16, #tpu.memory_space<vmem>>, vector<1x16x256xbf16>
    %29 = vector.shape_cast %28 : vector<1x16x256xbf16> to vector<16x256xbf16>
    %30 = arith.extf %29 : vector<16x256xbf16> to vector<16x256xf32>
    %c0_9 = arith.constant 0 : index
    %c0_10 = arith.constant 0 : index
    %31 = vector.load %arg2[%c0_9, %c0_10] : memref<16x1xf32, #tpu.memory_space<vmem>>, vector<16x1xf32>
    %32 = vector.broadcast %31 : vector<16x1xf32> to vector<16x256xf32>
    %33 = arith.mulf %30, %32 : vector<16x256xf32>
    %c0_11 = arith.constant 0 : index
    %c0_12 = arith.constant 0 : index
    %34 = vector.load %arg3[%c0_11, %c0_12] : memref<16x1xf32, #tpu.memory_space<vmem>>, vector<16x1xf32>
    %35 = vector.broadcast %34 : vector<16x1xf32> to vector<16x256xf32>
    %36 = arith.addf %33, %35 : vector<16x256xf32>
    %cst_13 = arith.constant 0.000000e+00 : f32
    %37 = vector.broadcast %cst_13 : f32 to vector<16x256xf32>
    %38 = arith.cmpf ogt, %36, %37 : vector<16x256xf32>
    %cst_14 = arith.constant 2.000000e-02 : f32
    %39 = vector.broadcast %cst_14 : f32 to vector<16x256xf32>
    %40 = arith.mulf %39, %36 : vector<16x256xf32>
    %41 = arith.select %38, %36, %40 : vector<16x256xi1>, vector<16x256xf32>
    %42 = vector.broadcast %23 : vector<1x256xf32> to vector<16x256xf32>
    %43 = arith.mulf %41, %42 : vector<16x256xf32>
    %44 = arith.truncf %43 : vector<16x256xf32> to vector<16x256xbf16>
    %c0_15 = arith.constant 0 : index
    %c17 = arith.constant 17 : index
    %45 = vector.load %arg11[%c0_15, %c17] : memref<48x290xbf16, #tpu.memory_space<vmem>>, vector<16x256xbf16>
    tpu.vector_store %arg11[%c0_15, %c17], %44 {strides = array<i32>} : memref<48x290xbf16, #tpu.memory_space<vmem>>, vector<16x256xbf16>,
    %46 = arith.truncf %41 : vector<16x256xf32> to vector<16x256xbf16>
    %c16 = arith.constant 16 : index
    %c17_16 = arith.constant 17 : index
    %47 = vector.load %arg11[%c16, %c17_16] : memref<48x290xbf16, #tpu.memory_space<vmem>>, vector<16x256xbf16>
    tpu.vector_store %arg11[%c16, %c17_16], %46 {strides = array<i32>} : memref<48x290xbf16, #tpu.memory_space<vmem>>, vector<16x256xbf16>,
    %48 = vector.broadcast %27 : vector<1x256xf32> to vector<16x256xf32>
    %49 = arith.mulf %41, %48 : vector<16x256xf32>
    %50 = arith.truncf %49 : vector<16x256xf32> to vector<16x256xbf16>
    %c32 = arith.constant 32 : index
    %c17_17 = arith.constant 17 : index
    %51 = vector.load %arg11[%c32, %c17_17] : memref<48x290xbf16, #tpu.memory_space<vmem>>, vector<16x256xbf16>
    tpu.vector_store %arg11[%c32, %c17_17], %50 {strides = array<i32>} : memref<48x290xbf16, #tpu.memory_space<vmem>>, vector<16x256xbf16>,
    %c0_18 = arith.constant 0 : index
    %c0_19 = arith.constant 0 : index
    %52 = vector.load %arg11[%c0_18, %c0_19] : memref<48x290xbf16, #tpu.memory_space<vmem>>, vector<16x256xbf16>
    %c0_20 = arith.constant 0 : index
    %c0_21 = arith.constant 0 : index
    %53 = vector.load %arg12[%c0_20, %c0_21] : memref<144x256xbf16, #tpu.memory_space<vmem>>, vector<16x256xbf16>
    tpu.vector_store %arg12[%c0_20, %c0_21], %52 {strides = array<i32>} : memref<144x256xbf16, #tpu.memory_space<vmem>>, vector<16x256xbf16>,
    %c16_22 = arith.constant 16 : index
    %c1 = arith.constant 1 : index
    %54 = vector.load %arg11[%c16_22, %c1] : memref<48x290xbf16, #tpu.memory_space<vmem>>, vector<16x256xbf16>
    %c16_23 = arith.constant 16 : index
    %c0_24 = arith.constant 0 : index
    %55 = vector.load %arg12[%c16_23, %c0_24] : memref<144x256xbf16, #tpu.memory_space<vmem>>, vector<16x256xbf16>
    tpu.vector_store %arg12[%c16_23, %c0_24], %54 {strides = array<i32>} : memref<144x256xbf16, #tpu.memory_space<vmem>>, vector<16x256xbf16>,
    %c32_25 = arith.constant 32 : index
    %c2 = arith.constant 2 : index
    %56 = vector.load %arg11[%c32_25, %c2] : memref<48x290xbf16, #tpu.memory_space<vmem>>, vector<16x256xbf16>
    %c32_26 = arith.constant 32 : index
    %c0_27 = arith.constant 0 : index
    %57 = vector.load %arg12[%c32_26, %c0_27] : memref<144x256xbf16, #tpu.memory_space<vmem>>, vector<16x256xbf16>
    tpu.vector_store %arg12[%c32_26, %c0_27], %56 {strides = array<i32>} : memref<144x256xbf16, #tpu.memory_space<vmem>>, vector<16x256xbf16>,
    %c0_28 = arith.constant 0 : index
    %c16_29 = arith.constant 16 : index
    %58 = vector.load %arg11[%c0_28, %c16_29] : memref<48x290xbf16, #tpu.memory_space<vmem>>, vector<16x256xbf16>
    %c48 = arith.constant 48 : index
    %c0_30 = arith.constant 0 : index
    %59 = vector.load %arg12[%c48, %c0_30] : memref<144x256xbf16, #tpu.memory_space<vmem>>, vector<16x256xbf16>
    tpu.vector_store %arg12[%c48, %c0_30], %58 {strides = array<i32>} : memref<144x256xbf16, #tpu.memory_space<vmem>>, vector<16x256xbf16>,
    %c16_31 = arith.constant 16 : index
    %c17_32 = arith.constant 17 : index
    %60 = vector.load %arg11[%c16_31, %c17_32] : memref<48x290xbf16, #tpu.memory_space<vmem>>, vector<16x256xbf16>
    %c64 = arith.constant 64 : index
    %c0_33 = arith.constant 0 : index
    %61 = vector.load %arg12[%c64, %c0_33] : memref<144x256xbf16, #tpu.memory_space<vmem>>, vector<16x256xbf16>
    tpu.vector_store %arg12[%c64, %c0_33], %60 {strides = array<i32>} : memref<144x256xbf16, #tpu.memory_space<vmem>>, vector<16x256xbf16>,
    %c32_34 = arith.constant 32 : index
    %c18 = arith.constant 18 : index
    %62 = vector.load %arg11[%c32_34, %c18] : memref<48x290xbf16, #tpu.memory_space<vmem>>, vector<16x256xbf16>
    %c80 = arith.constant 80 : index
    %c0_35 = arith.constant 0 : index
    %63 = vector.load %arg12[%c80, %c0_35] : memref<144x256xbf16, #tpu.memory_space<vmem>>, vector<16x256xbf16>
    tpu.vector_store %arg12[%c80, %c0_35], %62 {strides = array<i32>} : memref<144x256xbf16, #tpu.memory_space<vmem>>, vector<16x256xbf16>,
    %c0_36 = arith.constant 0 : index
    %c32_37 = arith.constant 32 : index
    %64 = vector.load %arg11[%c0_36, %c32_37] : memref<48x290xbf16, #tpu.memory_space<vmem>>, vector<16x256xbf16>
    %c96 = arith.constant 96 : index
    %c0_38 = arith.constant 0 : index
    %65 = vector.load %arg12[%c96, %c0_38] : memref<144x256xbf16, #tpu.memory_space<vmem>>, vector<16x256xbf16>
    tpu.vector_store %arg12[%c96, %c0_38], %64 {strides = array<i32>} : memref<144x256xbf16, #tpu.memory_space<vmem>>, vector<16x256xbf16>,
    %c16_39 = arith.constant 16 : index
    %c33 = arith.constant 33 : index
    %66 = vector.load %arg11[%c16_39, %c33] : memref<48x290xbf16, #tpu.memory_space<vmem>>, vector<16x256xbf16>
    %c112 = arith.constant 112 : index
    %c0_40 = arith.constant 0 : index
    %67 = vector.load %arg12[%c112, %c0_40] : memref<144x256xbf16, #tpu.memory_space<vmem>>, vector<16x256xbf16>
    tpu.vector_store %arg12[%c112, %c0_40], %66 {strides = array<i32>} : memref<144x256xbf16, #tpu.memory_space<vmem>>, vector<16x256xbf16>,
    %c32_41 = arith.constant 32 : index
    %c34 = arith.constant 34 : index
    %68 = vector.load %arg11[%c32_41, %c34] : memref<48x290xbf16, #tpu.memory_space<vmem>>, vector<16x256xbf16>
    %c128 = arith.constant 128 : index
    %c0_42 = arith.constant 0 : index
    %69 = vector.load %arg12[%c128, %c0_42] : memref<144x256xbf16, #tpu.memory_space<vmem>>, vector<16x256xbf16>
    tpu.vector_store %arg12[%c128, %c0_42], %68 {strides = array<i32>} : memref<144x256xbf16, #tpu.memory_space<vmem>>, vector<16x256xbf16>,
    %c0_43 = arith.constant 0 : index
    %c0_44 = arith.constant 0 : index
    %70 = vector.load %arg4[%c0_43, %c0_44] : memref<16x144xbf16, #tpu.memory_space<vmem>>, vector<16x144xbf16>
    %c0_45 = arith.constant 0 : index
    %c0_46 = arith.constant 0 : index
    %71 = vector.load %arg12[%c0_45, %c0_46] : memref<144x256xbf16, #tpu.memory_space<vmem>>, vector<144x256xbf16>
    %cst_47 = arith.constant dense<0.000000e+00> : vector<16x256xf32>
    %72 = tpu.matmul %70, %71, %cst_47 {dimension_numbers = #tpu.dot_dimension_numbers<[1], [0], [0], [1], [0, 0, 1, 1], [], []>} : vector<16x144xbf16>, vector<144x256xbf16>, vector<16x256xf32> -> vector<16x256xf32>
    %c0_48 = arith.constant 0 : index
    %c0_49 = arith.constant 0 : index
    %73 = vector.load %arg5[%c0_48, %c0_49] : memref<16x1xf32, #tpu.memory_space<vmem>>, vector<16x1xf32>
    %74 = vector.broadcast %73 : vector<16x1xf32> to vector<16x256xf32>
    %75 = arith.mulf %72, %74 : vector<16x256xf32>
    %c0_50 = arith.constant 0 : index
    %c0_51 = arith.constant 0 : index
    %76 = vector.load %arg6[%c0_50, %c0_51] : memref<16x1xf32, #tpu.memory_space<vmem>>, vector<16x1xf32>
    %77 = vector.broadcast %76 : vector<16x1xf32> to vector<16x256xf32>
    %78 = arith.addf %75, %77 : vector<16x256xf32>
    %cst_52 = arith.constant 0.000000e+00 : f32
    %79 = vector.broadcast %cst_52 : f32 to vector<16x256xf32>
    %80 = arith.cmpf ogt, %78, %79 : vector<16x256xf32>
    %cst_53 = arith.constant 2.000000e-02 : f32
    %81 = vector.broadcast %cst_53 : f32 to vector<16x256xf32>
    %82 = arith.mulf %81, %78 : vector<16x256xf32>
    %83 = arith.select %80, %78, %82 : vector<16x256xi1>, vector<16x256xf32>
    %84 = vector.broadcast %23 : vector<1x256xf32> to vector<16x256xf32>
    %85 = arith.mulf %83, %84 : vector<16x256xf32>
    %86 = arith.truncf %85 : vector<16x256xf32> to vector<16x256xbf16>
    %c0_54 = arith.constant 0 : index
    %c17_55 = arith.constant 17 : index
    %87 = vector.load %arg11[%c0_54, %c17_55] : memref<48x290xbf16, #tpu.memory_space<vmem>>, vector<16x256xbf16>
    tpu.vector_store %arg11[%c0_54, %c17_55], %86 {strides = array<i32>} : memref<48x290xbf16, #tpu.memory_space<vmem>>, vector<16x256xbf16>,
    %88 = arith.truncf %83 : vector<16x256xf32> to vector<16x256xbf16>
    %c16_56 = arith.constant 16 : index
    %c17_57 = arith.constant 17 : index
    %89 = vector.load %arg11[%c16_56, %c17_57] : memref<48x290xbf16, #tpu.memory_space<vmem>>, vector<16x256xbf16>
    tpu.vector_store %arg11[%c16_56, %c17_57], %88 {strides = array<i32>} : memref<48x290xbf16, #tpu.memory_space<vmem>>, vector<16x256xbf16>,
    %90 = vector.broadcast %27 : vector<1x256xf32> to vector<16x256xf32>
    %91 = arith.mulf %83, %90 : vector<16x256xf32>
    %92 = arith.truncf %91 : vector<16x256xf32> to vector<16x256xbf16>
    %c32_58 = arith.constant 32 : index
    %c17_59 = arith.constant 17 : index
    %93 = vector.load %arg11[%c32_58, %c17_59] : memref<48x290xbf16, #tpu.memory_space<vmem>>, vector<16x256xbf16>
    tpu.vector_store %arg11[%c32_58, %c17_59], %92 {strides = array<i32>} : memref<48x290xbf16, #tpu.memory_space<vmem>>, vector<16x256xbf16>,
    %c0_60 = arith.constant 0 : index
    %c0_61 = arith.constant 0 : index
    %94 = vector.load %arg11[%c0_60, %c0_61] : memref<48x290xbf16, #tpu.memory_space<vmem>>, vector<16x256xbf16>
    %c0_62 = arith.constant 0 : index
    %c0_63 = arith.constant 0 : index
    %95 = vector.load %arg12[%c0_62, %c0_63] : memref<144x256xbf16, #tpu.memory_space<vmem>>, vector<16x256xbf16>
    tpu.vector_store %arg12[%c0_62, %c0_63], %94 {strides = array<i32>} : memref<144x256xbf16, #tpu.memory_space<vmem>>, vector<16x256xbf16>,
    %c16_64 = arith.constant 16 : index
    %c1_65 = arith.constant 1 : index
    %96 = vector.load %arg11[%c16_64, %c1_65] : memref<48x290xbf16, #tpu.memory_space<vmem>>, vector<16x256xbf16>
    %c16_66 = arith.constant 16 : index
    %c0_67 = arith.constant 0 : index
    %97 = vector.load %arg12[%c16_66, %c0_67] : memref<144x256xbf16, #tpu.memory_space<vmem>>, vector<16x256xbf16>
    tpu.vector_store %arg12[%c16_66, %c0_67], %96 {strides = array<i32>} : memref<144x256xbf16, #tpu.memory_space<vmem>>, vector<16x256xbf16>,
    %c32_68 = arith.constant 32 : index
    %c2_69 = arith.constant 2 : index
    %98 = vector.load %arg11[%c32_68, %c2_69] : memref<48x290xbf16, #tpu.memory_space<vmem>>, vector<16x256xbf16>
    %c32_70 = arith.constant 32 : index
    %c0_71 = arith.constant 0 : index
    %99 = vector.load %arg12[%c32_70, %c0_71] : memref<144x256xbf16, #tpu.memory_space<vmem>>, vector<16x256xbf16>
    tpu.vector_store %arg12[%c32_70, %c0_71], %98 {strides = array<i32>} : memref<144x256xbf16, #tpu.memory_space<vmem>>, vector<16x256xbf16>,
    %c0_72 = arith.constant 0 : index
    %c16_73 = arith.constant 16 : index
    %100 = vector.load %arg11[%c0_72, %c16_73] : memref<48x290xbf16, #tpu.memory_space<vmem>>, vector<16x256xbf16>
    %c48_74 = arith.constant 48 : index
    %c0_75 = arith.constant 0 : index
    %101 = vector.load %arg12[%c48_74, %c0_75] : memref<144x256xbf16, #tpu.memory_space<vmem>>, vector<16x256xbf16>
    tpu.vector_store %arg12[%c48_74, %c0_75], %100 {strides = array<i32>} : memref<144x256xbf16, #tpu.memory_space<vmem>>, vector<16x256xbf16>,
    %c16_76 = arith.constant 16 : index
    %c17_77 = arith.constant 17 : index
    %102 = vector.load %arg11[%c16_76, %c17_77] : memref<48x290xbf16, #tpu.memory_space<vmem>>, vector<16x256xbf16>
    %c64_78 = arith.constant 64 : index
    %c0_79 = arith.constant 0 : index
    %103 = vector.load %arg12[%c64_78, %c0_79] : memref<144x256xbf16, #tpu.memory_space<vmem>>, vector<16x256xbf16>
    tpu.vector_store %arg12[%c64_78, %c0_79], %102 {strides = array<i32>} : memref<144x256xbf16, #tpu.memory_space<vmem>>, vector<16x256xbf16>,
    %c32_80 = arith.constant 32 : index
    %c18_81 = arith.constant 18 : index
    %104 = vector.load %arg11[%c32_80, %c18_81] : memref<48x290xbf16, #tpu.memory_space<vmem>>, vector<16x256xbf16>
    %c80_82 = arith.constant 80 : index
    %c0_83 = arith.constant 0 : index
    %105 = vector.load %arg12[%c80_82, %c0_83] : memref<144x256xbf16, #tpu.memory_space<vmem>>, vector<16x256xbf16>
    tpu.vector_store %arg12[%c80_82, %c0_83], %104 {strides = array<i32>} : memref<144x256xbf16, #tpu.memory_space<vmem>>, vector<16x256xbf16>,
    %c0_84 = arith.constant 0 : index
    %c32_85 = arith.constant 32 : index
    %106 = vector.load %arg11[%c0_84, %c32_85] : memref<48x290xbf16, #tpu.memory_space<vmem>>, vector<16x256xbf16>
    %c96_86 = arith.constant 96 : index
    %c0_87 = arith.constant 0 : index
    %107 = vector.load %arg12[%c96_86, %c0_87] : memref<144x256xbf16, #tpu.memory_space<vmem>>, vector<16x256xbf16>
    tpu.vector_store %arg12[%c96_86, %c0_87], %106 {strides = array<i32>} : memref<144x256xbf16, #tpu.memory_space<vmem>>, vector<16x256xbf16>,
    %c16_88 = arith.constant 16 : index
    %c33_89 = arith.constant 33 : index
    %108 = vector.load %arg11[%c16_88, %c33_89] : memref<48x290xbf16, #tpu.memory_space<vmem>>, vector<16x256xbf16>
    %c112_90 = arith.constant 112 : index
    %c0_91 = arith.constant 0 : index
    %109 = vector.load %arg12[%c112_90, %c0_91] : memref<144x256xbf16, #tpu.memory_space<vmem>>, vector<16x256xbf16>
    tpu.vector_store %arg12[%c112_90, %c0_91], %108 {strides = array<i32>} : memref<144x256xbf16, #tpu.memory_space<vmem>>, vector<16x256xbf16>,
    %c32_92 = arith.constant 32 : index
    %c34_93 = arith.constant 34 : index
    %110 = vector.load %arg11[%c32_92, %c34_93] : memref<48x290xbf16, #tpu.memory_space<vmem>>, vector<16x256xbf16>
    %c128_94 = arith.constant 128 : index
    %c0_95 = arith.constant 0 : index
    %111 = vector.load %arg12[%c128_94, %c0_95] : memref<144x256xbf16, #tpu.memory_space<vmem>>, vector<16x256xbf16>
    tpu.vector_store %arg12[%c128_94, %c0_95], %110 {strides = array<i32>} : memref<144x256xbf16, #tpu.memory_space<vmem>>, vector<16x256xbf16>,
    %c0_96 = arith.constant 0 : index
    %c0_97 = arith.constant 0 : index
    %112 = vector.load %arg7[%c0_96, %c0_97] : memref<16x144xbf16, #tpu.memory_space<vmem>>, vector<16x144xbf16>
    %c0_98 = arith.constant 0 : index
    %c0_99 = arith.constant 0 : index
    %113 = vector.load %arg12[%c0_98, %c0_99] : memref<144x256xbf16, #tpu.memory_space<vmem>>, vector<144x256xbf16>
    %cst_100 = arith.constant dense<0.000000e+00> : vector<16x256xf32>
    %114 = tpu.matmul %112, %113, %cst_100 {dimension_numbers = #tpu.dot_dimension_numbers<[1], [0], [0], [1], [0, 0, 1, 1], [], []>} : vector<16x144xbf16>, vector<144x256xbf16>, vector<16x256xf32> -> vector<16x256xf32>
    %c0_101 = arith.constant 0 : index
    %c0_102 = arith.constant 0 : index
    %115 = vector.load %arg8[%c0_101, %c0_102] : memref<16x1xf32, #tpu.memory_space<vmem>>, vector<16x1xf32>
    %116 = vector.broadcast %115 : vector<16x1xf32> to vector<16x256xf32>
    %117 = arith.mulf %114, %116 : vector<16x256xf32>
    %c0_103 = arith.constant 0 : index
    %c0_104 = arith.constant 0 : index
    %118 = vector.load %arg9[%c0_103, %c0_104] : memref<16x1xf32, #tpu.memory_space<vmem>>, vector<16x1xf32>
    %119 = vector.broadcast %118 : vector<16x1xf32> to vector<16x256xf32>
    %120 = arith.addf %117, %119 : vector<16x256xf32>
    %121 = arith.addf %120, %30 : vector<16x256xf32>
    %c0_105 = arith.constant 0 : index
    %c0_106 = arith.constant 0 : index
    %122 = vector.load %arg2[%c0_105, %c0_106] : memref<16x1xf32, #tpu.memory_space<vmem>>, vector<16x1xf32>
    %123 = vector.broadcast %122 : vector<16x1xf32> to vector<16x256xf32>
    %124 = arith.mulf %121, %123 : vector<16x256xf32>
    %c0_107 = arith.constant 0 : index
    %c0_108 = arith.constant 0 : index
    %125 = vector.load %arg3[%c0_107, %c0_108] : memref<16x1xf32, #tpu.memory_space<vmem>>, vector<16x1xf32>
    %126 = vector.broadcast %125 : vector<16x1xf32> to vector<16x256xf32>
    %127 = arith.addf %124, %126 : vector<16x256xf32>
    %cst_109 = arith.constant 0.000000e+00 : f32
    %128 = vector.broadcast %cst_109 : f32 to vector<16x256xf32>
    %129 = arith.cmpf ogt, %127, %128 : vector<16x256xf32>
    %cst_110 = arith.constant 2.000000e-02 : f32
    %130 = vector.broadcast %cst_110 : f32 to vector<16x256xf32>
    %131 = arith.mulf %130, %127 : vector<16x256xf32>
    %132 = arith.select %129, %127, %131 : vector<16x256xi1>, vector<16x256xf32>
    %133 = vector.broadcast %23 : vector<1x256xf32> to vector<16x256xf32>
    %134 = arith.mulf %132, %133 : vector<16x256xf32>
    %135 = arith.truncf %134 : vector<16x256xf32> to vector<16x256xbf16>
    %c0_111 = arith.constant 0 : index
    %c17_112 = arith.constant 17 : index
    %136 = vector.load %arg11[%c0_111, %c17_112] : memref<48x290xbf16, #tpu.memory_space<vmem>>, vector<16x256xbf16>
    tpu.vector_store %arg11[%c0_111, %c17_112], %135 {strides = array<i32>} : memref<48x290xbf16, #tpu.memory_space<vmem>>, vector<16x256xbf16>,
    %137 = arith.truncf %132 : vector<16x256xf32> to vector<16x256xbf16>
    %c16_113 = arith.constant 16 : index
    %c17_114 = arith.constant 17 : index
    %138 = vector.load %arg11[%c16_113, %c17_114] : memref<48x290xbf16, #tpu.memory_space<vmem>>, vector<16x256xbf16>
    tpu.vector_store %arg11[%c16_113, %c17_114], %137 {strides = array<i32>} : memref<48x290xbf16, #tpu.memory_space<vmem>>, vector<16x256xbf16>,
    %139 = vector.broadcast %27 : vector<1x256xf32> to vector<16x256xf32>
    %140 = arith.mulf %132, %139 : vector<16x256xf32>
    %141 = arith.truncf %140 : vector<16x256xf32> to vector<16x256xbf16>
    %c32_115 = arith.constant 32 : index
    %c17_116 = arith.constant 17 : index
    %142 = vector.load %arg11[%c32_115, %c17_116] : memref<48x290xbf16, #tpu.memory_space<vmem>>, vector<16x256xbf16>
    tpu.vector_store %arg11[%c32_115, %c17_116], %141 {strides = array<i32>} : memref<48x290xbf16, #tpu.memory_space<vmem>>, vector<16x256xbf16>,
    %c0_117 = arith.constant 0 : index
    %c0_118 = arith.constant 0 : index
    %143 = vector.load %arg11[%c0_117, %c0_118] : memref<48x290xbf16, #tpu.memory_space<vmem>>, vector<16x256xbf16>
    %c0_119 = arith.constant 0 : index
    %c0_120 = arith.constant 0 : index
    %144 = vector.load %arg12[%c0_119, %c0_120] : memref<144x256xbf16, #tpu.memory_space<vmem>>, vector<16x256xbf16>
    tpu.vector_store %arg12[%c0_119, %c0_120], %143 {strides = array<i32>} : memref<144x256xbf16, #tpu.memory_space<vmem>>, vector<16x256xbf16>,
    %c16_121 = arith.constant 16 : index
    %c1_122 = arith.constant 1 : index
    %145 = vector.load %arg11[%c16_121, %c1_122] : memref<48x290xbf16, #tpu.memory_space<vmem>>, vector<16x256xbf16>
    %c16_123 = arith.constant 16 : index
    %c0_124 = arith.constant 0 : index
    %146 = vector.load %arg12[%c16_123, %c0_124] : memref<144x256xbf16, #tpu.memory_space<vmem>>, vector<16x256xbf16>
    tpu.vector_store %arg12[%c16_123, %c0_124], %145 {strides = array<i32>} : memref<144x256xbf16, #tpu.memory_space<vmem>>, vector<16x256xbf16>,
    %c32_125 = arith.constant 32 : index
    %c2_126 = arith.constant 2 : index
    %147 = vector.load %arg11[%c32_125, %c2_126] : memref<48x290xbf16, #tpu.memory_space<vmem>>, vector<16x256xbf16>
    %c32_127 = arith.constant 32 : index
    %c0_128 = arith.constant 0 : index
    %148 = vector.load %arg12[%c32_127, %c0_128] : memref<144x256xbf16, #tpu.memory_space<vmem>>, vector<16x256xbf16>
    tpu.vector_store %arg12[%c32_127, %c0_128], %147 {strides = array<i32>} : memref<144x256xbf16, #tpu.memory_space<vmem>>, vector<16x256xbf16>,
    %c0_129 = arith.constant 0 : index
    %c16_130 = arith.constant 16 : index
    %149 = vector.load %arg11[%c0_129, %c16_130] : memref<48x290xbf16, #tpu.memory_space<vmem>>, vector<16x256xbf16>
    %c48_131 = arith.constant 48 : index
    %c0_132 = arith.constant 0 : index
    %150 = vector.load %arg12[%c48_131, %c0_132] : memref<144x256xbf16, #tpu.memory_space<vmem>>, vector<16x256xbf16>
    tpu.vector_store %arg12[%c48_131, %c0_132], %149 {strides = array<i32>} : memref<144x256xbf16, #tpu.memory_space<vmem>>, vector<16x256xbf16>,
    %c16_133 = arith.constant 16 : index
    %c17_134 = arith.constant 17 : index
    %151 = vector.load %arg11[%c16_133, %c17_134] : memref<48x290xbf16, #tpu.memory_space<vmem>>, vector<16x256xbf16>
    %c64_135 = arith.constant 64 : index
    %c0_136 = arith.constant 0 : index
    %152 = vector.load %arg12[%c64_135, %c0_136] : memref<144x256xbf16, #tpu.memory_space<vmem>>, vector<16x256xbf16>
    tpu.vector_store %arg12[%c64_135, %c0_136], %151 {strides = array<i32>} : memref<144x256xbf16, #tpu.memory_space<vmem>>, vector<16x256xbf16>,
    %c32_137 = arith.constant 32 : index
    %c18_138 = arith.constant 18 : index
    %153 = vector.load %arg11[%c32_137, %c18_138] : memref<48x290xbf16, #tpu.memory_space<vmem>>, vector<16x256xbf16>
    %c80_139 = arith.constant 80 : index
    %c0_140 = arith.constant 0 : index
    %154 = vector.load %arg12[%c80_139, %c0_140] : memref<144x256xbf16, #tpu.memory_space<vmem>>, vector<16x256xbf16>
    tpu.vector_store %arg12[%c80_139, %c0_140], %153 {strides = array<i32>} : memref<144x256xbf16, #tpu.memory_space<vmem>>, vector<16x256xbf16>,
    %c0_141 = arith.constant 0 : index
    %c32_142 = arith.constant 32 : index
    %155 = vector.load %arg11[%c0_141, %c32_142] : memref<48x290xbf16, #tpu.memory_space<vmem>>, vector<16x256xbf16>
    %c96_143 = arith.constant 96 : index
    %c0_144 = arith.constant 0 : index
    %156 = vector.load %arg12[%c96_143, %c0_144] : memref<144x256xbf16, #tpu.memory_space<vmem>>, vector<16x256xbf16>
    tpu.vector_store %arg12[%c96_143, %c0_144], %155 {strides = array<i32>} : memref<144x256xbf16, #tpu.memory_space<vmem>>, vector<16x256xbf16>,
    %c16_145 = arith.constant 16 : index
    %c33_146 = arith.constant 33 : index
    %157 = vector.load %arg11[%c16_145, %c33_146] : memref<48x290xbf16, #tpu.memory_space<vmem>>, vector<16x256xbf16>
    %c112_147 = arith.constant 112 : index
    %c0_148 = arith.constant 0 : index
    %158 = vector.load %arg12[%c112_147, %c0_148] : memref<144x256xbf16, #tpu.memory_space<vmem>>, vector<16x256xbf16>
    tpu.vector_store %arg12[%c112_147, %c0_148], %157 {strides = array<i32>} : memref<144x256xbf16, #tpu.memory_space<vmem>>, vector<16x256xbf16>,
    %c32_149 = arith.constant 32 : index
    %c34_150 = arith.constant 34 : index
    %159 = vector.load %arg11[%c32_149, %c34_150] : memref<48x290xbf16, #tpu.memory_space<vmem>>, vector<16x256xbf16>
    %c128_151 = arith.constant 128 : index
    %c0_152 = arith.constant 0 : index
    %160 = vector.load %arg12[%c128_151, %c0_152] : memref<144x256xbf16, #tpu.memory_space<vmem>>, vector<16x256xbf16>
    tpu.vector_store %arg12[%c128_151, %c0_152], %159 {strides = array<i32>} : memref<144x256xbf16, #tpu.memory_space<vmem>>, vector<16x256xbf16>,
    %c0_153 = arith.constant 0 : index
    %c0_154 = arith.constant 0 : index
    %161 = vector.load %arg4[%c0_153, %c0_154] : memref<16x144xbf16, #tpu.memory_space<vmem>>, vector<16x144xbf16>
    %c0_155 = arith.constant 0 : index
    %c0_156 = arith.constant 0 : index
    %162 = vector.load %arg12[%c0_155, %c0_156] : memref<144x256xbf16, #tpu.memory_space<vmem>>, vector<144x256xbf16>
    %cst_157 = arith.constant dense<0.000000e+00> : vector<16x256xf32>
    %163 = tpu.matmul %161, %162, %cst_157 {dimension_numbers = #tpu.dot_dimension_numbers<[1], [0], [0], [1], [0, 0, 1, 1], [], []>} : vector<16x144xbf16>, vector<144x256xbf16>, vector<16x256xf32> -> vector<16x256xf32>
    %c0_158 = arith.constant 0 : index
    %c0_159 = arith.constant 0 : index
    %164 = vector.load %arg5[%c0_158, %c0_159] : memref<16x1xf32, #tpu.memory_space<vmem>>, vector<16x1xf32>
    %165 = vector.broadcast %164 : vector<16x1xf32> to vector<16x256xf32>
    %166 = arith.mulf %163, %165 : vector<16x256xf32>
    %c0_160 = arith.constant 0 : index
    %c0_161 = arith.constant 0 : index
    %167 = vector.load %arg6[%c0_160, %c0_161] : memref<16x1xf32, #tpu.memory_space<vmem>>, vector<16x1xf32>
    %168 = vector.broadcast %167 : vector<16x1xf32> to vector<16x256xf32>
    %169 = arith.addf %166, %168 : vector<16x256xf32>
    %cst_162 = arith.constant 0.000000e+00 : f32
    %170 = vector.broadcast %cst_162 : f32 to vector<16x256xf32>
    %171 = arith.cmpf ogt, %169, %170 : vector<16x256xf32>
    %cst_163 = arith.constant 2.000000e-02 : f32
    %172 = vector.broadcast %cst_163 : f32 to vector<16x256xf32>
    %173 = arith.mulf %172, %169 : vector<16x256xf32>
    %174 = arith.select %171, %169, %173 : vector<16x256xi1>, vector<16x256xf32>
    %175 = vector.broadcast %23 : vector<1x256xf32> to vector<16x256xf32>
    %176 = arith.mulf %174, %175 : vector<16x256xf32>
    %177 = arith.truncf %176 : vector<16x256xf32> to vector<16x256xbf16>
    %c0_164 = arith.constant 0 : index
    %c17_165 = arith.constant 17 : index
    %178 = vector.load %arg11[%c0_164, %c17_165] : memref<48x290xbf16, #tpu.memory_space<vmem>>, vector<16x256xbf16>
    tpu.vector_store %arg11[%c0_164, %c17_165], %177 {strides = array<i32>} : memref<48x290xbf16, #tpu.memory_space<vmem>>, vector<16x256xbf16>,
    %179 = arith.truncf %174 : vector<16x256xf32> to vector<16x256xbf16>
    %c16_166 = arith.constant 16 : index
    %c17_167 = arith.constant 17 : index
    %180 = vector.load %arg11[%c16_166, %c17_167] : memref<48x290xbf16, #tpu.memory_space<vmem>>, vector<16x256xbf16>
    tpu.vector_store %arg11[%c16_166, %c17_167], %179 {strides = array<i32>} : memref<48x290xbf16, #tpu.memory_space<vmem>>, vector<16x256xbf16>,
    %181 = vector.broadcast %27 : vector<1x256xf32> to vector<16x256xf32>
    %182 = arith.mulf %174, %181 : vector<16x256xf32>
    %183 = arith.truncf %182 : vector<16x256xf32> to vector<16x256xbf16>
    %c32_168 = arith.constant 32 : index
    %c17_169 = arith.constant 17 : index
    %184 = vector.load %arg11[%c32_168, %c17_169] : memref<48x290xbf16, #tpu.memory_space<vmem>>, vector<16x256xbf16>
    tpu.vector_store %arg11[%c32_168, %c17_169], %183 {strides = array<i32>} : memref<48x290xbf16, #tpu.memory_space<vmem>>, vector<16x256xbf16>,
    %c0_170 = arith.constant 0 : index
    %c0_171 = arith.constant 0 : index
    %185 = vector.load %arg11[%c0_170, %c0_171] : memref<48x290xbf16, #tpu.memory_space<vmem>>, vector<16x256xbf16>
    %c0_172 = arith.constant 0 : index
    %c0_173 = arith.constant 0 : index
    %186 = vector.load %arg12[%c0_172, %c0_173] : memref<144x256xbf16, #tpu.memory_space<vmem>>, vector<16x256xbf16>
    tpu.vector_store %arg12[%c0_172, %c0_173], %185 {strides = array<i32>} : memref<144x256xbf16, #tpu.memory_space<vmem>>, vector<16x256xbf16>,
    %c16_174 = arith.constant 16 : index
    %c1_175 = arith.constant 1 : index
    %187 = vector.load %arg11[%c16_174, %c1_175] : memref<48x290xbf16, #tpu.memory_space<vmem>>, vector<16x256xbf16>
    %c16_176 = arith.constant 16 : index
    %c0_177 = arith.constant 0 : index
    %188 = vector.load %arg12[%c16_176, %c0_177] : memref<144x256xbf16, #tpu.memory_space<vmem>>, vector<16x256xbf16>
    tpu.vector_store %arg12[%c16_176, %c0_177], %187 {strides = array<i32>} : memref<144x256xbf16, #tpu.memory_space<vmem>>, vector<16x256xbf16>,
    %c32_178 = arith.constant 32 : index
    %c2_179 = arith.constant 2 : index
    %189 = vector.load %arg11[%c32_178, %c2_179] : memref<48x290xbf16, #tpu.memory_space<vmem>>, vector<16x256xbf16>
    %c32_180 = arith.constant 32 : index
    %c0_181 = arith.constant 0 : index
    %190 = vector.load %arg12[%c32_180, %c0_181] : memref<144x256xbf16, #tpu.memory_space<vmem>>, vector<16x256xbf16>
    tpu.vector_store %arg12[%c32_180, %c0_181], %189 {strides = array<i32>} : memref<144x256xbf16, #tpu.memory_space<vmem>>, vector<16x256xbf16>,
    %c0_182 = arith.constant 0 : index
    %c16_183 = arith.constant 16 : index
    %191 = vector.load %arg11[%c0_182, %c16_183] : memref<48x290xbf16, #tpu.memory_space<vmem>>, vector<16x256xbf16>
    %c48_184 = arith.constant 48 : index
    %c0_185 = arith.constant 0 : index
    %192 = vector.load %arg12[%c48_184, %c0_185] : memref<144x256xbf16, #tpu.memory_space<vmem>>, vector<16x256xbf16>
    tpu.vector_store %arg12[%c48_184, %c0_185], %191 {strides = array<i32>} : memref<144x256xbf16, #tpu.memory_space<vmem>>, vector<16x256xbf16>,
    %c16_186 = arith.constant 16 : index
    %c17_187 = arith.constant 17 : index
    %193 = vector.load %arg11[%c16_186, %c17_187] : memref<48x290xbf16, #tpu.memory_space<vmem>>, vector<16x256xbf16>
    %c64_188 = arith.constant 64 : index
    %c0_189 = arith.constant 0 : index
    %194 = vector.load %arg12[%c64_188, %c0_189] : memref<144x256xbf16, #tpu.memory_space<vmem>>, vector<16x256xbf16>
    tpu.vector_store %arg12[%c64_188, %c0_189], %193 {strides = array<i32>} : memref<144x256xbf16, #tpu.memory_space<vmem>>, vector<16x256xbf16>,
    %c32_190 = arith.constant 32 : index
    %c18_191 = arith.constant 18 : index
    %195 = vector.load %arg11[%c32_190, %c18_191] : memref<48x290xbf16, #tpu.memory_space<vmem>>, vector<16x256xbf16>
    %c80_192 = arith.constant 80 : index
    %c0_193 = arith.constant 0 : index
    %196 = vector.load %arg12[%c80_192, %c0_193] : memref<144x256xbf16, #tpu.memory_space<vmem>>, vector<16x256xbf16>
    tpu.vector_store %arg12[%c80_192, %c0_193], %195 {strides = array<i32>} : memref<144x256xbf16, #tpu.memory_space<vmem>>, vector<16x256xbf16>,
    %c0_194 = arith.constant 0 : index
    %c32_195 = arith.constant 32 : index
    %197 = vector.load %arg11[%c0_194, %c32_195] : memref<48x290xbf16, #tpu.memory_space<vmem>>, vector<16x256xbf16>
    %c96_196 = arith.constant 96 : index
    %c0_197 = arith.constant 0 : index
    %198 = vector.load %arg12[%c96_196, %c0_197] : memref<144x256xbf16, #tpu.memory_space<vmem>>, vector<16x256xbf16>
    tpu.vector_store %arg12[%c96_196, %c0_197], %197 {strides = array<i32>} : memref<144x256xbf16, #tpu.memory_space<vmem>>, vector<16x256xbf16>,
    %c16_198 = arith.constant 16 : index
    %c33_199 = arith.constant 33 : index
    %199 = vector.load %arg11[%c16_198, %c33_199] : memref<48x290xbf16, #tpu.memory_space<vmem>>, vector<16x256xbf16>
    %c112_200 = arith.constant 112 : index
    %c0_201 = arith.constant 0 : index
    %200 = vector.load %arg12[%c112_200, %c0_201] : memref<144x256xbf16, #tpu.memory_space<vmem>>, vector<16x256xbf16>
    tpu.vector_store %arg12[%c112_200, %c0_201], %199 {strides = array<i32>} : memref<144x256xbf16, #tpu.memory_space<vmem>>, vector<16x256xbf16>,
    %c32_202 = arith.constant 32 : index
    %c34_203 = arith.constant 34 : index
    %201 = vector.load %arg11[%c32_202, %c34_203] : memref<48x290xbf16, #tpu.memory_space<vmem>>, vector<16x256xbf16>
    %c128_204 = arith.constant 128 : index
    %c0_205 = arith.constant 0 : index
    %202 = vector.load %arg12[%c128_204, %c0_205] : memref<144x256xbf16, #tpu.memory_space<vmem>>, vector<16x256xbf16>
    tpu.vector_store %arg12[%c128_204, %c0_205], %201 {strides = array<i32>} : memref<144x256xbf16, #tpu.memory_space<vmem>>, vector<16x256xbf16>,
    %c0_206 = arith.constant 0 : index
    %c0_207 = arith.constant 0 : index
    %203 = vector.load %arg7[%c0_206, %c0_207] : memref<16x144xbf16, #tpu.memory_space<vmem>>, vector<16x144xbf16>
    %c0_208 = arith.constant 0 : index
    %c0_209 = arith.constant 0 : index
    %204 = vector.load %arg12[%c0_208, %c0_209] : memref<144x256xbf16, #tpu.memory_space<vmem>>, vector<144x256xbf16>
    %cst_210 = arith.constant dense<0.000000e+00> : vector<16x256xf32>
    %205 = tpu.matmul %203, %204, %cst_210 {dimension_numbers = #tpu.dot_dimension_numbers<[1], [0], [0], [1], [0, 0, 1, 1], [], []>} : vector<16x144xbf16>, vector<144x256xbf16>, vector<16x256xf32> -> vector<16x256xf32>
    %c0_211 = arith.constant 0 : index
    %c0_212 = arith.constant 0 : index
    %206 = vector.load %arg8[%c0_211, %c0_212] : memref<16x1xf32, #tpu.memory_space<vmem>>, vector<16x1xf32>
    %207 = vector.broadcast %206 : vector<16x1xf32> to vector<16x256xf32>
    %208 = arith.mulf %205, %207 : vector<16x256xf32>
    %c0_213 = arith.constant 0 : index
    %c0_214 = arith.constant 0 : index
    %209 = vector.load %arg9[%c0_213, %c0_214] : memref<16x1xf32, #tpu.memory_space<vmem>>, vector<16x1xf32>
    %210 = vector.broadcast %209 : vector<16x1xf32> to vector<16x256xf32>
    %211 = arith.addf %208, %210 : vector<16x256xf32>
    %212 = arith.addf %211, %121 : vector<16x256xf32>
    %213 = arith.truncf %212 : vector<16x256xf32> to vector<16x256xbf16>
    %c0_215 = arith.constant 0 : index
    %c0_216 = arith.constant 0 : index
    %c0_217 = arith.constant 0 : index
    %214 = vector.load %arg10[%c0_215, %c0_216, %c0_217] : memref<1x16x256xbf16, #tpu.memory_space<vmem>>, vector<1x16x256xbf16>
    %215 = vector.shape_cast %214 : vector<1x16x256xbf16> to vector<16x256xbf16>
    %216 = vector.shape_cast %213 : vector<16x256xbf16> to vector<1x16x256xbf16>
    tpu.vector_store %arg10[%c0_215, %c0_216, %c0_217], %216 {strides = array<i32>} : memref<1x16x256xbf16, #tpu.memory_space<vmem>>, vector<1x16x256xbf16>,
    return
  }
  func.func @transform_0(%arg0: i32) -> (i32, i32, i32) {
    %c0_i32 = arith.constant 0 : i32
    %c0_i32_0 = arith.constant 0 : i32
    %c0_i32_1 = arith.constant 0 : i32
    return %arg0, %c0_i32, %c0_i32_0 : i32, i32, i32
  }
  func.func @transform_1(%arg0: i32) -> (i32, i32) {
    %c0_i32 = arith.constant 0 : i32
    %c0_i32_0 = arith.constant 0 : i32
    %c0_i32_1 = arith.constant 0 : i32
    return %c0_i32, %c0_i32_0 : i32, i32
  }
  func.func @transform_2(%arg0: i32) -> (i32, i32) {
    %c0_i32 = arith.constant 0 : i32
    %c0_i32_0 = arith.constant 0 : i32
    %c0_i32_1 = arith.constant 0 : i32
    return %c0_i32, %c0_i32_0 : i32, i32
  }
  func.func @transform_3(%arg0: i32) -> (i32, i32) {
    %c0_i32 = arith.constant 0 : i32
    %c0_i32_0 = arith.constant 0 : i32
    %c0_i32_1 = arith.constant 0 : i32
    return %c0_i32, %c0_i32_0 : i32, i32
  }
  func.func @transform_4(%arg0: i32) -> (i32, i32) {
    %c0_i32 = arith.constant 0 : i32
    %c0_i32_0 = arith.constant 0 : i32
    %c0_i32_1 = arith.constant 0 : i32
    return %c0_i32, %c0_i32_0 : i32, i32
  }
  func.func @transform_5(%arg0: i32) -> (i32, i32) {
    %c0_i32 = arith.constant 0 : i32
    %c0_i32_0 = arith.constant 0 : i32
    %c0_i32_1 = arith.constant 0 : i32
    return %c0_i32, %c0_i32_0 : i32, i32
  }
  func.func @transform_6(%arg0: i32) -> (i32, i32) {
    %c0_i32 = arith.constant 0 : i32
    %c0_i32_0 = arith.constant 0 : i32
    %c0_i32_1 = arith.constant 0 : i32
    return %c0_i32, %c0_i32_0 : i32, i32
  }
  func.func @transform_7(%arg0: i32) -> (i32, i32) {
    %c0_i32 = arith.constant 0 : i32
    %c0_i32_0 = arith.constant 0 : i32
    %c0_i32_1 = arith.constant 0 : i32
    return %c0_i32, %c0_i32_0 : i32, i32
  }
  func.func @transform_8(%arg0: i32) -> (i32, i32) {
    %c0_i32 = arith.constant 0 : i32
    %c0_i32_0 = arith.constant 0 : i32
    %c0_i32_1 = arith.constant 0 : i32
    return %c0_i32, %c0_i32_0 : i32, i32
  }
  func.func @transform_9(%arg0: i32) -> (i32, i32, i32) {
    %c0_i32 = arith.constant 0 : i32
    %c0_i32_0 = arith.constant 0 : i32
    %c0_i32_1 = arith.constant 0 : i32
    return %arg0, %c0_i32, %c0_i32_0 : i32, i32, i32
  }
}

module attributes {stable_mosaic.version = 11 : i64} {
  func.func @_stage3_kernel(%arg0: i32, %arg1: memref<1x16x1024xbf16, #tpu.memory_space<vmem>>, %arg2: memref<16x144xbf16, #tpu.memory_space<vmem>>, %arg3: memref<16x1xf32, #tpu.memory_space<vmem>>, %arg4: memref<16x1xf32, #tpu.memory_space<vmem>>, %arg5: memref<8x144xbf16, #tpu.memory_space<vmem>>, %arg6: memref<8x1xf32, #tpu.memory_space<vmem>>, %arg7: memref<8x1xf32, #tpu.memory_space<vmem>>, %arg8: memref<1x72xbf16, #tpu.memory_space<vmem>>, %arg9: memref<1x1xf32, #tpu.memory_space<vmem>>, %arg10: memref<1x1xf32, #tpu.memory_space<vmem>>, %arg11: memref<1x1x1024xf32, #tpu.memory_space<vmem>>, %arg12: memref<48x1090xbf16, #tpu.memory_space<vmem>>, %arg13: memref<144x1024xbf16, #tpu.memory_space<vmem>>) attributes {dimension_semantics = [#tpu.dimension_semantics<parallel>], iteration_bounds = array<i64: 2>, scalar_prefetch = 0 : i64, scratch_operands = 2 : i64, tpu.core_type = #tpu.core_type<tc>, window_params = [{transform_indices = @transform_0, window_bounds = array<i64: 1, 16, 1024>}, {pipeline_mode = #tpu.pipeline_mode<synchronous>, transform_indices = @transform_1, window_bounds = array<i64: 16, 144>}, {pipeline_mode = #tpu.pipeline_mode<synchronous>, transform_indices = @transform_2, window_bounds = array<i64: 16, 1>}, {pipeline_mode = #tpu.pipeline_mode<synchronous>, transform_indices = @transform_3, window_bounds = array<i64: 16, 1>}, {pipeline_mode = #tpu.pipeline_mode<synchronous>, transform_indices = @transform_4, window_bounds = array<i64: 8, 144>}, {pipeline_mode = #tpu.pipeline_mode<synchronous>, transform_indices = @transform_5, window_bounds = array<i64: 8, 1>}, {pipeline_mode = #tpu.pipeline_mode<synchronous>, transform_indices = @transform_6, window_bounds = array<i64: 8, 1>}, {pipeline_mode = #tpu.pipeline_mode<synchronous>, transform_indices = @transform_7, window_bounds = array<i64: 1, 72>}, {pipeline_mode = #tpu.pipeline_mode<synchronous>, transform_indices = @transform_8, window_bounds = array<i64: 1, 1>}, {pipeline_mode = #tpu.pipeline_mode<synchronous>, transform_indices = @transform_9, window_bounds = array<i64: 1, 1>}, {transform_indices = @transform_10, window_bounds = array<i64: 1, 1, 1024>}]} {
    %cst = arith.constant 0.000000e+00 : bf16
    %0 = vector.broadcast %cst : bf16 to vector<48x33xbf16>
    %c0 = arith.constant 0 : index
    %c0_0 = arith.constant 0 : index
    %1 = vector.load %arg12[%c0, %c0_0] : memref<48x1090xbf16, #tpu.memory_space<vmem>>, vector<48x33xbf16>
    tpu.vector_store %arg12[%c0, %c0_0], %0 {strides = array<i32>} : memref<48x1090xbf16, #tpu.memory_space<vmem>>, vector<48x33xbf16>,
    %c0_1 = arith.constant 0 : index
    %c1057 = arith.constant 1057 : index
    %2 = vector.load %arg12[%c0_1, %c1057] : memref<48x1090xbf16, #tpu.memory_space<vmem>>, vector<48x33xbf16>
    tpu.vector_store %arg12[%c0_1, %c1057], %0 {strides = array<i32>} : memref<48x1090xbf16, #tpu.memory_space<vmem>>, vector<48x33xbf16>,
    %3 = tpu.iota {dimensions = array<i32: 1>} : vector<1x1024xi32>
    %c32_i32 = arith.constant 32 : i32
    %c0_i32 = arith.constant 0 : i32
    %4 = arith.cmpi eq, %c32_i32, %c0_i32 : i32
    %c1_i32 = arith.constant 1 : i32
    %5 = arith.select %4, %c1_i32, %c32_i32 : i32
    %6 = vector.broadcast %5 : i32 to vector<1x1024xi32>
    %7 = arith.remsi %3, %6 : vector<1x1024xi32>
    %c0_i32_2 = arith.constant 0 : i32
    %8 = vector.broadcast %c0_i32_2 : i32 to vector<1x1024xi32>
    %9 = arith.cmpi ne, %7, %8 : vector<1x1024xi32>
    %c0_i32_3 = arith.constant 0 : i32
    %10 = vector.broadcast %c0_i32_3 : i32 to vector<1x1024xi32>
    %11 = arith.cmpi slt, %7, %10 : vector<1x1024xi32>
    %c0_i32_4 = arith.constant 0 : i32
    %12 = arith.cmpi slt, %5, %c0_i32_4 : i32
    %13 = vector.broadcast %12 : i1 to vector<1x1024xi1>
    %14 = vector.broadcast %13 : vector<1x1024xi1> to vector<1x1024xi1>
    %15 = arith.xori %11, %14 : vector<1x1024xi1>
    %16 = arith.andi %15, %9 : vector<1x1024xi1>
    %17 = vector.broadcast %5 : i32 to vector<1x1024xi32>
    %18 = arith.addi %7, %17 : vector<1x1024xi32>
    %19 = arith.select %16, %18, %7 : vector<1x1024xi1>, vector<1x1024xi32>
    %c31_i32 = arith.constant 31 : i32
    %20 = vector.broadcast %c31_i32 : i32 to vector<1x1024xi32>
    %21 = arith.cmpi ne, %19, %20 : vector<1x1024xi32>
    %22 = arith.extui %21 : vector<1x1024xi1> to vector<1x1024xi32>
    %23 = arith.sitofp %22 : vector<1x1024xi32> to vector<1x1024xf32>
    %c0_i32_5 = arith.constant 0 : i32
    %24 = vector.broadcast %c0_i32_5 : i32 to vector<1x1024xi32>
    %25 = arith.cmpi ne, %19, %24 : vector<1x1024xi32>
    %26 = arith.extui %25 : vector<1x1024xi1> to vector<1x1024xi32>
    %27 = arith.sitofp %26 : vector<1x1024xi32> to vector<1x1024xf32>
    %c0_6 = arith.constant 0 : index
    %c0_7 = arith.constant 0 : index
    %c0_8 = arith.constant 0 : index
    %28 = vector.load %arg1[%c0_6, %c0_7, %c0_8] : memref<1x16x1024xbf16, #tpu.memory_space<vmem>>, vector<1x16x1024xbf16>
    %29 = vector.shape_cast %28 : vector<1x16x1024xbf16> to vector<16x1024xbf16>
    %30 = arith.extf %29 : vector<16x1024xbf16> to vector<16x1024xf32>
    %31 = vector.broadcast %23 : vector<1x1024xf32> to vector<16x1024xf32>
    %32 = arith.mulf %30, %31 : vector<16x1024xf32>
    %33 = arith.truncf %32 : vector<16x1024xf32> to vector<16x1024xbf16>
    %c0_9 = arith.constant 0 : index
    %c33 = arith.constant 33 : index
    %34 = vector.load %arg12[%c0_9, %c33] : memref<48x1090xbf16, #tpu.memory_space<vmem>>, vector<16x1024xbf16>
    tpu.vector_store %arg12[%c0_9, %c33], %33 {strides = array<i32>} : memref<48x1090xbf16, #tpu.memory_space<vmem>>, vector<16x1024xbf16>,
    %35 = arith.truncf %30 : vector<16x1024xf32> to vector<16x1024xbf16>
    %c16 = arith.constant 16 : index
    %c33_10 = arith.constant 33 : index
    %36 = vector.load %arg12[%c16, %c33_10] : memref<48x1090xbf16, #tpu.memory_space<vmem>>, vector<16x1024xbf16>
    tpu.vector_store %arg12[%c16, %c33_10], %35 {strides = array<i32>} : memref<48x1090xbf16, #tpu.memory_space<vmem>>, vector<16x1024xbf16>,
    %37 = vector.broadcast %27 : vector<1x1024xf32> to vector<16x1024xf32>
    %38 = arith.mulf %30, %37 : vector<16x1024xf32>
    %39 = arith.truncf %38 : vector<16x1024xf32> to vector<16x1024xbf16>
    %c32 = arith.constant 32 : index
    %c33_11 = arith.constant 33 : index
    %40 = vector.load %arg12[%c32, %c33_11] : memref<48x1090xbf16, #tpu.memory_space<vmem>>, vector<16x1024xbf16>
    tpu.vector_store %arg12[%c32, %c33_11], %39 {strides = array<i32>} : memref<48x1090xbf16, #tpu.memory_space<vmem>>, vector<16x1024xbf16>,
    %c0_12 = arith.constant 0 : index
    %c0_13 = arith.constant 0 : index
    %41 = vector.load %arg12[%c0_12, %c0_13] : memref<48x1090xbf16, #tpu.memory_space<vmem>>, vector<16x1024xbf16>
    %c0_14 = arith.constant 0 : index
    %c0_15 = arith.constant 0 : index
    %42 = vector.load %arg13[%c0_14, %c0_15] : memref<144x1024xbf16, #tpu.memory_space<vmem>>, vector<16x1024xbf16>
    tpu.vector_store %arg13[%c0_14, %c0_15], %41 {strides = array<i32>} : memref<144x1024xbf16, #tpu.memory_space<vmem>>, vector<16x1024xbf16>,
    %c16_16 = arith.constant 16 : index
    %c1 = arith.constant 1 : index
    %43 = vector.load %arg12[%c16_16, %c1] : memref<48x1090xbf16, #tpu.memory_space<vmem>>, vector<16x1024xbf16>
    %c16_17 = arith.constant 16 : index
    %c0_18 = arith.constant 0 : index
    %44 = vector.load %arg13[%c16_17, %c0_18] : memref<144x1024xbf16, #tpu.memory_space<vmem>>, vector<16x1024xbf16>
    tpu.vector_store %arg13[%c16_17, %c0_18], %43 {strides = array<i32>} : memref<144x1024xbf16, #tpu.memory_space<vmem>>, vector<16x1024xbf16>,
    %c32_19 = arith.constant 32 : index
    %c2 = arith.constant 2 : index
    %45 = vector.load %arg12[%c32_19, %c2] : memref<48x1090xbf16, #tpu.memory_space<vmem>>, vector<16x1024xbf16>
    %c32_20 = arith.constant 32 : index
    %c0_21 = arith.constant 0 : index
    %46 = vector.load %arg13[%c32_20, %c0_21] : memref<144x1024xbf16, #tpu.memory_space<vmem>>, vector<16x1024xbf16>
    tpu.vector_store %arg13[%c32_20, %c0_21], %45 {strides = array<i32>} : memref<144x1024xbf16, #tpu.memory_space<vmem>>, vector<16x1024xbf16>,
    %c0_22 = arith.constant 0 : index
    %c32_23 = arith.constant 32 : index
    %47 = vector.load %arg12[%c0_22, %c32_23] : memref<48x1090xbf16, #tpu.memory_space<vmem>>, vector<16x1024xbf16>
    %c48 = arith.constant 48 : index
    %c0_24 = arith.constant 0 : index
    %48 = vector.load %arg13[%c48, %c0_24] : memref<144x1024xbf16, #tpu.memory_space<vmem>>, vector<16x1024xbf16>
    tpu.vector_store %arg13[%c48, %c0_24], %47 {strides = array<i32>} : memref<144x1024xbf16, #tpu.memory_space<vmem>>, vector<16x1024xbf16>,
    %c16_25 = arith.constant 16 : index
    %c33_26 = arith.constant 33 : index
    %49 = vector.load %arg12[%c16_25, %c33_26] : memref<48x1090xbf16, #tpu.memory_space<vmem>>, vector<16x1024xbf16>
    %c64 = arith.constant 64 : index
    %c0_27 = arith.constant 0 : index
    %50 = vector.load %arg13[%c64, %c0_27] : memref<144x1024xbf16, #tpu.memory_space<vmem>>, vector<16x1024xbf16>
    tpu.vector_store %arg13[%c64, %c0_27], %49 {strides = array<i32>} : memref<144x1024xbf16, #tpu.memory_space<vmem>>, vector<16x1024xbf16>,
    %c32_28 = arith.constant 32 : index
    %c34 = arith.constant 34 : index
    %51 = vector.load %arg12[%c32_28, %c34] : memref<48x1090xbf16, #tpu.memory_space<vmem>>, vector<16x1024xbf16>
    %c80 = arith.constant 80 : index
    %c0_29 = arith.constant 0 : index
    %52 = vector.load %arg13[%c80, %c0_29] : memref<144x1024xbf16, #tpu.memory_space<vmem>>, vector<16x1024xbf16>
    tpu.vector_store %arg13[%c80, %c0_29], %51 {strides = array<i32>} : memref<144x1024xbf16, #tpu.memory_space<vmem>>, vector<16x1024xbf16>,
    %c0_30 = arith.constant 0 : index
    %c64_31 = arith.constant 64 : index
    %53 = vector.load %arg12[%c0_30, %c64_31] : memref<48x1090xbf16, #tpu.memory_space<vmem>>, vector<16x1024xbf16>
    %c96 = arith.constant 96 : index
    %c0_32 = arith.constant 0 : index
    %54 = vector.load %arg13[%c96, %c0_32] : memref<144x1024xbf16, #tpu.memory_space<vmem>>, vector<16x1024xbf16>
    tpu.vector_store %arg13[%c96, %c0_32], %53 {strides = array<i32>} : memref<144x1024xbf16, #tpu.memory_space<vmem>>, vector<16x1024xbf16>,
    %c16_33 = arith.constant 16 : index
    %c65 = arith.constant 65 : index
    %55 = vector.load %arg12[%c16_33, %c65] : memref<48x1090xbf16, #tpu.memory_space<vmem>>, vector<16x1024xbf16>
    %c112 = arith.constant 112 : index
    %c0_34 = arith.constant 0 : index
    %56 = vector.load %arg13[%c112, %c0_34] : memref<144x1024xbf16, #tpu.memory_space<vmem>>, vector<16x1024xbf16>
    tpu.vector_store %arg13[%c112, %c0_34], %55 {strides = array<i32>} : memref<144x1024xbf16, #tpu.memory_space<vmem>>, vector<16x1024xbf16>,
    %c32_35 = arith.constant 32 : index
    %c66 = arith.constant 66 : index
    %57 = vector.load %arg12[%c32_35, %c66] : memref<48x1090xbf16, #tpu.memory_space<vmem>>, vector<16x1024xbf16>
    %c128 = arith.constant 128 : index
    %c0_36 = arith.constant 0 : index
    %58 = vector.load %arg13[%c128, %c0_36] : memref<144x1024xbf16, #tpu.memory_space<vmem>>, vector<16x1024xbf16>
    tpu.vector_store %arg13[%c128, %c0_36], %57 {strides = array<i32>} : memref<144x1024xbf16, #tpu.memory_space<vmem>>, vector<16x1024xbf16>,
    %c0_37 = arith.constant 0 : index
    %c0_38 = arith.constant 0 : index
    %59 = vector.load %arg2[%c0_37, %c0_38] : memref<16x144xbf16, #tpu.memory_space<vmem>>, vector<16x144xbf16>
    %c0_39 = arith.constant 0 : index
    %c0_40 = arith.constant 0 : index
    %60 = vector.load %arg13[%c0_39, %c0_40] : memref<144x1024xbf16, #tpu.memory_space<vmem>>, vector<144x1024xbf16>
    %cst_41 = arith.constant dense<0.000000e+00> : vector<16x1024xf32>
    %61 = tpu.matmul %59, %60, %cst_41 {dimension_numbers = #tpu.dot_dimension_numbers<[1], [0], [0], [1], [0, 0, 1, 1], [], []>} : vector<16x144xbf16>, vector<144x1024xbf16>, vector<16x1024xf32> -> vector<16x1024xf32>
    %c0_42 = arith.constant 0 : index
    %c0_43 = arith.constant 0 : index
    %62 = vector.load %arg3[%c0_42, %c0_43] : memref<16x1xf32, #tpu.memory_space<vmem>>, vector<16x1xf32>
    %63 = vector.broadcast %62 : vector<16x1xf32> to vector<16x1024xf32>
    %64 = arith.mulf %61, %63 : vector<16x1024xf32>
    %c0_44 = arith.constant 0 : index
    %c0_45 = arith.constant 0 : index
    %65 = vector.load %arg4[%c0_44, %c0_45] : memref<16x1xf32, #tpu.memory_space<vmem>>, vector<16x1xf32>
    %66 = vector.broadcast %65 : vector<16x1xf32> to vector<16x1024xf32>
    %67 = arith.addf %64, %66 : vector<16x1024xf32>
    %cst_46 = arith.constant 0.000000e+00 : f32
    %68 = vector.broadcast %cst_46 : f32 to vector<16x1024xf32>
    %69 = arith.cmpf ogt, %67, %68 : vector<16x1024xf32>
    %cst_47 = arith.constant 2.000000e-02 : f32
    %70 = vector.broadcast %cst_47 : f32 to vector<16x1024xf32>
    %71 = arith.mulf %70, %67 : vector<16x1024xf32>
    %72 = arith.select %69, %67, %71 : vector<16x1024xi1>, vector<16x1024xf32>
    %73 = vector.broadcast %23 : vector<1x1024xf32> to vector<16x1024xf32>
    %74 = arith.mulf %72, %73 : vector<16x1024xf32>
    %75 = arith.truncf %74 : vector<16x1024xf32> to vector<16x1024xbf16>
    %c0_48 = arith.constant 0 : index
    %c33_49 = arith.constant 33 : index
    %76 = vector.load %arg12[%c0_48, %c33_49] : memref<48x1090xbf16, #tpu.memory_space<vmem>>, vector<16x1024xbf16>
    tpu.vector_store %arg12[%c0_48, %c33_49], %75 {strides = array<i32>} : memref<48x1090xbf16, #tpu.memory_space<vmem>>, vector<16x1024xbf16>,
    %77 = arith.truncf %72 : vector<16x1024xf32> to vector<16x1024xbf16>
    %c16_50 = arith.constant 16 : index
    %c33_51 = arith.constant 33 : index
    %78 = vector.load %arg12[%c16_50, %c33_51] : memref<48x1090xbf16, #tpu.memory_space<vmem>>, vector<16x1024xbf16>
    tpu.vector_store %arg12[%c16_50, %c33_51], %77 {strides = array<i32>} : memref<48x1090xbf16, #tpu.memory_space<vmem>>, vector<16x1024xbf16>,
    %79 = vector.broadcast %27 : vector<1x1024xf32> to vector<16x1024xf32>
    %80 = arith.mulf %72, %79 : vector<16x1024xf32>
    %81 = arith.truncf %80 : vector<16x1024xf32> to vector<16x1024xbf16>
    %c32_52 = arith.constant 32 : index
    %c33_53 = arith.constant 33 : index
    %82 = vector.load %arg12[%c32_52, %c33_53] : memref<48x1090xbf16, #tpu.memory_space<vmem>>, vector<16x1024xbf16>
    tpu.vector_store %arg12[%c32_52, %c33_53], %81 {strides = array<i32>} : memref<48x1090xbf16, #tpu.memory_space<vmem>>, vector<16x1024xbf16>,
    %c0_54 = arith.constant 0 : index
    %c0_55 = arith.constant 0 : index
    %83 = vector.load %arg12[%c0_54, %c0_55] : memref<48x1090xbf16, #tpu.memory_space<vmem>>, vector<16x1024xbf16>
    %c0_56 = arith.constant 0 : index
    %c0_57 = arith.constant 0 : index
    %84 = vector.load %arg13[%c0_56, %c0_57] : memref<144x1024xbf16, #tpu.memory_space<vmem>>, vector<16x1024xbf16>
    tpu.vector_store %arg13[%c0_56, %c0_57], %83 {strides = array<i32>} : memref<144x1024xbf16, #tpu.memory_space<vmem>>, vector<16x1024xbf16>,
    %c16_58 = arith.constant 16 : index
    %c1_59 = arith.constant 1 : index
    %85 = vector.load %arg12[%c16_58, %c1_59] : memref<48x1090xbf16, #tpu.memory_space<vmem>>, vector<16x1024xbf16>
    %c16_60 = arith.constant 16 : index
    %c0_61 = arith.constant 0 : index
    %86 = vector.load %arg13[%c16_60, %c0_61] : memref<144x1024xbf16, #tpu.memory_space<vmem>>, vector<16x1024xbf16>
    tpu.vector_store %arg13[%c16_60, %c0_61], %85 {strides = array<i32>} : memref<144x1024xbf16, #tpu.memory_space<vmem>>, vector<16x1024xbf16>,
    %c32_62 = arith.constant 32 : index
    %c2_63 = arith.constant 2 : index
    %87 = vector.load %arg12[%c32_62, %c2_63] : memref<48x1090xbf16, #tpu.memory_space<vmem>>, vector<16x1024xbf16>
    %c32_64 = arith.constant 32 : index
    %c0_65 = arith.constant 0 : index
    %88 = vector.load %arg13[%c32_64, %c0_65] : memref<144x1024xbf16, #tpu.memory_space<vmem>>, vector<16x1024xbf16>
    tpu.vector_store %arg13[%c32_64, %c0_65], %87 {strides = array<i32>} : memref<144x1024xbf16, #tpu.memory_space<vmem>>, vector<16x1024xbf16>,
    %c0_66 = arith.constant 0 : index
    %c32_67 = arith.constant 32 : index
    %89 = vector.load %arg12[%c0_66, %c32_67] : memref<48x1090xbf16, #tpu.memory_space<vmem>>, vector<16x1024xbf16>
    %c48_68 = arith.constant 48 : index
    %c0_69 = arith.constant 0 : index
    %90 = vector.load %arg13[%c48_68, %c0_69] : memref<144x1024xbf16, #tpu.memory_space<vmem>>, vector<16x1024xbf16>
    tpu.vector_store %arg13[%c48_68, %c0_69], %89 {strides = array<i32>} : memref<144x1024xbf16, #tpu.memory_space<vmem>>, vector<16x1024xbf16>,
    %c16_70 = arith.constant 16 : index
    %c33_71 = arith.constant 33 : index
    %91 = vector.load %arg12[%c16_70, %c33_71] : memref<48x1090xbf16, #tpu.memory_space<vmem>>, vector<16x1024xbf16>
    %c64_72 = arith.constant 64 : index
    %c0_73 = arith.constant 0 : index
    %92 = vector.load %arg13[%c64_72, %c0_73] : memref<144x1024xbf16, #tpu.memory_space<vmem>>, vector<16x1024xbf16>
    tpu.vector_store %arg13[%c64_72, %c0_73], %91 {strides = array<i32>} : memref<144x1024xbf16, #tpu.memory_space<vmem>>, vector<16x1024xbf16>,
    %c32_74 = arith.constant 32 : index
    %c34_75 = arith.constant 34 : index
    %93 = vector.load %arg12[%c32_74, %c34_75] : memref<48x1090xbf16, #tpu.memory_space<vmem>>, vector<16x1024xbf16>
    %c80_76 = arith.constant 80 : index
    %c0_77 = arith.constant 0 : index
    %94 = vector.load %arg13[%c80_76, %c0_77] : memref<144x1024xbf16, #tpu.memory_space<vmem>>, vector<16x1024xbf16>
    tpu.vector_store %arg13[%c80_76, %c0_77], %93 {strides = array<i32>} : memref<144x1024xbf16, #tpu.memory_space<vmem>>, vector<16x1024xbf16>,
    %c0_78 = arith.constant 0 : index
    %c64_79 = arith.constant 64 : index
    %95 = vector.load %arg12[%c0_78, %c64_79] : memref<48x1090xbf16, #tpu.memory_space<vmem>>, vector<16x1024xbf16>
    %c96_80 = arith.constant 96 : index
    %c0_81 = arith.constant 0 : index
    %96 = vector.load %arg13[%c96_80, %c0_81] : memref<144x1024xbf16, #tpu.memory_space<vmem>>, vector<16x1024xbf16>
    tpu.vector_store %arg13[%c96_80, %c0_81], %95 {strides = array<i32>} : memref<144x1024xbf16, #tpu.memory_space<vmem>>, vector<16x1024xbf16>,
    %c16_82 = arith.constant 16 : index
    %c65_83 = arith.constant 65 : index
    %97 = vector.load %arg12[%c16_82, %c65_83] : memref<48x1090xbf16, #tpu.memory_space<vmem>>, vector<16x1024xbf16>
    %c112_84 = arith.constant 112 : index
    %c0_85 = arith.constant 0 : index
    %98 = vector.load %arg13[%c112_84, %c0_85] : memref<144x1024xbf16, #tpu.memory_space<vmem>>, vector<16x1024xbf16>
    tpu.vector_store %arg13[%c112_84, %c0_85], %97 {strides = array<i32>} : memref<144x1024xbf16, #tpu.memory_space<vmem>>, vector<16x1024xbf16>,
    %c32_86 = arith.constant 32 : index
    %c66_87 = arith.constant 66 : index
    %99 = vector.load %arg12[%c32_86, %c66_87] : memref<48x1090xbf16, #tpu.memory_space<vmem>>, vector<16x1024xbf16>
    %c128_88 = arith.constant 128 : index
    %c0_89 = arith.constant 0 : index
    %100 = vector.load %arg13[%c128_88, %c0_89] : memref<144x1024xbf16, #tpu.memory_space<vmem>>, vector<16x1024xbf16>
    tpu.vector_store %arg13[%c128_88, %c0_89], %99 {strides = array<i32>} : memref<144x1024xbf16, #tpu.memory_space<vmem>>, vector<16x1024xbf16>,
    %c0_90 = arith.constant 0 : index
    %c0_91 = arith.constant 0 : index
    %101 = vector.load %arg5[%c0_90, %c0_91] : memref<8x144xbf16, #tpu.memory_space<vmem>>, vector<8x144xbf16>
    %c0_92 = arith.constant 0 : index
    %c0_93 = arith.constant 0 : index
    %102 = vector.load %arg13[%c0_92, %c0_93] : memref<144x1024xbf16, #tpu.memory_space<vmem>>, vector<144x1024xbf16>
    %cst_94 = arith.constant dense<0.000000e+00> : vector<8x1024xf32>
    %103 = tpu.matmul %101, %102, %cst_94 {dimension_numbers = #tpu.dot_dimension_numbers<[1], [0], [0], [1], [0, 0, 1, 1], [], []>} : vector<8x144xbf16>, vector<144x1024xbf16>, vector<8x1024xf32> -> vector<8x1024xf32>
    %c0_95 = arith.constant 0 : index
    %c0_96 = arith.constant 0 : index
    %104 = vector.load %arg6[%c0_95, %c0_96] : memref<8x1xf32, #tpu.memory_space<vmem>>, vector<8x1xf32>
    %105 = vector.broadcast %104 : vector<8x1xf32> to vector<8x1024xf32>
    %106 = arith.mulf %103, %105 : vector<8x1024xf32>
    %c0_97 = arith.constant 0 : index
    %c0_98 = arith.constant 0 : index
    %107 = vector.load %arg7[%c0_97, %c0_98] : memref<8x1xf32, #tpu.memory_space<vmem>>, vector<8x1xf32>
    %108 = vector.broadcast %107 : vector<8x1xf32> to vector<8x1024xf32>
    %109 = arith.addf %106, %108 : vector<8x1024xf32>
    %cst_99 = arith.constant 0.000000e+00 : f32
    %110 = vector.broadcast %cst_99 : f32 to vector<8x1024xf32>
    %111 = arith.cmpf ogt, %109, %110 : vector<8x1024xf32>
    %cst_100 = arith.constant 2.000000e-02 : f32
    %112 = vector.broadcast %cst_100 : f32 to vector<8x1024xf32>
    %113 = arith.mulf %112, %109 : vector<8x1024xf32>
    %114 = arith.select %111, %109, %113 : vector<8x1024xi1>, vector<8x1024xf32>
    %115 = vector.broadcast %23 : vector<1x1024xf32> to vector<8x1024xf32>
    %116 = arith.mulf %114, %115 : vector<8x1024xf32>
    %117 = arith.truncf %116 : vector<8x1024xf32> to vector<8x1024xbf16>
    %c0_101 = arith.constant 0 : index
    %c33_102 = arith.constant 33 : index
    %118 = vector.load %arg12[%c0_101, %c33_102] : memref<48x1090xbf16, #tpu.memory_space<vmem>>, vector<8x1024xbf16>
    tpu.vector_store %arg12[%c0_101, %c33_102], %117 {strides = array<i32>} : memref<48x1090xbf16, #tpu.memory_space<vmem>>, vector<8x1024xbf16>,
    %119 = arith.truncf %114 : vector<8x1024xf32> to vector<8x1024xbf16>
    %c16_103 = arith.constant 16 : index
    %c33_104 = arith.constant 33 : index
    %120 = vector.load %arg12[%c16_103, %c33_104] : memref<48x1090xbf16, #tpu.memory_space<vmem>>, vector<8x1024xbf16>
    tpu.vector_store %arg12[%c16_103, %c33_104], %119 {strides = array<i32>} : memref<48x1090xbf16, #tpu.memory_space<vmem>>, vector<8x1024xbf16>,
    %121 = vector.broadcast %27 : vector<1x1024xf32> to vector<8x1024xf32>
    %122 = arith.mulf %114, %121 : vector<8x1024xf32>
    %123 = arith.truncf %122 : vector<8x1024xf32> to vector<8x1024xbf16>
    %c32_105 = arith.constant 32 : index
    %c33_106 = arith.constant 33 : index
    %124 = vector.load %arg12[%c32_105, %c33_106] : memref<48x1090xbf16, #tpu.memory_space<vmem>>, vector<8x1024xbf16>
    tpu.vector_store %arg12[%c32_105, %c33_106], %123 {strides = array<i32>} : memref<48x1090xbf16, #tpu.memory_space<vmem>>, vector<8x1024xbf16>,
    %c0_107 = arith.constant 0 : index
    %c0_108 = arith.constant 0 : index
    %125 = vector.load %arg12[%c0_107, %c0_108] : memref<48x1090xbf16, #tpu.memory_space<vmem>>, vector<8x1024xbf16>
    %c0_109 = arith.constant 0 : index
    %c0_110 = arith.constant 0 : index
    %126 = vector.load %arg13[%c0_109, %c0_110] : memref<144x1024xbf16, #tpu.memory_space<vmem>>, vector<8x1024xbf16>
    tpu.vector_store %arg13[%c0_109, %c0_110], %125 {strides = array<i32>} : memref<144x1024xbf16, #tpu.memory_space<vmem>>, vector<8x1024xbf16>,
    %c16_111 = arith.constant 16 : index
    %c1_112 = arith.constant 1 : index
    %127 = vector.load %arg12[%c16_111, %c1_112] : memref<48x1090xbf16, #tpu.memory_space<vmem>>, vector<8x1024xbf16>
    %c8 = arith.constant 8 : index
    %c0_113 = arith.constant 0 : index
    %128 = vector.load %arg13[%c8, %c0_113] : memref<144x1024xbf16, #tpu.memory_space<vmem>>, vector<8x1024xbf16>
    tpu.vector_store %arg13[%c8, %c0_113], %127 {strides = array<i32>} : memref<144x1024xbf16, #tpu.memory_space<vmem>>, vector<8x1024xbf16>,
    %c32_114 = arith.constant 32 : index
    %c2_115 = arith.constant 2 : index
    %129 = vector.load %arg12[%c32_114, %c2_115] : memref<48x1090xbf16, #tpu.memory_space<vmem>>, vector<8x1024xbf16>
    %c16_116 = arith.constant 16 : index
    %c0_117 = arith.constant 0 : index
    %130 = vector.load %arg13[%c16_116, %c0_117] : memref<144x1024xbf16, #tpu.memory_space<vmem>>, vector<8x1024xbf16>
    tpu.vector_store %arg13[%c16_116, %c0_117], %129 {strides = array<i32>} : memref<144x1024xbf16, #tpu.memory_space<vmem>>, vector<8x1024xbf16>,
    %c0_118 = arith.constant 0 : index
    %c32_119 = arith.constant 32 : index
    %131 = vector.load %arg12[%c0_118, %c32_119] : memref<48x1090xbf16, #tpu.memory_space<vmem>>, vector<8x1024xbf16>
    %c24 = arith.constant 24 : index
    %c0_120 = arith.constant 0 : index
    %132 = vector.load %arg13[%c24, %c0_120] : memref<144x1024xbf16, #tpu.memory_space<vmem>>, vector<8x1024xbf16>
    tpu.vector_store %arg13[%c24, %c0_120], %131 {strides = array<i32>} : memref<144x1024xbf16, #tpu.memory_space<vmem>>, vector<8x1024xbf16>,
    %c16_121 = arith.constant 16 : index
    %c33_122 = arith.constant 33 : index
    %133 = vector.load %arg12[%c16_121, %c33_122] : memref<48x1090xbf16, #tpu.memory_space<vmem>>, vector<8x1024xbf16>
    %c32_123 = arith.constant 32 : index
    %c0_124 = arith.constant 0 : index
    %134 = vector.load %arg13[%c32_123, %c0_124] : memref<144x1024xbf16, #tpu.memory_space<vmem>>, vector<8x1024xbf16>
    tpu.vector_store %arg13[%c32_123, %c0_124], %133 {strides = array<i32>} : memref<144x1024xbf16, #tpu.memory_space<vmem>>, vector<8x1024xbf16>,
    %c32_125 = arith.constant 32 : index
    %c34_126 = arith.constant 34 : index
    %135 = vector.load %arg12[%c32_125, %c34_126] : memref<48x1090xbf16, #tpu.memory_space<vmem>>, vector<8x1024xbf16>
    %c40 = arith.constant 40 : index
    %c0_127 = arith.constant 0 : index
    %136 = vector.load %arg13[%c40, %c0_127] : memref<144x1024xbf16, #tpu.memory_space<vmem>>, vector<8x1024xbf16>
    tpu.vector_store %arg13[%c40, %c0_127], %135 {strides = array<i32>} : memref<144x1024xbf16, #tpu.memory_space<vmem>>, vector<8x1024xbf16>,
    %c0_128 = arith.constant 0 : index
    %c64_129 = arith.constant 64 : index
    %137 = vector.load %arg12[%c0_128, %c64_129] : memref<48x1090xbf16, #tpu.memory_space<vmem>>, vector<8x1024xbf16>
    %c48_130 = arith.constant 48 : index
    %c0_131 = arith.constant 0 : index
    %138 = vector.load %arg13[%c48_130, %c0_131] : memref<144x1024xbf16, #tpu.memory_space<vmem>>, vector<8x1024xbf16>
    tpu.vector_store %arg13[%c48_130, %c0_131], %137 {strides = array<i32>} : memref<144x1024xbf16, #tpu.memory_space<vmem>>, vector<8x1024xbf16>,
    %c16_132 = arith.constant 16 : index
    %c65_133 = arith.constant 65 : index
    %139 = vector.load %arg12[%c16_132, %c65_133] : memref<48x1090xbf16, #tpu.memory_space<vmem>>, vector<8x1024xbf16>
    %c56 = arith.constant 56 : index
    %c0_134 = arith.constant 0 : index
    %140 = vector.load %arg13[%c56, %c0_134] : memref<144x1024xbf16, #tpu.memory_space<vmem>>, vector<8x1024xbf16>
    tpu.vector_store %arg13[%c56, %c0_134], %139 {strides = array<i32>} : memref<144x1024xbf16, #tpu.memory_space<vmem>>, vector<8x1024xbf16>,
    %c32_135 = arith.constant 32 : index
    %c66_136 = arith.constant 66 : index
    %141 = vector.load %arg12[%c32_135, %c66_136] : memref<48x1090xbf16, #tpu.memory_space<vmem>>, vector<8x1024xbf16>
    %c64_137 = arith.constant 64 : index
    %c0_138 = arith.constant 0 : index
    %142 = vector.load %arg13[%c64_137, %c0_138] : memref<144x1024xbf16, #tpu.memory_space<vmem>>, vector<8x1024xbf16>
    tpu.vector_store %arg13[%c64_137, %c0_138], %141 {strides = array<i32>} : memref<144x1024xbf16, #tpu.memory_space<vmem>>, vector<8x1024xbf16>,
    %c0_139 = arith.constant 0 : index
    %c0_140 = arith.constant 0 : index
    %143 = vector.load %arg8[%c0_139, %c0_140] : memref<1x72xbf16, #tpu.memory_space<vmem>>, vector<1x72xbf16>
    %c0_141 = arith.constant 0 : index
    %c0_142 = arith.constant 0 : index
    %144 = vector.load %arg13[%c0_141, %c0_142] : memref<144x1024xbf16, #tpu.memory_space<vmem>>, vector<72x1024xbf16>
    %cst_143 = arith.constant dense<0.000000e+00> : vector<1x1024xf32>
    %145 = tpu.matmul %143, %144, %cst_143 {dimension_numbers = #tpu.dot_dimension_numbers<[1], [0], [0], [1], [0, 0, 1, 1], [], []>} : vector<1x72xbf16>, vector<72x1024xbf16>, vector<1x1024xf32> -> vector<1x1024xf32>
    %c0_144 = arith.constant 0 : index
    %c0_145 = arith.constant 0 : index
    %146 = vector.load %arg9[%c0_144, %c0_145] : memref<1x1xf32, #tpu.memory_space<vmem>>, vector<1x1xf32>
    %147 = vector.broadcast %146 : vector<1x1xf32> to vector<1x1024xf32>
    %148 = arith.mulf %145, %147 : vector<1x1024xf32>
    %c0_146 = arith.constant 0 : index
    %c0_147 = arith.constant 0 : index
    %149 = vector.load %arg10[%c0_146, %c0_147] : memref<1x1xf32, #tpu.memory_space<vmem>>, vector<1x1xf32>
    %150 = vector.broadcast %149 : vector<1x1xf32> to vector<1x1024xf32>
    %151 = arith.addf %148, %150 : vector<1x1024xf32>
    %152 = math.tanh %151 : vector<1x1024xf32>
    %c0_148 = arith.constant 0 : index
    %c0_149 = arith.constant 0 : index
    %c0_150 = arith.constant 0 : index
    %153 = vector.load %arg11[%c0_148, %c0_149, %c0_150] : memref<1x1x1024xf32, #tpu.memory_space<vmem>>, vector<1x1x1024xf32>
    %154 = vector.shape_cast %153 : vector<1x1x1024xf32> to vector<1x1024xf32>
    %155 = vector.shape_cast %152 : vector<1x1024xf32> to vector<1x1x1024xf32>
    tpu.vector_store %arg11[%c0_148, %c0_149, %c0_150], %155 {strides = array<i32>} : memref<1x1x1024xf32, #tpu.memory_space<vmem>>, vector<1x1x1024xf32>,
    return
  }
  func.func @transform_0(%arg0: i32) -> (i32, i32, i32) {
    %c0_i32 = arith.constant 0 : i32
    %c0_i32_0 = arith.constant 0 : i32
    %c0_i32_1 = arith.constant 0 : i32
    return %arg0, %c0_i32, %c0_i32_0 : i32, i32, i32
  }
  func.func @transform_1(%arg0: i32) -> (i32, i32) {
    %c0_i32 = arith.constant 0 : i32
    %c0_i32_0 = arith.constant 0 : i32
    %c0_i32_1 = arith.constant 0 : i32
    return %c0_i32, %c0_i32_0 : i32, i32
  }
  func.func @transform_2(%arg0: i32) -> (i32, i32) {
    %c0_i32 = arith.constant 0 : i32
    %c0_i32_0 = arith.constant 0 : i32
    %c0_i32_1 = arith.constant 0 : i32
    return %c0_i32, %c0_i32_0 : i32, i32
  }
  func.func @transform_3(%arg0: i32) -> (i32, i32) {
    %c0_i32 = arith.constant 0 : i32
    %c0_i32_0 = arith.constant 0 : i32
    %c0_i32_1 = arith.constant 0 : i32
    return %c0_i32, %c0_i32_0 : i32, i32
  }
  func.func @transform_4(%arg0: i32) -> (i32, i32) {
    %c0_i32 = arith.constant 0 : i32
    %c0_i32_0 = arith.constant 0 : i32
    %c0_i32_1 = arith.constant 0 : i32
    return %c0_i32, %c0_i32_0 : i32, i32
  }
  func.func @transform_5(%arg0: i32) -> (i32, i32) {
    %c0_i32 = arith.constant 0 : i32
    %c0_i32_0 = arith.constant 0 : i32
    %c0_i32_1 = arith.constant 0 : i32
    return %c0_i32, %c0_i32_0 : i32, i32
  }
  func.func @transform_6(%arg0: i32) -> (i32, i32) {
    %c0_i32 = arith.constant 0 : i32
    %c0_i32_0 = arith.constant 0 : i32
    %c0_i32_1 = arith.constant 0 : i32
    return %c0_i32, %c0_i32_0 : i32, i32
  }
  func.func @transform_7(%arg0: i32) -> (i32, i32) {
    %c0_i32 = arith.constant 0 : i32
    %c0_i32_0 = arith.constant 0 : i32
    %c0_i32_1 = arith.constant 0 : i32
    return %c0_i32, %c0_i32_0 : i32, i32
  }
  func.func @transform_8(%arg0: i32) -> (i32, i32) {
    %c0_i32 = arith.constant 0 : i32
    %c0_i32_0 = arith.constant 0 : i32
    %c0_i32_1 = arith.constant 0 : i32
    return %c0_i32, %c0_i32_0 : i32, i32
  }
  func.func @transform_9(%arg0: i32) -> (i32, i32) {
    %c0_i32 = arith.constant 0 : i32
    %c0_i32_0 = arith.constant 0 : i32
    %c0_i32_1 = arith.constant 0 : i32
    return %c0_i32, %c0_i32_0 : i32, i32
  }
  func.func @transform_10(%arg0: i32) -> (i32, i32, i32) {
    %c0_i32 = arith.constant 0 : i32
    %c0_i32_0 = arith.constant 0 : i32
    %c0_i32_1 = arith.constant 0 : i32
    return %arg0, %c0_i32, %c0_i32_0 : i32, i32, i32
  }
}

</mosaic_0001>

<bundles_post_ra>
// kernel: generator_x2_interpolate_forward.3
= control target key start
LH: loop header
LB: loop body
LE: loop exit
PB: predicated region body
PF: predicated region fallthrough
CT: control target
= control target key end

     0   :  { %s722_s15 = smov 0   ;;  %s805_s0 = inlined_call_operand.vmem [shape: f32[2,16,64], index: 0, kind: input, shape index: {}]   ;;  %s806_s1 = inlined_call_operand.vmem [shape: bf16[16,144], index: 1, kind: input, shape index: {}]   ;;  %s807_s2 = inlined_call_operand.vmem [shape: f32[16,1], index: 2, kind: input, shape index: {}]   ;;  %s808_s3 = inlined_call_operand.vmem [shape: f32[16,1], index: 3, kind: input, shape index: {}]   ;;  %s809_s4 = inlined_call_operand.vmem [shape: bf16[2,16,64], index: 4, kind: output, shape index: {}]  }
   0x1 LB: > { %s585_s16 = sadd.s32 4294967295, %s684_s15   ;;  %p589_p0 = scmp.ge.s32.totalorder %s684_s15, 1  ;;  %s684_s15 = sphi %s722_s15, %s14_s15  }
   0x2   : > { %p162_p1 = scmp.lt.s32.totalorder %s684_s15, 3 }
   0x4   : > { %p163_p2 = pnand %p589_p0, %p162_p1 }
   0x5   : > { %p188_p3 = scmp.lt.s32.totalorder (!%p163_p2), %s585_s16, 1  ;;  %s688_s21 = smov (!%p163_p2), 9  }
   0x6   : > { %166 = sbr.rel (%p163_p2) target bundleno = 457 (0x1c9), region = 36  ;;  %s689_s22 = smov (!%p163_p2), 111  }
   0x7   : > { %s690_s23 = smov (!%p163_p2), 112   ;;  %s691_s24 = smov (!%p163_p2), 119  }
   0x8   : > { %s692_s25 = smov (!%p163_p2), 118   ;;  %s693_s26 = smov (!%p163_p2), 120  }
   0x9   : > { %s694_s27 = smov (!%p163_p2), 126   ;;  %s695_s28 = smov (!%p163_p2), 127  }
   0xa   : > { %s696_s29 = smov (!%p163_p2), 110  }
   0xb   : > { %v213_v0 = vlaneseq  ;;  %vm199_vm0 = vcmask 68608   ;;  %v686_v1 = vmov 0   ;;  %vm206_vm1 = vcmask 667208   ;;  %s811_s16 = smov (!%p188_p3, %s585_s16), 1  ;;  %v492_v57 = vld [vmem:[%s807_s2] sm:$0xff]  ;;  %v493_v59 = vld [vmem:[%s807_s2 + $0x8] sm:$0xff] }
   0xc   : > { %202 = vst.msk [vmem:[#allocation2 + $0x8] sm:$0xf] %vm199_vm0, %v686_v1  ;;  %675 = vset.pattern.permute.xlu1 %v686_v1  ;;  %677 = vset.pattern.permute.xlu0 %v686_v1  ;;  %s643_s17 = sshll.u32 %s811_s16, 4  ;;  %v687_v6 = vmov 0.0   ;;  %vm247_vm4 = vcmask 592968   ;;  %vm278_vm5 = vcmask 519168  }
   0xd   : > { %v214_v2 = vand.u32 127, %v213_v0  ;;  %209 = vst.msk [vmem:[#allocation2 + $0x8] sm:$0xf] %vm206_vm1, %v686_v1  ;;  %676 = vset.pattern.permute.xlu2 %v686_v1  ;;  %s192_s20 = scalar_lea.vmem %s805_s0, %s643_s17  ;;  %v506_v58 = vld [vmem:[%s808_s3] sm:$0xff]  ;;  %v507_v62 = vld [vmem:[%s808_s3 + $0x8] sm:$0xff]  ;;  %vm460_vm6 = vcmask 130048  }
   0xe   : > { %200 = vst.msk [vmem:[#allocation2] sm:$0xf] %vm199_vm0, %v686_v1  ;;  %v233_v4 = vld [vmem:[%s192_s20] sm:$0xff]  ;;  %v234_v11 = vld [vmem:[%s192_s20 + $0x8] sm:$0xff] }
   0xf   : > { %v219_v3 = vand.u32 7, %v214_v2  ;;  %201 = vst.msk [vmem:[#allocation2 + $0x4] sm:$0xf] %vm199_vm0, %v686_v1  ;;  %v250_v5 = vpack.c.bf16 %v233_v4, %v233_v4  ;;  %v251_v16 = vpack.c.bf16 %v234_v11, %v234_v11 }
  0x10   : > { %203 = vst.msk [vmem:[#allocation2 + $0xc] sm:$0xf] %vm199_vm0, %v686_v1 }
  0x11   : > { %vm227_vm2 = vcmp.ne.s32.totalorder %v219_v3, 7  ;;  %vm230_vm3 = vcmp.ne.s32.totalorder %v219_v3, 0  ;;  %204 = vst.msk [vmem:[#allocation2 + $0x10] sm:$0xf] %vm199_vm0, %v686_v1  ;;  %254 = vrot.lane.b32.xlu0 %v250_v5, %s688_s21  ;;  %v645_v5 = vld [vmem:[%s806_s1 + $0x4] sm:$0xf] }
  0x12   : > { %v594_v7 = vsel %vm227_vm2, 1.0, %v687_v6  ;;  %v595_v8 = vsel %vm230_vm3, 1.0, %v687_v6  ;;  %205 = vst.msk [vmem:[#allocation2 + $0x14] sm:$0xf] %vm199_vm0, %v686_v1  ;;  %v600_v6 = vld [vmem:[%s806_s1 + $0x8] sm:$0xf0] }
  0x13   : > { %v235_v9 = vmul.f32 %v594_v7, %v233_v4  ;;  %v262_v10 = vmul.f32 %v595_v8, %v233_v4  ;;  %211 = vst.msk [vmem:[#allocation2 + $0x10] sm:$0xf] %vm206_vm1, %v686_v1  ;;  %v236_v14 = vmul.f32 %v594_v7, %v234_v11  ;;  %v263_v15 = vmul.f32 %v595_v8, %v234_v11  ;;  %v646_v11 = vld [vmem:[%s806_s1 + $0x4] sm:$0xf0] }
  0x14   : > { %207 = vst.msk [vmem:[#allocation2] sm:$0xf] %vm206_vm1, %v686_v1 }
  0x15   : > { %v237_v12 = vpack.c.bf16 %v235_v9, %v235_v9  ;;  %v264_v13 = vpack.c.bf16 %v262_v10, %v262_v10  ;;  %208 = vst.msk [vmem:[#allocation2 + $0x4] sm:$0xf] %vm206_vm1, %v686_v1  ;;  %v238_v17 = vpack.c.bf16 %v236_v14, %v236_v14  ;;  %v265_v18 = vpack.c.bf16 %v263_v15, %v263_v15  ;;  %v598_v10 = vld [vmem:[%s806_s1] sm:$0xf] }
  0x16   : > { %210 = vst.msk [vmem:[#allocation2 + $0xc] sm:$0xf] %vm206_vm1, %v686_v1  ;;  %v603_v9 = vor.u32 %v645_v5, %v600_v6 }
  0x17   : > { %241 = vrot.lane.b32.xlu1 %v237_v12, %s688_s21  ;;  %268 = vrot.lane.b32.xlu2 %v264_v13, %s688_s21  ;;  %212 = vst.msk [vmem:[#allocation2 + $0x14] sm:$0xf] %vm206_vm1, %v686_v1  ;;  %v599_v13 = vor.u32 %v646_v11, %v598_v10 }
  0x19   : > { %256 = vrot.lane.b32.xlu0 %v251_v16, %s688_s21 }
  0x1f   : > { %243 = vrot.lane.b32.xlu1 %v238_v17, %s688_s21  ;;  %270 = vrot.lane.b32.xlu2 %v265_v18, %s688_s21 }
  0x71   : > { %v269_v19 = vpop.permute.xlu2 %268 }
  0x72   : > { %274 = vst.msk [vmem:[#allocation2 + $0x10] sm:$0xf] %vm247_vm4, %v269_v19 }
  0x79   : > { %v271_v20 = vpop.permute.xlu2 %270  ;;  %v329_v35 = vld [vmem:[#allocation2 + $0x10] sm:$0xf] }
  0x7a   : > { %275 = vst.msk [vmem:[#allocation2 + $0x14] sm:$0xf] %vm247_vm4, %v271_v20  ;;  %v293_v38 = vld [vmem:[#allocation2 + $0x10] sm:$0xf] }
  0x7b   : > { %v365_v40 = vld [vmem:[#allocation2 + $0x10] sm:$0xf] }
  0x81   : > { %v330_v30 = vld [vmem:[#allocation2 + $0x14] sm:$0xf] }
  0x82   : > { %v294_v37 = vld [vmem:[#allocation2 + $0x14] sm:$0xf] }
  0x83   : > { %v255_v21 = vpop.permute.xlu0 %254  ;;  %v366_v41 = vld [vmem:[#allocation2 + $0x14] sm:$0xf] }
  0x84   : > { %260 = vst.msk [vmem:[#allocation2 + $0x8] sm:$0xf] %vm247_vm4, %v255_v21 }
  0x89   : > { %v242_v22 = vpop.permute.xlu1 %241 }
  0x8a   : > { %248 = vst.msk [vmem:[#allocation2] sm:$0xf] %vm247_vm4, %v242_v22 }
  0x8b   : > { %v257_v23 = vpop.permute.xlu0 %256  ;;  %v353_v24 = vld [vmem:[#allocation2 + $0x8] sm:$0xf] }
  0x8c   : > { %261 = vst.msk [vmem:[#allocation2 + $0xc] sm:$0xf] %vm247_vm4, %v257_v23  ;;  %357 = vrot.lane.b32.xlu0 %v353_v24, %s689_s22  ;;  %v317_v28 = vld [vmem:[#allocation2 + $0x8] sm:$0xf] }
  0x8d   : > { %v281_v39 = vld [vmem:[#allocation2 + $0x8] sm:$0xf] }
  0x91   : > { %v276_v25 = vld [vmem:[#allocation2] sm:$0xf]  ;;  %v244_v27 = vpop.permute.xlu1 %243 }
  0x92   : > { %v341_v26 = vld [vmem:[#allocation2] sm:$0xf]  ;;  %249 = vst.msk [vmem:[#allocation2 + $0x4] sm:$0xf] %vm247_vm4, %v244_v27 }
  0x93   : > { %345 = vrot.lane.b32.xlu2 %v341_v26, %s690_s23  ;;  %279 = vst.msk [vmem:[#allocation3] sm:$0xf] %vm278_vm5, %v276_v25  ;;  %v354_v29 = vld [vmem:[#allocation2 + $0xc] sm:$0xf]  ;;  %v305_v34 = vld [vmem:[#allocation2] sm:$0xf] }
  0x94   : > { %321 = vrot.lane.b32.xlu0 %v317_v28, %s691_s24  ;;  %359 = vrot.lane.b32.xlu1 %v354_v29, %s689_s22  ;;  %v318_v33 = vld [vmem:[#allocation2 + $0xc] sm:$0xf]  ;;  %s644_s22 = sshll.u32 %s811_s16, 3 }
  0x95   : > { %v282_v42 = vld [vmem:[#allocation2 + $0xc] sm:$0xf] }
  0x99   : > { %v277_v31 = vld [vmem:[#allocation2 + $0x4] sm:$0xf] }
  0x9a   : > { %280 = vst.msk [vmem:[#allocation3 + $0x4] sm:$0xf] %vm278_vm5, %v277_v31  ;;  %v342_v32 = vld [vmem:[#allocation2 + $0x4] sm:$0xf] }
  0x9b   : > { %335 = vrot.lane.b32.xlu2 %v330_v30, %s692_s25  ;;  %v306_v36 = vld [vmem:[#allocation2 + $0x4] sm:$0xf] }
  0x9c   : > { %323 = vrot.lane.b32.xlu1 %v318_v33, %s691_s24  ;;  %347 = vrot.lane.b32.xlu0 %v342_v32, %s690_s23 }
  0xa1   : > { %v647_v12 = vld [vmem:[#allocation3] sm:$0xff] }
  0xa3   : > { %309 = vrot.lane.b32.xlu2 %v305_v34, %s693_s26 }
  0xa4   : > { %333 = vrot.lane.b32.xlu1 %v329_v35, %s692_s25  ;;  %311 = vrot.lane.b32.xlu0 %v306_v36, %s693_s26  ;;  %s197_s25 = scalar_lea.vmem %s809_s4, %s644_s22 }
  0xab   : > { %299 = vrot.lane.b32.xlu2 %v294_v37, %s694_s27 }
  0xac   : > { %297 = vrot.lane.b32.xlu1 %v293_v38, %s694_s27  ;;  %285 = vrot.lane.b32.xlu0 %v281_v39, %s695_s28 }
  0xb3   : > { %369 = vrot.lane.b32.xlu2 %v365_v40, %s696_s29 }
  0xb4   : > { %287 = vrot.lane.b32.xlu1 %v282_v42, %s695_s28  ;;  %371 = vrot.lane.b32.xlu0 %v366_v41, %s696_s29 }
  0xbb   : > { %501 = vperm.xlu2 %676, %v493_v59  }
  0xbc   : > { %496 = vperm.xlu1 %675, %v492_v57   ;;  %510 = vperm.xlu0 %677, %v506_v58  }
  0xc4   : > { %515 = vperm.xlu1 %675, %v507_v62  }
  0xed   : > { %v346_v43 = vpop.permute.xlu2 %345 }
  0xee   : > { %351 = vst.msk [vmem:[#allocation3 + $0x30] sm:$0xf] %vm278_vm5, %v346_v43 }
  0xf5   : > { %v336_v44 = vpop.permute.xlu2 %335 }
  0xf6   : > { %340 = vst.msk [vmem:[#allocation3 + $0x2c] sm:$0xf] %vm278_vm5, %v336_v44 }
  0xfd   : > { %v310_v45 = vpop.permute.xlu2 %309 }
  0xfe   : > { %315 = vst.msk [vmem:[#allocation3 + $0x18] sm:$0xf] %vm278_vm5, %v310_v45  ;;  %v358_v46 = vpop.permute.xlu0 %357 }
  0xff   : > { %363 = vst.msk [vmem:[#allocation3 + $0x38] sm:$0xf] %vm278_vm5, %v358_v46 }
 0x105   : > { %v300_v47 = vpop.permute.xlu2 %299 }
 0x106   : > { %304 = vst.msk [vmem:[#allocation3 + $0x14] sm:$0xf] %vm278_vm5, %v300_v47  ;;  %v322_v48 = vpop.permute.xlu0 %321  ;;  %v360_v49 = vpop.permute.xlu1 %359 }
 0x107   : > { %327 = vst.msk [vmem:[#allocation3 + $0x20] sm:$0xf] %vm278_vm5, %v322_v48 }
 0x108   : > { %364 = vst.msk [vmem:[#allocation3 + $0x3c] sm:$0xf] %vm278_vm5, %v360_v49 }
 0x10d   : > { %v370_v50 = vpop.permute.xlu2 %369 }
 0x10e   : > { %375 = vst.msk [vmem:[#allocation3 + $0x40] sm:$0xf] %vm278_vm5, %v370_v50  ;;  %v348_v51 = vpop.permute.xlu0 %347  ;;  %v324_v52 = vpop.permute.xlu1 %323 }
 0x10f   : > { %352 = vst.msk [vmem:[#allocation3 + $0x34] sm:$0xf] %vm278_vm5, %v348_v51  ;;  %v654_v53 = vld [vmem:[#allocation3 + $0x38] sm:$0xff] }
 0x110   : > { %328 = vst.msk [vmem:[#allocation3 + $0x24] sm:$0xf] %vm278_vm5, %v324_v52  ;;  %464 = vmatpush.bf16.msra.mxu0 %v654_v53 }
 0x115   : > { %v502_v22 = vpop.permute.xlu2 %501 }
 0x116   : > { %v312_v54 = vpop.permute.xlu0 %311  ;;  %v334_v55 = vpop.permute.xlu1 %333  ;;  %v653_v56 = vld [vmem:[#allocation3 + $0x30] sm:$0xff] }
 0x117   : > { %316 = vst.msk [vmem:[#allocation3 + $0x1c] sm:$0xf] %vm278_vm5, %v312_v54  ;;  %465 = vmatpush.bf16.msra.mxu0 %v653_v56  ;;  %v651_v0 = vld [vmem:[#allocation3 + $0x20] sm:$0xff] }
 0x118   : > { %339 = vst.msk [vmem:[#allocation3 + $0x28] sm:$0xf] %vm278_vm5, %v334_v55 }
 0x11e   : > { %v286_v60 = vpop.permute.xlu0 %285  ;;  %v298_v61 = vpop.permute.xlu1 %297  ;;  %v650_v3 = vld [vmem:[#allocation3 + $0x18] sm:$0xff] }
 0x11f   : > { %291 = vst.msk [vmem:[#allocation3 + $0x8] sm:$0xf] %vm278_vm5, %v286_v60  ;;  %v652_v63 = vld [vmem:[#allocation3 + $0x28] sm:$0xff] }
 0x120   : > { %303 = vst.msk [vmem:[#allocation3 + $0x10] sm:$0xf] %vm278_vm5, %v298_v61  ;;  %466 = vmatpush.bf16.msra.mxu0 %v652_v63 }
 0x124   : > { %467 = vmatpush.bf16.msra.mxu0 %v651_v0 }
 0x126   : > { %v372_v1 = vpop.permute.xlu0 %371  ;;  %v288_v2 = vpop.permute.xlu1 %287 }
 0x127   : > { %376 = vst.msk [vmem:[#allocation3 + $0x44] sm:$0xf] %vm278_vm5, %v372_v1  ;;  %v649_v4 = vld [vmem:[#allocation3 + $0x10] sm:$0xff] }
 0x128   : > { %292 = vst.msk [vmem:[#allocation3 + $0xc] sm:$0xf] %vm278_vm5, %v288_v2  ;;  %468 = vmatpush.bf16.msra.mxu0 %v650_v3 }
 0x12c   : > { %469 = vmatpush.bf16.msra.mxu0 %v649_v4 }
 0x12e   : > { %v655_v7 = vld [vmem:[#allocation3 + $0x40] sm:$0xff]  ;;  %v497_v17 = vpop.permute.xlu1 %496  ;;  %v511_v18 = vpop.permute.xlu0 %510 }
 0x12f   : > { %v648_v8 = vld [vmem:[#allocation3 + $0x8] sm:$0xff]  ;;  %485 = vmatpush.bf16.msra.mxu1 %v655_v7 }
 0x130   : > { %470 = vmatpush.bf16.msra.mxu0 %v648_v8 }
 0x132   : > { %640 = vmatmul.msk.bf16.vlgmr.msra.gmra.mxu1 %vm460_vm6, %v603_v9 }
 0x134   : > { %471 = vmatpush.bf16.msra.mxu0 %v647_v12 }
 0x136   : > { %v516_v29 = vpop.permute.xlu1 %515 }
 0x137   : > { %472 = vmatmul.bf16.vlgmr.msra.gmra.mxu0 %v599_v13 }
 0x1af   : > { %v487_v14 = vpop.f32.mrf.mxu1 }
 0x1b4   : > { %v473_v15 = vpop.f32.mrf.mxu0 }
 0x1b5   : > { %v488_v16 = vadd.f32 %v487_v14, %v473_v15 }
 0x1b7   : > { %v504_v19 = vmul.f32 %v497_v17, %v488_v16  ;;  %v489_v23 = vpop.f32.mrf.mxu1 }
 0x1b9   : > { %v518_v20 = vadd.f32 %v511_v18, %v504_v19 }
 0x1bb   : > { %vm520_vm7 = vcmp.gt.f32.partialorder %v518_v20, 0.0  ;;  %v522_v21 = vmul.f32 0.02, %v518_v20 }
 0x1bc   : > { %v475_v24 = vpop.f32.mrf.mxu0 }
 0x1bd   : > { %v524_v25 = vsel %vm520_vm7, %v518_v20, %v522_v21  ;;  %v490_v26 = vadd.f32 %v489_v23, %v475_v24 }
 0x1be   : > { %v526_v27 = vpack.c.bf16 %v524_v25, %v524_v25 }
 0x1bf   : > { %v505_v28 = vmul.f32 %v502_v22, %v490_v26 }
 0x1c0   : > { %528 = vst.msk [vmem:[%s197_s25] sm:$0xf] %vm278_vm5, %v526_v27 }
 0x1c1   : > { %v519_v30 = vadd.f32 %v516_v29, %v505_v28 }
 0x1c3   : > { %vm521_vm8 = vcmp.gt.f32.partialorder %v519_v30, 0.0  ;;  %v523_v31 = vmul.f32 0.02, %v519_v30 }
 0x1c5   : > { %v525_v32 = vsel %vm521_vm8, %v519_v30, %v523_v31 }
 0x1c6   : > { %v527_v33 = vpack.c.bf16 %v525_v32, %v525_v32 }
 0x1c8   : > { %529 = vst.msk [vmem:[%s197_s25 + $0x4] sm:$0xf] %vm278_vm5, %v527_v33 }
 0x1c9 PF: > { %s14_s15 = sadd.s32 1, %s684_s15  }
 0x1ca   : > { %p11_p4 = scmp.ge.s32.totalorder %s14_s15, 4  }
 0x1cc   :  { %13 = sbr.rel (!%p11_p4) target bundleno = 1 (0x1), region = 66 }

// kernel: generator_x2_interpolate_forward.4
= control target key start
LH: loop header
LB: loop body
LE: loop exit
PB: predicated region body
PF: predicated region fallthrough
CT: control target
= control target key end

     0   :  { %s3126_s30 = smov 0   ;;  %s3783_s0 = inlined_call_operand.vmem [shape: bf16[2,16,256], index: 0, kind: input, shape index: {}]   ;;  %s3784_s1 = inlined_call_operand.vmem [shape: f32[16,1], index: 1, kind: input, shape index: {}]   ;;  %s3785_s2 = inlined_call_operand.vmem [shape: f32[16,1], index: 2, kind: input, shape index: {}]   ;;  %s3786_s3 = inlined_call_operand.vmem [shape: bf16[16,144], index: 3, kind: input, shape index: {}]   ;;  %s3787_s4 = inlined_call_operand.vmem [shape: f32[16,1], index: 4, kind: input, shape index: {}]   ;;  %s3788_s5 = inlined_call_operand.vmem [shape: f32[16,1], index: 5, kind: input, shape index: {}]   ;;  %s3789_s6 = inlined_call_operand.vmem [shape: bf16[16,144], index: 6, kind: input, shape index: {}]   ;;  %s3790_s7 = inlined_call_operand.vmem [shape: f32[16,1], index: 7, kind: input, shape index: {}]   ;;  %s3791_s8 = inlined_call_operand.vmem [shape: f32[16,1], index: 8, kind: input, shape index: {}]   ;;  %s3792_s9 = inlined_call_operand.vmem [shape: bf16[2,16,256], index: 9, kind: output, shape index: {}]  }
   0x1 LB: > { %s2610_s10 = sadd.s32 4294967295, %s3063_s30   ;;  %p2614_p0 = scmp.ge.s32.totalorder %s3063_s30, 1  ;;  %s3063_s30 = sphi %s3126_s30, %s19_s30  }
   0x2   : > { %p287_p1 = scmp.lt.s32.totalorder %s3063_s30, 3 }
   0x4   : > { %p288_p2 = pnand %p2614_p0, %p287_p1 }
   0x5   : > { %p323_p3 = scmp.lt.s32.totalorder (!%p288_p2), %s2610_s10, 1  ;;  %s3067_s23 = smov (!%p288_p2), 17  }
   0x6   : > { %291 = sbr.rel (%p288_p2) target bundleno = 2086 (0x826), region = 56  ;;  %s3068_s24 = smov (!%p288_p2), 95  }
   0x7   : > { %s3069_s25 = smov (!%p288_p2), 111   ;;  %s3070_s26 = smov (!%p288_p2), 127  }
   0x8   : > { %s3071_s27 = smov (!%p288_p2), 96   ;;  %s3072_s28 = smov (!%p288_p2), 110  }
   0x9   : > { %s3073_s29 = smov (!%p288_p2), 94   ;;  %s3074_s11 = smov (!%p288_p2), 112  }
   0xa   : > { %s3075_s12 = smov (!%p288_p2), 126  }
   0xb   : > { %v409_v0 = vld [vmem:[%s3785_s2] sm:$0xff]  ;;  %v3065_v2 = vmov 0   ;;  %v410_v3 = vld [vmem:[%s3785_s2 + $0x8] sm:$0xff]  ;;  %s3798_s10 = smov (!%p323_p3, %s2610_s10), 1  ;;  %v348_v5 = vlaneseq  ;;  %vm334_vm0 = vcmask 134144   ;;  %vm341_vm1 = vcmask 273544  }
   0xc   : > { %v393_v1 = vld [vmem:[%s3784_s1] sm:$0xff]  ;;  %3055 = vset.pattern.permute.xlu1 %v3065_v2  ;;  %3054 = vset.pattern.permute.xlu0 %v3065_v2  ;;  %v394_v4 = vld [vmem:[%s3784_s1 + $0x8] sm:$0xff]  ;;  %s3793_s19 = sshll.u32 %s3798_s10, 4  ;;  %337 = vst.msk [vmem:[#allocation2 + $0x18] sm:$0xf] %vm334_vm0, %v3065_v2  ;;  %v3066_v22 = vmov 0.0  }
   0xd   : > { %413 = vperm.xlu1 %3055, %v409_v0   ;;  %397 = vperm.xlu0 %3054, %v393_v1   ;;  %v349_v6 = vand.u32 127, %v348_v5  ;;  %s327_s22 = scalar_lea.vmem %s3783_s0, %s3793_s19  ;;  %344 = vst.msk [vmem:[#allocation2 + $0x20] sm:$0xf] %vm341_vm1, %v3065_v2  ;;  %vm458_vm10 = vcmask 1043592   ;;  %vm459_vm11 = vcmask 1047556   ;;  %vm451_vm12 = vcmask 138240  }
   0xe   : > { %3056 = vset.pattern.permute.xlu2 %v3065_v2  ;;  %v3154_v8 = vld [vmem:[%s327_s22] sm:$0xff]  ;;  %335 = vst.msk [vmem:[#allocation2] sm:$0xf] %vm334_vm0, %v3065_v2  ;;  %v3168_v17 = vld [vmem:[%s327_s22 + $0x8] sm:$0xff]  ;;  %vm3204_vm13 = vmor %vm459_vm11, %vm458_vm10  ;;  %vm533_vm14 = vcmask 1043456   ;;  %vm709_vm15 = vcmask 777216  }
   0xf   : > { %v350_v7 = vadd.s32 128, %v349_v6  ;;  %v355_v9 = vand.u32 15, %v349_v6  ;;  %v389_v10 = vunpack.c.l.bf16 %v3154_v8  ;;  %v390_v11 = vunpack.c.h.bf16 %v3154_v8  ;;  %336 = vst.msk [vmem:[#allocation2 + $0xc] sm:$0xf] %vm334_vm0, %v3065_v2  ;;  %s3796_s17 = sshll.u32 %s3798_s10, 4 }
  0x10   : > { %338 = vst.msk [vmem:[#allocation2 + $0x24] sm:$0xf] %vm334_vm0, %v3065_v2  ;;  %v391_v20 = vunpack.c.l.bf16 %v3168_v17  ;;  %v392_v21 = vunpack.c.h.bf16 %v3168_v17 }
  0x11   : > { %v362_v12 = vand.u32 15, %v350_v7  ;;  %vm375_vm2 = vcmp.ne.s32.totalorder %v355_v9, 15  ;;  %339 = vst.msk [vmem:[#allocation2 + $0x30] sm:$0xf] %vm334_vm0, %v3065_v2  ;;  %vm381_vm6 = vcmp.ne.s32.totalorder %v355_v9, 0 }
  0x12   : > { %340 = vst.msk [vmem:[#allocation2 + $0x3c] sm:$0xf] %vm334_vm0, %v3065_v2  ;;  %v3175_v23 = vsel %vm375_vm2, 1.0, %v3066_v22  ;;  %v3190_v43 = vsel %vm381_vm6, 1.0, %v3066_v22  ;;  %vm680_vm2 = vcmask 785408   ;;  %vm564_vm6 = vcmask 1031168  }
  0x13   : > { %vm376_vm3 = vcmp.ne.s32.totalorder %v362_v12, 15  ;;  %342 = vst.msk [vmem:[#allocation2 + $0x8] sm:$0xf] %vm341_vm1, %v3065_v2  ;;  %vm382_vm7 = vcmp.ne.s32.totalorder %v362_v12, 0 }
  0x14   : > { %343 = vst.msk [vmem:[#allocation2 + $0x14] sm:$0xf] %vm341_vm1, %v3065_v2  ;;  %v3177_v24 = vsel %vm376_vm3, 1.0, %v3066_v22  ;;  %v3192_v44 = vsel %vm382_vm7, 1.0, %v3066_v22  ;;  %vm651_vm3 = vcmask 900096   ;;  %vm535_vm7 = vcmask 1039360  }
  0x15   : > { %418 = vperm.xlu1 %3055, %v410_v3   ;;  %402 = vperm.xlu0 %3054, %v394_v4   ;;  %345 = vst.msk [vmem:[#allocation2 + $0x2c] sm:$0xf] %vm341_vm1, %v3065_v2 }
  0x16   : > { %346 = vst.msk [vmem:[#allocation2 + $0x38] sm:$0xf] %vm341_vm1, %v3065_v2 }
  0x17   : > { %347 = vst.msk [vmem:[#allocation2 + $0x44] sm:$0xf] %vm341_vm1, %v3065_v2  ;;  %vm622_vm1 = vcmask 908288  }
  0x7f   : > { %v414_v13 = vpop.permute.xlu1 %413  ;;  %v398_v14 = vpop.permute.xlu0 %397 }
  0x80   : > { %v405_v15 = vmul.f32 %v398_v14, %v389_v10  ;;  %v406_v16 = vmul.f32 %v398_v14, %v390_v11 }
  0x82   : > { %v421_v18 = vadd.f32 %v414_v13, %v405_v15  ;;  %v422_v19 = vadd.f32 %v414_v13, %v406_v16 }
  0x84   : > { %vm425_vm4 = vcmp.gt.f32.partialorder %v421_v18, 0.0  ;;  %vm426_vm5 = vcmp.gt.f32.partialorder %v422_v19, 0.0  ;;  %v429_v25 = vmul.f32 0.02, %v421_v18  ;;  %v430_v26 = vmul.f32 0.02, %v422_v19 }
  0x86   : > { %v433_v27 = vsel %vm425_vm4, %v421_v18, %v429_v25  ;;  %v434_v28 = vsel %vm426_vm5, %v422_v19, %v430_v26  ;;  %vm738_vm4 = vcmask 769024   ;;  %vm593_vm5 = vcmask 916480  }
  0x87   : > { %v403_v29 = vpop.permute.xlu0 %402  ;;  %v465_v30 = vpack.c.bf16 %v434_v28, %v433_v27  ;;  %v437_v31 = vmul.f32 %v3175_v23, %v433_v27  ;;  %v438_v32 = vmul.f32 %v3177_v24, %v434_v28  ;;  %v419_v35 = vpop.permute.xlu1 %418  ;;  %v485_v52 = vmul.f32 %v3190_v43, %v433_v27 }
  0x88   : > { %v407_v33 = vmul.f32 %v403_v29, %v391_v20  ;;  %v408_v34 = vmul.f32 %v403_v29, %v392_v21  ;;  %v486_v53 = vmul.f32 %v3192_v44, %v434_v28 }
  0x89   : > { %469 = vrot.lane.b32.xlu2 %v465_v30, %s3067_s23  ;;  %v441_v36 = vpack.c.bf16 %v438_v32, %v437_v31 }
  0x8a   : > { %v423_v37 = vadd.f32 %v419_v35, %v407_v33  ;;  %v424_v38 = vadd.f32 %v419_v35, %v408_v34  ;;  %v489_v54 = vpack.c.bf16 %v486_v53, %v485_v52 }
  0x8b   : > { %445 = vrot.lane.b32.xlu0 %v441_v36, %s3067_s23 }
  0x8c   : > { %v431_v39 = vmul.f32 0.02, %v423_v37  ;;  %v432_v40 = vmul.f32 0.02, %v424_v38  ;;  %vm427_vm8 = vcmp.gt.f32.partialorder %v423_v37, 0.0  ;;  %vm428_vm9 = vcmp.gt.f32.partialorder %v424_v38, 0.0 }
  0x8e   : > { %v435_v41 = vsel %vm427_vm8, %v423_v37, %v431_v39  ;;  %v436_v42 = vsel %vm428_vm9, %v424_v38, %v432_v40  ;;  %v925_v40 = vld [vmem:[%s3787_s4] sm:$0xff]  ;;  %vm865_vm8 = vcmask 130048  }
  0x8f   : > { %v466_v45 = vpack.c.bf16 %v436_v42, %v435_v41  ;;  %v439_v46 = vmul.f32 %v3175_v23, %v435_v41  ;;  %v440_v47 = vmul.f32 %v3177_v24, %v436_v42  ;;  %v487_v48 = vmul.f32 %v3190_v43, %v435_v41  ;;  %v926_v41 = vld [vmem:[%s3787_s4 + $0x8] sm:$0xff] }
  0x90   : > { %v488_v49 = vmul.f32 %v3192_v44, %v436_v42 }
  0x91   : > { %471 = vrot.lane.b32.xlu2 %v466_v45, %s3067_s23  ;;  %v442_v50 = vpack.c.bf16 %v440_v47, %v439_v46  ;;  %v942_v45 = vld [vmem:[%s3788_s5 + $0x8] sm:$0xff] }
  0x92   : > { %v490_v51 = vpack.c.bf16 %v488_v49, %v487_v48 }
  0x93   : > { %447 = vrot.lane.b32.xlu1 %v442_v50, %s3067_s23 }
  0x94   : > { %495 = vrot.lane.b32.xlu0 %v490_v51, %s3067_s23 }
  0x99   : > { %493 = vrot.lane.b32.xlu2 %v489_v54, %s3067_s23 }
  0xe3   : > { %v470_v55 = vpop.permute.xlu2 %469 }
  0xe4   : > { %v473_v57 = vrot.slane %v470_v55, 4 }
  0xe6   : > { %v475_v58 = vsel %vm451_vm12, %v473_v57, %v470_v55  ;;  %482 = vst.msk [vmem:[#allocation2 + $0x20] sm:$0xf] %vm334_vm0, %v473_v57 }
  0xe7   : > { %481 = vst.msk [vmem:[#allocation2 + $0x18] sm:$0xff] %vm3204_vm13, %v475_v58 }
  0xeb   : > { %v472_v59 = vpop.permute.xlu2 %471 }
  0xec   : > { %v474_v60 = vrot.slane %v472_v59, 4 }
  0xed   : > { %v689_v61 = vld [vmem:[#allocation2 + $0x20] sm:$0xf] }
  0xee   : > { %v476_v62 = vsel %vm451_vm12, %v474_v60, %v472_v59  ;;  %484 = vst.msk [vmem:[#allocation2 + $0x2c] sm:$0xf] %vm334_vm0, %v474_v60  ;;  %698 = vrot.lane.b32.xlu2 %v689_v61, %s3068_s24  ;;  %v602_v1 = vld [vmem:[#allocation2 + $0x20] sm:$0xf]  ;;  %v513_v6 = vld [vmem:[#allocation2 + $0x18] sm:$0xff] }
  0xef   : > { %483 = vst.msk [vmem:[#allocation2 + $0x24] sm:$0xff] %vm3204_vm13, %v476_v62  ;;  %v514_v38 = vld [vmem:[#allocation2 + $0x20] sm:$0xf] }
  0xf3   : > { %v494_v63 = vpop.permute.xlu2 %493 }
  0xf4   : > { %v497_v0 = vrot.slane %v494_v63, 4 }
  0xf5   : > { %v691_v2 = vld [vmem:[#allocation2 + $0x2c] sm:$0xf] }
  0xf6   : > { %v499_v3 = vsel %vm451_vm12, %v497_v0, %v494_v63  ;;  %506 = vst.msk [vmem:[#allocation2 + $0x38] sm:$0xf] %vm334_vm0, %v497_v0  ;;  %611 = vrot.lane.b32.xlu2 %v602_v1, %s3069_s25  ;;  %702 = vrot.lane.b32.xlu1 %v691_v2, %s3068_s24  ;;  %v3221_v4 = vld [vmem:[#allocation2 + $0x24] sm:$0xff]  ;;  %v604_v7 = vld [vmem:[#allocation2 + $0x2c] sm:$0xf] }
  0xf7   : > { %505 = vst.msk [vmem:[#allocation2 + $0x30] sm:$0xff] %vm3204_vm13, %v499_v3  ;;  %700 = vrot.lane.b32.xlu0 %v3221_v4, %s3068_s24  ;;  %v516_v39 = vld [vmem:[#allocation2 + $0x2c] sm:$0xf] }
  0xfd   : > { %v446_v5 = vpop.permute.xlu0 %445  ;;  %v631_v29 = vld [vmem:[#allocation2 + $0x38] sm:$0xf] }
  0xfe   : > { %v449_v9 = vrot.slane %v446_v5, 4  ;;  %521 = vrot.lane.b32.xlu2 %v513_v6, %s3070_s26  ;;  %615 = vrot.lane.b32.xlu1 %v604_v7, %s3069_s25  ;;  %v718_v31 = vld [vmem:[#allocation2 + $0x38] sm:$0xf]  ;;  %v630_v36 = vld [vmem:[#allocation2 + $0x30] sm:$0xff] }
  0xff   : > { %613 = vrot.lane.b32.xlu0 %v3221_v4, %s3069_s25  ;;  %v544_v33 = vld [vmem:[#allocation2 + $0x38] sm:$0xf] }
 0x100   : > { %v452_v12 = vsel %vm451_vm12, %v449_v9, %v446_v5  ;;  %462 = vst.msk [vmem:[#allocation2 + $0x8] sm:$0xf] %vm334_vm0, %v449_v9 }
 0x101   : > { %461 = vst.msk [vmem:[#allocation2] sm:$0xff] %vm3204_vm13, %v452_v12 }
 0x105   : > { %v448_v13 = vpop.permute.xlu1 %447 }
 0x106   : > { %v450_v14 = vrot.slane %v448_v13, 4  ;;  %v496_v15 = vpop.permute.xlu0 %495  ;;  %696 = vrot.lane.b32.xlu1 %v513_v6, %s3068_s24 }
 0x107   : > { %v498_v16 = vrot.slane %v496_v15, 4  ;;  %v660_v18 = vld [vmem:[#allocation2 + $0x8] sm:$0xf] }
 0x108   : > { %v453_v19 = vsel %vm451_vm12, %v450_v14, %v448_v13  ;;  %464 = vst.msk [vmem:[#allocation2 + $0x14] sm:$0xf] %vm334_vm0, %v450_v14  ;;  %669 = vrot.lane.b32.xlu0 %v660_v18, %s3071_s27  ;;  %v659_v25 = vld [vmem:[#allocation2] sm:$0xff]  ;;  %v573_v32 = vld [vmem:[#allocation2 + $0x8] sm:$0xf] }
 0x109   : > { %463 = vst.msk [vmem:[#allocation2 + $0xc] sm:$0xff] %vm3204_vm13, %v453_v19  ;;  %v500_v22 = vsel %vm451_vm12, %v498_v16, %v496_v15 }
 0x10a   : > { %507 = vst.msk [vmem:[#allocation2 + $0x3c] sm:$0xff] %vm3204_vm13, %v500_v22 }
 0x10b   : > { %508 = vst.msk [vmem:[#allocation2 + $0x44] sm:$0xf] %vm334_vm0, %v498_v16 }
 0x10c   : > { %511 = vst [vmem:[#allocation3] sm:$0xff] %v659_v25 }
 0x10e   : > { %609 = vrot.lane.b32.xlu1 %v513_v6, %s3069_s25 }
 0x10f   : > { %v662_v26 = vld [vmem:[#allocation2 + $0x14] sm:$0xf] }
 0x110   : > { %673 = vrot.lane.b32.xlu2 %v662_v26, %s3071_s27  ;;  %v661_v27 = vld [vmem:[#allocation2 + $0xc] sm:$0xff]  ;;  %v575_v34 = vld [vmem:[#allocation2 + $0x14] sm:$0xf] }
 0x111   : > { %512 = vst [vmem:[#allocation3 + $0x8] sm:$0xff] %v661_v27  ;;  %v632_v37 = vld [vmem:[#allocation2 + $0x3c] sm:$0xff] }
 0x112   : > { %v633_v28 = vld [vmem:[#allocation2 + $0x44] sm:$0xf] }
 0x113   : > { %644 = vrot.lane.b32.xlu0 %v633_v28, %s3072_s28  ;;  %v720_v30 = vld [vmem:[#allocation2 + $0x44] sm:$0xf] }
 0x114   : > { %v546_v35 = vld [vmem:[#allocation2 + $0x44] sm:$0xf] }
 0x116   : > { %640 = vrot.lane.b32.xlu1 %v631_v29, %s3072_s28 }
 0x118   : > { %731 = vrot.lane.b32.xlu2 %v720_v30, %s3073_s29 }
 0x11b   : > { %727 = vrot.lane.b32.xlu0 %v718_v31, %s3073_s29 }
 0x11e   : > { %582 = vrot.lane.b32.xlu1 %v573_v32, %s3074_s11 }
 0x120   : > { %553 = vrot.lane.b32.xlu2 %v544_v33, %s3075_s12 }
 0x123   : > { %586 = vrot.lane.b32.xlu0 %v575_v34, %s3074_s11 }
 0x126   : > { %557 = vrot.lane.b32.xlu1 %v546_v35, %s3075_s12 }
 0x128   : > { %667 = vrot.lane.b32.xlu2 %v659_v25, %s3071_s27 }
 0x12b   : > { %638 = vrot.lane.b32.xlu0 %v630_v36, %s3072_s28 }
 0x12e   : > { %671 = vrot.lane.b32.xlu1 %v661_v27, %s3071_s27 }
 0x130   : > { %642 = vrot.lane.b32.xlu2 %v632_v37, %s3072_s28 }
 0x133   : > { %580 = vrot.lane.b32.xlu0 %v659_v25, %s3074_s11 }
 0x136   : > { %729 = vrot.lane.b32.xlu1 %v632_v37, %s3073_s29 }
 0x138   : > { %725 = vrot.lane.b32.xlu2 %v630_v36, %s3073_s29 }
 0x13b   : > { %555 = vrot.lane.b32.xlu0 %v632_v37, %s3075_s12 }
 0x13e   : > { %551 = vrot.lane.b32.xlu1 %v630_v36, %s3075_s12 }
 0x140   : > { %584 = vrot.lane.b32.xlu2 %v661_v27, %s3074_s11 }
 0x143   : > { %523 = vrot.lane.b32.xlu0 %v514_v38, %s3070_s26 }
 0x146   : > { %525 = vrot.lane.b32.xlu1 %v3221_v4, %s3070_s26 }
 0x148   : > { %527 = vrot.lane.b32.xlu2 %v516_v39, %s3070_s26  ;;  %v699_v42 = vpop.permute.xlu2 %698 }
 0x149   : > { %v705_v0 = vrot.slane %v699_v42, 4 }
 0x14b   : > { %929 = vperm.xlu0 %3054, %v925_v40  }
 0x14e   : > { %934 = vperm.xlu1 %3055, %v926_v41  }
 0x150   : > { %v612_v46 = vpop.permute.xlu2 %611 }
 0x151   : > { %v618_v7 = vrot.slane %v612_v46, 4 }
 0x153   : > { %950 = vperm.xlu0 %3054, %v942_v45  }
 0x158   : > { %v3278_v47 = vpop.permute.xlu2 %521 }
 0x168   : > { %v703_v48 = vpop.permute.xlu1 %702 }
 0x169   : > { %v707_v49 = vrot.slane %v703_v48, 4  ;;  %v701_v50 = vpop.permute.xlu0 %700 }
 0x16a   : > { %v706_v51 = vrot.slane %v701_v50, 4  ;;  %v3280_v52 = vpop.permute.xlu2 %673 }
 0x16c   : > { %v711_v53 = vsel %vm533_vm14, %v706_v51, %v707_v49 }
 0x16d   : > { %v712_v54 = vsel %vm709_vm15, %v701_v50, %v711_v53 }
 0x16e   : > { %716 = vst [vmem:[#allocation3 + $0x78] sm:$0xff] %v712_v54 }
 0x170   : > { %v616_v55 = vpop.permute.xlu1 %615 }
 0x171   : > { %v620_v57 = vrot.slane %v616_v55, 4  ;;  %v614_v58 = vpop.permute.xlu0 %613 }
 0x172   : > { %v619_v59 = vrot.slane %v614_v58, 4  ;;  %v3284_v60 = vpop.permute.xlu2 %731 }
 0x174   : > { %v624_v61 = vsel %vm533_vm14, %v619_v59, %v620_v57 }
 0x175   : > { %v625_v62 = vsel %vm622_vm1, %v614_v58, %v624_v61  ;;  %v2972_v19 = vld [vmem:[#allocation3 + $0x74] sm:$0xf0]  ;;  %v678_v58 = vrot.slane %v3280_v52, 4 }
 0x176   : > { %629 = vst [vmem:[#allocation3 + $0x48] sm:$0xff] %v625_v62 }
 0x178   : > { %v697_v63 = vpop.permute.xlu1 %696 }
 0x179   : > { %v704_v1 = vrot.slane %v697_v63, 4 }
 0x17a   : > { %v3288_v2 = vpop.permute.xlu2 %553  ;;  %v670_v4 = vpop.permute.xlu0 %669 }
 0x17b   : > { %v708_v3 = vsel %vm533_vm14, %v704_v1, %v705_v0  ;;  %v676_v13 = vrot.slane %v670_v4, 4 }
 0x17c   : > { %v710_v5 = vsel %vm709_vm15, %v697_v63, %v708_v3 }
 0x17d   : > { %715 = vst [vmem:[#allocation3 + $0x70] sm:$0xff] %v710_v5 }
 0x180   : > { %v610_v6 = vpop.permute.xlu1 %609 }
 0x181   : > { %v617_v9 = vrot.slane %v610_v6, 4 }
 0x182   : > { %v668_v12 = vpop.permute.xlu2 %667 }
 0x183   : > { %v621_v14 = vsel %vm533_vm14, %v617_v9, %v618_v7  ;;  %v675_v15 = vrot.slane %v668_v12, 4 }
 0x184   : > { %v623_v16 = vsel %vm622_vm1, %v610_v6, %v621_v14  ;;  %v2689_v18 = vld [vmem:[#allocation3 + $0x70] sm:$0xf]  ;;  %v736_v6 = vrot.slane %v3284_v60, 4 }
 0x185   : > { %628 = vst [vmem:[#allocation3 + $0x40] sm:$0xff] %v623_v16  ;;  %v679_v22 = vsel %vm533_vm14, %v675_v15, %v676_v13  ;;  %v645_v25 = vpop.permute.xlu0 %644  ;;  %v2690_v26 = vor.u32 %v2972_v19, %v2689_v18 }
 0x186   : > { %v681_v27 = vsel %vm680_vm2, %v668_v12, %v679_v22  ;;  %v649_v30 = vrot.slane %v645_v25, 4 }
 0x187   : > { %686 = vst [vmem:[#allocation3 + $0x60] sm:$0xff] %v681_v27  ;;  %869 = vmatpush.bf16.msra.mxu0 %v2690_v26  ;;  %v560_v27 = vrot.slane %v3288_v2, 4  ;;  %v2627_v2 = vld [vmem:[%s3786_s3 + $0x8] sm:$0xf0] }
 0x188   : > { %v641_v28 = vpop.permute.xlu1 %640 }
 0x189   : > { %v647_v51 = vrot.slane %v641_v28, 4 }
 0x18a   : > { %v643_v29 = vpop.permute.xlu2 %642 }
 0x18b   : > { %v648_v31 = vrot.slane %v643_v29, 4 }
 0x18d   : > { %v653_v32 = vsel %vm533_vm14, %v648_v31, %v649_v30  ;;  %v728_v33 = vpop.permute.xlu0 %727  ;;  %v2665_v31 = vld [vmem:[#allocation3 + $0x40] sm:$0xf] }
 0x18e   : > { %v654_v34 = vsel %vm651_vm3, %v643_v29, %v653_v32  ;;  %v734_v37 = vrot.slane %v728_v33, 4  ;;  %v2681_v13 = vld [vmem:[#allocation3 + $0x60] sm:$0xf]  ;;  %v2966_v32 = vld [vmem:[#allocation3 + $0x44] sm:$0xf0] }
 0x18f   : > { %658 = vst [vmem:[#allocation3 + $0x58] sm:$0xff] %v654_v34  ;;  %v2971_v33 = vld [vmem:[#allocation3 + $0x74] sm:$0xf] }
 0x190   : > { %v583_v35 = vpop.permute.xlu1 %582 }
 0x191   : > { %v589_v1 = vrot.slane %v583_v35, 4 }
 0x192   : > { %v726_v36 = vpop.permute.xlu2 %725 }
 0x193   : > { %v733_v38 = vrot.slane %v726_v36, 4 }
 0x195   : > { %v737_v39 = vsel %vm533_vm14, %v733_v38, %v734_v37  ;;  %v587_v40 = vpop.permute.xlu0 %586 }
 0x196   : > { %v739_v41 = vsel %vm738_vm4, %v726_v36, %v737_v39  ;;  %v591_v46 = vrot.slane %v587_v40, 4  ;;  %v2968_v26 = vld [vmem:[#allocation3 + $0x54] sm:$0xf0]  ;;  %v2955_v36 = vld [vmem:[%s3786_s3 + $0x4] sm:$0xf] }
 0x197   : > { %744 = vst [vmem:[#allocation3 + $0x80] sm:$0xff] %v739_v41  ;;  %v529_v41 = vrot.slane %v3278_v47, 4 }
 0x198   : > { %v558_v42 = vpop.permute.xlu1 %557 }
 0x199   : > { %v562_v18 = vrot.slane %v558_v42, 4 }
 0x19a   : > { %v585_v45 = vpop.permute.xlu2 %584 }
 0x19b   : > { %v590_v48 = vrot.slane %v585_v45, 4 }
 0x19d   : > { %v595_v49 = vsel %vm533_vm14, %v590_v48, %v591_v46  ;;  %v639_v50 = vpop.permute.xlu0 %638 }
 0x19e   : > { %v596_v53 = vsel %vm593_vm5, %v585_v45, %v595_v49  ;;  %v646_v54 = vrot.slane %v639_v50, 4  ;;  %v2697_v35 = vld [vmem:[#allocation3 + $0x80] sm:$0xf]  ;;  %v2973_v39 = vld [vmem:[#allocation3 + $0x84] sm:$0xf]  ;;  %v2666_v45 = vor.u32 %v2966_v32, %v2665_v31 }
 0x19f   : > { %600 = vst [vmem:[#allocation3 + $0x38] sm:$0xff] %v596_v53  ;;  %v2691_v49 = vld [vmem:[#allocation3 + $0x78] sm:$0xf0]  ;;  %v2956_v31 = vld [vmem:[%s3786_s3 + $0x4] sm:$0xf0] }
 0x1a0   : > { %v650_v55 = vsel %vm533_vm14, %v646_v54, %v647_v51  ;;  %v672_v57 = vpop.permute.xlu1 %671  ;;  %v2694_v53 = vor.u32 %v2971_v33, %v2691_v49  ;;  %v2633_v32 = vld [vmem:[#allocation3] sm:$0xf] }
 0x1a1   : > { %v652_v59 = vsel %vm651_vm3, %v639_v50, %v650_v55  ;;  %v677_v61 = vrot.slane %v672_v57, 4  ;;  %v2630_v55 = vor.u32 %v2955_v36, %v2627_v2 }
 0x1a2   : > { %657 = vst [vmem:[#allocation3 + $0x50] sm:$0xff] %v652_v59  ;;  %v528_v50 = vpop.permute.xlu2 %527 }
 0x1a3   : > { %v682_v62 = vsel %vm533_vm14, %v677_v61, %v678_v58  ;;  %v941_v58 = vld [vmem:[%s3788_s5] sm:$0xff] }
 0x1a4   : > { %v683_v63 = vsel %vm680_vm2, %v672_v57, %v682_v62  ;;  %945 = vperm.xlu2 %3056, %v941_v58  }
 0x1a5   : > { %687 = vst [vmem:[#allocation3 + $0x68] sm:$0xff] %v683_v63  ;;  %v581_v0 = vpop.permute.xlu0 %580  ;;  %v532_v63 = vrot.slane %v528_v50, 4 }
 0x1a6   : > { %v588_v3 = vrot.slane %v581_v0, 4  ;;  %v2964_v62 = vld [vmem:[#allocation3 + $0x34] sm:$0xf0] }
 0x1a8   : > { %v592_v4 = vsel %vm533_vm14, %v588_v3, %v589_v1  ;;  %v730_v5 = vpop.permute.xlu1 %729 }
 0x1a9   : > { %v594_v7 = vsel %vm593_vm5, %v581_v0, %v592_v4  ;;  %v735_v52 = vrot.slane %v730_v5, 4  ;;  %v2673_v22 = vld [vmem:[#allocation3 + $0x50] sm:$0xf]  ;;  %v2969_v4 = vld [vmem:[#allocation3 + $0x64] sm:$0xf] }
 0x1aa   : > { %599 = vst [vmem:[#allocation3 + $0x30] sm:$0xff] %v594_v7  ;;  %v2674_v30 = vor.u32 %v2968_v26, %v2673_v22  ;;  %v2967_v7 = vld [vmem:[#allocation3 + $0x54] sm:$0xf]  ;;  %v2659_v26 = vld [vmem:[#allocation3 + $0x38] sm:$0xf0] }
 0x1ab   : > { %v740_v9 = vsel %vm533_vm14, %v735_v52, %v736_v6 }
 0x1ac   : > { %v741_v12 = vsel %vm738_vm4, %v730_v5, %v740_v9  ;;  %v2970_v14 = vld [vmem:[#allocation3 + $0x64] sm:$0xf0]  ;;  %v2683_v57 = vld [vmem:[#allocation3 + $0x68] sm:$0xf0] }
 0x1ad   : > { %745 = vst [vmem:[#allocation3 + $0x88] sm:$0xff] %v741_v12  ;;  %v556_v15 = vpop.permute.xlu0 %555  ;;  %v2682_v16 = vor.u32 %v2970_v14, %v2681_v13  ;;  %v2686_v5 = vor.u32 %v2969_v4, %v2683_v57  ;;  %v2675_v13 = vld [vmem:[#allocation3 + $0x58] sm:$0xf0] }
 0x1ae   : > { %v561_v19 = vrot.slane %v556_v15, 4  ;;  %v2678_v14 = vor.u32 %v2967_v7, %v2675_v13 }
 0x1af   : > { %870 = vmatpush.bf16.msra.mxu0 %v2682_v16  ;;  %v2667_v16 = vld [vmem:[#allocation3 + $0x48] sm:$0xf0] }
 0x1b0   : > { %v566_v60 = vsel %vm533_vm14, %v561_v19, %v562_v18  ;;  %v552_v25 = vpop.permute.xlu1 %551 }
 0x1b1   : > { %v567_v28 = vsel %vm564_vm6, %v556_v15, %v566_v60  ;;  %v559_v29 = vrot.slane %v552_v25, 4  ;;  %v2657_v54 = vld [vmem:[#allocation3 + $0x30] sm:$0xf]  ;;  %v2965_v15 = vld [vmem:[#allocation3 + $0x44] sm:$0xf] }
 0x1b2   : > { %571 = vst [vmem:[#allocation3 + $0x28] sm:$0xff] %v567_v28  ;;  %v2658_v3 = vor.u32 %v2964_v62, %v2657_v54  ;;  %v2670_v18 = vor.u32 %v2965_v15, %v2667_v16  ;;  %v2963_v19 = vld [vmem:[#allocation3 + $0x34] sm:$0xf]  ;;  %v2958_v28 = vld [vmem:[#allocation3 + $0x4] sm:$0xf0] }
 0x1b3   : > { %v563_v34 = vsel %vm533_vm14, %v559_v29, %v560_v27  ;;  %871 = vmatpush.bf16.msra.mxu0 %v2674_v30  ;;  %v2662_v27 = vor.u32 %v2963_v19, %v2659_v26  ;;  %v2625_v30 = vld [vmem:[%s3786_s3] sm:$0xf]  ;;  %v2634_v33 = vor.u32 %v2958_v28, %v2633_v32 }
 0x1b4   : > { %v565_v37 = vsel %vm564_vm6, %v552_v25, %v563_v34  ;;  %v2974_v38 = vld [vmem:[#allocation3 + $0x84] sm:$0xf0]  ;;  %v2699_v40 = vld [vmem:[#allocation3 + $0x88] sm:$0xf0]  ;;  %v2626_v36 = vor.u32 %v2956_v31, %v2625_v30 }
 0x1b5   : > { %570 = vst [vmem:[#allocation3 + $0x20] sm:$0xff] %v565_v37  ;;  %v524_v42 = vpop.permute.xlu0 %523  ;;  %v2698_v46 = vor.u32 %v2974_v38, %v2697_v35  ;;  %v2702_v48 = vor.u32 %v2973_v39, %v2699_v40  ;;  %v2635_v39 = vld [vmem:[#allocation3 + $0x8] sm:$0xf0]  ;;  %v2957_v40 = vld [vmem:[#allocation3 + $0x4] sm:$0xf] }
 0x1b6   : > { %v530_v51 = vrot.slane %v524_v42, 4 }
 0x1b7   : > { %872 = vmatpush.bf16.msra.mxu0 %v2666_v45  ;;  %890 = vmatpush.bf16.msra.mxu2 %v2698_v46 }
 0x1b8   : > { %v534_v59 = vsel %vm533_vm14, %v529_v41, %v530_v51  ;;  %918 = vmatpush.bf16.msra.mxu3 %v2702_v48  ;;  %v526_v61 = vpop.permute.xlu1 %525  ;;  %v2638_v41 = vor.u32 %v2957_v40, %v2635_v39 }
 0x1b9   : > { %v536_v0 = vsel %vm535_vm7, %v3278_v47, %v534_v59  ;;  %v531_v1 = vrot.slane %v526_v61, 4  ;;  %v2962_v12 = vld [vmem:[#allocation3 + $0x24] sm:$0xf0]  ;;  %v2651_v34 = vld [vmem:[#allocation3 + $0x28] sm:$0xf0] }
 0x1ba   : > { %541 = vst [vmem:[#allocation3 + $0x10] sm:$0xff] %v536_v0  ;;  %2703 = vmatmul.msk.bf16.vlgmr.msra.gmra.mxu2 %vm865_vm8, %v2630_v55 }
 0x1bb   : > { %897 = vmatpush.bf16.msrb.mxu2 %v2694_v53  ;;  %v537_v6 = vsel %vm533_vm14, %v531_v1, %v532_v63  ;;  %873 = vmatpush.bf16.msra.mxu0 %v2658_v3 }
 0x1bc   : > { %2704 = vmatmul.msk.bf16.vlgmr.msra.gmra.mxu3 %vm865_vm8, %v2630_v55  ;;  %v538_v52 = vsel %vm535_vm7, %v526_v61, %v537_v6  ;;  %v2649_v9 = vld [vmem:[#allocation3 + $0x20] sm:$0xf]  ;;  %v2961_v29 = vld [vmem:[#allocation3 + $0x24] sm:$0xf] }
 0x1bd   : > { %542 = vst [vmem:[#allocation3 + $0x18] sm:$0xff] %v538_v52  ;;  %v2650_v47 = vor.u32 %v2962_v12, %v2649_v9  ;;  %v2654_v35 = vor.u32 %v2961_v29, %v2651_v34  ;;  %v930_v49 = vpop.permute.xlu0 %929 }
 0x1bf   : > { %898 = vmatpush.bf16.msrb.mxu2 %v2686_v5  ;;  %874 = vmatpush.bf16.msra.mxu0 %v2650_v47 }
 0x1c0   : > { %v935_v61 = vpop.permute.xlu1 %934 }
 0x1c1   : > { %v2641_v22 = vld [vmem:[#allocation3 + $0x10] sm:$0xf]  ;;  %v2959_v37 = vld [vmem:[#allocation3 + $0x14] sm:$0xf] }
 0x1c3   : > { %899 = vmatpush.bf16.msrb.mxu2 %v2678_v14 }
 0x1c4   : > { %v2960_v60 = vld [vmem:[#allocation3 + $0x14] sm:$0xf0]  ;;  %v2643_v2 = vld [vmem:[#allocation3 + $0x18] sm:$0xf0] }
 0x1c5   : > { %v2642_v25 = vor.u32 %v2960_v60, %v2641_v22  ;;  %v2646_v38 = vor.u32 %v2959_v37, %v2643_v2  ;;  %v951_v3 = vpop.permute.xlu0 %950 }
 0x1c7   : > { %900 = vmatpush.bf16.msrb.mxu2 %v2670_v18  ;;  %875 = vmatpush.bf16.msra.mxu0 %v2642_v25 }
 0x1cb   : > { %901 = vmatpush.bf16.msrb.mxu2 %v2662_v27  ;;  %876 = vmatpush.bf16.msra.mxu0 %v2634_v33 }
 0x1ce   : > { %877 = vmatmul.bf16.vlgmr.msra.gmra.mxu0 %v2626_v36 }
 0x1cf   : > { %902 = vmatpush.bf16.msrb.mxu2 %v2654_v35 }
 0x1d3   : > { %903 = vmatpush.bf16.msrb.mxu2 %v2646_v38 }
 0x1d7   : > { %904 = vmatpush.bf16.msrb.mxu2 %v2638_v41 }
 0x1da   : > { %905 = vmatmul.bf16.vlgmr.msrb.gmra.mxu2 %v2626_v36 }
 0x1fe   : > { %v946_v51 = vpop.permute.xlu2 %945 }
 0x23d   : > { %v892_v42 = vpop.f32.mrf.mxu2 }
 0x23f   : > { %v920_v55 = vpop.f32.mrf.mxu3 }
 0x245   : > { %v894_v48 = vpop.f32.mrf.mxu2 }
 0x247   : > { %v922_v7 = vpop.f32.mrf.mxu3 }
 0x24b   : > { %v878_v45 = vpop.f32.mrf.mxu0 }
 0x24c   : > { %v893_v46 = vadd.f32 %v892_v42, %v878_v45 }
 0x24e   : > { %v937_v50 = vmul.f32 %v930_v49, %v893_v46 }
 0x250   : > { %v953_v54 = vadd.f32 %v946_v51, %v937_v50 }
 0x252   : > { %v961_v62 = vmul.f32 0.02, %v953_v54  ;;  %vm957_vm9 = vcmp.gt.f32.partialorder %v953_v54, 0.0 }
 0x253   : > { %v880_v53 = vpop.f32.mrf.mxu0 }
 0x254   : > { %v895_v57 = vadd.f32 %v894_v48, %v880_v53  ;;  %v965_v4 = vsel %vm957_vm9, %v953_v54, %v961_v62 }
 0x255   : > { %v1013_v47 = vmul.f32 %v3190_v43, %v965_v4  ;;  %v969_v15 = vmul.f32 %v3175_v23, %v965_v4 }
 0x256   : > { %v939_v63 = vmul.f32 %v935_v61, %v895_v57 }
 0x258   : > { %v955_v5 = vadd.f32 %v951_v3, %v939_v63 }
 0x25a   : > { %v963_v18 = vmul.f32 0.02, %v955_v5  ;;  %vm959_vm11 = vcmp.gt.f32.partialorder %v955_v5, 0.0 }
 0x25c   : > { %v967_v27 = vsel %vm959_vm11, %v955_v5, %v963_v18 }
 0x25d   : > { %v906_v58 = vpop.f32.mrf.mxu2  ;;  %v1015_v29 = vmul.f32 %v3190_v43, %v967_v27  ;;  %v971_v31 = vmul.f32 %v3175_v23, %v967_v27 }
 0x25e   : > { %v921_v59 = vadd.f32 %v920_v55, %v906_v58 }
 0x260   : > { %v938_v0 = vmul.f32 %v930_v49, %v921_v59 }
 0x262   : > { %v954_v1 = vadd.f32 %v946_v51, %v938_v0 }
 0x264   : > { %v962_v6 = vmul.f32 0.02, %v954_v1  ;;  %vm958_vm10 = vcmp.gt.f32.partialorder %v954_v1, 0.0 }
 0x265   : > { %v908_v52 = vpop.f32.mrf.mxu2 }
 0x266   : > { %v923_v9 = vadd.f32 %v922_v7, %v908_v52  ;;  %v966_v12 = vsel %vm958_vm10, %v954_v1, %v962_v6 }
 0x267   : > { %v993_v13 = vpack.c.bf16 %v966_v12, %v965_v4  ;;  %v1014_v14 = vmul.f32 %v3192_v44, %v966_v12  ;;  %v970_v16 = vmul.f32 %v3177_v24, %v966_v12 }
 0x268   : > { %v940_v19 = vmul.f32 %v935_v61, %v923_v9 }
 0x269   : > { %997 = vrot.lane.b32.xlu1 %v993_v13, %s3067_s23  ;;  %v1017_v22 = vpack.c.bf16 %v1014_v14, %v1013_v47  ;;  %v973_v60 = vpack.c.bf16 %v970_v16, %v969_v15 }
 0x26a   : > { %v956_v25 = vadd.f32 %v951_v3, %v940_v19 }
 0x26b   : > { %1021 = vrot.lane.b32.xlu2 %v1017_v22, %s3067_s23  ;;  %977 = vrot.lane.b32.xlu0 %v973_v60, %s3067_s23  ;;  %v1443_v22 = vld [vmem:[%s3790_s7] sm:$0xff] }
 0x26c   : > { %vm960_vm9 = vcmp.gt.f32.partialorder %v956_v25, 0.0  ;;  %v964_v26 = vmul.f32 0.02, %v956_v25  ;;  %v1459_v60 = vld [vmem:[%s3791_s8] sm:$0xff] }
 0x26e   : > { %v968_v28 = vsel %vm960_vm9, %v956_v25, %v964_v26  ;;  %v1444_v25 = vld [vmem:[%s3790_s7 + $0x8] sm:$0xff] }
 0x26f   : > { %v1016_v30 = vmul.f32 %v3192_v44, %v968_v28  ;;  %v972_v32 = vmul.f32 %v3177_v24, %v968_v28  ;;  %v994_v34 = vpack.c.bf16 %v968_v28, %v967_v27  ;;  %v1460_v26 = vld [vmem:[%s3791_s8 + $0x8] sm:$0xff] }
 0x270   : > { %v1480_v28 = vld [vmem:[%s3784_s1 + $0x8] sm:$0xff] }
 0x271   : > { %v1018_v33 = vpack.c.bf16 %v1016_v30, %v1015_v29  ;;  %v974_v35 = vpack.c.bf16 %v972_v32, %v971_v31  ;;  %v1479_v29 = vld [vmem:[%s3784_s1] sm:$0xff]  ;;  %v1496_v32 = vld [vmem:[%s3785_s2 + $0x8] sm:$0xff] }
 0x272   : > { %v1495_v30 = vld [vmem:[%s3785_s2] sm:$0xff] }
 0x273   : > { %1023 = vrot.lane.b32.xlu0 %v1018_v33, %s3067_s23  ;;  %999 = vrot.lane.b32.xlu2 %v994_v34, %s3067_s23 }
 0x274   : > { %979 = vrot.lane.b32.xlu1 %v974_v35, %s3067_s23 }
 0x2c5   : > { %v1022_v36 = vpop.permute.xlu2 %1021 }
 0x2c6   : > { %v1025_v2 = vrot.slane %v1022_v36, 4 }
 0x2c8   : > { %v1027_v37 = vsel %vm451_vm12, %v1025_v2, %v1022_v36  ;;  %1034 = vst.msk [vmem:[#allocation2 + $0x38] sm:$0xf] %vm334_vm0, %v1025_v2 }
 0x2c9   : > { %1033 = vst.msk [vmem:[#allocation2 + $0x30] sm:$0xff] %vm3204_vm13, %v1027_v37 }
 0x2cd   : > { %v1000_v38 = vpop.permute.xlu2 %999 }
 0x2ce   : > { %v1002_v39 = vrot.slane %v1000_v38, 4 }
 0x2cf   : > { %v1238_v0 = vld [vmem:[#allocation2 + $0x38] sm:$0xf] }
 0x2d0   : > { %v1004_v40 = vsel %vm451_vm12, %v1002_v39, %v1000_v38  ;;  %1012 = vst.msk [vmem:[#allocation2 + $0x2c] sm:$0xf] %vm334_vm0, %v1002_v39  ;;  %v1070_v3 = vld [vmem:[#allocation2 + $0x38] sm:$0xf]  ;;  %v1153_v5 = vld [vmem:[#allocation2 + $0x30] sm:$0xff] }
 0x2d1   : > { %1011 = vst.msk [vmem:[#allocation2 + $0x24] sm:$0xff] %vm3204_vm13, %v1004_v40  ;;  %v1154_v4 = vld [vmem:[#allocation2 + $0x38] sm:$0xf] }
 0x2d7   : > { %v1212_v9 = vld [vmem:[#allocation2 + $0x2c] sm:$0xf] }
 0x2d8   : > { %v1211_v7 = vld [vmem:[#allocation2 + $0x24] sm:$0xff]  ;;  %v1128_v47 = vld [vmem:[#allocation2 + $0x2c] sm:$0xf] }
 0x2d9   : > { %v1044_v19 = vld [vmem:[#allocation2 + $0x2c] sm:$0xf] }
 0x2db   : > { %v998_v41 = vpop.permute.xlu1 %997 }
 0x2dc   : > { %v1001_v42 = vrot.slane %v998_v41, 4 }
 0x2dd   : > { %v978_v45 = vpop.permute.xlu0 %977 }
 0x2de   : > { %v1003_v46 = vsel %vm451_vm12, %v1001_v42, %v998_v41  ;;  %1010 = vst.msk [vmem:[#allocation2 + $0x20] sm:$0xf] %vm334_vm0, %v1001_v42  ;;  %v981_v48 = vrot.slane %v978_v45, 4 }
 0x2df   : > { %1009 = vst.msk [vmem:[#allocation2 + $0x18] sm:$0xff] %vm3204_vm13, %v1003_v46 }
 0x2e0   : > { %v983_v49 = vsel %vm451_vm12, %v981_v48, %v978_v45  ;;  %990 = vst.msk [vmem:[#allocation2 + $0x8] sm:$0xf] %vm334_vm0, %v981_v48 }
 0x2e1   : > { %989 = vst.msk [vmem:[#allocation2] sm:$0xff] %vm3204_vm13, %v983_v49 }
 0x2e5   : > { %v1024_v50 = vpop.permute.xlu0 %1023  ;;  %v1210_v51 = vld [vmem:[#allocation2 + $0x20] sm:$0xf] }
 0x2e6   : > { %v980_v53 = vpop.permute.xlu1 %979  ;;  %v1026_v54 = vrot.slane %v1024_v50, 4  ;;  %1219 = vrot.lane.b32.xlu2 %v1210_v51, %s3068_s24  ;;  %v1209_v55 = vld [vmem:[#allocation2 + $0x18] sm:$0xff]  ;;  %v1126_v63 = vld [vmem:[#allocation2 + $0x20] sm:$0xf] }
 0x2e7   : > { %v982_v57 = vrot.slane %v980_v53, 4  ;;  %1217 = vrot.lane.b32.xlu1 %v1209_v55, %s3068_s24  ;;  %v1182_v58 = vld [vmem:[#allocation2 + $0x8] sm:$0xf]  ;;  %v1042_v18 = vld [vmem:[#allocation2 + $0x20] sm:$0xf] }
 0x2e8   : > { %v1028_v59 = vsel %vm451_vm12, %v1026_v54, %v1024_v50  ;;  %1036 = vst.msk [vmem:[#allocation2 + $0x44] sm:$0xf] %vm334_vm0, %v1026_v54  ;;  %1191 = vrot.lane.b32.xlu0 %v1182_v58, %s3071_s27  ;;  %v1181_v62 = vld [vmem:[#allocation2] sm:$0xff]  ;;  %v1098_v6 = vld [vmem:[#allocation2 + $0x8] sm:$0xf] }
 0x2e9   : > { %v984_v61 = vsel %vm451_vm12, %v982_v57, %v980_v53  ;;  %992 = vst.msk [vmem:[#allocation2 + $0x14] sm:$0xf] %vm334_vm0, %v982_v57 }
 0x2ea   : > { %991 = vst.msk [vmem:[#allocation2 + $0xc] sm:$0xff] %vm3204_vm13, %v984_v61 }
 0x2eb   : > { %1035 = vst.msk [vmem:[#allocation2 + $0x3c] sm:$0xff] %vm3204_vm13, %v1028_v59 }
 0x2ec   : > { %1039 = vst [vmem:[#allocation3] sm:$0xff] %v1181_v62 }
 0x2ee   : > { %1135 = vrot.lane.b32.xlu2 %v1126_v63, %s3069_s25 }
 0x2ef   : > { %1133 = vrot.lane.b32.xlu1 %v1209_v55, %s3069_s25  ;;  %v1240_v12 = vld [vmem:[#allocation2 + $0x44] sm:$0xf] }
 0x2f0   : > { %1247 = vrot.lane.b32.xlu0 %v1238_v0, %s3073_s29  ;;  %v1184_v52 = vld [vmem:[#allocation2 + $0x14] sm:$0xf]  ;;  %v1156_v13 = vld [vmem:[#allocation2 + $0x44] sm:$0xf] }
 0x2f1   : > { %v1183_v1 = vld [vmem:[#allocation2 + $0xc] sm:$0xff]  ;;  %v1100_v15 = vld [vmem:[#allocation2 + $0x14] sm:$0xf]  ;;  %v1072_v16 = vld [vmem:[#allocation2 + $0x44] sm:$0xf] }
 0x2f2   : > { %1040 = vst [vmem:[#allocation3 + $0x8] sm:$0xff] %v1183_v1  ;;  %v1155_v14 = vld [vmem:[#allocation2 + $0x3c] sm:$0xff] }
 0x2f6   : > { %1079 = vrot.lane.b32.xlu2 %v1070_v3, %s3075_s12 }
 0x2f7   : > { %1163 = vrot.lane.b32.xlu1 %v1154_v4, %s3072_s28 }
 0x2f8   : > { %1161 = vrot.lane.b32.xlu0 %v1153_v5, %s3072_s28 }
 0x2fe   : > { %1189 = vrot.lane.b32.xlu2 %v1181_v62, %s3071_s27 }
 0x2ff   : > { %1107 = vrot.lane.b32.xlu1 %v1098_v6, %s3074_s11 }
 0x300   : > { %1105 = vrot.lane.b32.xlu0 %v1181_v62, %s3074_s11 }
 0x306   : > { %1245 = vrot.lane.b32.xlu2 %v1153_v5, %s3073_s29 }
 0x307   : > { %1077 = vrot.lane.b32.xlu1 %v1153_v5, %s3075_s12 }
 0x308   : > { %1221 = vrot.lane.b32.xlu0 %v1211_v7, %s3068_s24 }
 0x30e   : > { %1195 = vrot.lane.b32.xlu2 %v1184_v52, %s3071_s27 }
 0x30f   : > { %1223 = vrot.lane.b32.xlu1 %v1212_v9, %s3068_s24 }
 0x310   : > { %1137 = vrot.lane.b32.xlu0 %v1211_v7, %s3069_s25 }
 0x316   : > { %1251 = vrot.lane.b32.xlu2 %v1240_v12, %s3073_s29 }
 0x317   : > { %1139 = vrot.lane.b32.xlu1 %v1128_v47, %s3069_s25 }
 0x318   : > { %1167 = vrot.lane.b32.xlu0 %v1156_v13, %s3072_s28 }
 0x31e   : > { %1165 = vrot.lane.b32.xlu2 %v1155_v14, %s3072_s28 }
 0x31f   : > { %1193 = vrot.lane.b32.xlu1 %v1183_v1, %s3071_s27 }
 0x320   : > { %1111 = vrot.lane.b32.xlu0 %v1100_v15, %s3074_s11 }
 0x326   : > { %1049 = vrot.lane.b32.xlu2 %v1209_v55, %s3070_s26 }
 0x327   : > { %1249 = vrot.lane.b32.xlu1 %v1155_v14, %s3073_s29 }
 0x328   : > { %1081 = vrot.lane.b32.xlu0 %v1155_v14, %s3075_s12 }
 0x32e   : > { %1109 = vrot.lane.b32.xlu2 %v1183_v1, %s3074_s11 }
 0x32f   : > { %1083 = vrot.lane.b32.xlu1 %v1072_v16, %s3075_s12 }
 0x330   : > { %1051 = vrot.lane.b32.xlu0 %v1042_v18, %s3070_s26 }
 0x336   : > { %1055 = vrot.lane.b32.xlu2 %v1044_v19, %s3070_s26 }
 0x337   : > { %1053 = vrot.lane.b32.xlu1 %v1211_v7, %s3070_s26 }
 0x338   : > { %1447 = vperm.xlu0 %3054, %v1443_v22  }
 0x33e   : > { %1463 = vperm.xlu2 %3056, %v1459_v60  }
 0x33f   : > { %1452 = vperm.xlu1 %3055, %v1444_v25  }
 0x340   : > { %v1220_v27 = vpop.permute.xlu2 %1219  ;;  %1468 = vperm.xlu0 %3054, %v1460_v26  }
 0x341   : > { %v1226_v36 = vrot.slane %v1220_v27, 4 }
 0x346   : > { %1488 = vperm.xlu2 %3056, %v1480_v28  }
 0x347   : > { %1483 = vperm.xlu1 %3055, %v1479_v29  }
 0x348   : > { %v1136_v31 = vpop.permute.xlu2 %1135  ;;  %1499 = vperm.xlu0 %3054, %v1495_v30  }
 0x349   : > { %v1142_v49 = vrot.slane %v1136_v31, 4 }
 0x34f   : > { %1504 = vperm.xlu1 %3055, %v1496_v32  }
 0x350   : > { %v1080_v33 = vpop.permute.xlu2 %1079 }
 0x351   : > { %v1086_v14 = vrot.slane %v1080_v33, 4 }
 0x358   : > { %v1190_v34 = vpop.permute.xlu2 %1189 }
 0x359   : > { %v1218_v35 = vpop.permute.xlu1 %1217  ;;  %v1197_v38 = vrot.slane %v1190_v34, 4 }
 0x35a   : > { %v1225_v2 = vrot.slane %v1218_v35, 4  ;;  %v1192_v37 = vpop.permute.xlu0 %1191 }
 0x35b   : > { %v1198_v39 = vrot.slane %v1192_v37, 4 }
 0x35c   : > { %v1229_v40 = vsel %vm533_vm14, %v1225_v2, %v1226_v36 }
 0x35d   : > { %v1230_v41 = vsel %vm709_vm15, %v1218_v35, %v1229_v40  ;;  %v1201_v42 = vsel %vm533_vm14, %v1197_v38, %v1198_v39 }
 0x35e   : > { %1235 = vst [vmem:[#allocation3 + $0x70] sm:$0xff] %v1230_v41  ;;  %v1202_v45 = vsel %vm680_vm2, %v1190_v34, %v1201_v42 }
 0x35f   : > { %1207 = vst [vmem:[#allocation3 + $0x60] sm:$0xff] %v1202_v45 }
 0x360   : > { %v1246_v46 = vpop.permute.xlu2 %1245 }
 0x361   : > { %v1134_v48 = vpop.permute.xlu1 %1133  ;;  %v1253_v53 = vrot.slane %v1246_v46, 4 }
 0x362   : > { %v1141_v50 = vrot.slane %v1134_v48, 4  ;;  %v1248_v51 = vpop.permute.xlu0 %1247 }
 0x363   : > { %v1254_v54 = vrot.slane %v1248_v51, 4 }
 0x364   : > { %v1145_v55 = vsel %vm533_vm14, %v1141_v50, %v1142_v49 }
 0x365   : > { %v1146_v57 = vsel %vm622_vm1, %v1134_v48, %v1145_v55  ;;  %v1257_v58 = vsel %vm533_vm14, %v1253_v53, %v1254_v54  ;;  %v2771_v39 = vld [vmem:[#allocation3 + $0x70] sm:$0xf] }
 0x366   : > { %1151 = vst [vmem:[#allocation3 + $0x40] sm:$0xff] %v1146_v57  ;;  %v1258_v59 = vsel %vm738_vm4, %v1246_v46, %v1257_v58 }
 0x367   : > { %1263 = vst [vmem:[#allocation3 + $0x80] sm:$0xff] %v1258_v59 }
 0x368   : > { %v1196_v61 = vpop.permute.xlu2 %1195 }
 0x369   : > { %v1164_v62 = vpop.permute.xlu1 %1163  ;;  %v1200_v48 = vrot.slane %v1196_v61, 4 }
 0x36a   : > { %v1170_v63 = vrot.slane %v1164_v62, 4  ;;  %v1162_v0 = vpop.permute.xlu0 %1161 }
 0x36b   : > { %v1169_v1 = vrot.slane %v1162_v0, 4 }
 0x36d   : > { %v1173_v3 = vsel %vm533_vm14, %v1169_v1, %v1170_v63 }
 0x36e   : > { %v1174_v4 = vsel %vm651_vm3, %v1162_v0, %v1173_v3  ;;  %v2763_v3 = vld [vmem:[#allocation3 + $0x60] sm:$0xf] }
 0x36f   : > { %1179 = vst [vmem:[#allocation3 + $0x50] sm:$0xff] %v1174_v4 }
 0x370   : > { %v1252_v6 = vpop.permute.xlu2 %1251 }
 0x371   : > { %v1108_v5 = vpop.permute.xlu1 %1107  ;;  %v1256_v62 = vrot.slane %v1252_v6, 4 }
 0x372   : > { %v1114_v7 = vrot.slane %v1108_v5, 4  ;;  %v1106_v52 = vpop.permute.xlu0 %1105 }
 0x373   : > { %v1113_v9 = vrot.slane %v1106_v52, 4 }
 0x375   : > { %v1117_v12 = vsel %vm533_vm14, %v1113_v9, %v1114_v7 }
 0x376   : > { %v1118_v47 = vsel %vm593_vm5, %v1106_v52, %v1117_v12  ;;  %v2755_v9 = vld [vmem:[#allocation3 + $0x50] sm:$0xf] }
 0x377   : > { %1123 = vst [vmem:[#allocation3 + $0x30] sm:$0xff] %v1118_v47 }
 0x378   : > { %v1166_v18 = vpop.permute.xlu2 %1165 }
 0x379   : > { %v1078_v13 = vpop.permute.xlu1 %1077  ;;  %v1171_v35 = vrot.slane %v1166_v18, 4 }
 0x37a   : > { %v1085_v15 = vrot.slane %v1078_v13, 4  ;;  %v1222_v16 = vpop.permute.xlu0 %1221 }
 0x37b   : > { %v1227_v25 = vrot.slane %v1222_v16, 4 }
 0x37c   : > { %v1089_v19 = vsel %vm533_vm14, %v1085_v15, %v1086_v14 }
 0x37d   : > { %v1090_v22 = vsel %vm564_vm6, %v1078_v13, %v1089_v19  ;;  %v2779_v19 = vld [vmem:[#allocation3 + $0x80] sm:$0xf] }
 0x37e   : > { %1095 = vst [vmem:[#allocation3 + $0x20] sm:$0xff] %v1090_v22 }
 0x380   : > { %v3450_v30 = vpop.permute.xlu2 %1049 }
 0x381   : > { %v1224_v60 = vpop.permute.xlu1 %1223  ;;  %v1057_v6 = vrot.slane %v3450_v30, 4 }
 0x382   : > { %v1228_v26 = vrot.slane %v1224_v60, 4  ;;  %v1138_v27 = vpop.permute.xlu0 %1137 }
 0x383   : > { %v1143_v32 = vrot.slane %v1138_v27, 4 }
 0x384   : > { %v1231_v28 = vsel %vm533_vm14, %v1227_v25, %v1228_v26  ;;  %v2975_v25 = vld [vmem:[%s3789_s6 + $0x4] sm:$0xf]  ;;  %v2709_v26 = vld [vmem:[%s3789_s6 + $0x8] sm:$0xf0] }
 0x385   : > { %v1232_v29 = vsel %vm709_vm15, %v1222_v16, %v1231_v28  ;;  %v2747_v16 = vld [vmem:[#allocation3 + $0x40] sm:$0xf] }
 0x386   : > { %1236 = vst [vmem:[#allocation3 + $0x78] sm:$0xff] %v1232_v29 }
 0x388   : > { %v1110_v45 = vpop.permute.xlu2 %1109 }
 0x389   : > { %v1140_v31 = vpop.permute.xlu1 %1139  ;;  %v1115_v51 = vrot.slane %v1110_v45, 4 }
 0x38a   : > { %v1144_v33 = vrot.slane %v1140_v31, 4  ;;  %v1168_v34 = vpop.permute.xlu0 %1167  ;;  %v2993_v31 = vld [vmem:[#allocation3 + $0x84] sm:$0xf] }
 0x38b   : > { %v1172_v36 = vrot.slane %v1168_v34, 4 }
 0x38c   : > { %v1147_v2 = vsel %vm533_vm14, %v1143_v32, %v1144_v33 }
 0x38d   : > { %v1148_v37 = vsel %vm622_vm1, %v1138_v27, %v1147_v2  ;;  %v1175_v38 = vsel %vm533_vm14, %v1171_v35, %v1172_v36  ;;  %v2992_v40 = vld [vmem:[#allocation3 + $0x74] sm:$0xf0]  ;;  %v2773_v60 = vld [vmem:[#allocation3 + $0x78] sm:$0xf0]  ;;  %v2991_v2 = vld [vmem:[#allocation3 + $0x74] sm:$0xf] }
 0x38e   : > { %1152 = vst [vmem:[#allocation3 + $0x48] sm:$0xff] %v1148_v37  ;;  %v1176_v41 = vsel %vm651_vm3, %v1166_v18, %v1175_v38  ;;  %v2772_v42 = vor.u32 %v2992_v40, %v2771_v39  ;;  %v2776_v38 = vor.u32 %v2991_v2, %v2773_v60  ;;  %v2712_v40 = vor.u32 %v2975_v25, %v2709_v26  ;;  %v2717_v25 = vld [vmem:[#allocation3 + $0x8] sm:$0xf0]  ;;  %v2977_v26 = vld [vmem:[#allocation3 + $0x4] sm:$0xf] }
 0x38f   : > { %1180 = vst [vmem:[#allocation3 + $0x58] sm:$0xff] %v1176_v41 }
 0x390   : > { %1387 = vmatpush.bf16.msra.mxu1 %v2772_v42  ;;  %v1056_v37 = vpop.permute.xlu2 %1055 }
 0x391   : > { %v1194_v46 = vpop.permute.xlu1 %1193 }
 0x392   : > { %v1199_v49 = vrot.slane %v1194_v46, 4  ;;  %v1112_v50 = vpop.permute.xlu0 %1111 }
 0x393   : > { %v1116_v53 = vrot.slane %v1112_v50, 4 }
 0x394   : > { %v1203_v54 = vsel %vm533_vm14, %v1199_v49, %v1200_v48 }
 0x395   : > { %v1204_v55 = vsel %vm680_vm2, %v1194_v46, %v1203_v54  ;;  %v1119_v57 = vsel %vm533_vm14, %v1115_v51, %v1116_v53  ;;  %v2986_v18 = vld [vmem:[#allocation3 + $0x44] sm:$0xf0]  ;;  %v1060_v46 = vrot.slane %v1056_v37, 4 }
 0x396   : > { %1208 = vst [vmem:[#allocation3 + $0x68] sm:$0xff] %v1204_v55  ;;  %v1120_v58 = vsel %vm593_vm5, %v1110_v45, %v1119_v57  ;;  %v2988_v7 = vld [vmem:[#allocation3 + $0x54] sm:$0xf0]  ;;  %v2748_v34 = vor.u32 %v2986_v18, %v2747_v16  ;;  %v2739_v45 = vld [vmem:[#allocation3 + $0x30] sm:$0xf] }
 0x397   : > { %1124 = vst [vmem:[#allocation3 + $0x38] sm:$0xff] %v1120_v58  ;;  %v2756_v14 = vor.u32 %v2988_v7, %v2755_v9  ;;  %v2757_v53 = vld [vmem:[#allocation3 + $0x58] sm:$0xf0]  ;;  %v2731_v55 = vld [vmem:[#allocation3 + $0x20] sm:$0xf] }
 0x398   : > { %v2983_v7 = vld [vmem:[#allocation3 + $0x34] sm:$0xf]  ;;  %v2978_v9 = vld [vmem:[#allocation3 + $0x4] sm:$0xf0] }
 0x399   : > { %v1250_v59 = vpop.permute.xlu1 %1249 }
 0x39a   : > { %v1255_v63 = vrot.slane %v1250_v59, 4  ;;  %v1082_v0 = vpop.permute.xlu0 %1081 }
 0x39b   : > { %v1087_v12 = vrot.slane %v1082_v0, 4 }
 0x39c   : > { %v1259_v61 = vsel %vm533_vm14, %v1255_v63, %v1256_v62  ;;  %v2749_v63 = vld [vmem:[#allocation3 + $0x48] sm:$0xf0] }
 0x39d   : > { %v1260_v1 = vsel %vm738_vm4, %v1250_v59, %v1259_v61  ;;  %v2990_v4 = vld [vmem:[#allocation3 + $0x64] sm:$0xf0]  ;;  %v2765_v41 = vld [vmem:[#allocation3 + $0x68] sm:$0xf0]  ;;  %v2987_v59 = vld [vmem:[#allocation3 + $0x54] sm:$0xf] }
 0x39e   : > { %1264 = vst [vmem:[#allocation3 + $0x88] sm:$0xff] %v1260_v1  ;;  %v2764_v5 = vor.u32 %v2990_v4, %v2763_v3  ;;  %v2984_v39 = vld [vmem:[#allocation3 + $0x34] sm:$0xf0]  ;;  %v2760_v62 = vor.u32 %v2987_v59, %v2757_v53  ;;  %v2741_v1 = vld [vmem:[#allocation3 + $0x38] sm:$0xf0] }
 0x39f   : > { %v2740_v49 = vor.u32 %v2984_v39, %v2739_v45 }
 0x3a0   : > { %1388 = vmatpush.bf16.msra.mxu1 %v2764_v5 }
 0x3a1   : > { %v1084_v52 = vpop.permute.xlu1 %1083 }
 0x3a2   : > { %v1088_v47 = vrot.slane %v1084_v52, 4  ;;  %v1052_v13 = vpop.permute.xlu0 %1051  ;;  %v2744_v52 = vor.u32 %v2983_v7, %v2741_v1 }
 0x3a3   : > { %v1058_v15 = vrot.slane %v1052_v13, 4  ;;  %v2976_v13 = vld [vmem:[%s3789_s6 + $0x4] sm:$0xf0] }
 0x3a4   : > { %v1091_v22 = vsel %vm533_vm14, %v1087_v12, %v1088_v47  ;;  %1389 = vmatpush.bf16.msra.mxu1 %v2756_v14  ;;  %v2707_v47 = vld [vmem:[%s3789_s6] sm:$0xf]  ;;  %v2715_v14 = vld [vmem:[#allocation3] sm:$0xf] }
 0x3a5   : > { %v1092_v27 = vsel %vm564_vm6, %v1082_v0, %v1091_v22  ;;  %v1061_v28 = vsel %vm533_vm14, %v1057_v6, %v1058_v15  ;;  %v2994_v29 = vld [vmem:[#allocation3 + $0x84] sm:$0xf0]  ;;  %v2781_v32 = vld [vmem:[#allocation3 + $0x88] sm:$0xf0]  ;;  %v2985_v0 = vld [vmem:[#allocation3 + $0x44] sm:$0xf]  ;;  %v2716_v6 = vor.u32 %v2978_v9, %v2715_v14  ;;  %v2708_v18 = vor.u32 %v2976_v13, %v2707_v47 }
 0x3a6   : > { %1096 = vst [vmem:[#allocation3 + $0x28] sm:$0xff] %v1092_v27  ;;  %v1062_v33 = vsel %vm535_vm7, %v3450_v30, %v1061_v28  ;;  %v2780_v35 = vor.u32 %v2994_v29, %v2779_v19  ;;  %v2784_v36 = vor.u32 %v2993_v31, %v2781_v32  ;;  %v2989_v30 = vld [vmem:[#allocation3 + $0x64] sm:$0xf]  ;;  %v2752_v61 = vor.u32 %v2985_v0, %v2749_v63 }
 0x3a7   : > { %1067 = vst [vmem:[#allocation3 + $0x10] sm:$0xff] %v1062_v33  ;;  %v2768_v50 = vor.u32 %v2989_v30, %v2765_v41  ;;  %v2981_v15 = vld [vmem:[#allocation3 + $0x24] sm:$0xf]  ;;  %v2720_v27 = vor.u32 %v2977_v26, %v2717_v25 }
 0x3a8   : > { %1390 = vmatpush.bf16.msra.mxu1 %v2748_v34  ;;  %1408 = vmatpush.bf16.msrb.mxu3 %v2780_v35  ;;  %v1464_v35 = vpop.permute.xlu2 %1463 }
 0x3a9   : > { %1436 = vmatpush.bf16.msrb.mxu0 %v2784_v36  ;;  %v1054_v42 = vpop.permute.xlu1 %1053 }
 0x3aa   : > { %v1059_v48 = vrot.slane %v1054_v42, 4  ;;  %v1448_v29 = vpop.permute.xlu0 %1447 }
 0x3ab   : > { %2785 = vmatmul.msk.bf16.vlgmr.msrb.gmra.mxu3 %vm865_vm8, %v2712_v40 }
 0x3ac   : > { %1415 = vmatpush.bf16.msra.mxu3 %v2776_v38  ;;  %v1063_v51 = vsel %vm533_vm14, %v1059_v48, %v1060_v46  ;;  %1391 = vmatpush.bf16.msra.mxu1 %v2740_v49 }
 0x3ad   : > { %2786 = vmatmul.msk.bf16.vlgmr.msrb.gmra.mxu0 %vm865_vm8, %v2712_v40  ;;  %v1064_v54 = vsel %vm535_vm7, %v1054_v42, %v1063_v51  ;;  %v2982_v57 = vld [vmem:[#allocation3 + $0x24] sm:$0xf0]  ;;  %v2733_v12 = vld [vmem:[#allocation3 + $0x28] sm:$0xf0] }
 0x3ae   : > { %1068 = vst [vmem:[#allocation3 + $0x18] sm:$0xff] %v1064_v54  ;;  %v2732_v58 = vor.u32 %v2982_v57, %v2731_v55  ;;  %v2723_v3 = vld [vmem:[#allocation3 + $0x10] sm:$0xf]  ;;  %v2736_v16 = vor.u32 %v2981_v15, %v2733_v12  ;;  %v2979_v22 = vld [vmem:[#allocation3 + $0x14] sm:$0xf] }
 0x3b0   : > { %1416 = vmatpush.bf16.msra.mxu3 %v2768_v50  ;;  %1392 = vmatpush.bf16.msra.mxu1 %v2732_v58  ;;  %v1489_v57 = vpop.permute.xlu2 %1488 }
 0x3b1   : > { %v1453_v34 = vpop.permute.xlu1 %1452 }
 0x3b2   : > { %v1469_v37 = vpop.permute.xlu0 %1468 }
 0x3b4   : > { %1417 = vmatpush.bf16.msra.mxu3 %v2760_v62 }
 0x3b5   : > { %v2980_v4 = vld [vmem:[#allocation3 + $0x14] sm:$0xf0]  ;;  %v2725_v19 = vld [vmem:[#allocation3 + $0x18] sm:$0xf0] }
 0x3b6   : > { %v2724_v5 = vor.u32 %v2980_v4, %v2723_v3  ;;  %v2728_v60 = vor.u32 %v2979_v22, %v2725_v19 }
 0x3b8   : > { %1418 = vmatpush.bf16.msra.mxu3 %v2752_v61  ;;  %1393 = vmatpush.bf16.msra.mxu1 %v2724_v5 }
 0x3b9   : > { %v1484_v45 = vpop.permute.xlu1 %1483 }
 0x3ba   : > { %v1500_v50 = vpop.permute.xlu0 %1499 }
 0x3bc   : > { %1419 = vmatpush.bf16.msra.mxu3 %v2744_v52  ;;  %1394 = vmatpush.bf16.msra.mxu1 %v2716_v6 }
 0x3bf   : > { %1395 = vmatmul.bf16.vlgmr.msra.gmra.mxu1 %v2708_v18 }
 0x3c0   : > { %1420 = vmatpush.bf16.msra.mxu3 %v2736_v16 }
 0x3c1   : > { %v1505_v4 = vpop.permute.xlu1 %1504 }
 0x3c4   : > { %1421 = vmatpush.bf16.msra.mxu3 %v2728_v60 }
 0x3c8   : > { %1422 = vmatpush.bf16.msra.mxu3 %v2720_v27 }
 0x3cb   : > { %1423 = vmatmul.bf16.vlgmr.msra.gmra.mxu3 %v2708_v18 }
 0x42a   : > { %v1438_v42 = vpop.f32.mrf.mxu0 }
 0x42e   : > { %v1410_v28 = vpop.f32.mrf.mxu3 }
 0x432   : > { %v1440_v58 = vpop.f32.mrf.mxu0 }
 0x436   : > { %v1412_v36 = vpop.f32.mrf.mxu3 }
 0x43c   : > { %v1396_v31 = vpop.f32.mrf.mxu1 }
 0x43d   : > { %v1411_v32 = vadd.f32 %v1410_v28, %v1396_v31 }
 0x43f   : > { %v1455_v33 = vmul.f32 %v1448_v29, %v1411_v32 }
 0x441   : > { %v1471_v2 = vadd.f32 %v1464_v35, %v1455_v33 }
 0x443   : > { %v3486_v40 = vadd.f32 %v1471_v2, %v389_v10 }
 0x444   : > { %v1398_v38 = vpop.f32.mrf.mxu1 }
 0x445   : > { %v1413_v39 = vadd.f32 %v1412_v36, %v1398_v38  ;;  %v1491_v46 = vmul.f32 %v1484_v45, %v3486_v40 }
 0x447   : > { %v1457_v41 = vmul.f32 %v1453_v34, %v1413_v39  ;;  %v1507_v53 = vadd.f32 %v1500_v50, %v1491_v46 }
 0x449   : > { %v1473_v49 = vadd.f32 %v1469_v37, %v1457_v41  ;;  %v1515_v62 = vmul.f32 0.02, %v1507_v53  ;;  %vm1511_vm10 = vcmp.gt.f32.partialorder %v1507_v53, 0.0 }
 0x44b   : > { %v3491_v54 = vadd.f32 %v1473_v49, %v391_v20  ;;  %v1519_v20 = vsel %vm1511_vm10, %v1507_v53, %v1515_v62 }
 0x44c   : > { %v1567_v9 = vmul.f32 %v3190_v43, %v1519_v20  ;;  %v1523_v13 = vmul.f32 %v3175_v23, %v1519_v20 }
 0x44d   : > { %v1493_v63 = vmul.f32 %v1489_v57, %v3491_v54 }
 0x44e   : > { %v1424_v48 = vpop.f32.mrf.mxu3 }
 0x44f   : > { %v1439_v30 = vadd.f32 %v1438_v42, %v1424_v48  ;;  %v1509_v5 = vadd.f32 %v1505_v4, %v1493_v63 }
 0x451   : > { %v1456_v51 = vmul.f32 %v1448_v29, %v1439_v30  ;;  %v1517_v15 = vmul.f32 0.02, %v1509_v5  ;;  %vm1513_vm9 = vcmp.gt.f32.partialorder %v1509_v5, 0.0 }
 0x453   : > { %v1472_v55 = vadd.f32 %v1464_v35, %v1456_v51  ;;  %v1521_v19 = vsel %vm1513_vm9, %v1509_v5, %v1517_v15 }
 0x454   : > { %v1525_v60 = vmul.f32 %v3175_v23, %v1521_v19  ;;  %v1569_v26 = vmul.f32 %v3190_v43, %v1521_v19 }
 0x455   : > { %v3495_v10 = vadd.f32 %v1472_v55, %v390_v11 }
 0x456   : > { %v1426_v59 = vpop.f32.mrf.mxu3 }
 0x457   : > { %v1492_v0 = vmul.f32 %v1484_v45, %v3495_v10  ;;  %v1441_v61 = vadd.f32 %v1440_v58, %v1426_v59 }
 0x459   : > { %v1508_v1 = vadd.f32 %v1500_v50, %v1492_v0  ;;  %v1458_v3 = vmul.f32 %v1453_v34, %v1441_v61 }
 0x45b   : > { %v1474_v7 = vadd.f32 %v1469_v37, %v1458_v3  ;;  %vm1512_vm11 = vcmp.gt.f32.partialorder %v1508_v1, 0.0  ;;  %v1516_v52 = vmul.f32 0.02, %v1508_v1 }
 0x45d   : > { %v3501_v8 = vadd.f32 %v1474_v7, %v392_v21  ;;  %v1520_v11 = vsel %vm1512_vm11, %v1508_v1, %v1516_v52 }
 0x45e   : > { %v1547_v12 = vpack.c.bf16 %v1520_v11, %v1519_v20  ;;  %v1568_v47 = vmul.f32 %v3192_v44, %v1520_v11  ;;  %v1524_v14 = vmul.f32 %v3177_v24, %v1520_v11 }
 0x45f   : > { %v1494_v6 = vmul.f32 %v1489_v57, %v3501_v8 }
 0x460   : > { %1551 = vrot.lane.b32.xlu2 %v1547_v12, %s3067_s23  ;;  %v1571_v16 = vpack.c.bf16 %v1568_v47, %v1567_v9  ;;  %v1527_v18 = vpack.c.bf16 %v1524_v14, %v1523_v13  ;;  %v1998_v14 = vld [vmem:[%s3787_s4 + $0x8] sm:$0xff] }
 0x461   : > { %v1510_v17 = vadd.f32 %v1505_v4, %v1494_v6  ;;  %v2013_v6 = vld [vmem:[%s3788_s5] sm:$0xff] }
 0x462   : > { %1575 = vrot.lane.b32.xlu0 %v1571_v16, %s3067_s23  ;;  %1531 = vrot.lane.b32.xlu1 %v1527_v18, %s3067_s23  ;;  %v1997_v18 = vld [vmem:[%s3787_s4] sm:$0xff] }
 0x463   : > { %vm1514_vm10 = vcmp.gt.f32.partialorder %v1510_v17, 0.0  ;;  %v1518_v21 = vmul.f32 0.02, %v1510_v17 }
 0x465   : > { %v1522_v22 = vsel %vm1514_vm10, %v1510_v17, %v1518_v21 }
 0x466   : > { %v1526_v25 = vmul.f32 %v3177_v24, %v1522_v22  ;;  %v1570_v27 = vmul.f32 %v3192_v44, %v1522_v22  ;;  %v1548_v28 = vpack.c.bf16 %v1522_v22, %v1521_v19  ;;  %v2014_v19 = vld [vmem:[%s3788_s5 + $0x8] sm:$0xff] }
 0x468   : > { %v1528_v29 = vpack.c.bf16 %v1526_v25, %v1525_v60  ;;  %v1572_v31 = vpack.c.bf16 %v1570_v27, %v1569_v26 }
 0x46a   : > { %1553 = vrot.lane.b32.xlu0 %v1548_v28, %s3067_s23  ;;  %1533 = vrot.lane.b32.xlu2 %v1528_v29, %s3067_s23 }
 0x46b   : > { %1577 = vrot.lane.b32.xlu1 %v1572_v31, %s3067_s23 }
 0x4ba   : > { %v1552_v32 = vpop.permute.xlu2 %1551 }
 0x4bb   : > { %v1555_v33 = vrot.slane %v1552_v32, 4 }
 0x4bd   : > { %v1557_v34 = vsel %vm451_vm12, %v1555_v33, %v1552_v32  ;;  %1564 = vst.msk [vmem:[#allocation2 + $0x20] sm:$0xf] %vm334_vm0, %v1555_v33 }
 0x4be   : > { %1563 = vst.msk [vmem:[#allocation2 + $0x18] sm:$0xff] %vm3204_vm13, %v1557_v34 }
 0x4c4   : > { %v1534_v35 = vpop.permute.xlu2 %1533  ;;  %v1764_v36 = vld [vmem:[#allocation2 + $0x20] sm:$0xf] }
 0x4c5   : > { %v1536_v2 = vrot.slane %v1534_v35, 4  ;;  %1773 = vrot.lane.b32.xlu0 %v1764_v36, %s3068_s24  ;;  %v1763_v37 = vld [vmem:[#allocation2 + $0x18] sm:$0xff]  ;;  %v1680_v39 = vld [vmem:[#allocation2 + $0x20] sm:$0xf] }
 0x4c6   : > { %1771 = vrot.lane.b32.xlu2 %v1763_v37, %s3068_s24  ;;  %v1596_v16 = vld [vmem:[#allocation2 + $0x20] sm:$0xf] }
 0x4c7   : > { %v1538_v38 = vsel %vm451_vm12, %v1536_v2, %v1534_v35  ;;  %1546 = vst.msk [vmem:[#allocation2 + $0x14] sm:$0xf] %vm334_vm0, %v1536_v2 }
 0x4c8   : > { %1545 = vst.msk [vmem:[#allocation2 + $0xc] sm:$0xff] %vm3204_vm13, %v1538_v38 }
 0x4cd   : > { %1689 = vrot.lane.b32.xlu0 %v1680_v39, %s3069_s25 }
 0x4ce   : > { %1687 = vrot.lane.b32.xlu2 %v1763_v37, %s3069_s25  ;;  %v1738_v20 = vld [vmem:[#allocation2 + $0x14] sm:$0xf] }
 0x4cf   : > { %v1592_v41 = vld [vmem:[#allocation2 + $0xc] sm:$0xff]  ;;  %v1654_v7 = vld [vmem:[#allocation2 + $0x14] sm:$0xf] }
 0x4d0   : > { %1594 = vst [vmem:[#allocation3 + $0x8] sm:$0xff] %v1592_v41 }
 0x4d4   : > { %v1576_v42 = vpop.permute.xlu0 %1575  ;;  %v1532_v45 = vpop.permute.xlu1 %1531 }
 0x4d5   : > { %v1579_v46 = vrot.slane %v1576_v42, 4  ;;  %v1535_v48 = vrot.slane %v1532_v45, 4 }
 0x4d7   : > { %v1581_v49 = vsel %vm451_vm12, %v1579_v46, %v1576_v42  ;;  %1588 = vst.msk [vmem:[#allocation2 + $0x38] sm:$0xf] %vm334_vm0, %v1579_v46  ;;  %v1537_v30 = vsel %vm451_vm12, %v1535_v48, %v1532_v45 }
 0x4d8   : > { %1587 = vst.msk [vmem:[#allocation2 + $0x30] sm:$0xff] %vm3204_vm13, %v1581_v49 }
 0x4d9   : > { %1543 = vst.msk [vmem:[#allocation2] sm:$0xff] %vm3204_vm13, %v1537_v30 }
 0x4da   : > { %1544 = vst.msk [vmem:[#allocation2 + $0x8] sm:$0xf] %vm334_vm0, %v1535_v48 }
 0x4dc   : > { %v1554_v50 = vpop.permute.xlu0 %1553 }
 0x4dd   : > { %v1556_v51 = vrot.slane %v1554_v50, 4  ;;  %v1578_v53 = vpop.permute.xlu1 %1577 }
 0x4de   : > { %v1580_v55 = vrot.slane %v1578_v53, 4  ;;  %v1624_v57 = vld [vmem:[#allocation2 + $0x38] sm:$0xf] }
 0x4df   : > { %v1708_v58 = vld [vmem:[#allocation2 + $0x38] sm:$0xf]  ;;  %v1558_v59 = vsel %vm451_vm12, %v1556_v51, %v1554_v50  ;;  %1566 = vst.msk [vmem:[#allocation2 + $0x2c] sm:$0xf] %vm334_vm0, %v1556_v51  ;;  %1633 = vrot.lane.b32.xlu0 %v1624_v57, %s3075_s12  ;;  %v1623_v3 = vld [vmem:[#allocation2 + $0x30] sm:$0xff] }
 0x4e0   : > { %1717 = vrot.lane.b32.xlu2 %v1708_v58, %s3072_s28  ;;  %v1591_v62 = vld [vmem:[#allocation2] sm:$0xff]  ;;  %1565 = vst.msk [vmem:[#allocation2 + $0x24] sm:$0xff] %vm3204_vm13, %v1558_v59  ;;  %v1582_v63 = vsel %vm451_vm12, %v1580_v55, %v1578_v53  ;;  %v1792_v61 = vld [vmem:[#allocation2 + $0x38] sm:$0xf] }
 0x4e1   : > { %1593 = vst [vmem:[#allocation3] sm:$0xff] %v1591_v62  ;;  %v1736_v0 = vld [vmem:[#allocation2 + $0x8] sm:$0xf] }
 0x4e2   : > { %1589 = vst.msk [vmem:[#allocation2 + $0x3c] sm:$0xff] %vm3204_vm13, %v1582_v63  ;;  %1745 = vrot.lane.b32.xlu1 %v1736_v0, %s3071_s27  ;;  %v1652_v1 = vld [vmem:[#allocation2 + $0x8] sm:$0xf] }
 0x4e3   : > { %1590 = vst.msk [vmem:[#allocation2 + $0x44] sm:$0xf] %vm334_vm0, %v1580_v55 }
 0x4e6   : > { %v1766_v4 = vld [vmem:[#allocation2 + $0x2c] sm:$0xf] }
 0x4e7   : > { %1743 = vrot.lane.b32.xlu0 %v1591_v62, %s3071_s27  ;;  %v1682_v5 = vld [vmem:[#allocation2 + $0x2c] sm:$0xf]  ;;  %v1765_v52 = vld [vmem:[#allocation2 + $0x24] sm:$0xff] }
 0x4e8   : > { %1801 = vrot.lane.b32.xlu2 %v1792_v61, %s3073_s29  ;;  %v1598_v13 = vld [vmem:[#allocation2 + $0x2c] sm:$0xf] }
 0x4e9   : > { %v1709_v9 = vld [vmem:[#allocation2 + $0x3c] sm:$0xff] }
 0x4ea   : > { %1661 = vrot.lane.b32.xlu1 %v1652_v1, %s3074_s11  ;;  %v1626_v11 = vld [vmem:[#allocation2 + $0x44] sm:$0xf] }
 0x4eb   : > { %v1710_v12 = vld [vmem:[#allocation2 + $0x44] sm:$0xf] }
 0x4ec   : > { %v1794_v47 = vld [vmem:[#allocation2 + $0x44] sm:$0xf] }
 0x4ef   : > { %1659 = vrot.lane.b32.xlu0 %v1591_v62, %s3074_s11 }
 0x4f0   : > { %1631 = vrot.lane.b32.xlu2 %v1623_v3, %s3075_s12 }
 0x4f2   : > { %1715 = vrot.lane.b32.xlu1 %v1623_v3, %s3072_s28 }
 0x4f7   : > { %1749 = vrot.lane.b32.xlu0 %v1738_v20, %s3071_s27 }
 0x4f8   : > { %1777 = vrot.lane.b32.xlu2 %v1766_v4, %s3068_s24 }
 0x4fa   : > { %1799 = vrot.lane.b32.xlu1 %v1623_v3, %s3073_s29 }
 0x4ff   : > { %1665 = vrot.lane.b32.xlu0 %v1654_v7, %s3074_s11 }
 0x500   : > { %1693 = vrot.lane.b32.xlu2 %v1682_v5, %s3069_s25 }
 0x502   : > { %1775 = vrot.lane.b32.xlu1 %v1765_v52, %s3068_s24 }
 0x507   : > { %1603 = vrot.lane.b32.xlu0 %v1763_v37, %s3070_s26 }
 0x508   : > { %1747 = vrot.lane.b32.xlu2 %v1592_v41, %s3071_s27 }
 0x50a   : > { %1691 = vrot.lane.b32.xlu1 %v1765_v52, %s3069_s25 }
 0x50f   : > { %1719 = vrot.lane.b32.xlu0 %v1709_v9, %s3072_s28 }
 0x510   : > { %1637 = vrot.lane.b32.xlu2 %v1626_v11, %s3075_s12 }
 0x512   : > { %1721 = vrot.lane.b32.xlu1 %v1710_v12, %s3072_s28 }
 0x517   : > { %1803 = vrot.lane.b32.xlu0 %v1709_v9, %s3073_s29 }
 0x518   : > { %1663 = vrot.lane.b32.xlu2 %v1592_v41, %s3074_s11 }
 0x51a   : > { %1805 = vrot.lane.b32.xlu1 %v1794_v47, %s3073_s29 }
 0x51f   : > { %1609 = vrot.lane.b32.xlu0 %v1598_v13, %s3070_s26 }
 0x520   : > { %1607 = vrot.lane.b32.xlu2 %v1765_v52, %s3070_s26  ;;  %v1772_v15 = vpop.permute.xlu2 %1771 }
 0x521   : > { %v1779_v22 = vrot.slane %v1772_v15, 4 }
 0x522   : > { %1635 = vrot.lane.b32.xlu1 %v1709_v9, %s3075_s12 }
 0x527   : > { %2017 = vperm.xlu0 %3054, %v2013_v6  }
 0x528   : > { %2006 = vperm.xlu2 %3056, %v1998_v14   ;;  %v1688_v17 = vpop.permute.xlu2 %1687 }
 0x529   : > { %v1695_v29 = vrot.slane %v1688_v17, 4 }
 0x52a   : > { %1605 = vrot.lane.b32.xlu1 %v1596_v16, %s3070_s26 }
 0x532   : > { %2001 = vperm.xlu1 %3055, %v1997_v18  }
 0x537   : > { %v1774_v21 = vpop.permute.xlu0 %1773 }
 0x538   : > { %v1780_v60 = vrot.slane %v1774_v21, 4 }
 0x53a   : > { %v1718_v25 = vpop.permute.xlu2 %1717  ;;  %v1783_v26 = vsel %vm533_vm14, %v1779_v22, %v1780_v60  ;;  %2022 = vperm.xlu1 %3055, %v2014_v19  }
 0x53b   : > { %v1784_v27 = vsel %vm709_vm15, %v1772_v15, %v1783_v26  ;;  %v1724_v63 = vrot.slane %v1718_v25, 4 }
 0x53c   : > { %1789 = vst [vmem:[#allocation3 + $0x70] sm:$0xff] %v1784_v27 }
 0x53f   : > { %v1690_v28 = vpop.permute.xlu0 %1689 }
 0x540   : > { %v1696_v31 = vrot.slane %v1690_v28, 4 }
 0x542   : > { %v1802_v32 = vpop.permute.xlu2 %1801  ;;  %v1699_v33 = vsel %vm533_vm14, %v1695_v29, %v1696_v31 }
 0x543   : > { %v1700_v34 = vsel %vm622_vm1, %v1688_v17, %v1699_v33  ;;  %v1808_v9 = vrot.slane %v1802_v32, 4  ;;  %v2853_v33 = vld [vmem:[#allocation3 + $0x70] sm:$0xf] }
 0x544   : > { %1705 = vst [vmem:[#allocation3 + $0x40] sm:$0xff] %v1700_v34 }
 0x54a   : > { %v1632_v35 = vpop.permute.xlu2 %1631 }
 0x54b   : > { %v1639_v37 = vrot.slane %v1632_v35, 4 }
 0x551   : > { %v1634_v36 = vpop.permute.xlu0 %1633 }
 0x552   : > { %v1778_v2 = vpop.permute.xlu2 %1777  ;;  %v1640_v38 = vrot.slane %v1634_v36, 4  ;;  %v3011_v36 = vld [vmem:[#allocation3 + $0x74] sm:$0xf] }
 0x553   : > { %v1782_v19 = vrot.slane %v1778_v2, 4 }
 0x554   : > { %v1643_v39 = vsel %vm533_vm14, %v1639_v37, %v1640_v38  ;;  %v1746_v41 = vpop.permute.xlu1 %1745 }
 0x555   : > { %v1644_v42 = vsel %vm564_vm6, %v1632_v35, %v1643_v39  ;;  %v1752_v48 = vrot.slane %v1746_v41, 4 }
 0x556   : > { %1649 = vst [vmem:[#allocation3 + $0x20] sm:$0xff] %v1644_v42 }
 0x559   : > { %v1744_v46 = vpop.permute.xlu0 %1743 }
 0x55a   : > { %v1694_v45 = vpop.permute.xlu2 %1693  ;;  %v1751_v49 = vrot.slane %v1744_v46, 4 }
 0x55b   : > { %v1698_v29 = vrot.slane %v1694_v45, 4 }
 0x55c   : > { %v1755_v30 = vsel %vm533_vm14, %v1751_v49, %v1752_v48  ;;  %v1662_v50 = vpop.permute.xlu1 %1661 }
 0x55d   : > { %v1756_v51 = vsel %vm680_vm2, %v1744_v46, %v1755_v30  ;;  %v1668_v57 = vrot.slane %v1662_v50, 4 }
 0x55e   : > { %1761 = vst [vmem:[#allocation3 + $0x60] sm:$0xff] %v1756_v51 }
 0x561   : > { %v1660_v55 = vpop.permute.xlu0 %1659 }
 0x562   : > { %v1748_v53 = vpop.permute.xlu2 %1747  ;;  %v1667_v58 = vrot.slane %v1660_v55, 4 }
 0x563   : > { %v1753_v5 = vrot.slane %v1748_v53, 4 }
 0x564   : > { %v1671_v59 = vsel %vm533_vm14, %v1667_v58, %v1668_v57  ;;  %v1716_v62 = vpop.permute.xlu1 %1715 }
 0x565   : > { %v1672_v0 = vsel %vm593_vm5, %v1660_v55, %v1671_v59  ;;  %v1723_v61 = vrot.slane %v1716_v62, 4  ;;  %v2845_v45 = vld [vmem:[#allocation3 + $0x60] sm:$0xf]  ;;  %v3009_v49 = vld [vmem:[#allocation3 + $0x64] sm:$0xf] }
 0x566   : > { %1677 = vst [vmem:[#allocation3 + $0x30] sm:$0xff] %v1672_v0 }
 0x567   : > { %v1727_v1 = vsel %vm533_vm14, %v1723_v61, %v1724_v63 }
 0x568   : > { %v1728_v3 = vsel %vm651_vm3, %v1716_v62, %v1727_v1 }
 0x569   : > { %1733 = vst [vmem:[#allocation3 + $0x50] sm:$0xff] %v1728_v3  ;;  %v1750_v4 = vpop.permute.xlu0 %1749 }
 0x56a   : > { %v3598_v20 = vpop.permute.xlu2 %1637  ;;  %v1754_v7 = vrot.slane %v1750_v4, 4 }
 0x56c   : > { %v1757_v52 = vsel %vm533_vm14, %v1753_v5, %v1754_v7  ;;  %v1800_v11 = vpop.permute.xlu1 %1799 }
 0x56d   : > { %v1758_v12 = vsel %vm680_vm2, %v1748_v53, %v1757_v52  ;;  %v1807_v47 = vrot.slane %v1800_v11, 4 }
 0x56e   : > { %1762 = vst [vmem:[#allocation3 + $0x68] sm:$0xff] %v1758_v12 }
 0x56f   : > { %v1811_v13 = vsel %vm533_vm14, %v1807_v47, %v1808_v9 }
 0x570   : > { %v1812_v14 = vsel %vm738_vm4, %v1800_v11, %v1811_v13  ;;  %v2837_v61 = vld [vmem:[#allocation3 + $0x50] sm:$0xf]  ;;  %v3007_v4 = vld [vmem:[#allocation3 + $0x54] sm:$0xf] }
 0x571   : > { %1817 = vst [vmem:[#allocation3 + $0x80] sm:$0xff] %v1812_v14  ;;  %v1666_v6 = vpop.permute.xlu0 %1665  ;;  %v1642_v14 = vrot.slane %v3598_v20, 4  ;;  %v2995_v20 = vld [vmem:[%s3786_s3 + $0x4] sm:$0xf] }
 0x572   : > { %v1664_v15 = vpop.permute.xlu2 %1663  ;;  %v1670_v16 = vrot.slane %v1666_v6, 4 }
 0x573   : > { %v1669_v18 = vrot.slane %v1664_v15, 4 }
 0x574   : > { %v1776_v21 = vpop.permute.xlu1 %1775 }
 0x575   : > { %v1673_v17 = vsel %vm533_vm14, %v1669_v18, %v1670_v16  ;;  %v1781_v60 = vrot.slane %v1776_v21, 4  ;;  %v3010_v41 = vld [vmem:[#allocation3 + $0x64] sm:$0xf0]  ;;  %v2847_v42 = vld [vmem:[#allocation3 + $0x68] sm:$0xf0] }
 0x576   : > { %v1674_v22 = vsel %vm593_vm5, %v1664_v15, %v1673_v17  ;;  %v2846_v50 = vor.u32 %v3010_v41, %v2845_v45  ;;  %v2850_v51 = vor.u32 %v3009_v49, %v2847_v42  ;;  %v2829_v16 = vld [vmem:[#allocation3 + $0x40] sm:$0xf]  ;;  %v3005_v18 = vld [vmem:[#allocation3 + $0x44] sm:$0xf] }
 0x577   : > { %1678 = vst [vmem:[#allocation3 + $0x38] sm:$0xff] %v1674_v22  ;;  %v1785_v25 = vsel %vm533_vm14, %v1781_v60, %v1782_v19  ;;  %v2821_v60 = vld [vmem:[#allocation3 + $0x30] sm:$0xf]  ;;  %v2813_v49 = vld [vmem:[#allocation3 + $0x20] sm:$0xf] }
 0x578   : > { %v1786_v26 = vsel %vm709_vm15, %v1776_v21, %v1785_v25 }
 0x579   : > { %1790 = vst [vmem:[#allocation3 + $0x78] sm:$0xff] %v1786_v26  ;;  %v3608_v27 = vpop.permute.xlu0 %1603  ;;  %v2861_v26 = vld [vmem:[#allocation3 + $0x80] sm:$0xf] }
 0x57a   : > { %v1608_v63 = vpop.permute.xlu2 %1607 }
 0x57b   : > { %v1613_v9 = vrot.slane %v1608_v63, 4 }
 0x57c   : > { %v1692_v28 = vpop.permute.xlu1 %1691 }
 0x57d   : > { %v1697_v31 = vrot.slane %v1692_v28, 4 }
 0x57e   : > { %v3004_v25 = vld [vmem:[#allocation3 + $0x34] sm:$0xf0] }
 0x57f   : > { %v1701_v32 = vsel %vm533_vm14, %v1697_v31, %v1698_v29  ;;  %v2823_v29 = vld [vmem:[#allocation3 + $0x38] sm:$0xf0]  ;;  %v2791_v31 = vld [vmem:[%s3786_s3 + $0x8] sm:$0xf0] }
 0x580   : > { %v1702_v34 = vsel %vm622_vm1, %v1692_v28, %v1701_v32  ;;  %v3012_v35 = vld [vmem:[#allocation3 + $0x74] sm:$0xf0]  ;;  %v2855_v2 = vld [vmem:[#allocation3 + $0x78] sm:$0xf0]  ;;  %v2794_v41 = vor.u32 %v2995_v20, %v2791_v31 }
 0x581   : > { %1706 = vst [vmem:[#allocation3 + $0x48] sm:$0xff] %v1702_v34  ;;  %v2854_v37 = vor.u32 %v3012_v35, %v2853_v33  ;;  %v2858_v38 = vor.u32 %v3011_v36, %v2855_v2  ;;  %v1720_v39 = vpop.permute.xlu0 %1719  ;;  %v3013_v34 = vld [vmem:[#allocation3 + $0x84] sm:$0xf]  ;;  %v2822_v36 = vor.u32 %v3004_v25, %v2821_v60 }
 0x582   : > { %v1725_v46 = vrot.slane %v1720_v39, 4 }
 0x583   : > { %1941 = vmatpush.bf16.msra.mxu2 %v2854_v37  ;;  %1969 = vmatpush.bf16.msra.mxu0 %v2858_v38  ;;  %v3003_v37 = vld [vmem:[#allocation3 + $0x34] sm:$0xf] }
 0x584   : > { %v1722_v48 = vpop.permute.xlu1 %1721 }
 0x585   : > { %v1726_v30 = vrot.slane %v1722_v48, 4 }
 0x587   : > { %v1729_v53 = vsel %vm533_vm14, %v1725_v46, %v1726_v30  ;;  %1942 = vmatpush.bf16.msra.mxu2 %v2846_v50  ;;  %1970 = vmatpush.bf16.msra.mxu0 %v2850_v51  ;;  %v1611_v46 = vrot.slane %v3608_v27, 4  ;;  %v3001_v51 = vld [vmem:[#allocation3 + $0x24] sm:$0xf] }
 0x588   : > { %v1730_v55 = vsel %vm651_vm3, %v1720_v39, %v1729_v53  ;;  %v3006_v47 = vld [vmem:[#allocation3 + $0x44] sm:$0xf0]  ;;  %v2831_v13 = vld [vmem:[#allocation3 + $0x48] sm:$0xf0]  ;;  %v2826_v39 = vor.u32 %v3003_v37, %v2823_v29  ;;  %v2007_v29 = vpop.permute.xlu2 %2006 }
 0x589   : > { %1734 = vst [vmem:[#allocation3 + $0x58] sm:$0xff] %v1730_v55  ;;  %v1804_v57 = vpop.permute.xlu0 %1803  ;;  %v2830_v19 = vor.u32 %v3006_v47, %v2829_v16  ;;  %v2834_v22 = vor.u32 %v3005_v18, %v2831_v13 }
 0x58a   : > { %v1809_v58 = vrot.slane %v1804_v57, 4 }
 0x58c   : > { %v1806_v59 = vpop.permute.xlu1 %1805 }
 0x58d   : > { %v1810_v62 = vrot.slane %v1806_v59, 4 }
 0x58f   : > { %v1813_v0 = vsel %vm533_vm14, %v1809_v58, %v1810_v62 }
 0x590   : > { %v1814_v1 = vsel %vm738_vm4, %v1804_v57, %v1813_v0  ;;  %v3008_v3 = vld [vmem:[#allocation3 + $0x54] sm:$0xf0]  ;;  %v2839_v5 = vld [vmem:[#allocation3 + $0x58] sm:$0xf0] }
 0x591   : > { %1818 = vst [vmem:[#allocation3 + $0x88] sm:$0xff] %v1814_v1  ;;  %v2838_v7 = vor.u32 %v3008_v3, %v2837_v61  ;;  %v2842_v52 = vor.u32 %v3007_v4, %v2839_v5  ;;  %v1610_v11 = vpop.permute.xlu0 %1609  ;;  %v2797_v1 = vld [vmem:[#allocation3] sm:$0xf]  ;;  %v2997_v3 = vld [vmem:[#allocation3 + $0x4] sm:$0xf] }
 0x592   : > { %v1614_v12 = vrot.slane %v1610_v11, 4  ;;  %v2996_v4 = vld [vmem:[%s3786_s3 + $0x4] sm:$0xf0]  ;;  %v2998_v5 = vld [vmem:[#allocation3 + $0x4] sm:$0xf0] }
 0x593   : > { %1943 = vmatpush.bf16.msra.mxu2 %v2838_v7  ;;  %1971 = vmatpush.bf16.msra.mxu0 %v2842_v52  ;;  %v2799_v7 = vld [vmem:[#allocation3 + $0x8] sm:$0xf0]  ;;  %v2798_v52 = vor.u32 %v2998_v5, %v2797_v1 }
 0x594   : > { %v1617_v6 = vsel %vm533_vm14, %v1613_v9, %v1614_v12  ;;  %v1636_v15 = vpop.permute.xlu1 %1635  ;;  %v2802_v11 = vor.u32 %v2997_v3, %v2799_v7 }
 0x595   : > { %v1618_v17 = vsel %vm535_vm7, %v1608_v63, %v1617_v6  ;;  %v1641_v21 = vrot.slane %v1636_v15, 4 }
 0x596   : > { %1622 = vst [vmem:[#allocation3 + $0x18] sm:$0xff] %v1618_v17 }
 0x597   : > { %v1645_v28 = vsel %vm533_vm14, %v1641_v21, %v1642_v14  ;;  %1944 = vmatpush.bf16.msra.mxu2 %v2830_v19  ;;  %1972 = vmatpush.bf16.msra.mxu0 %v2834_v22 }
 0x598   : > { %v1646_v32 = vsel %vm564_vm6, %v1636_v15, %v1645_v28  ;;  %v3014_v33 = vld [vmem:[#allocation3 + $0x84] sm:$0xf0]  ;;  %v2863_v35 = vld [vmem:[#allocation3 + $0x88] sm:$0xf0] }
 0x599   : > { %1650 = vst [vmem:[#allocation3 + $0x28] sm:$0xff] %v1646_v32  ;;  %v2862_v2 = vor.u32 %v3014_v33, %v2861_v26  ;;  %v2866_v38 = vor.u32 %v3013_v34, %v2863_v35  ;;  %v2018_v18 = vpop.permute.xlu0 %2017 }
 0x59b   : > { %1945 = vmatpush.bf16.msra.mxu2 %v2822_v36  ;;  %1962 = vmatpush.bf16.msrb.mxu1 %v2862_v2 }
 0x59c   : > { %1973 = vmatpush.bf16.msra.mxu0 %v2826_v39  ;;  %v1606_v42 = vpop.permute.xlu1 %1605 }
 0x59d   : > { %v1612_v48 = vrot.slane %v1606_v42, 4  ;;  %v3000_v58 = vld [vmem:[#allocation3 + $0x14] sm:$0xf0]  ;;  %v2807_v63 = vld [vmem:[#allocation3 + $0x18] sm:$0xf0] }
 0x59e   : > { %2867 = vmatmul.msk.bf16.vlgmr.msrb.gmra.mxu1 %vm865_vm8, %v2794_v41 }
 0x59f   : > { %1990 = vmatpush.bf16.msra.mxu1 %v2866_v38  ;;  %v1615_v45 = vsel %vm533_vm14, %v1611_v46, %v1612_v48 }
 0x5a0   : > { %v1616_v30 = vsel %vm535_vm7, %v3608_v27, %v1615_v45  ;;  %v3002_v50 = vld [vmem:[#allocation3 + $0x24] sm:$0xf0]  ;;  %v2815_v53 = vld [vmem:[#allocation3 + $0x28] sm:$0xf0]  ;;  %v2789_v27 = vld [vmem:[%s3786_s3] sm:$0xf] }
 0x5a1   : > { %1621 = vst [vmem:[#allocation3 + $0x10] sm:$0xff] %v1616_v30  ;;  %v2814_v55 = vor.u32 %v3002_v50, %v2813_v49  ;;  %v2818_v57 = vor.u32 %v3001_v51, %v2815_v53  ;;  %v2790_v9 = vor.u32 %v2996_v4, %v2789_v27 }
 0x5a3   : > { %1946 = vmatpush.bf16.msra.mxu2 %v2814_v55  ;;  %1974 = vmatpush.bf16.msra.mxu0 %v2818_v57 }
 0x5a4   : > { %v2002_v15 = vpop.permute.xlu1 %2001 }
 0x5a8   : > { %v2805_v59 = vld [vmem:[#allocation3 + $0x10] sm:$0xf]  ;;  %v2999_v62 = vld [vmem:[#allocation3 + $0x14] sm:$0xf] }
 0x5a9   : > { %v2806_v0 = vor.u32 %v3000_v58, %v2805_v59  ;;  %v2810_v61 = vor.u32 %v2999_v62, %v2807_v63 }
 0x5ab   : > { %1947 = vmatpush.bf16.msra.mxu2 %v2806_v0  ;;  %1975 = vmatpush.bf16.msra.mxu0 %v2810_v61 }
 0x5ac   : > { %v2023_v32 = vpop.permute.xlu1 %2022 }
 0x5ae   : > { %2868 = vmatmul.msk.bf16.vlgmr.msra.gmra.mxu1 %vm865_vm8, %v2794_v41 }
 0x5af   : > { %1948 = vmatpush.bf16.msra.mxu2 %v2798_v52  ;;  %1976 = vmatpush.bf16.msra.mxu0 %v2802_v11 }
 0x5b2   : > { %1949 = vmatmul.bf16.vlgmr.msra.gmra.mxu2 %v2790_v9  ;;  %1977 = vmatmul.bf16.vlgmr.msra.gmra.mxu0 %v2790_v9 }
 0x61b   : > { %v1964_v12 = vpop.f32.mrf.mxu1 }
 0x623   : > { %v1966_v47 = vpop.f32.mrf.mxu1 }
 0x62b   : > { %v1992_v13 = vpop.f32.mrf.mxu1 }
 0x62f   : > { %v1978_v14 = vpop.f32.mrf.mxu0 }
 0x630   : > { %v1993_v6 = vadd.f32 %v1992_v13, %v1978_v14 }
 0x632   : > { %v2010_v16 = vmul.f32 %v2002_v15, %v1993_v6 }
 0x633   : > { %v1994_v60 = vpop.f32.mrf.mxu1 }
 0x634   : > { %v2026_v17 = vadd.f32 %v2018_v18, %v2010_v16 }
 0x635   : > { %v1950_v21 = vpop.f32.mrf.mxu2 }
 0x636   : > { %v1965_v19 = vadd.f32 %v1964_v12, %v1950_v21  ;;  %v2034_v22 = vmul.f32 0.02, %v2026_v17  ;;  %vm2030_vm11 = vcmp.gt.f32.partialorder %v2026_v17, 0.0 }
 0x637   : > { %v1980_v25 = vpop.f32.mrf.mxu0 }
 0x638   : > { %v2009_v26 = vmul.f32 %v2002_v15, %v1965_v19  ;;  %v1995_v28 = vadd.f32 %v1994_v60, %v1980_v25  ;;  %v2038_v33 = vsel %vm2030_vm11, %v2026_v17, %v2034_v22 }
 0x639   : > { %v2086_v38 = vmul.f32 %v3192_v44, %v2038_v33  ;;  %v2042_v46 = vmul.f32 %v3177_v24, %v2038_v33 }
 0x63a   : > { %v2025_v20 = vadd.f32 %v2018_v18, %v2009_v26  ;;  %v2012_v31 = vmul.f32 %v2007_v29, %v1995_v28 }
 0x63c   : > { %v2033_v34 = vmul.f32 0.02, %v2025_v20  ;;  %v2028_v35 = vadd.f32 %v2023_v32, %v2012_v31  ;;  %vm2029_vm9 = vcmp.gt.f32.partialorder %v2025_v20, 0.0 }
 0x63d   : > { %v1952_v36 = vpop.f32.mrf.mxu2 }
 0x63e   : > { %v1967_v2 = vadd.f32 %v1966_v47, %v1952_v36  ;;  %v2037_v37 = vsel %vm2029_vm9, %v2025_v20, %v2033_v34  ;;  %v2036_v48 = vmul.f32 0.02, %v2028_v35  ;;  %vm2032_vm10 = vcmp.gt.f32.partialorder %v2028_v35, 0.0 }
 0x63f   : > { %v2065_v39 = vpack.c.bf16 %v2038_v33, %v2037_v37  ;;  %v2085_v41 = vmul.f32 %v3190_v43, %v2037_v37  ;;  %v2041_v42 = vmul.f32 %v3175_v23, %v2037_v37  ;;  %v2531_v37 = vld [vmem:[%s3791_s8] sm:$0xff] }
 0x640   : > { %v2011_v45 = vmul.f32 %v2007_v29, %v1967_v2  ;;  %v2040_v53 = vsel %vm2032_vm10, %v2028_v35, %v2036_v48  ;;  %v2516_v2 = vld [vmem:[%s3790_s7 + $0x8] sm:$0xff] }
 0x641   : > { %2069 = vrot.lane.b32.xlu2 %v2065_v39, %s3067_s23  ;;  %v2089_v49 = vpack.c.bf16 %v2086_v38, %v2085_v41  ;;  %v2045_v30 = vpack.c.bf16 %v2042_v46, %v2041_v42  ;;  %v2088_v58 = vmul.f32 %v3192_v44, %v2040_v53  ;;  %v2044_v62 = vmul.f32 %v3177_v24, %v2040_v53  ;;  %v2515_v46 = vld [vmem:[%s3790_s7] sm:$0xff] }
 0x642   : > { %v2027_v50 = vadd.f32 %v2023_v32, %v2011_v45 }
 0x643   : > { %2093 = vrot.lane.b32.xlu0 %v2089_v49, %s3067_s23  ;;  %2049 = vrot.lane.b32.xlu1 %v2045_v30, %s3067_s23  ;;  %v2532_v49 = vld [vmem:[%s3791_s8 + $0x8] sm:$0xff] }
 0x644   : > { %vm2031_vm11 = vcmp.gt.f32.partialorder %v2027_v50, 0.0  ;;  %v2035_v51 = vmul.f32 0.02, %v2027_v50 }
 0x646   : > { %v2039_v55 = vsel %vm2031_vm11, %v2027_v50, %v2035_v51 }
 0x647   : > { %v2087_v57 = vmul.f32 %v3190_v43, %v2039_v55  ;;  %v2043_v59 = vmul.f32 %v3175_v23, %v2039_v55  ;;  %v2066_v0 = vpack.c.bf16 %v2040_v53, %v2039_v55 }
 0x649   : > { %v2090_v63 = vpack.c.bf16 %v2088_v58, %v2087_v57  ;;  %v2046_v61 = vpack.c.bf16 %v2044_v62, %v2043_v59 }
 0x64b   : > { %2095 = vrot.lane.b32.xlu1 %v2090_v63, %s3067_s23  ;;  %2071 = vrot.lane.b32.xlu0 %v2066_v0, %s3067_s23 }
 0x64c   : > { %2051 = vrot.lane.b32.xlu2 %v2046_v61, %s3067_s23  ;;  %s332_s23 = scalar_lea.vmem %s3792_s9, %s3796_s17 }
 0x69b   : > { %v2070_v1 = vpop.permute.xlu2 %2069 }
 0x69c   : > { %v2073_v3 = vrot.slane %v2070_v1, 4 }
 0x69e   : > { %v2075_v27 = vsel %vm451_vm12, %v2073_v3, %v2070_v1  ;;  %2082 = vst.msk [vmem:[#allocation2 + $0x20] sm:$0xf] %vm334_vm0, %v2073_v3 }
 0x69f   : > { %2081 = vst.msk [vmem:[#allocation2 + $0x18] sm:$0xff] %vm3204_vm13, %v2075_v27 }
 0x6a5   : > { %v2282_v23 = vld [vmem:[#allocation2 + $0x20] sm:$0xf] }
 0x6a6   : > { %v2052_v24 = vpop.permute.xlu2 %2051  ;;  %2291 = vrot.lane.b32.xlu0 %v2282_v23, %s3068_s24  ;;  %v2281_v43 = vld [vmem:[#allocation2 + $0x18] sm:$0xff]  ;;  %v2198_v5 = vld [vmem:[#allocation2 + $0x20] sm:$0xf] }
 0x6a7   : > { %v2054_v44 = vrot.slane %v2052_v24, 4  ;;  %2289 = vrot.lane.b32.xlu2 %v2281_v43, %s3068_s24  ;;  %v2114_v9 = vld [vmem:[#allocation2 + $0x20] sm:$0xf] }
 0x6a9   : > { %v2056_v4 = vsel %vm451_vm12, %v2054_v44, %v2052_v24  ;;  %2064 = vst.msk [vmem:[#allocation2 + $0x14] sm:$0xf] %vm334_vm0, %v2054_v44 }
 0x6aa   : > { %2063 = vst.msk [vmem:[#allocation2 + $0xc] sm:$0xff] %vm3204_vm13, %v2056_v4 }
 0x6ae   : > { %2207 = vrot.lane.b32.xlu0 %v2198_v5, %s3069_s25 }
 0x6af   : > { %2205 = vrot.lane.b32.xlu2 %v2281_v43, %s3069_s25 }
 0x6b0   : > { %v2256_v29 = vld [vmem:[#allocation2 + $0x14] sm:$0xf] }
 0x6b1   : > { %v2110_v7 = vld [vmem:[#allocation2 + $0xc] sm:$0xff]  ;;  %v2172_v31 = vld [vmem:[#allocation2 + $0x14] sm:$0xf] }
 0x6b2   : > { %2112 = vst [vmem:[#allocation3 + $0x8] sm:$0xff] %v2110_v7 }
 0x6b5   : > { %v2094_v52 = vpop.permute.xlu0 %2093  ;;  %v2050_v11 = vpop.permute.xlu1 %2049 }
 0x6b6   : > { %v2097_v12 = vrot.slane %v2094_v52, 4  ;;  %v2053_v47 = vrot.slane %v2050_v11, 4  ;;  %2123 = vrot.lane.b32.xlu0 %v2114_v9, %s3070_s26 }
 0x6b7   : > { %2121 = vrot.lane.b32.xlu2 %v2281_v43, %s3070_s26 }
 0x6b8   : > { %v2099_v13 = vsel %vm451_vm12, %v2097_v12, %v2094_v52  ;;  %2106 = vst.msk [vmem:[#allocation2 + $0x38] sm:$0xf] %vm334_vm0, %v2097_v12  ;;  %v2055_v14 = vsel %vm451_vm12, %v2053_v47, %v2050_v11 }
 0x6b9   : > { %2105 = vst.msk [vmem:[#allocation2 + $0x30] sm:$0xff] %vm3204_vm13, %v2099_v13 }
 0x6ba   : > { %2061 = vst.msk [vmem:[#allocation2] sm:$0xff] %vm3204_vm13, %v2055_v14 }
 0x6bb   : > { %2062 = vst.msk [vmem:[#allocation2 + $0x8] sm:$0xf] %vm334_vm0, %v2053_v47 }
 0x6bd   : > { %v2072_v6 = vpop.permute.xlu0 %2071  ;;  %v2096_v15 = vpop.permute.xlu1 %2095 }
 0x6be   : > { %v2074_v16 = vrot.slane %v2072_v6, 4  ;;  %v2098_v18 = vrot.slane %v2096_v15, 4 }
 0x6bf   : > { %v2226_v17 = vld [vmem:[#allocation2 + $0x38] sm:$0xf] }
 0x6c0   : > { %v2076_v21 = vsel %vm451_vm12, %v2074_v16, %v2072_v6  ;;  %2084 = vst.msk [vmem:[#allocation2 + $0x2c] sm:$0xf] %vm334_vm0, %v2074_v16  ;;  %v2100_v19 = vsel %vm451_vm12, %v2098_v18, %v2096_v15  ;;  %2235 = vrot.lane.b32.xlu2 %v2226_v17, %s3072_s28  ;;  %v2142_v25 = vld [vmem:[#allocation2 + $0x38] sm:$0xf]  ;;  %v2225_v20 = vld [vmem:[#allocation2 + $0x30] sm:$0xff] }
 0x6c1   : > { %v2109_v22 = vld [vmem:[#allocation2] sm:$0xff]  ;;  %2083 = vst.msk [vmem:[#allocation2 + $0x24] sm:$0xff] %vm3204_vm13, %v2076_v21  ;;  %v2310_v42 = vld [vmem:[#allocation2 + $0x38] sm:$0xf] }
 0x6c2   : > { %2111 = vst [vmem:[#allocation3] sm:$0xff] %v2109_v22  ;;  %v2254_v60 = vld [vmem:[#allocation2 + $0x8] sm:$0xf]  ;;  %2261 = vrot.lane.b32.xlu0 %v2109_v22, %s3071_s27 }
 0x6c3   : > { %2107 = vst.msk [vmem:[#allocation2 + $0x3c] sm:$0xff] %vm3204_vm13, %v2100_v19  ;;  %2263 = vrot.lane.b32.xlu1 %v2254_v60, %s3071_s27  ;;  %v2170_v26 = vld [vmem:[#allocation2 + $0x8] sm:$0xf] }
 0x6c4   : > { %2108 = vst.msk [vmem:[#allocation2 + $0x44] sm:$0xf] %vm334_vm0, %v2098_v18 }
 0x6c7   : > { %v2284_v28 = vld [vmem:[#allocation2 + $0x2c] sm:$0xf] }
 0x6c8   : > { %2151 = vrot.lane.b32.xlu2 %v2142_v25, %s3075_s12  ;;  %v2200_v56 = vld [vmem:[#allocation2 + $0x2c] sm:$0xf]  ;;  %v2283_v33 = vld [vmem:[#allocation2 + $0x24] sm:$0xff] }
 0x6c9   : > { %v2116_v34 = vld [vmem:[#allocation2 + $0x2c] sm:$0xf] }
 0x6ca   : > { %2177 = vrot.lane.b32.xlu0 %v2109_v22, %s3074_s11  ;;  %v2227_v32 = vld [vmem:[#allocation2 + $0x3c] sm:$0xff] }
 0x6cb   : > { %2179 = vrot.lane.b32.xlu1 %v2170_v26, %s3074_s11  ;;  %v2228_v35 = vld [vmem:[#allocation2 + $0x44] sm:$0xf] }
 0x6cc   : > { %v2312_v36 = vld [vmem:[#allocation2 + $0x44] sm:$0xf] }
 0x6cd   : > { %v2144_v39 = vld [vmem:[#allocation2 + $0x44] sm:$0xf] }
 0x6d0   : > { %2295 = vrot.lane.b32.xlu2 %v2284_v28, %s3068_s24 }
 0x6d2   : > { %2267 = vrot.lane.b32.xlu0 %v2256_v29, %s3071_s27 }
 0x6d3   : > { %2233 = vrot.lane.b32.xlu1 %v2225_v20, %s3072_s28 }
 0x6d8   : > { %2211 = vrot.lane.b32.xlu2 %v2200_v56, %s3069_s25 }
 0x6da   : > { %2183 = vrot.lane.b32.xlu0 %v2172_v31, %s3074_s11 }
 0x6db   : > { %2149 = vrot.lane.b32.xlu1 %v2225_v20, %s3075_s12 }
 0x6e0   : > { %2265 = vrot.lane.b32.xlu2 %v2110_v7, %s3071_s27 }
 0x6e2   : > { %2237 = vrot.lane.b32.xlu0 %v2227_v32, %s3072_s28 }
 0x6e3   : > { %2293 = vrot.lane.b32.xlu1 %v2283_v33, %s3068_s24 }
 0x6e8   : > { %2181 = vrot.lane.b32.xlu2 %v2110_v7, %s3074_s11 }
 0x6ea   : > { %2317 = vrot.lane.b32.xlu0 %v2225_v20, %s3073_s29 }
 0x6eb   : > { %2209 = vrot.lane.b32.xlu1 %v2283_v33, %s3069_s25 }
 0x6f0   : > { %2127 = vrot.lane.b32.xlu2 %v2116_v34, %s3070_s26 }
 0x6f2   : > { %2153 = vrot.lane.b32.xlu0 %v2227_v32, %s3075_s12 }
 0x6f3   : > { %2239 = vrot.lane.b32.xlu1 %v2228_v35, %s3072_s28 }
 0x6f8   : > { %2321 = vrot.lane.b32.xlu2 %v2227_v32, %s3073_s29 }
 0x6fa   : > { %2323 = vrot.lane.b32.xlu0 %v2312_v36, %s3073_s29 }
 0x6fb   : > { %2125 = vrot.lane.b32.xlu1 %v2283_v33, %s3070_s26 }
 0x700   : > { %2524 = vperm.xlu2 %3056, %v2516_v2  }
 0x701   : > { %v2290_v38 = vpop.permute.xlu2 %2289 }
 0x702   : > { %2535 = vperm.xlu0 %3054, %v2531_v37   ;;  %v2297_v30 = vrot.slane %v2290_v38, 4 }
 0x703   : > { %2155 = vrot.lane.b32.xlu1 %v2144_v39, %s3075_s12 }
 0x709   : > { %v2206_v41 = vpop.permute.xlu2 %2205 }
 0x70a   : > { %v2213_v58 = vrot.slane %v2206_v41, 4 }
 0x70b   : > { %2319 = vrot.lane.b32.xlu1 %v2310_v42, %s3073_s29 }
 0x711   : > { %v2122_v48 = vpop.permute.xlu2 %2121 }
 0x712   : > { %v2129_v1 = vrot.slane %v2122_v48, 4 }
 0x713   : > { %2519 = vperm.xlu1 %3055, %v2515_v46  }
 0x718   : > { %v2292_v45 = vpop.permute.xlu0 %2291 }
 0x719   : > { %v2298_v50 = vrot.slane %v2292_v45, 4 }
 0x71a   : > { %v2236_v51 = vpop.permute.xlu2 %2235 }
 0x71b   : > { %v2301_v53 = vsel %vm533_vm14, %v2297_v30, %v2298_v50  ;;  %2540 = vperm.xlu1 %3055, %v2532_v49   ;;  %v2242_v19 = vrot.slane %v2236_v51, 4 }
 0x71c   : > { %v2302_v55 = vsel %vm709_vm15, %v2290_v38, %v2301_v53 }
 0x71d   : > { %2307 = vst [vmem:[#allocation3 + $0x70] sm:$0xff] %v2302_v55 }
 0x720   : > { %v2208_v57 = vpop.permute.xlu0 %2207 }
 0x721   : > { %v2214_v59 = vrot.slane %v2208_v57, 4 }
 0x722   : > { %v2152_v62 = vpop.permute.xlu2 %2151 }
 0x723   : > { %v2217_v63 = vsel %vm533_vm14, %v2213_v58, %v2214_v59  ;;  %v2158_v33 = vrot.slane %v2152_v62, 4 }
 0x724   : > { %v2218_v0 = vsel %vm622_vm1, %v2206_v41, %v2217_v63  ;;  %v2935_v55 = vld [vmem:[#allocation3 + $0x70] sm:$0xf]  ;;  %v3031_v59 = vld [vmem:[#allocation3 + $0x74] sm:$0xf] }
 0x725   : > { %2223 = vst [vmem:[#allocation3 + $0x40] sm:$0xff] %v2218_v0 }
 0x728   : > { %v2124_v61 = vpop.permute.xlu0 %2123 }
 0x729   : > { %v2130_v3 = vrot.slane %v2124_v61, 4 }
 0x72a   : > { %v2296_v24 = vpop.permute.xlu2 %2295 }
 0x72b   : > { %v2133_v27 = vsel %vm533_vm14, %v2129_v1, %v2130_v3  ;;  %v2300_v41 = vrot.slane %v2296_v24, 4 }
 0x72c   : > { %v2134_v23 = vsel %vm535_vm7, %v2122_v48, %v2133_v27 }
 0x72d   : > { %2139 = vst [vmem:[#allocation3 + $0x10] sm:$0xff] %v2134_v23 }
 0x732   : > { %v2212_v5 = vpop.permute.xlu2 %2211 }
 0x733   : > { %v2216_v30 = vrot.slane %v2212_v5, 4 }
 0x734   : > { %v2262_v43 = vpop.permute.xlu0 %2261 }
 0x735   : > { %v2264_v44 = vpop.permute.xlu1 %2263  ;;  %v2269_v4 = vrot.slane %v2262_v43, 4 }
 0x736   : > { %v2270_v7 = vrot.slane %v2264_v44, 4 }
 0x738   : > { %v2273_v52 = vsel %vm533_vm14, %v2269_v4, %v2270_v7 }
 0x739   : > { %v2274_v11 = vsel %vm680_vm2, %v2262_v43, %v2273_v52 }
 0x73a   : > { %2279 = vst [vmem:[#allocation3 + $0x60] sm:$0xff] %v2274_v11  ;;  %v2266_v14 = vpop.permute.xlu2 %2265 }
 0x73b   : > { %v2271_v18 = vrot.slane %v2266_v14, 4 }
 0x73c   : > { %v2178_v9 = vpop.permute.xlu0 %2177 }
 0x73d   : > { %v2180_v12 = vpop.permute.xlu1 %2179  ;;  %v2185_v47 = vrot.slane %v2178_v9, 4 }
 0x73e   : > { %v2186_v13 = vrot.slane %v2180_v12, 4 }
 0x740   : > { %v2189_v6 = vsel %vm533_vm14, %v2185_v47, %v2186_v13 }
 0x741   : > { %v2190_v15 = vsel %vm593_vm5, %v2178_v9, %v2189_v6  ;;  %v2927_v23 = vld [vmem:[#allocation3 + $0x60] sm:$0xf]  ;;  %v3029_v24 = vld [vmem:[#allocation3 + $0x64] sm:$0xf] }
 0x742   : > { %2195 = vst [vmem:[#allocation3 + $0x30] sm:$0xff] %v2190_v15  ;;  %v2182_v29 = vpop.permute.xlu2 %2181 }
 0x743   : > { %v2187_v56 = vrot.slane %v2182_v29, 4 }
 0x744   : > { %v2268_v16 = vpop.permute.xlu0 %2267 }
 0x745   : > { %v2234_v17 = vpop.permute.xlu1 %2233  ;;  %v2272_v21 = vrot.slane %v2268_v16, 4 }
 0x746   : > { %v2241_v22 = vrot.slane %v2234_v17, 4 }
 0x747   : > { %v2275_v60 = vsel %vm533_vm14, %v2271_v18, %v2272_v21 }
 0x748   : > { %v2245_v25 = vsel %vm533_vm14, %v2241_v22, %v2242_v19  ;;  %v2276_v26 = vsel %vm680_vm2, %v2266_v14, %v2275_v60 }
 0x749   : > { %v2246_v28 = vsel %vm651_vm3, %v2234_v17, %v2245_v25  ;;  %2280 = vst [vmem:[#allocation3 + $0x68] sm:$0xff] %v2276_v26 }
 0x74a   : > { %2251 = vst [vmem:[#allocation3 + $0x50] sm:$0xff] %v2246_v28  ;;  %v2128_v51 = vpop.permute.xlu2 %2127 }
 0x74b   : > { %v2132_v14 = vrot.slane %v2128_v51, 4 }
 0x74c   : > { %v2184_v20 = vpop.permute.xlu0 %2183 }
 0x74d   : > { %v2150_v31 = vpop.permute.xlu1 %2149  ;;  %v2188_v32 = vrot.slane %v2184_v20, 4 }
 0x74e   : > { %v2157_v34 = vrot.slane %v2150_v31, 4 }
 0x74f   : > { %v2191_v35 = vsel %vm533_vm14, %v2187_v56, %v2188_v32  ;;  %v2911_v56 = vld [vmem:[#allocation3 + $0x40] sm:$0xf] }
 0x750   : > { %v2161_v36 = vsel %vm533_vm14, %v2157_v34, %v2158_v33  ;;  %v2192_v2 = vsel %vm593_vm5, %v2182_v29, %v2191_v35  ;;  %v3030_v61 = vld [vmem:[#allocation3 + $0x64] sm:$0xf0]  ;;  %v2929_v1 = vld [vmem:[#allocation3 + $0x68] sm:$0xf0] }
 0x751   : > { %v2162_v37 = vsel %vm564_vm6, %v2150_v31, %v2161_v36  ;;  %2196 = vst [vmem:[#allocation3 + $0x38] sm:$0xff] %v2192_v2  ;;  %v2928_v4 = vor.u32 %v3030_v61, %v2927_v23  ;;  %v2932_v5 = vor.u32 %v3029_v24, %v2929_v1  ;;  %v2919_v17 = vld [vmem:[#allocation3 + $0x50] sm:$0xf]  ;;  %v3027_v21 = vld [vmem:[#allocation3 + $0x54] sm:$0xf] }
 0x752   : > { %2167 = vst [vmem:[#allocation3 + $0x20] sm:$0xff] %v2162_v37  ;;  %v2322_v11 = vpop.permute.xlu2 %2321  ;;  %v3025_v31 = vld [vmem:[#allocation3 + $0x44] sm:$0xf]  ;;  %v2887_v61 = vld [vmem:[#allocation3 + $0x10] sm:$0xf] }
 0x753   : > { %v2327_v12 = vrot.slane %v2322_v11, 4  ;;  %v3019_v1 = vld [vmem:[#allocation3 + $0x14] sm:$0xf]  ;;  %v2879_v23 = vld [vmem:[#allocation3] sm:$0xf] }
 0x754   : > { %v2238_v38 = vpop.permute.xlu0 %2237  ;;  %v3018_v24 = vld [vmem:[#allocation3 + $0x4] sm:$0xf0] }
 0x755   : > { %v2294_v39 = vpop.permute.xlu1 %2293  ;;  %v2243_v43 = vrot.slane %v2238_v38, 4 }
 0x756   : > { %v2299_v42 = vrot.slane %v2294_v39, 4 }
 0x758   : > { %v2303_v46 = vsel %vm533_vm14, %v2299_v42, %v2300_v41  ;;  %v3024_v36 = vld [vmem:[#allocation3 + $0x34] sm:$0xf0]  ;;  %v2905_v2 = vld [vmem:[#allocation3 + $0x38] sm:$0xf0]  ;;  %v3023_v41 = vld [vmem:[#allocation3 + $0x34] sm:$0xf] }
 0x759   : > { %v2304_v48 = vsel %vm709_vm15, %v2294_v39, %v2303_v46  ;;  %v2903_v39 = vld [vmem:[#allocation3 + $0x30] sm:$0xf]  ;;  %v2908_v46 = vor.u32 %v3023_v41, %v2905_v2  ;;  %v2895_v51 = vld [vmem:[#allocation3 + $0x20] sm:$0xf] }
 0x75a   : > { %2308 = vst [vmem:[#allocation3 + $0x78] sm:$0xff] %v2304_v48  ;;  %v2904_v42 = vor.u32 %v3024_v36, %v2903_v39 }
 0x75c   : > { %v3741_v45 = vpop.permute.xlu0 %2317 }
 0x75d   : > { %v2210_v49 = vpop.permute.xlu1 %2209 }
 0x75e   : > { %v2215_v50 = vrot.slane %v2210_v49, 4 }
 0x760   : > { %v2219_v53 = vsel %vm533_vm14, %v2215_v50, %v2216_v30 }
 0x761   : > { %v2220_v57 = vsel %vm622_vm1, %v2210_v49, %v2219_v53  ;;  %v3032_v58 = vld [vmem:[#allocation3 + $0x74] sm:$0xf0]  ;;  %v2937_v62 = vld [vmem:[#allocation3 + $0x78] sm:$0xf0]  ;;  %v2325_v49 = vrot.slane %v3741_v45, 4 }
 0x762   : > { %2224 = vst [vmem:[#allocation3 + $0x48] sm:$0xff] %v2220_v57  ;;  %v2936_v63 = vor.u32 %v3032_v58, %v2935_v55  ;;  %v2940_v0 = vor.u32 %v3031_v59, %v2937_v62  ;;  %v3021_v57 = vld [vmem:[#allocation3 + $0x24] sm:$0xf] }
 0x764   : > { %2459 = vmatpush.bf16.msrb.mxu3 %v2936_v63  ;;  %2487 = vmatpush.bf16.msrb.mxu1 %v2940_v0  ;;  %v2154_v3 = vpop.permute.xlu0 %2153 }
 0x765   : > { %v2240_v27 = vpop.permute.xlu1 %2239  ;;  %v2159_v32 = vrot.slane %v2154_v3, 4 }
 0x766   : > { %v2244_v44 = vrot.slane %v2240_v27, 4 }
 0x768   : > { %v2247_v7 = vsel %vm533_vm14, %v2243_v43, %v2244_v44  ;;  %2460 = vmatpush.bf16.msrb.mxu3 %v2928_v4  ;;  %2488 = vmatpush.bf16.msrb.mxu1 %v2932_v5  ;;  %v3017_v43 = vld [vmem:[#allocation3 + $0x4] sm:$0xf]  ;;  %v3016_v44 = vld [vmem:[%s3789_s6 + $0x4] sm:$0xf0]  ;;  %v3015_v5 = vld [vmem:[%s3789_s6 + $0x4] sm:$0xf] }
 0x769   : > { %v2248_v52 = vsel %vm651_vm3, %v2238_v38, %v2247_v7  ;;  %v3026_v28 = vld [vmem:[#allocation3 + $0x44] sm:$0xf0]  ;;  %v2913_v29 = vld [vmem:[#allocation3 + $0x48] sm:$0xf0]  ;;  %v2873_v7 = vld [vmem:[%s3789_s6 + $0x8] sm:$0xf0] }
 0x76a   : > { %2252 = vst [vmem:[#allocation3 + $0x58] sm:$0xff] %v2248_v52  ;;  %v2912_v34 = vor.u32 %v3026_v28, %v2911_v56  ;;  %v2916_v35 = vor.u32 %v3025_v31, %v2913_v29 }
 0x76c   : > { %v2324_v9 = vpop.permute.xlu0 %2323 }
 0x76d   : > { %v2126_v47 = vpop.permute.xlu1 %2125  ;;  %v2328_v13 = vrot.slane %v2324_v9, 4 }
 0x76e   : > { %v2131_v6 = vrot.slane %v2126_v47, 4 }
 0x76f   : > { %v2331_v15 = vsel %vm533_vm14, %v2327_v12, %v2328_v13  ;;  %v2880_v12 = vor.u32 %v3018_v24, %v2879_v23  ;;  %v2881_v13 = vld [vmem:[#allocation3 + $0x8] sm:$0xf0] }
 0x770   : > { %v2135_v16 = vsel %vm533_vm14, %v2131_v6, %v2132_v14  ;;  %v2332_v18 = vsel %vm738_vm4, %v2322_v11, %v2331_v15  ;;  %v2884_v6 = vor.u32 %v3017_v43, %v2881_v13 }
 0x771   : > { %v2136_v19 = vsel %vm535_vm7, %v2126_v47, %v2135_v16  ;;  %2336 = vst [vmem:[#allocation3 + $0x88] sm:$0xff] %v2332_v18  ;;  %v3028_v22 = vld [vmem:[#allocation3 + $0x54] sm:$0xf0]  ;;  %v2921_v60 = vld [vmem:[#allocation3 + $0x58] sm:$0xf0]  ;;  %v2876_v16 = vor.u32 %v3015_v5, %v2873_v7 }
 0x772   : > { %2140 = vst [vmem:[#allocation3 + $0x18] sm:$0xff] %v2136_v19  ;;  %v2920_v25 = vor.u32 %v3028_v22, %v2919_v17  ;;  %v2924_v26 = vor.u32 %v3027_v21, %v2921_v60 }
 0x774   : > { %2461 = vmatpush.bf16.msrb.mxu3 %v2920_v25  ;;  %2489 = vmatpush.bf16.msrb.mxu1 %v2924_v26  ;;  %v2536_v28 = vpop.permute.xlu0 %2535 }
 0x775   : > { %v2156_v20 = vpop.permute.xlu1 %2155 }
 0x776   : > { %v2160_v33 = vrot.slane %v2156_v20, 4 }
 0x778   : > { %v2163_v37 = vsel %vm533_vm14, %v2159_v32, %v2160_v33  ;;  %2462 = vmatpush.bf16.msrb.mxu3 %v2912_v34  ;;  %2490 = vmatpush.bf16.msrb.mxu1 %v2916_v35  ;;  %v3034_v4 = vld [vmem:[#allocation3 + $0x84] sm:$0xf0]  ;;  %v2945_v9 = vld [vmem:[#allocation3 + $0x88] sm:$0xf0]  ;;  %v2525_v34 = vpop.permute.xlu2 %2524 }
 0x779   : > { %v2164_v38 = vsel %vm564_vm6, %v2154_v3, %v2163_v37  ;;  %v3020_v63 = vld [vmem:[#allocation3 + $0x14] sm:$0xf0]  ;;  %v2889_v0 = vld [vmem:[#allocation3 + $0x18] sm:$0xf0] }
 0x77a   : > { %2168 = vst [vmem:[#allocation3 + $0x28] sm:$0xff] %v2164_v38  ;;  %v2888_v3 = vor.u32 %v3020_v63, %v2887_v61  ;;  %v2892_v27 = vor.u32 %v3019_v1, %v2889_v0 }
 0x77c   : > { %2463 = vmatpush.bf16.msrb.mxu3 %v2904_v42  ;;  %2491 = vmatpush.bf16.msrb.mxu1 %v2908_v46 }
 0x77d   : > { %v2320_v48 = vpop.permute.xlu1 %2319 }
 0x77e   : > { %v2326_v30 = vrot.slane %v2320_v48, 4 }
 0x780   : > { %v2329_v50 = vsel %vm533_vm14, %v2325_v49, %v2326_v30 }
 0x781   : > { %v2330_v53 = vsel %vm738_vm4, %v3741_v45, %v2329_v50  ;;  %v3022_v55 = vld [vmem:[#allocation3 + $0x24] sm:$0xf0]  ;;  %v2897_v58 = vld [vmem:[#allocation3 + $0x28] sm:$0xf0]  ;;  %v2871_v45 = vld [vmem:[%s3789_s6] sm:$0xf] }
 0x782   : > { %2335 = vst [vmem:[#allocation3 + $0x80] sm:$0xff] %v2330_v53  ;;  %v2896_v59 = vor.u32 %v3022_v55, %v2895_v51  ;;  %v2900_v62 = vor.u32 %v3021_v57, %v2897_v58  ;;  %v2872_v15 = vor.u32 %v3016_v44, %v2871_v45 }
 0x784   : > { %2464 = vmatpush.bf16.msrb.mxu3 %v2896_v59  ;;  %2492 = vmatpush.bf16.msrb.mxu1 %v2900_v62 }
 0x785   : > { %v2520_v19 = vpop.permute.xlu1 %2519 }
 0x788   : > { %2465 = vmatpush.bf16.msrb.mxu3 %v2888_v3  ;;  %2493 = vmatpush.bf16.msrb.mxu1 %v2892_v27 }
 0x789   : > { %v2943_v52 = vld [vmem:[#allocation3 + $0x80] sm:$0xf]  ;;  %v3033_v11 = vld [vmem:[#allocation3 + $0x84] sm:$0xf] }
 0x78a   : > { %v2944_v47 = vor.u32 %v3034_v4, %v2943_v52  ;;  %v2948_v14 = vor.u32 %v3033_v11, %v2945_v9 }
 0x78c   : > { %2466 = vmatpush.bf16.msrb.mxu3 %v2880_v12  ;;  %2480 = vmatpush.bf16.msrb.mxu2 %v2944_v47 }
 0x78d   : > { %2494 = vmatpush.bf16.msrb.mxu1 %v2884_v6  ;;  %2508 = vmatpush.bf16.msrb.mxu0 %v2948_v14  ;;  %v2541_v42 = vpop.permute.xlu1 %2540 }
 0x78f   : > { %2467 = vmatmul.bf16.vlgmr.msrb.gmra.mxu3 %v2872_v15  ;;  %2949 = vmatmul.msk.bf16.vlgmr.msrb.gmra.mxu2 %vm865_vm8, %v2876_v16 }
 0x790   : > { %2495 = vmatmul.bf16.vlgmr.msrb.gmra.mxu1 %v2872_v15  ;;  %2950 = vmatmul.msk.bf16.vlgmr.msrb.gmra.mxu0 %vm865_vm8, %v2876_v16 }
 0x80d   : > { %v2496_v18 = vpop.f32.mrf.mxu1  ;;  %v2510_v17 = vpop.f32.mrf.mxu0 }
 0x80e   : > { %v2511_v21 = vadd.f32 %v2510_v17, %v2496_v18 }
 0x810   : > { %v2528_v22 = vmul.f32 %v2520_v19, %v2511_v21 }
 0x812   : > { %v2468_v60 = vpop.f32.mrf.mxu3  ;;  %v2482_v25 = vpop.f32.mrf.mxu2  ;;  %v2544_v29 = vadd.f32 %v2536_v28, %v2528_v22 }
 0x813   : > { %v2483_v26 = vadd.f32 %v2482_v25, %v2468_v60 }
 0x814   : > { %v2548_v35 = vadd.f32 %v2544_v29, %v3495_v10 }
 0x815   : > { %v2527_v20 = vmul.f32 %v2520_v19, %v2483_v26  ;;  %v2498_v56 = vpop.f32.mrf.mxu1  ;;  %v2512_v31 = vpop.f32.mrf.mxu0 }
 0x816   : > { %v2513_v32 = vadd.f32 %v2512_v31, %v2498_v56 }
 0x817   : > { %v2543_v33 = vadd.f32 %v2536_v28, %v2527_v20 }
 0x818   : > { %v2530_v2 = vmul.f32 %v2525_v34, %v2513_v32 }
 0x819   : > { %v2547_v36 = vadd.f32 %v2543_v33, %v3486_v40 }
 0x81a   : > { %v2470_v37 = vpop.f32.mrf.mxu3  ;;  %v2484_v38 = vpop.f32.mrf.mxu2  ;;  %v2546_v46 = vadd.f32 %v2541_v42, %v2530_v2 }
 0x81b   : > { %v2551_v39 = vpack.c.bf16 %v2548_v35, %v2547_v36  ;;  %v2485_v41 = vadd.f32 %v2484_v38, %v2470_v37 }
 0x81c   : > { %v2550_v30 = vadd.f32 %v2546_v46, %v3501_v8 }
 0x81d   : > { %2553 = vst [vmem:[%s332_s23] sm:$0xff] %v2551_v39  ;;  %v2529_v48 = vmul.f32 %v2525_v34, %v2485_v41 }
 0x81f   : > { %v2545_v49 = vadd.f32 %v2541_v42, %v2529_v48 }
 0x821   : > { %v2549_v10 = vadd.f32 %v2545_v49, %v3491_v54 }
 0x823   : > { %v2552_v40 = vpack.c.bf16 %v2550_v30, %v2549_v10 }
 0x825   : > { %2554 = vst [vmem:[%s332_s23 + $0x8] sm:$0xff] %v2552_v40 }
 0x826 PF: > { %s19_s30 = sadd.s32 1, %s3063_s30  }
 0x827   : > { %p16_p4 = scmp.ge.s32.totalorder %s19_s30, 4  }
 0x829   :  { %18 = sbr.rel (!%p16_p4) target bundleno = 1 (0x1), region = 86 }

// kernel: generator_x2_interpolate_forward.5
= control target key start
LH: loop header
LB: loop body
LE: loop exit
PB: predicated region body
PF: predicated region fallthrough
CT: control target
= control target key end

     0   :  { %s5881_s17 = smov 0   ;;  %s8120_s0 = inlined_call_operand.vmem [shape: bf16[2,16,1024], index: 0, kind: input, shape index: {}]   ;;  %s8121_s1 = inlined_call_operand.vmem [shape: bf16[16,144], index: 1, kind: input, shape index: {}]   ;;  %s8122_s2 = inlined_call_operand.vmem [shape: f32[16,1], index: 2, kind: input, shape index: {}]   ;;  %s8123_s3 = inlined_call_operand.vmem [shape: f32[16,1], index: 3, kind: input, shape index: {}]   ;;  %s8124_s4 = inlined_call_operand.vmem [shape: bf16[8,144], index: 4, kind: input, shape index: {}]   ;;  %s8125_s5 = inlined_call_operand.vmem [shape: f32[8,1], index: 5, kind: input, shape index: {}]   ;;  %s8126_s6 = inlined_call_operand.vmem [shape: f32[8,1], index: 6, kind: input, shape index: {}]   ;;  %s8127_s7 = inlined_call_operand.vmem [shape: bf16[1,72], index: 7, kind: input, shape index: {}]   ;;  %s8128_s8 = inlined_call_operand.<no memory space> [shape: f32[1,1], index: 8, kind: input, shape index: {}]   ;;  %s8129_s10 = inlined_call_operand.vmem [shape: f32[2,1,1024], index: 10, kind: output, shape index: {}]   ;;  %s8130_s9 = inlined_call_operand.<no memory space> [shape: f32[1,1], index: 9, kind: input, shape index: {}]  }
   0x1   :  { %v15_v0 = vstv %s8128_s8  ;;  %v17_v1 = vstv %s8130_s9 }
   0x2   :  { %16 = vst [vmem:[#allocation4] sm:$0x1] %v15_v0 }
   0x3   :  { %18 = vst [vmem:[#allocation5] sm:$0x1] %v17_v1 }
   0x4 LB: > { %s4822_s18 = sadd.s32 4294967295, %s5807_s17   ;;  %p4826_p0 = scmp.ge.s32.totalorder %s5807_s17, 1  ;;  %s5807_s17 = sphi %s5881_s17, %s24_s17  }
   0x5   : > { %p316_p1 = scmp.lt.s32.totalorder %s5807_s17, 3 }
   0x7   : > { %p317_p2 = pnand %p4826_p0, %p316_p1 }
   0x8   : > { %p353_p3 = scmp.lt.s32.totalorder (!%p317_p2), %s4822_s18, 1  ;;  %s5809_s21 = smov (!%p317_p2), 33  }
   0x9   : > { %320 = sbr.rel (%p317_p2) target bundleno = 1606 (0x646), region = 60  ;;  %s5812_s22 = smov (!%p317_p2), 95  }
   0xa   : > { %s5813_s23 = smov (!%p317_p2), 63   ;;  %s5814_s24 = smov (!%p317_p2), 64  }
   0xb   : > { %s5815_s25 = smov (!%p317_p2), 94   ;;  %s5816_s26 = smov (!%p317_p2), 62  }
   0xc   : > { %s5817_s27 = smov (!%p317_p2), 96   ;;  %s5818_s28 = smov (!%p317_p2), 126  }
   0xd   : > { %s5819_s29 = smov (!%p317_p2), 127  }
   0xe   : > { %v377_v2 = vlaneseq  ;;  %s8186_s18 = smov (!%p353_p3, %s4822_s18), 1  ;;  %v5810_v23 = vmov 0.0  }
   0xf   : > { %s5584_s8 = sshll.u32 %s8186_s18, 6 }
  0x10   : > { %v5891_v3 = vand.u32 127, %v377_v2  ;;  %s5906_s20 = scalar_lea.vmem %s8120_s0, %s5584_s8 }
  0x11   : > { %v5912_v8 = vld [vmem:[%s5906_s20 + $0x28] sm:$0xff]  ;;  %v5915_v9 = vld [vmem:[%s5906_s20 + $0x10] sm:$0xff]  ;;  %v5918_v10 = vld [vmem:[%s5906_s20] sm:$0xff] }
  0x12   : > { %v5895_v4 = vadd.s32 512, %v5891_v3  ;;  %v5898_v5 = vadd.s32 640, %v5891_v3  ;;  %v5901_v6 = vadd.s32 256, %v5891_v3  ;;  %v5909_v7 = vadd.s32 384, %v5891_v3  ;;  %667 = vrot.lane.b32.xlu2 %v5912_v8, %s5809_s21  ;;  %661 = vrot.lane.b32.xlu1 %v5915_v9, %s5809_s21  ;;  %v5935_v19 = vld [vmem:[%s5906_s20 + $0x8] sm:$0xff]  ;;  %v5949_v27 = vld [vmem:[%s5906_s20 + $0x30] sm:$0xff] }
  0x13   : > { %v379_v14 = vadd.s32 128, %v5891_v3  ;;  %657 = vrot.lane.b32.xlu0 %v5918_v10, %s5809_s21  ;;  %v542_v15 = vunpack.c.l.bf16 %v5915_v9  ;;  %v543_v16 = vunpack.c.h.bf16 %v5915_v9  ;;  %v538_v17 = vunpack.c.l.bf16 %v5918_v10  ;;  %v534_v28 = vld [vmem:[%s5906_s20 + $0x20] sm:$0xff] }
  0x14   : > { %v418_v11 = vand.u32 31, %v5895_v4  ;;  %v425_v12 = vand.u32 31, %v5898_v5  ;;  %v404_v13 = vand.u32 31, %v5901_v6  ;;  %v390_v18 = vand.u32 31, %v5891_v3 }
  0x15   : > { %v411_v20 = vand.u32 31, %v5909_v7  ;;  %v540_v21 = vunpack.c.l.bf16 %v5935_v19  ;;  %v541_v22 = vunpack.c.h.bf16 %v5935_v19  ;;  %v397_v25 = vand.u32 31, %v379_v14 }
  0x16   : > { %vm486_vm0 = vcmp.ne.s32.totalorder %v418_v11, 31  ;;  %vm487_vm1 = vcmp.ne.s32.totalorder %v425_v12, 31  ;;  %vm484_vm2 = vcmp.ne.s32.totalorder %v404_v13, 31  ;;  %v539_v26 = vunpack.c.h.bf16 %v5918_v10 }
  0x17   : > { %v5945_v24 = vsel %vm486_vm0, 1.0, %v5810_v23  ;;  %v5953_v29 = vsel %vm487_vm1, 1.0, %v5810_v23  ;;  %vm485_vm3 = vcmp.ne.s32.totalorder %v411_v20, 31  ;;  %v5956_v30 = vsel %vm484_vm2, 1.0, %v5810_v23 }
  0x18   : > { %v5959_v31 = vsel %vm485_vm3, 1.0, %v5810_v23  ;;  %vm482_vm4 = vcmp.ne.s32.totalorder %v390_v18, 31  ;;  %vm483_vm5 = vcmp.ne.s32.totalorder %v397_v25, 31  ;;  %v558_v32 = vmul.f32 %v5945_v24, %v542_v15 }
  0x19   : > { %v5965_v33 = vsel %vm482_vm4, 1.0, %v5810_v23  ;;  %v5968_v34 = vsel %vm483_vm5, 1.0, %v5810_v23  ;;  %v559_v35 = vmul.f32 %v5953_v29, %v543_v16  ;;  %v556_v36 = vmul.f32 %v5956_v30, %v540_v21 }
  0x1a   : > { %669 = vrot.lane.b32.xlu2 %v5949_v27, %s5809_s21  ;;  %665 = vrot.lane.b32.xlu1 %v534_v28, %s5809_s21  ;;  %v557_v37 = vmul.f32 %v5959_v31, %v541_v22  ;;  %v554_v38 = vmul.f32 %v5965_v33, %v538_v17  ;;  %v555_v39 = vmul.f32 %v5968_v34, %v539_v26  ;;  %v548_v40 = vunpack.c.l.bf16 %v5912_v8 }
  0x1b   : > { %659 = vrot.lane.b32.xlu0 %v5935_v19, %s5809_s21  ;;  %v550_v41 = vunpack.c.l.bf16 %v5949_v27  ;;  %v549_v42 = vunpack.c.h.bf16 %v5912_v8  ;;  %v551_v43 = vunpack.c.h.bf16 %v5949_v27  ;;  %v572_v44 = vpack.c.bf16 %v559_v35, %v558_v32 }
  0x1c   : > { %v571_v45 = vpack.c.bf16 %v557_v37, %v556_v36  ;;  %v546_v46 = vunpack.c.l.bf16 %v534_v28  ;;  %v547_v47 = vunpack.c.h.bf16 %v534_v28  ;;  %v570_v48 = vpack.c.bf16 %v555_v39, %v554_v38  ;;  %v537_v37 = vld [vmem:[%s5906_s20 + $0x38] sm:$0xff] }
  0x1d   : > { %v566_v49 = vmul.f32 %v5945_v24, %v550_v41  ;;  %v567_v50 = vmul.f32 %v5953_v29, %v551_v43  ;;  %v564_v51 = vmul.f32 %v5956_v30, %v548_v40  ;;  %v565_v52 = vmul.f32 %v5959_v31, %v549_v42 }
  0x1e   : > { %v562_v53 = vmul.f32 %v5965_v33, %v546_v46  ;;  %v563_v54 = vmul.f32 %v5968_v34, %v547_v47  ;;  %vm506_vm6 = vcmp.ne.s32.totalorder %v390_v18, 0  ;;  %vm507_vm7 = vcmp.ne.s32.totalorder %v397_v25, 0 }
  0x1f   : > { %vm508_vm8 = vcmp.ne.s32.totalorder %v404_v13, 0  ;;  %vm509_vm9 = vcmp.ne.s32.totalorder %v411_v20, 0  ;;  %v576_v55 = vpack.c.bf16 %v567_v50, %v566_v49  ;;  %v575_v56 = vpack.c.bf16 %v565_v52, %v564_v51 }
  0x20   : > { %v5998_v57 = vsel %vm506_vm6, 1.0, %v5810_v23  ;;  %v574_v58 = vpack.c.bf16 %v563_v54, %v562_v53  ;;  %v6001_v59 = vsel %vm507_vm7, 1.0, %v5810_v23  ;;  %v6004_v60 = vsel %vm508_vm8, 1.0, %v5810_v23 }
  0x21   : > { %v6007_v61 = vsel %vm509_vm9, 1.0, %v5810_v23  ;;  %v723_v62 = vmul.f32 %v5998_v57, %v546_v46  ;;  %v724_v63 = vmul.f32 %v6001_v59, %v547_v47  ;;  %v717_v0 = vmul.f32 %v6004_v60, %v540_v21 }
  0x22   : > { %590 = vrot.lane.b32.xlu2 %v572_v44, %s5809_s21  ;;  %588 = vrot.lane.b32.xlu1 %v571_v45, %s5809_s21  ;;  %v718_v1 = vmul.f32 %v6007_v61, %v541_v22  ;;  %v715_v2 = vmul.f32 %v5998_v57, %v538_v17  ;;  %v716_v6 = vmul.f32 %v6001_v59, %v539_v26  ;;  %vm510_vm10 = vcmp.ne.s32.totalorder %v418_v11, 0  ;;  %v533_v22 = vld [vmem:[%s5906_s20 + $0x18] sm:$0xff] }
  0x23   : > { %586 = vrot.lane.b32.xlu0 %v570_v48, %s5809_s21  ;;  %vm511_vm11 = vcmp.ne.s32.totalorder %v425_v12, 0  ;;  %v384_v7 = vadd.s32 768, %v5891_v3  ;;  %v385_v8 = vadd.s32 896, %v5891_v3  ;;  %v735_v13 = vpack.c.bf16 %v724_v63, %v723_v62 }
  0x24   : > { %v732_v14 = vpack.c.bf16 %v718_v1, %v717_v0  ;;  %v6027_v18 = vsel %vm510_vm10, 1.0, %v5810_v23  ;;  %v731_v10 = vpack.c.bf16 %v716_v6, %v715_v2  ;;  %v6030_v17 = vsel %vm511_vm11, 1.0, %v5810_v23 }
  0x25   : > { %v432_v19 = vand.u32 31, %v384_v7  ;;  %v439_v4 = vand.u32 31, %v385_v8  ;;  %v727_v11 = vmul.f32 %v6027_v18, %v550_v41  ;;  %v728_v3 = vmul.f32 %v6030_v17, %v551_v43 }
  0x26   : > { %v719_v5 = vmul.f32 %v6027_v18, %v542_v15  ;;  %v720_v12 = vmul.f32 %v6030_v17, %v543_v16  ;;  %v725_v20 = vmul.f32 %v6004_v60, %v548_v40  ;;  %v726_v21 = vmul.f32 %v6007_v61, %v549_v42 }
  0x27   : > { %vm488_vm12 = vcmp.ne.s32.totalorder %v432_v19, 31  ;;  %vm489_vm13 = vcmp.ne.s32.totalorder %v439_v4, 31  ;;  %v737_v25 = vpack.c.bf16 %v728_v3, %v727_v11  ;;  %v544_v27 = vunpack.c.l.bf16 %v533_v22 }
  0x28   : > { %v733_v26 = vpack.c.bf16 %v720_v12, %v719_v5  ;;  %v545_v28 = vunpack.c.h.bf16 %v533_v22  ;;  %v736_v32 = vpack.c.bf16 %v726_v21, %v725_v20  ;;  %v6047_v15 = vsel %vm488_vm12, 1.0, %v5810_v23 }
  0x29   : > { %v6050_v9 = vsel %vm489_vm13, 1.0, %v5810_v23  ;;  %v560_v16 = vmul.f32 %v6047_v15, %v544_v27  ;;  %vm512_vm14 = vcmp.ne.s32.totalorder %v432_v19, 0  ;;  %vm513_vm15 = vcmp.ne.s32.totalorder %v439_v4, 0 }
  0x2a   : > { %598 = vrot.lane.b32.xlu2 %v576_v55, %s5809_s21  ;;  %596 = vrot.lane.b32.xlu1 %v575_v56, %s5809_s21  ;;  %v561_v35 = vmul.f32 %v6050_v9, %v545_v28  ;;  %v552_v38 = vunpack.c.l.bf16 %v537_v37  ;;  %v553_v39 = vunpack.c.h.bf16 %v537_v37  ;;  %v6059_v40 = vsel %vm512_vm14, 1.0, %v5810_v23 }
  0x2b   : > { %594 = vrot.lane.b32.xlu0 %v574_v58, %s5809_s21  ;;  %v6062_v41 = vsel %vm513_vm15, 1.0, %v5810_v23  ;;  %v721_v42 = vmul.f32 %v6059_v40, %v544_v27  ;;  %vm363_vm0 = vcmask 265216   ;;  %v5811_v50 = vmov 0  }
  0x2c   : > { %v573_v36 = vpack.c.bf16 %v561_v35, %v560_v16  ;;  %v722_v43 = vmul.f32 %v6062_v41, %v545_v28  ;;  %v568_v44 = vmul.f32 %v6047_v15, %v552_v38  ;;  %v569_v45 = vmul.f32 %v6050_v9, %v553_v39  ;;  %366 = vst.msk [vmem:[#allocation2 + $0x48] sm:$0xf] %vm363_vm0, %v5811_v50 }
  0x2d   : > { %v729_v23 = vmul.f32 %v6059_v40, %v552_v38  ;;  %v730_v48 = vmul.f32 %v6062_v41, %v553_v39  ;;  %5784 = vset.pattern.permute.xlu1 %v5811_v50  ;;  %5783 = vset.pattern.permute.xlu0 %v5811_v50  ;;  %364 = vst.msk [vmem:[#allocation2] sm:$0xf] %vm363_vm0, %v5811_v50  ;;  %vm370_vm1 = vcmask 535816   ;;  %vm636_vm2 = vcmask 1043720  }
  0x2e   : > { %v734_v46 = vpack.c.bf16 %v722_v43, %v721_v42  ;;  %v577_v47 = vpack.c.bf16 %v569_v45, %v568_v44  ;;  %5782 = vset.pattern.permute.xlu2 %v5811_v50  ;;  %365 = vst.msk [vmem:[#allocation2 + $0x24] sm:$0xf] %vm363_vm0, %v5811_v50  ;;  %vm637_vm3 = vcmask 1047556   ;;  %vm610_vm4 = vcmask 269312  }
  0x2f   : > { %v738_v49 = vpack.c.bf16 %v730_v48, %v729_v23  ;;  %367 = vst.msk [vmem:[#allocation2 + $0x6c] sm:$0xf] %vm363_vm0, %v5811_v50  ;;  %vm6092_vm5 = vmor %vm637_vm3, %vm636_vm2  ;;  %vm612_vm6 = vcmask 1043456   ;;  %vm1121_vm7 = vcmask 777216   ;;  %vm1370_vm8 = vcmask 515072  }
  0x30   : > { %368 = vst.msk [vmem:[#allocation2 + $0x90] sm:$0xf] %vm363_vm0, %v5811_v50  ;;  %vm1204_vm9 = vcmask 769024   ;;  %vm1038_vm10 = vcmask 785408   ;;  %vm1287_vm11 = vcmask 523264   ;;  %vm1453_vm12 = vcmask 506880  }
  0x31   : > { %369 = vst.msk [vmem:[#allocation2 + $0xb4] sm:$0xf] %vm363_vm0, %v5811_v50  ;;  %vm8139_vm13 = vcmask 130048   ;;  %vm955_vm14 = vcmask 1031168   ;;  %vm872_vm15 = vcmask 1039360  }
  0x32   : > { %755 = vrot.lane.b32.xlu2 %v735_v13, %s5809_s21  ;;  %749 = vrot.lane.b32.xlu1 %v732_v14, %s5809_s21  ;;  %371 = vst.msk [vmem:[#allocation2 + $0x20] sm:$0xf] %vm370_vm1, %v5811_v50 }
  0x33   : > { %747 = vrot.lane.b32.xlu0 %v731_v10, %s5809_s21  ;;  %372 = vst.msk [vmem:[#allocation2 + $0x44] sm:$0xf] %vm370_vm1, %v5811_v50 }
  0x34   : > { %373 = vst.msk [vmem:[#allocation2 + $0x68] sm:$0xf] %vm370_vm1, %v5811_v50 }
  0x35   : > { %374 = vst.msk [vmem:[#allocation2 + $0x8c] sm:$0xf] %vm370_vm1, %v5811_v50 }
  0x36   : > { %375 = vst.msk [vmem:[#allocation2 + $0xb0] sm:$0xf] %vm370_vm1, %v5811_v50 }
  0x37   : > { %376 = vst.msk [vmem:[#allocation2 + $0xd4] sm:$0xf] %vm370_vm1, %v5811_v50 }
  0x3a   : > { %759 = vrot.lane.b32.xlu2 %v737_v25, %s5809_s21  ;;  %751 = vrot.lane.b32.xlu1 %v733_v26, %s5809_s21 }
  0x3b   : > { %757 = vrot.lane.b32.xlu0 %v736_v32, %s5809_s21 }
  0x42   : > { %592 = vrot.lane.b32.xlu2 %v573_v36, %s5809_s21  ;;  %671 = vrot.lane.b32.xlu1 %v537_v37, %s5809_s21 }
  0x43   : > { %663 = vrot.lane.b32.xlu0 %v533_v22, %s5809_s21 }
  0x4a   : > { %753 = vrot.lane.b32.xlu1 %v734_v46, %s5809_s21  ;;  %761 = vrot.lane.b32.xlu2 %v738_v49, %s5809_s21 }
  0x4b   : > { %600 = vrot.lane.b32.xlu0 %v577_v47, %s5809_s21 }
  0x6c   : > { %v6082_v51 = vpop.permute.xlu2 %667 }
  0x6d   : > { %v678_v3 = vrot.slane %v6082_v51, 4 }
  0x74   : > { %v6084_v52 = vpop.permute.xlu2 %669 }
  0x75   : > { %v679_v5 = vrot.slane %v6084_v52, 4 }
  0x77   : > { %v691_v26 = vsel %vm612_vm6, %v678_v3, %v679_v5 }
  0x78   : > { %v6152_v37 = vsel %vm610_vm4, %v691_v26, %v6084_v52 }
  0x7c   : > { %v6086_v53 = vpop.permute.xlu2 %590 }
  0x7d   : > { %v604_v12 = vrot.slane %v6086_v53, 4 }
  0x84   : > { %v6088_v54 = vpop.permute.xlu1 %661  ;;  %v6090_v55 = vpop.permute.xlu2 %598 }
  0x85   : > { %v658_v56 = vpop.permute.xlu0 %657  ;;  %v675_v8 = vrot.slane %v6088_v54, 4  ;;  %v608_v39 = vrot.slane %v6090_v55, 4 }
  0x86   : > { %v673_v62 = vrot.slane %v658_v56, 4 }
  0x88   : > { %v681_v63 = vsel %vm610_vm4, %v673_v62, %v658_v56 }
  0x89   : > { %705 = vst.msk [vmem:[#allocation2 + $0x48] sm:$0xff] %vm6092_vm5, %v681_v63 }
  0x8c   : > { %v6099_v0 = vpop.permute.xlu1 %665  ;;  %v6101_v1 = vpop.permute.xlu2 %755 }
  0x8d   : > { %v677_v2 = vrot.slane %v6099_v0, 4  ;;  %v767_v6 = vrot.slane %v6101_v1, 4  ;;  %v660_v7 = vpop.permute.xlu0 %659 }
  0x8e   : > { %v674_v13 = vrot.slane %v660_v7, 4 }
  0x8f   : > { %v688_v14 = vsel %vm610_vm4, %v677_v2, %v6099_v0  ;;  %v778_v10 = vsel %vm610_vm4, %v767_v6, %v6101_v1 }
  0x90   : > { %710 = vst.msk [vmem:[#allocation2 + $0x6c] sm:$0xff] %vm6092_vm5, %v688_v14  ;;  %v684_v19 = vsel %vm612_vm6, %v674_v13, %v675_v8  ;;  %v6119_v4 = vld [vmem:[#allocation2 + $0x48] sm:$0xff]  ;;  %v682_v42 = vsel %vm612_vm6, %v673_v62, %v674_v13 }
  0x91   : > { %800 = vst.msk [vmem:[#allocation2 + $0xb4] sm:$0xff] %vm6092_vm5, %v778_v10  ;;  %v6125_v11 = vsel %vm610_vm4, %v684_v19, %v6088_v54  ;;  %1090 = vrot.lane.b32.xlu1 %v6119_v4, %s5812_s22  ;;  %1339 = vrot.lane.b32.xlu0 %v6119_v4, %s5813_s23  ;;  %v6170_v48 = vsel %vm610_vm4, %v682_v42, %v660_v7 }
  0x92   : > { %1343 = vrot.lane.b32.xlu2 %v6125_v11, %s5813_s23 }
  0x94   : > { %v6136_v20 = vpop.permute.xlu2 %759  ;;  %v589_v21 = vpop.permute.xlu1 %588 }
  0x95   : > { %v603_v22 = vrot.slane %v589_v21, 4  ;;  %v587_v25 = vpop.permute.xlu0 %586 }
  0x96   : > { %v602_v27 = vrot.slane %v587_v25, 4 }
  0x97   : > { %v615_v28 = vsel %vm612_vm6, %v603_v22, %v604_v12  ;;  %v6142_v32 = vld [vmem:[#allocation2 + $0x6c] sm:$0xff] }
  0x98   : > { %v6146_v16 = vsel %vm610_vm4, %v615_v28, %v6086_v53  ;;  %v611_v35 = vsel %vm610_vm4, %v602_v27, %v587_v25  ;;  %v613_v36 = vsel %vm612_vm6, %v602_v27, %v603_v22  ;;  %v769_v27 = vrot.slane %v6136_v20, 4 }
  0x99   : > { %641 = vst [vmem:[#allocation2 + $0x10] sm:$0xff] %v6146_v16  ;;  %v6156_v38 = vsel %vm610_vm4, %v613_v36, %v589_v21  ;;  %1100 = vrot.lane.b32.xlu1 %v6142_v32, %s5812_s22  ;;  %1349 = vrot.lane.b32.xlu0 %v6142_v32, %s5813_s23 }
  0x9a   : > { %639 = vst.msk [vmem:[#allocation2] sm:$0xff] %vm6092_vm5, %v611_v35  ;;  %1353 = vrot.lane.b32.xlu2 %v6152_v37, %s5813_s23 }
  0x9b   : > { %640 = vst [vmem:[#allocation2 + $0x8] sm:$0xff] %v6156_v38 }
  0x9c   : > { %v593_v43 = vpop.permute.xlu2 %592  ;;  %v597_v44 = vpop.permute.xlu1 %596 }
  0x9d   : > { %v605_v45 = vrot.slane %v593_v43, 4  ;;  %v607_v46 = vrot.slane %v597_v44, 4  ;;  %v595_v47 = vpop.permute.xlu0 %594 }
  0x9e   : > { %v606_v23 = vrot.slane %v595_v47, 4 }
  0x9f   : > { %v617_v49 = vsel %vm612_vm6, %v604_v12, %v605_v45  ;;  %643 = vst.msk [vmem:[#allocation2 + $0x20] sm:$0xf] %vm363_vm0, %v605_v45  ;;  %v622_v50 = vsel %vm612_vm6, %v607_v46, %v608_v39  ;;  %v689_v12 = vsel %vm612_vm6, %v677_v2, %v678_v3 }
  0xa0   : > { %v6178_v53 = vsel %vm610_vm4, %v617_v49, %v593_v43  ;;  %v6182_v56 = vsel %vm610_vm4, %v622_v50, %v6090_v55  ;;  %v619_v62 = vsel %vm610_vm4, %v606_v23, %v595_v47  ;;  %v620_v63 = vsel %vm612_vm6, %v606_v23, %v607_v46  ;;  %v807_v19 = vld [vmem:[#allocation2 + $0x10] sm:$0xff] }
  0xa1   : > { %816 = vst [vmem:[#allocation3 + $0x18] sm:$0xff] %v6178_v53  ;;  %v6188_v7 = vsel %vm610_vm4, %v620_v63, %v597_v44  ;;  %1341 = vrot.lane.b32.xlu1 %v6170_v48, %s5813_s23  ;;  %1094 = vrot.lane.b32.xlu0 %v6125_v11, %s5812_s22  ;;  %v805_v13 = vld [vmem:[#allocation2] sm:$0xff]  ;;  %v6210_v25 = vsel %vm610_vm4, %v689_v12, %v6082_v51  ;;  %v1158_v43 = vld [vmem:[#allocation2 + $0xb4] sm:$0xff] }
  0xa2   : > { %646 = vst [vmem:[#allocation2 + $0x34] sm:$0xff] %v6182_v56  ;;  %1092 = vrot.lane.b32.xlu2 %v6170_v48, %s5812_s22  ;;  %v806_v14 = vld [vmem:[#allocation2 + $0x8] sm:$0xff]  ;;  %v1236_v44 = vld [vmem:[#allocation2] sm:$0xff] }
  0xa3   : > { %644 = vst.msk [vmem:[#allocation2 + $0x24] sm:$0xff] %vm6092_vm5, %v619_v62 }
  0xa4   : > { %645 = vst [vmem:[#allocation2 + $0x2c] sm:$0xff] %v6188_v7  ;;  %v6200_v10 = vpop.permute.xlu1 %749  ;;  %v6222_v51 = vpop.permute.xlu2 %761 }
  0xa5   : > { %v6205_v21 = vpop.permute.xlu0 %747  ;;  %813 = vst [vmem:[#allocation3] sm:$0xff] %v805_v13  ;;  %v770_v35 = vrot.slane %v6222_v51, 4 }
  0xa6   : > { %v763_v22 = vrot.slane %v6205_v21, 4  ;;  %814 = vst [vmem:[#allocation3 + $0x8] sm:$0xff] %v806_v14 }
  0xa7   : > { %815 = vst [vmem:[#allocation3 + $0x10] sm:$0xff] %v807_v19  ;;  %v6227_v42 = vsel %vm612_vm6, %v769_v27, %v770_v35 }
  0xa8   : > { %v771_v26 = vsel %vm610_vm4, %v763_v22, %v6205_v21  ;;  %804 = vst.msk [vmem:[#allocation2 + $0xd4] sm:$0xf] %vm363_vm0, %v770_v35 }
  0xa9   : > { %795 = vst.msk [vmem:[#allocation2 + $0x90] sm:$0xff] %vm6092_vm5, %v771_v26  ;;  %1351 = vrot.lane.b32.xlu1 %v6210_v25, %s5813_s23  ;;  %1104 = vrot.lane.b32.xlu0 %v6152_v37, %s5812_s22  ;;  %v811_v0 = vld [vmem:[#allocation2 + $0x34] sm:$0xff]  ;;  %v764_v26 = vrot.slane %v6200_v10, 4 }
  0xaa   : > { %1102 = vrot.lane.b32.xlu2 %v6210_v25, %s5812_s22  ;;  %v809_v2 = vld [vmem:[#allocation2 + $0x24] sm:$0xff]  ;;  %819 = vst [vmem:[#allocation3 + $0x30] sm:$0xff] %v811_v0 }
  0xab   : > { %817 = vst [vmem:[#allocation3 + $0x20] sm:$0xff] %v809_v2  ;;  %v810_v3 = vld [vmem:[#allocation2 + $0x2c] sm:$0xff]  ;;  %v1241_v63 = vld [vmem:[#allocation2 + $0x24] sm:$0xff] }
  0xac   : > { %v752_v28 = vpop.permute.xlu1 %751  ;;  %818 = vst [vmem:[#allocation3 + $0x28] sm:$0xff] %v810_v3 }
  0xad   : > { %v758_v36 = vpop.permute.xlu0 %757 }
  0xae   : > { %v768_v12 = vrot.slane %v758_v36, 4 }
  0xb0   : > { %v1153_v45 = vld [vmem:[#allocation2 + $0x90] sm:$0xff]  ;;  %v779_v55 = vsel %vm612_vm6, %v767_v6, %v768_v12  ;;  %v781_v6 = vsel %vm612_vm6, %v768_v12, %v769_v27 }
  0xb1   : > { %1256 = vrot.lane.b32.xlu0 %v1236_v44, %s5814_s24  ;;  %1173 = vrot.lane.b32.xlu1 %v1153_v45, %s5815_s25  ;;  %v780_v0 = vsel %vm610_vm4, %v779_v55, %v758_v36  ;;  %v6374_v55 = vsel %vm610_vm4, %v6227_v42, %v6222_v51 }
  0xb2   : > { %1432 = vrot.lane.b32.xlu2 %v1158_v43, %s5816_s26 }
  0xb4   : > { %v6233_v46 = vpop.permute.xlu1 %671 }
  0xb5   : > { %v680_v47 = vrot.slane %v6233_v46, 4  ;;  %v6236_v23 = vpop.permute.xlu0 %663 }
  0xb6   : > { %v676_v49 = vrot.slane %v6236_v23, 4 }
  0xb7   : > { %v6242_v50 = vsel %vm612_vm6, %v679_v5, %v680_v47  ;;  %714 = vst.msk [vmem:[#allocation2 + $0x8c] sm:$0xf] %vm363_vm0, %v680_v47  ;;  %v765_v5 = vrot.slane %v752_v28, 4 }
  0xb8   : > { %v6248_v62 = vsel %vm612_vm6, %v675_v8, %v676_v49  ;;  %709 = vst.msk [vmem:[#allocation2 + $0x68] sm:$0xf] %vm363_vm0, %v676_v49 }
  0xb9   : > { %1266 = vrot.lane.b32.xlu0 %v1241_v63, %s5814_s24  ;;  %1183 = vrot.lane.b32.xlu1 %v1158_v43, %s5815_s25  ;;  %v774_v3 = vsel %vm612_vm6, %v764_v26, %v765_v5 }
  0xba   : > { %1260 = vrot.lane.b32.xlu2 %v6146_v16, %s5814_s24  ;;  %v775_v1 = vsel %vm610_vm4, %v774_v3, %v752_v28 }
  0xbc   : > { %v6255_v52 = vpop.permute.xlu1 %753 }
  0xbd   : > { %v601_v13 = vpop.permute.xlu0 %600  ;;  %v766_v14 = vrot.slane %v6255_v52, 4 }
  0xbe   : > { %v609_v54 = vrot.slane %v601_v13, 4 }
  0xbf   : > { %v6259_v8 = vsel %vm612_vm6, %v765_v5, %v766_v14  ;;  %799 = vst.msk [vmem:[#allocation2 + $0xb0] sm:$0xf] %vm363_vm0, %v766_v14 }
  0xc0   : > { %v624_v19 = vsel %vm612_vm6, %v608_v39, %v609_v54  ;;  %648 = vst.msk [vmem:[#allocation2 + $0x44] sm:$0xf] %vm363_vm0, %v609_v54  ;;  %v772_v39 = vsel %vm612_vm6, %v763_v22, %v764_v26  ;;  %v777_v26 = vsel %vm610_vm4, %v6259_v8, %v6255_v52 }
  0xc1   : > { %v6267_v21 = vsel %vm610_vm4, %v624_v19, %v601_v13  ;;  %1422 = vrot.lane.b32.xlu0 %v1153_v45, %s5816_s26  ;;  %1007 = vrot.lane.b32.xlu1 %v1236_v44, %s5817_s27  ;;  %v773_v2 = vsel %vm610_vm4, %v772_v39, %v6200_v10  ;;  %v782_v10 = vsel %vm610_vm4, %v781_v6, %v6136_v20 }
  0xc2   : > { %820 = vst [vmem:[#allocation3 + $0x38] sm:$0xff] %v6267_v21  ;;  %1270 = vrot.lane.b32.xlu2 %v6182_v56, %s5814_s24 }
  0xc9   : > { %1258 = vrot.lane.b32.xlu1 %v6156_v38, %s5814_s24  ;;  %1434 = vrot.lane.b32.xlu0 %v780_v0, %s5816_s26 }
  0xca   : > { %1175 = vrot.lane.b32.xlu2 %v773_v2, %s5815_s25 }
  0xd1   : > { %1268 = vrot.lane.b32.xlu1 %v6188_v7, %s5814_s24  ;;  %1177 = vrot.lane.b32.xlu0 %v775_v1, %s5815_s25 }
  0xd2   : > { %1185 = vrot.lane.b32.xlu2 %v780_v0, %s5815_s25 }
  0xd9   : > { %1424 = vrot.lane.b32.xlu1 %v773_v2, %s5816_s26  ;;  %1187 = vrot.lane.b32.xlu0 %v782_v10, %s5815_s25 }
  0xda   : > { %1009 = vrot.lane.b32.xlu2 %v6156_v38, %s5817_s27 }
  0xe1   : > { %1017 = vrot.lane.b32.xlu1 %v1241_v63, %s5817_s27  ;;  %1011 = vrot.lane.b32.xlu0 %v6146_v16, %s5817_s27 }
  0xe2   : > { %1019 = vrot.lane.b32.xlu2 %v6188_v7, %s5817_s27 }
  0xe9   : > { %924 = vrot.lane.b32.xlu1 %v1153_v45, %s5818_s28  ;;  %1021 = vrot.lane.b32.xlu0 %v6182_v56, %s5817_s27 }
  0xea   : > { %926 = vrot.lane.b32.xlu2 %v773_v2, %s5818_s28 }
  0xec   : > { %v6308_v20 = vpop.permute.xlu2 %1343 }
  0xf1   : > { %934 = vrot.lane.b32.xlu1 %v1158_v43, %s5818_s28  ;;  %928 = vrot.lane.b32.xlu0 %v775_v1, %s5818_s28 }
  0xf2   : > { %936 = vrot.lane.b32.xlu2 %v780_v0, %s5818_s28 }
  0xf4   : > { %v6313_v16 = vpop.permute.xlu2 %1353 }
  0xf5   : > { %v1366_v52 = vrot.slane %v6313_v16, 4 }
  0xf9   : > { %1426 = vrot.lane.b32.xlu1 %v775_v1, %s5816_s26  ;;  %938 = vrot.lane.b32.xlu0 %v782_v10, %s5818_s28 }
  0xfa   : > { %1436 = vrot.lane.b32.xlu2 %v782_v10, %s5816_s26 }
  0xfc   : > { %v1093_v38 = vpop.permute.xlu2 %1092 }
  0xfd   : > { %v1111_v27 = vrot.slane %v1093_v38, 4 }
 0x101   : > { %843 = vrot.lane.b32.xlu1 %v6170_v48, %s5819_s29  ;;  %841 = vrot.lane.b32.xlu0 %v6119_v4, %s5819_s29 }
 0x102   : > { %845 = vrot.lane.b32.xlu2 %v6125_v11, %s5819_s29 }
 0x103   : > { %v1091_v56 = vpop.permute.xlu1 %1090  ;;  %v1340_v7 = vpop.permute.xlu0 %1339 }
 0x104   : > { %v1110_v22 = vrot.slane %v1091_v56, 4  ;;  %v1103_v28 = vpop.permute.xlu2 %1102 }
 0x105   : > { %v1116_v43 = vrot.slane %v1103_v28, 4 }
 0x106   : > { %v1120_v35 = vsel %vm612_vm6, %v1110_v22, %v1111_v27 }
 0x107   : > { %v1122_v36 = vsel %vm1121_vm7, %v1091_v56, %v1120_v35 }
 0x108   : > { %1145 = vst [vmem:[#allocation3 + $0x100] sm:$0xff] %v1122_v36 }
 0x109   : > { %853 = vrot.lane.b32.xlu1 %v6210_v25, %s5819_s29  ;;  %851 = vrot.lane.b32.xlu0 %v6142_v32, %s5819_s29  ;;  %v6339_v25 = vsel %vm610_vm4, %v6242_v50, %v6233_v46  ;;  %v6344_v32 = vsel %vm610_vm4, %v6248_v62, %v6236_v23  ;;  %v1359_v50 = vrot.slane %v1340_v7, 4 }
 0x10a   : > { %855 = vrot.lane.b32.xlu2 %v6152_v37, %s5819_s29  ;;  %v1361_v37 = vrot.slane %v6308_v20, 4 }
 0x10b   : > { %v1101_v4 = vpop.permute.xlu1 %1100  ;;  %v1350_v11 = vpop.permute.xlu0 %1349 }
 0x10c   : > { %v1115_v48 = vrot.slane %v1101_v4, 4  ;;  %v6332_v44 = vpop.permute.xlu2 %1432  ;;  %v1364_v8 = vrot.slane %v1350_v11, 4 }
 0x10e   : > { %v1129_v45 = vsel %vm612_vm6, %v1115_v48, %v1116_v43  ;;  %v1323_v48 = vld [vmem:[#allocation2 + $0x68] sm:$0xf] }
 0x10f   : > { %v1130_v47 = vsel %vm1121_vm7, %v1101_v4, %v1129_v45 }
 0x110   : > { %1149 = vst [vmem:[#allocation3 + $0x120] sm:$0xff] %v1130_v47 }
 0x111   : > { %1355 = vrot.lane.b32.xlu1 %v6339_v25, %s5813_s23  ;;  %1345 = vrot.lane.b32.xlu0 %v6344_v32, %s5813_s23 }
 0x112   : > { %1262 = vrot.lane.b32.xlu2 %v6178_v53, %s5814_s24 }
 0x113   : > { %v1342_v49 = vpop.permute.xlu1 %1341  ;;  %v6353_v46 = vpop.permute.xlu0 %1094 }
 0x114   : > { %v1360_v63 = vrot.slane %v1342_v49, 4  ;;  %v8131_v23 = vrot.slane %v6353_v46, 4  ;;  %v6356_v62 = vpop.permute.xlu2 %1260 }
 0x116   : > { %v1369_v5 = vsel %vm612_vm6, %v1359_v50, %v1360_v63  ;;  %v1372_v13 = vsel %vm612_vm6, %v1360_v63, %v1361_v37  ;;  %v1123_v14 = vsel %vm612_vm6, %v1111_v27, %v8131_v23  ;;  %v1328_v50 = vld [vmem:[#allocation2 + $0x8c] sm:$0xf] }
 0x117   : > { %v1371_v54 = vsel %vm1370_vm8, %v1340_v7, %v1369_v5  ;;  %v1373_v19 = vsel %vm1370_vm8, %v1342_v49, %v1372_v13  ;;  %v1124_v12 = vsel %vm1121_vm7, %v1093_v38, %v1123_v14 }
 0x118   : > { %1394 = vst [vmem:[#allocation3 + $0x1c0] sm:$0xff] %v1371_v54 }
 0x119   : > { %1395 = vst [vmem:[#allocation3 + $0x1c8] sm:$0xff] %v1373_v19  ;;  %1179 = vrot.lane.b32.xlu1 %v777_v26, %s5815_s25  ;;  %1272 = vrot.lane.b32.xlu0 %v6267_v21, %s5814_s24 }
 0x11a   : > { %1146 = vst [vmem:[#allocation3 + $0x108] sm:$0xff] %v1124_v12  ;;  %1189 = vrot.lane.b32.xlu2 %v6374_v55, %s5815_s25 }
 0x11b   : > { %v1352_v39 = vpop.permute.xlu1 %1351  ;;  %v6381_v0 = vpop.permute.xlu0 %1104 }
 0x11c   : > { %v1365_v2 = vrot.slane %v1352_v39, 4  ;;  %v8132_v51 = vrot.slane %v6381_v0, 4  ;;  %v6385_v42 = vpop.permute.xlu2 %1270 }
 0x11e   : > { %v1378_v3 = vsel %vm612_vm6, %v1364_v8, %v1365_v2  ;;  %v1380_v1 = vsel %vm612_vm6, %v1365_v2, %v1366_v52  ;;  %v1131_v6 = vsel %vm612_vm6, %v1116_v43, %v8132_v51 }
 0x11f   : > { %v1379_v10 = vsel %vm1370_vm8, %v1350_v11, %v1378_v3  ;;  %v1381_v38 = vsel %vm1370_vm8, %v1352_v39, %v1380_v1  ;;  %v1132_v56 = vsel %vm1121_vm7, %v1103_v28, %v1131_v6  ;;  %v5080_v36 = vld [vmem:[#allocation3 + $0x1c0] sm:$0xf]  ;;  %v1240_v6 = vld [vmem:[#allocation2 + $0x20] sm:$0xf] }
 0x120   : > { %1398 = vst [vmem:[#allocation3 + $0x1e0] sm:$0xff] %v1379_v10  ;;  %v5088_v43 = vld [vmem:[#allocation3 + $0x1c8] sm:$0xf] }
 0x121   : > { %1399 = vst [vmem:[#allocation3 + $0x1e8] sm:$0xff] %v1381_v38  ;;  %1106 = vrot.lane.b32.xlu1 %v6339_v25, %s5812_s22  ;;  %1096 = vrot.lane.b32.xlu0 %v6344_v32, %s5812_s22  ;;  %v1447_v38 = vrot.slane %v6332_v44, 4 }
 0x122   : > { %1150 = vst [vmem:[#allocation3 + $0x128] sm:$0xff] %v1132_v56  ;;  %1013 = vrot.lane.b32.xlu2 %v6178_v53, %s5817_s27  ;;  %v1278_v56 = vrot.slane %v6356_v62, 4 }
 0x123   : > { %v1174_v7 = vpop.permute.xlu1 %1173  ;;  %v1257_v22 = vpop.permute.xlu0 %1256 }
 0x124   : > { %v1193_v27 = vrot.slane %v1174_v7, 4  ;;  %v6403_v35 = vpop.permute.xlu2 %1175 }
 0x125   : > { %v1194_v28 = vrot.slane %v6403_v35, 4 }
 0x127   : > { %v5647_v4 = vld [vmem:[#allocation3 + $0x1dc] sm:$0xf0]  ;;  %v1203_v11 = vsel %vm612_vm6, %v1193_v27, %v1194_v28 }
 0x128   : > { %v5648_v45 = vld [vmem:[#allocation3 + $0x1e4] sm:$0xf0]  ;;  %v5081_v47 = vor.u32 %v5647_v4, %v5080_v36  ;;  %v1205_v53 = vsel %vm1204_vm9, %v1174_v7, %v1203_v11  ;;  %v1276_v36 = vrot.slane %v1257_v22, 4 }
 0x129   : > { %1347 = vrot.lane.b32.xlu1 %v1323_v48, %s5813_s23  ;;  %1023 = vrot.lane.b32.xlu0 %v6267_v21, %s5817_s27  ;;  %v5089_v49 = vor.u32 %v5648_v45, %v5088_v43  ;;  %1228 = vst [vmem:[#allocation3 + $0x140] sm:$0xff] %v1205_v53 }
 0x12a   : > { %1932 = vmatpush.bf16.msra.mxu0 %v5081_v47  ;;  %1357 = vrot.lane.b32.xlu2 %v1328_v50, %s5813_s23  ;;  %v1157_v50 = vld [vmem:[#allocation2 + $0xb0] sm:$0xf] }
 0x12b   : > { %1988 = vmatpush.bf16.msra.mxu1 %v5089_v49  ;;  %v1184_v63 = vpop.permute.xlu1 %1183  ;;  %v1267_v5 = vpop.permute.xlu0 %1266 }
 0x12c   : > { %v1198_v13 = vrot.slane %v1184_v63, 4  ;;  %v6414_v14 = vpop.permute.xlu2 %1185 }
 0x12d   : > { %v1199_v54 = vrot.slane %v6414_v14, 4 }
 0x12f   : > { %v1212_v19 = vsel %vm612_vm6, %v1198_v13, %v1199_v54 }
 0x130   : > { %v1213_v21 = vsel %vm1204_vm9, %v1184_v63, %v1212_v19  ;;  %v1281_v19 = vrot.slane %v1267_v5, 4 }
 0x131   : > { %1438 = vrot.lane.b32.xlu1 %v6374_v55, %s5816_s26  ;;  %1428 = vrot.lane.b32.xlu0 %v777_v26, %s5816_s26  ;;  %1232 = vst [vmem:[#allocation3 + $0x160] sm:$0xff] %v1213_v21 }
 0x132   : > { %930 = vrot.lane.b32.xlu2 %v777_v26, %s5818_s28  ;;  %v1245_v26 = vld [vmem:[#allocation2 + $0x44] sm:$0xf] }
 0x133   : > { %v1008_v12 = vpop.permute.xlu1 %1007  ;;  %v6425_v39 = vpop.permute.xlu0 %1422 }
 0x134   : > { %v1027_v8 = vrot.slane %v1008_v12, 4  ;;  %v6427_v2 = vpop.permute.xlu2 %1009 }
 0x135   : > { %v1028_v3 = vrot.slane %v6427_v2, 4 }
 0x137   : > { %v1037_v1 = vsel %vm612_vm6, %v1027_v8, %v1028_v3 }
 0x138   : > { %v1039_v10 = vsel %vm1038_vm10, %v1008_v12, %v1037_v1 }
 0x139   : > { %1264 = vrot.lane.b32.xlu1 %v1240_v6, %s5814_s24  ;;  %940 = vrot.lane.b32.xlu0 %v6374_v55, %s5818_s28  ;;  %1062 = vst [vmem:[#allocation3 + $0xc0] sm:$0xff] %v1039_v10 }
 0x13a   : > { %1274 = vrot.lane.b32.xlu2 %v1245_v26, %s5814_s24  ;;  %v1074_v26 = vld [vmem:[#allocation2 + $0x68] sm:$0xf] }
 0x13b   : > { %v1259_v7 = vpop.permute.xlu1 %1258  ;;  %v6440_v27 = vpop.permute.xlu0 %1434 }
 0x13c   : > { %v1277_v4 = vrot.slane %v1259_v7, 4  ;;  %v1448_v11 = vrot.slane %v6440_v27, 4  ;;  %v6443_v48 = vpop.permute.xlu2 %1019 }
 0x13e   : > { %v1286_v55 = vsel %vm612_vm6, %v1276_v36, %v1277_v4  ;;  %v1289_v43 = vsel %vm612_vm6, %v1277_v4, %v1278_v56  ;;  %v1461_v45 = vsel %vm612_vm6, %v1447_v38, %v1448_v11  ;;  %v1162_v38 = vld [vmem:[#allocation2 + $0xd4] sm:$0xf]  ;;  %v1442_v36 = vrot.slane %v6425_v39, 4 }
 0x13f   : > { %v1288_v47 = vsel %vm1287_vm11, %v1257_v22, %v1286_v55  ;;  %v1290_v53 = vsel %vm1287_vm11, %v1259_v7, %v1289_v43  ;;  %v1462_v49 = vsel %vm1453_vm12, %v6332_v44, %v1461_v45  ;;  %v1283_v22 = vrot.slane %v6385_v42, 4  ;;  %v1079_v7 = vld [vmem:[#allocation2 + $0x8c] sm:$0xf] }
 0x140   : > { %1311 = vst [vmem:[#allocation3 + $0x180] sm:$0xff] %v1288_v47  ;;  %v996_v47 = vld [vmem:[#allocation2 + $0x44] sm:$0xf] }
 0x141   : > { %1312 = vst [vmem:[#allocation3 + $0x188] sm:$0xff] %v1290_v53  ;;  %857 = vrot.lane.b32.xlu1 %v6339_v25, %s5819_s29  ;;  %847 = vrot.lane.b32.xlu0 %v6344_v32, %s5819_s29 }
 0x142   : > { %1481 = vst [vmem:[#allocation3 + $0x220] sm:$0xff] %v1462_v49  ;;  %1181 = vrot.lane.b32.xlu2 %v1157_v50, %s5815_s25  ;;  %v991_v50 = vld [vmem:[#allocation2 + $0x20] sm:$0xf] }
 0x143   : > { %v1269_v63 = vpop.permute.xlu1 %1268  ;;  %v6461_v13 = vpop.permute.xlu0 %1177 }
 0x144   : > { %v1282_v21 = vrot.slane %v1269_v63, 4  ;;  %v1195_v44 = vrot.slane %v6461_v13, 4  ;;  %v6465_v12 = vpop.permute.xlu2 %926 }
 0x146   : > { %v1295_v25 = vsel %vm612_vm6, %v1281_v19, %v1282_v21  ;;  %v1297_v32 = vsel %vm612_vm6, %v1282_v21, %v1283_v22  ;;  %v1206_v8 = vsel %vm612_vm6, %v1194_v28, %v1195_v44 }
 0x147   : > { %v1296_v1 = vsel %vm1287_vm11, %v1267_v5, %v1295_v25  ;;  %v1298_v6 = vsel %vm1287_vm11, %v1269_v63, %v1297_v32  ;;  %v1207_v10 = vsel %vm1204_vm9, %v6403_v35, %v1206_v8  ;;  %v5048_v63 = vld [vmem:[#allocation3 + $0x180] sm:$0xf] }
 0x148   : > { %1315 = vst [vmem:[#allocation3 + $0x1a0] sm:$0xff] %v1296_v1  ;;  %v5056_v21 = vld [vmem:[#allocation3 + $0x188] sm:$0xf]  ;;  %v5631_v8 = vld [vmem:[#allocation3 + $0x15c] sm:$0xf0] }
 0x149   : > { %1316 = vst [vmem:[#allocation3 + $0x1a8] sm:$0xff] %v1298_v6  ;;  %1098 = vrot.lane.b32.xlu1 %v1074_v26, %s5812_s22  ;;  %1191 = vrot.lane.b32.xlu0 %v1162_v38, %s5815_s25  ;;  %v908_v1 = vld [vmem:[#allocation2 + $0xb0] sm:$0xf]  ;;  %v5016_v6 = vld [vmem:[#allocation3 + $0x140] sm:$0xf] }
 0x14a   : > { %1229 = vst [vmem:[#allocation3 + $0x148] sm:$0xff] %v1207_v10  ;;  %1108 = vrot.lane.b32.xlu2 %v1079_v7, %s5812_s22  ;;  %v1033_v10 = vrot.slane %v6443_v48, 4  ;;  %v5017_v7 = vor.u32 %v5631_v8, %v5016_v6 }
 0x14b   : > { %v6483_v28 = vpop.permute.xlu1 %1424  ;;  %v6485_v5 = vpop.permute.xlu0 %1187 }
 0x14c   : > { %v1443_v35 = vrot.slane %v6483_v28, 4  ;;  %v1200_v4 = vrot.slane %v6485_v5, 4  ;;  %v6490_v55 = vpop.permute.xlu2 %936 }
 0x14e   : > { %v1452_v43 = vsel %vm612_vm6, %v1442_v36, %v1443_v35  ;;  %v1214_v45 = vsel %vm612_vm6, %v1199_v54, %v1200_v4 }
 0x14f   : > { %v1454_v53 = vsel %vm1453_vm12, %v6425_v39, %v1452_v43  ;;  %v1215_v49 = vsel %vm1204_vm9, %v6414_v14, %v1214_v45  ;;  %v5639_v19 = vld [vmem:[#allocation3 + $0x19c] sm:$0xf0] }
 0x150   : > { %1477 = vst [vmem:[#allocation3 + $0x200] sm:$0xff] %v1454_v53  ;;  %v5640_v25 = vld [vmem:[#allocation3 + $0x1a4] sm:$0xf0]  ;;  %v5049_v32 = vor.u32 %v5639_v19, %v5048_v63  ;;  %v4984_v43 = vld [vmem:[#allocation3 + $0x100] sm:$0xf] }
 0x151   : > { %1233 = vst [vmem:[#allocation3 + $0x168] sm:$0xff] %v1215_v49  ;;  %1025 = vrot.lane.b32.xlu1 %v996_v47, %s5817_s27  ;;  %1015 = vrot.lane.b32.xlu0 %v991_v50, %s5817_s27  ;;  %v5057_v54 = vor.u32 %v5640_v25, %v5056_v21  ;;  %v5623_v45 = vld [vmem:[#allocation3 + $0x11c] sm:$0xf0]  ;;  %v825_v50 = vld [vmem:[#allocation2 + $0x68] sm:$0xf] }
 0x152   : > { %1933 = vmatpush.bf16.msra.mxu0 %v5049_v32  ;;  %932 = vrot.lane.b32.xlu2 %v908_v1, %s5818_s28  ;;  %v913_v63 = vld [vmem:[#allocation2 + $0xd4] sm:$0xf]  ;;  %v5655_v19 = vld [vmem:[#allocation3 + $0x21c] sm:$0xf0]  ;;  %v5114_v21 = vld [vmem:[#allocation3 + $0x220] sm:$0xf0] }
 0x153   : > { %1989 = vmatpush.bf16.msra.mxu1 %v5057_v54  ;;  %v1018_v14 = vpop.permute.xlu1 %1017  ;;  %v6507_v39 = vpop.permute.xlu0 %1011  ;;  %v5082_v25 = vld [vmem:[#allocation3 + $0x1e0] sm:$0xf0]  ;;  %v5024_v6 = vld [vmem:[#allocation3 + $0x148] sm:$0xf] }
 0x154   : > { %v1032_v26 = vrot.slane %v1018_v14, 4  ;;  %v1029_v38 = vrot.slane %v6507_v39, 4  ;;  %v6511_v36 = vpop.permute.xlu2 %1436 }
 0x155   : > { %v1449_v47 = vrot.slane %v6511_v36, 4 }
 0x156   : > { %v1046_v53 = vsel %vm612_vm6, %v1032_v26, %v1033_v10  ;;  %v1040_v49 = vsel %vm612_vm6, %v1028_v3, %v1029_v38  ;;  %1934 = vmatpush.bf16.msra.mxu0 %v5017_v7  ;;  %v4985_v26 = vor.u32 %v5623_v45, %v4984_v43 }
 0x157   : > { %v1047_v32 = vsel %vm1038_vm10, %v1018_v14, %v1046_v53  ;;  %v1041_v54 = vsel %vm1038_vm10, %v6427_v2, %v1040_v49  ;;  %v5112_v8 = vld [vmem:[#allocation3 + $0x200] sm:$0xf]  ;;  %v5651_v1 = vld [vmem:[#allocation3 + $0x204] sm:$0xf]  ;;  %v1463_v3 = vsel %vm612_vm6, %v1448_v11, %v1449_v47  ;;  %v5585_v2 = vld [vmem:[%s8121_s1 + $0x4] sm:$0xf] }
 0x158   : > { %1066 = vst [vmem:[#allocation3 + $0xe0] sm:$0xff] %v1047_v32  ;;  %v5113_v7 = vor.u32 %v5655_v19, %v5112_v8  ;;  %v5117_v23 = vor.u32 %v5651_v1, %v5114_v21  ;;  %v5632_v51 = vld [vmem:[#allocation3 + $0x164] sm:$0xf0]  ;;  %v1464_v14 = vsel %vm1453_vm12, %v6440_v27, %v1463_v3  ;;  %v5643_v49 = vld [vmem:[#allocation3 + $0x1c4] sm:$0xf]  ;;  %v945_v21 = vrot.slane %v6465_v12, 4 }
 0x159   : > { %1063 = vst [vmem:[#allocation3 + $0xc8] sm:$0xff] %v1041_v54  ;;  %849 = vrot.lane.b32.xlu1 %v825_v50, %s5819_s29  ;;  %942 = vrot.lane.b32.xlu0 %v913_v63, %s5818_s28  ;;  %v5025_v53 = vor.u32 %v5632_v51, %v5024_v6  ;;  %v4850_v11 = vld [vmem:[%s8121_s1 + $0x8] sm:$0xf0]  ;;  %v5085_v43 = vor.u32 %v5643_v49, %v5082_v25  ;;  %v5624_v27 = vld [vmem:[#allocation3 + $0x124] sm:$0xf0] }
 0x15a   : > { %1935 = vmatpush.bf16.msra.mxu0 %v4985_v26  ;;  %1953 = vmatpush.bf16.msra.mxu2 %v5113_v7  ;;  %1482 = vst [vmem:[#allocation3 + $0x228] sm:$0xff] %v1464_v14  ;;  %v6538_v45 = vor.u32 %v5585_v2, %v4850_v11  ;;  %v5050_v63 = vld [vmem:[#allocation3 + $0x1a0] sm:$0xf0]  ;;  %v830_v51 = vld [vmem:[#allocation2 + $0x8c] sm:$0xf] }
 0x15b   : > { %1981 = vmatpush.bf16.msra.mxu3 %v5117_v23  ;;  %1990 = vmatpush.bf16.msra.mxu1 %v5025_v53  ;;  %v925_v19 = vpop.permute.xlu1 %924  ;;  %v6540_v50 = vpop.permute.xlu0 %1021  ;;  %v4992_v25 = vld [vmem:[#allocation3 + $0x108] sm:$0xf]  ;;  %v5635_v23 = vld [vmem:[#allocation3 + $0x184] sm:$0xf]  ;;  %v4952_v2 = vld [vmem:[#allocation3 + $0xc0] sm:$0xf] }
 0x15c   : > { %v944_v32 = vrot.slane %v925_v19, 4  ;;  %v1034_v54 = vrot.slane %v6540_v50, 4  ;;  %859 = vrot.lane.b32.xlu2 %v830_v51, %s5819_s29  ;;  %v6545_v8 = vpop.permute.xlu2 %845  ;;  %v4993_v1 = vor.u32 %v5624_v27, %v4992_v25  ;;  %v5053_v26 = vor.u32 %v5635_v23, %v5050_v63  ;;  %v5018_v49 = vld [vmem:[#allocation3 + $0x160] sm:$0xf0]  ;;  %v1411_v11 = vld [vmem:[#allocation2 + $0xd4] sm:$0xf] }
 0x15d   : > { %5142 = vmatmul.msk.bf16.vlgmr.msra.gmra.mxu2 %vm8139_vm13, %v6538_v45 }
 0x15e   : > { %1960 = vmatpush.bf16.msrb.mxu2 %v5085_v43  ;;  %v954_v6 = vsel %vm612_vm6, %v944_v32, %v945_v21  ;;  %v1048_v3 = vsel %vm612_vm6, %v1033_v10, %v1034_v54  ;;  %5143 = vmatmul.msk.bf16.vlgmr.msra.gmra.mxu3 %vm8139_vm13, %v6538_v45  ;;  %v1406_v43 = vld [vmem:[#allocation2 + $0xb0] sm:$0xf]  ;;  %v5627_v10 = vld [vmem:[#allocation3 + $0x144] sm:$0xf]  ;;  %v950_v32 = vrot.slane %v6490_v55, 4 }
 0x15f   : > { %v956_v7 = vsel %vm955_vm14, %v925_v19, %v954_v6  ;;  %v1049_v14 = vsel %vm1038_vm10, %v6443_v48, %v1048_v3  ;;  %1991 = vmatpush.bf16.msra.mxu1 %v4993_v1  ;;  %v5615_v53 = vld [vmem:[#allocation3 + $0xdc] sm:$0xf0]  ;;  %v5021_v19 = vor.u32 %v5627_v10, %v5018_v49  ;;  %v4986_v48 = vld [vmem:[#allocation3 + $0x120] sm:$0xf0] }
 0x160   : > { %979 = vst [vmem:[#allocation3 + $0x80] sm:$0xff] %v956_v7  ;;  %v4953_v27 = vor.u32 %v5615_v53, %v4952_v2  ;;  %v5619_v6 = vld [vmem:[#allocation3 + $0x104] sm:$0xf]  ;;  %v4960_v49 = vld [vmem:[#allocation3 + $0xc8] sm:$0xf] }
 0x161   : > { %1067 = vst [vmem:[#allocation3 + $0xe8] sm:$0xff] %v1049_v14  ;;  %1440 = vrot.lane.b32.xlu1 %v1411_v11, %s5816_s26  ;;  %1430 = vrot.lane.b32.xlu0 %v1406_v43, %s5816_s26  ;;  %v4989_v7 = vor.u32 %v5619_v6, %v4986_v48  ;;  %v4954_v53 = vld [vmem:[#allocation3 + $0xe0] sm:$0xf0] }
 0x162   : > { %1961 = vmatpush.bf16.msrb.mxu2 %v5053_v26  ;;  %1936 = vmatpush.bf16.msra.mxu0 %v4953_v27  ;;  %v5611_v27 = vld [vmem:[#allocation3 + $0xc4] sm:$0xf] }
 0x163   : > { %v935_v63 = vpop.permute.xlu1 %934  ;;  %v6560_v51 = vpop.permute.xlu0 %928  ;;  %v4957_v10 = vor.u32 %v5611_v27, %v4954_v53  ;;  %v8133_v27 = vrot.slane %v6545_v8, 4 }
 0x164   : > { %v949_v25 = vrot.slane %v935_v63, 4  ;;  %v946_v1 = vrot.slane %v6560_v51, 4  ;;  %v6564_v23 = vpop.permute.xlu2 %855 }
 0x166   : > { %1962 = vmatpush.bf16.msrb.mxu2 %v5021_v19  ;;  %v963_v3 = vsel %vm612_vm6, %v949_v25, %v950_v32  ;;  %v957_v26 = vsel %vm612_vm6, %v945_v21, %v946_v1 }
 0x167   : > { %v964_v14 = vsel %vm955_vm14, %v935_v63, %v963_v3  ;;  %v958_v2 = vsel %vm955_vm14, %v6465_v12, %v957_v26  ;;  %v4920_v26 = vld [vmem:[#allocation3 + $0x80] sm:$0xf]  ;;  %v5603_v53 = vld [vmem:[#allocation3 + $0x84] sm:$0xf] }
 0x168   : > { %983 = vst [vmem:[#allocation3 + $0xa0] sm:$0xff] %v964_v14  ;;  %v5616_v11 = vld [vmem:[#allocation3 + $0xe4] sm:$0xf0] }
 0x169   : > { %980 = vst [vmem:[#allocation3 + $0x88] sm:$0xff] %v958_v2  ;;  %v4961_v43 = vor.u32 %v5616_v11, %v4960_v49 }
 0x16a   : > { %1963 = vmatpush.bf16.msrb.mxu2 %v4989_v7 }
 0x16b   : > { %1992 = vmatpush.bf16.msra.mxu1 %v4961_v43  ;;  %v6573_v19 = vpop.permute.xlu1 %1426  ;;  %v6575_v25 = vpop.permute.xlu0 %938 }
 0x16c   : > { %v1444_v21 = vrot.slane %v6573_v19, 4  ;;  %v8134_v63 = vrot.slane %v6575_v25, 4  ;;  %v6579_v12 = vpop.permute.xlu2 %1262 }
 0x16d   : > { %v8136_v48 = vrot.slane %v6579_v12, 4 }
 0x16e   : > { %1964 = vmatpush.bf16.msrb.mxu2 %v4957_v10  ;;  %v1455_v6 = vsel %vm612_vm6, %v1443_v35, %v1444_v21  ;;  %v965_v3 = vsel %vm612_vm6, %v950_v32, %v8134_v63  ;;  %v8138_v63 = vrot.slane %v6564_v23, 4 }
 0x16f   : > { %v1456_v7 = vsel %vm1453_vm12, %v6483_v28, %v1455_v6  ;;  %v966_v14 = vsel %vm955_vm14, %v6490_v55, %v965_v3  ;;  %v5607_v2 = vld [vmem:[#allocation3 + $0x9c] sm:$0xf0]  ;;  %v4922_v49 = vld [vmem:[#allocation3 + $0xa0] sm:$0xf0]  ;;  %v1291_v35 = vsel %vm612_vm6, %v1278_v56, %v8136_v48 }
 0x170   : > { %1478 = vst [vmem:[#allocation3 + $0x208] sm:$0xff] %v1456_v7  ;;  %v4921_v11 = vor.u32 %v5607_v2, %v4920_v26  ;;  %v4925_v43 = vor.u32 %v5603_v53, %v4922_v49  ;;  %v1292_v32 = vsel %vm1287_vm11, %v6356_v62, %v1291_v35  ;;  %v5090_v7 = vld [vmem:[#allocation3 + $0x1e8] sm:$0xf0]  ;;  %v5656_v49 = vld [vmem:[#allocation3 + $0x224] sm:$0xf0] }
 0x171   : > { %984 = vst [vmem:[#allocation3 + $0xa8] sm:$0xff] %v966_v14  ;;  %v5644_v35 = vld [vmem:[#allocation3 + $0x1cc] sm:$0xf] }
 0x172   : > { %1937 = vmatpush.bf16.msra.mxu0 %v4921_v11  ;;  %1965 = vmatpush.bf16.msrb.mxu2 %v4925_v43  ;;  %1313 = vst [vmem:[#allocation3 + $0x190] sm:$0xff] %v1292_v32  ;;  %v4928_v43 = vld [vmem:[#allocation3 + $0x88] sm:$0xf] }
 0x173   : > { %v844_v28 = vpop.permute.xlu1 %843  ;;  %v842_v55 = vpop.permute.xlu0 %841 }
 0x174   : > { %v862_v10 = vrot.slane %v844_v28, 4  ;;  %v861_v6 = vrot.slane %v842_v55, 4  ;;  %v6602_v3 = vpop.permute.xlu2 %1189 }
 0x175   : > { %v8135_v56 = vrot.slane %v6602_v3, 4 }
 0x176   : > { %v874_v26 = vsel %vm612_vm6, %v862_v10, %v8133_v27  ;;  %v871_v62 = vsel %vm612_vm6, %v861_v6, %v862_v10  ;;  %v5093_v6 = vor.u32 %v5644_v35, %v5090_v7 }
 0x177   : > { %v875_v14 = vsel %vm872_vm15, %v844_v28, %v874_v26  ;;  %v873_v2 = vsel %vm872_vm15, %v842_v55, %v871_v62  ;;  %v5120_v53 = vld [vmem:[#allocation3 + $0x208] sm:$0xf]  ;;  %v1216_v11 = vsel %vm612_vm6, %v1200_v4, %v8135_v56  ;;  %v5058_v55 = vld [vmem:[#allocation3 + $0x1a8] sm:$0xf0] }
 0x178   : > { %897 = vst [vmem:[#allocation3 + $0x48] sm:$0xff] %v875_v14  ;;  %v5608_v32 = vld [vmem:[#allocation3 + $0xa4] sm:$0xf0]  ;;  %v5121_v27 = vor.u32 %v5656_v49, %v5120_v53  ;;  %v1217_v10 = vsel %vm1204_vm9, %v6485_v5, %v1216_v11  ;;  %v5636_v56 = vld [vmem:[#allocation3 + $0x18c] sm:$0xf] }
 0x179   : > { %896 = vst [vmem:[#allocation3 + $0x40] sm:$0xff] %v873_v2  ;;  %v4929_v28 = vor.u32 %v5608_v32, %v4928_v43  ;;  %v5061_v53 = vor.u32 %v5636_v56, %v5058_v55  ;;  %v5026_v2 = vld [vmem:[#allocation3 + $0x168] sm:$0xf0] }
 0x17a   : > { %2009 = vmatpush.bf16.msrb.mxu3 %v5121_v27  ;;  %1234 = vst [vmem:[#allocation3 + $0x170] sm:$0xff] %v1217_v10  ;;  %v5628_v11 = vld [vmem:[#allocation3 + $0x14c] sm:$0xf] }
 0x17b   : > { %1993 = vmatpush.bf16.msra.mxu1 %v4929_v28  ;;  %v854_v26 = vpop.permute.xlu1 %853  ;;  %v852_v62 = vpop.permute.xlu0 %851  ;;  %v5029_v32 = vor.u32 %v5628_v11, %v5026_v2  ;;  %v2184_v10 = vld [vmem:[%s8123_s3] sm:$0xff] }
 0x17c   : > { %v867_v4 = vrot.slane %v854_v26, 4  ;;  %v866_v14 = vrot.slane %v852_v62, 4  ;;  %v6619_v48 = vpop.permute.xlu2 %1013  ;;  %v4994_v28 = vld [vmem:[#allocation3 + $0x128] sm:$0xf0]  ;;  %2188 = vperm.xlu1 %5784, %v2184_v10  }
 0x17d   : > { %v8137_v5 = vrot.slane %v6619_v48, 4  ;;  %5144 = vmatmul.msk.bf16.vlgmr.msrb.gmra.mxu3 %vm8139_vm13, %v6538_v45  ;;  %v4962_v2 = vld [vmem:[#allocation3 + $0xe8] sm:$0xf0] }
 0x17e   : > { %2016 = vmatpush.bf16.msra.mxu3 %v5093_v6  ;;  %v882_v27 = vsel %vm612_vm6, %v867_v4, %v8138_v63  ;;  %v880_v7 = vsel %vm612_vm6, %v866_v14, %v867_v4  ;;  %v5592_v63 = vld [vmem:[#allocation3 + $0x24] sm:$0xf0] }
 0x17f   : > { %v883_v49 = vsel %vm872_vm15, %v854_v26, %v882_v27  ;;  %v881_v35 = vsel %vm872_vm15, %v852_v62, %v880_v7  ;;  %v1042_v56 = vsel %vm612_vm6, %v1029_v38, %v8137_v5  ;;  %v5620_v62 = vld [vmem:[#allocation3 + $0x10c] sm:$0xf]  ;;  %v4896_v7 = vld [vmem:[#allocation3 + $0x48] sm:$0xf] }
 0x180   : > { %901 = vst [vmem:[#allocation3 + $0x68] sm:$0xff] %v883_v49  ;;  %v1043_v43 = vsel %vm1038_vm10, %v6507_v39, %v1042_v56  ;;  %v4997_v14 = vor.u32 %v5620_v62, %v4994_v28  ;;  %v4888_v56 = vld [vmem:[#allocation3 + $0x40] sm:$0xf]  ;;  %v5595_v11 = vld [vmem:[#allocation3 + $0x44] sm:$0xf] }
 0x181   : > { %900 = vst [vmem:[#allocation3 + $0x60] sm:$0xff] %v881_v35  ;;  %v5591_v62 = vld [vmem:[#allocation3 + $0x1c] sm:$0xf0] }
 0x182   : > { %2017 = vmatpush.bf16.msra.mxu3 %v5061_v53  ;;  %1064 = vst [vmem:[#allocation3 + $0xd0] sm:$0xff] %v1043_v43 }
 0x183   : > { %v1356_v6 = vpop.permute.xlu1 %1355  ;;  %v6640_v55 = vpop.permute.xlu0 %1345 }
 0x184   : > { %v1367_v26 = vrot.slane %v1356_v6, 4  ;;  %v1362_v38 = vrot.slane %v6640_v55, 4  ;;  %v1358_v4 = vpop.permute.xlu2 %1357 }
 0x185   : > { %v1368_v39 = vrot.slane %v1358_v4, 4  ;;  %v4858_v4 = vld [vmem:[#allocation3 + $0x20] sm:$0xf0] }
 0x186   : > { %2018 = vmatpush.bf16.msra.mxu3 %v5029_v32  ;;  %v1382_v53 = vsel %vm612_vm6, %v1366_v52, %v1367_v26  ;;  %v1374_v27 = vsel %vm612_vm6, %v1361_v37, %v1362_v38 }
 0x187   : > { %v1383_v49 = vsel %vm1370_vm8, %v6313_v16, %v1382_v53  ;;  %v1375_v35 = vsel %vm1370_vm8, %v6308_v20, %v1374_v27  ;;  %v5600_v43 = vld [vmem:[#allocation3 + $0x64] sm:$0xf0]  ;;  %v1384_v52 = vsel %vm612_vm6, %v1367_v26, %v1368_v39  ;;  %v5612_v53 = vld [vmem:[#allocation3 + $0xcc] sm:$0xf]  ;;  %v2157_v20 = vld [vmem:[%s8122_s2 + $0x8] sm:$0xff] }
 0x188   : > { %1400 = vst [vmem:[#allocation3 + $0x1f0] sm:$0xff] %v1383_v49  ;;  %v5599_v32 = vld [vmem:[#allocation3 + $0x5c] sm:$0xf0]  ;;  %v4890_v10 = vld [vmem:[#allocation3 + $0x60] sm:$0xf0]  ;;  %v4897_v28 = vor.u32 %v5600_v43, %v4896_v7  ;;  %v1385_v37 = vsel %vm1370_vm8, %v1356_v6, %v1384_v52  ;;  %2165 = vperm.xlu0 %5783, %v2157_v20  }
 0x189   : > { %1396 = vst [vmem:[#allocation3 + $0x1d0] sm:$0xff] %v1375_v35  ;;  %v4889_v5 = vor.u32 %v5599_v32, %v4888_v56  ;;  %v4893_v16 = vor.u32 %v5595_v11, %v4890_v10  ;;  %v4848_v26 = vld [vmem:[%s8121_s1] sm:$0xf]  ;;  %v5586_v6 = vld [vmem:[%s8121_s1 + $0x4] sm:$0xf0] }
 0x18a   : > { %2019 = vmatpush.bf16.msra.mxu3 %v4997_v14  ;;  %1994 = vmatpush.bf16.msra.mxu1 %v4897_v28  ;;  %v4965_v14 = vor.u32 %v5612_v53, %v4962_v2  ;;  %1401 = vst [vmem:[#allocation3 + $0x1f8] sm:$0xff] %v1385_v37  ;;  %v4864_v7 = vld [vmem:[#allocation3 + $0x8] sm:$0xf]  ;;  %v4930_v49 = vld [vmem:[#allocation3 + $0xa8] sm:$0xf0] }
 0x18b   : > { %1938 = vmatpush.bf16.msra.mxu0 %v4889_v5  ;;  %1966 = vmatpush.bf16.msrb.mxu2 %v4893_v16  ;;  %v6666_v39 = vpop.permute.xlu1 %1179  ;;  %v6668_v27 = vpop.permute.xlu0 %1272  ;;  %v5652_v35 = vld [vmem:[#allocation3 + $0x20c] sm:$0xf]  ;;  %v4856_v11 = vld [vmem:[#allocation3] sm:$0xf]  ;;  %v5587_v43 = vld [vmem:[#allocation3 + $0x4] sm:$0xf]  ;;  %v4865_v52 = vor.u32 %v5592_v63, %v4864_v7  ;;  %v6674_v16 = vor.u32 %v5586_v6, %v4848_v26 }
 0x18c   : > { %v1196_v2 = vrot.slane %v6666_v39, 4  ;;  %v1284_v56 = vrot.slane %v6668_v27, 4  ;;  %v6672_v32 = vpop.permute.xlu2 %930  ;;  %v4857_v10 = vor.u32 %v5591_v62, %v4856_v11  ;;  %v4861_v5 = vor.u32 %v5587_v43, %v4858_v4  ;;  %v5604_v28 = vld [vmem:[#allocation3 + $0x8c] sm:$0xf] }
 0x18d   : > { %v5122_v37 = vld [vmem:[#allocation3 + $0x228] sm:$0xf0]  ;;  %v947_v53 = vrot.slane %v6672_v32, 4 }
 0x18e   : > { %2020 = vmatpush.bf16.msra.mxu3 %v4965_v14  ;;  %v1208_v20 = vsel %vm612_vm6, %v1195_v44, %v1196_v2  ;;  %v1299_v63 = vsel %vm612_vm6, %v1283_v22, %v1284_v56  ;;  %1995 = vmatpush.bf16.msra.mxu1 %v4865_v52  ;;  %v4933_v14 = vor.u32 %v5604_v28, %v4930_v49  ;;  %v4898_v11 = vld [vmem:[#allocation3 + $0x68] sm:$0xf0] }
 0x18f   : > { %v5125_v62 = vor.u32 %v5652_v35, %v5122_v37  ;;  %v1209_v4 = vsel %vm1204_vm9, %v6461_v13, %v1208_v20  ;;  %v1300_v26 = vsel %vm1287_vm11, %v6385_v42, %v1299_v63  ;;  %1939 = vmatpush.bf16.msra.mxu0 %v4857_v10  ;;  %1967 = vmatpush.bf16.msrb.mxu2 %v4861_v5  ;;  %v5649_v6 = vld [vmem:[#allocation3 + $0x1ec] sm:$0xf0]  ;;  %v5098_v7 = vld [vmem:[#allocation3 + $0x1f0] sm:$0xf0]  ;;  %v5596_v43 = vld [vmem:[#allocation3 + $0x4c] sm:$0xf] }
 0x190   : > { %v959_v22 = vsel %vm612_vm6, %v946_v1, %v947_v53  ;;  %1230 = vst [vmem:[#allocation3 + $0x150] sm:$0xff] %v1209_v4  ;;  %v5096_v44 = vld [vmem:[#allocation3 + $0x1d0] sm:$0xf]  ;;  %v5645_v49 = vld [vmem:[#allocation3 + $0x1d4] sm:$0xf]  ;;  %v4901_v52 = vor.u32 %v5596_v43, %v4898_v11  ;;  %v8157_v4 = vrot.slane %v6353_v46, 4 }
 0x191   : > { %v960_v13 = vsel %vm955_vm14, %v6560_v51, %v959_v22  ;;  %1317 = vst [vmem:[#allocation3 + $0x1b0] sm:$0xff] %v1300_v26  ;;  %1996 = vmatmul.bf16.vlgmr.msra.gmra.mxu1 %v6674_v16  ;;  %v5097_v42 = vor.u32 %v5649_v6, %v5096_v44  ;;  %v5101_v35 = vor.u32 %v5645_v49, %v5098_v7  ;;  %v4866_v5 = vld [vmem:[#allocation3 + $0x28] sm:$0xf0]  ;;  %v5064_v22 = vld [vmem:[#allocation3 + $0x190] sm:$0xf] }
 0x192   : > { %2021 = vmatpush.bf16.msra.mxu3 %v4933_v14  ;;  %1940 = vmatmul.bf16.vlgmr.msra.gmra.mxu0 %v6674_v16  ;;  %981 = vst [vmem:[#allocation3 + $0x90] sm:$0xff] %v960_v13  ;;  %v5588_v20 = vld [vmem:[#allocation3 + $0xc] sm:$0xf]  ;;  %v8156_v14 = vrot.slane %v6381_v0, 4  ;;  %v5637_v44 = vld [vmem:[#allocation3 + $0x194] sm:$0xf] }
 0x193   : > { %2037 = vmatpush.bf16.msrb.mxu0 %v5125_v62  ;;  %1968 = vmatmul.bf16.vlgmr.msrb.gmra.mxu2 %v6674_v16  ;;  %v6699_v1 = vpop.permute.xlu1 %1106  ;;  %v6701_v10 = vpop.permute.xlu0 %1096  ;;  %v4869_v6 = vor.u32 %v5588_v20, %v4866_v5  ;;  %v2156_v13 = vld [vmem:[%s8122_s2] sm:$0xff] }
 0x194   : > { %2044 = vmatpush.bf16.msra.mxu2 %v5097_v42  ;;  %v1118_v51 = vrot.slane %v6699_v1, 4  ;;  %v1113_v28 = vrot.slane %v6701_v10, 4  ;;  %v1275_v37 = vpop.permute.xlu2 %1274  ;;  %2160 = vperm.xlu2 %5782, %v2156_v13  }
 0x195   : > { %v1285_v63 = vrot.slane %v1275_v37, 4 }
 0x196   : > { %2022 = vmatpush.bf16.msra.mxu3 %v4901_v52  ;;  %v1133_v62 = vsel %vm612_vm6, %v8156_v14, %v1118_v51  ;;  %v1125_v26 = vsel %vm612_vm6, %v8157_v4, %v1113_v28  ;;  %v5633_v14 = vld [vmem:[#allocation3 + $0x16c] sm:$0xf0] }
 0x197   : > { %2072 = vmatpush.bf16.msra.mxu0 %v5101_v35  ;;  %v1134_v7 = vsel %vm1121_vm7, %v6381_v0, %v1133_v62  ;;  %v1126_v11 = vsel %vm1121_vm7, %v6353_v46, %v1125_v26  ;;  %v1301_v49 = vsel %vm612_vm6, %v1284_v56, %v1285_v63  ;;  %v5032_v46 = vld [vmem:[#allocation3 + $0x150] sm:$0xf]  ;;  %v5629_v5 = vld [vmem:[#allocation3 + $0x154] sm:$0xf] }
 0x198   : > { %1151 = vst [vmem:[#allocation3 + $0x130] sm:$0xff] %v1134_v7  ;;  %v5641_v42 = vld [vmem:[#allocation3 + $0x1ac] sm:$0xf0]  ;;  %v5066_v35 = vld [vmem:[#allocation3 + $0x1b0] sm:$0xf0]  ;;  %v1302_v43 = vsel %vm1287_vm11, %v6668_v27, %v1301_v49  ;;  %v5033_v4 = vor.u32 %v5633_v14, %v5032_v46 }
 0x199   : > { %1147 = vst [vmem:[#allocation3 + $0x110] sm:$0xff] %v1126_v11  ;;  %v5065_v0 = vor.u32 %v5641_v42, %v5064_v22  ;;  %v5069_v52 = vor.u32 %v5637_v44, %v5066_v35  ;;  %v5034_v62 = vld [vmem:[#allocation3 + $0x170] sm:$0xf0]  ;;  %v4968_v14 = vld [vmem:[#allocation3 + $0xd0] sm:$0xf] }
 0x19a   : > { %2023 = vmatpush.bf16.msra.mxu3 %v4869_v6  ;;  %1318 = vst [vmem:[#allocation3 + $0x1b8] sm:$0xff] %v1302_v43  ;;  %v5037_v26 = vor.u32 %v5629_v5, %v5034_v62  ;;  %v2185_v42 = vld [vmem:[%s8123_s3 + $0x8] sm:$0xff] }
 0x19b   : > { %2045 = vmatpush.bf16.msra.mxu2 %v5065_v0  ;;  %2073 = vmatpush.bf16.msra.mxu0 %v5069_v52  ;;  %v1348_v56 = vpop.permute.xlu1 %1347  ;;  %v6725_v37 = vpop.permute.xlu0 %1023 }
 0x19c   : > { %v1363_v20 = vrot.slane %v1348_v56, 4  ;;  %v1035_v63 = vrot.slane %v6725_v37, 4  ;;  %v1182_v27 = vpop.permute.xlu2 %1181  ;;  %2193 = vperm.xlu2 %5782, %v2185_v42  }
 0x19d   : > { %2024 = vmatmul.bf16.vlgmr.msra.gmra.mxu3 %v6674_v16  ;;  %v1197_v6 = vrot.slane %v1182_v27, 4 }
 0x19e   : > { %v1376_v7 = vsel %vm612_vm6, %v1362_v38, %v1363_v20  ;;  %v1050_v11 = vsel %vm612_vm6, %v1034_v54, %v1035_v63 }
 0x19f   : > { %v1377_v22 = vsel %vm1370_vm8, %v6640_v55, %v1376_v7  ;;  %v1051_v44 = vsel %vm1038_vm10, %v6540_v50, %v1050_v11  ;;  %2046 = vmatpush.bf16.msra.mxu2 %v5033_v4  ;;  %2074 = vmatpush.bf16.msra.mxu0 %v5037_v26  ;;  %v5625_v49 = vld [vmem:[#allocation3 + $0x12c] sm:$0xf0]  ;;  %v5002_v13 = vld [vmem:[#allocation3 + $0x130] sm:$0xf0]  ;;  %v1210_v38 = vsel %vm612_vm6, %v1196_v2, %v1197_v6  ;;  %v5650_v6 = vld [vmem:[#allocation3 + $0x1f4] sm:$0xf0] }
 0x1a0   : > { %1397 = vst [vmem:[#allocation3 + $0x1d8] sm:$0xff] %v1377_v22  ;;  %v5000_v54 = vld [vmem:[#allocation3 + $0x110] sm:$0xf]  ;;  %v5621_v35 = vld [vmem:[#allocation3 + $0x114] sm:$0xf]  ;;  %v1211_v55 = vsel %vm1204_vm9, %v6666_v39, %v1210_v38 }
 0x1a1   : > { %1068 = vst [vmem:[#allocation3 + $0xf0] sm:$0xff] %v1051_v44  ;;  %v5001_v50 = vor.u32 %v5625_v49, %v5000_v54  ;;  %v5005_v43 = vor.u32 %v5621_v35, %v5002_v13  ;;  %v5613_v4 = vld [vmem:[#allocation3 + $0xd4] sm:$0xf]  ;;  %v8158_v54 = vrot.slane %v6579_v12, 4 }
 0x1a2   : > { %5145 = vmatmul.msk.bf16.vlgmr.msrb.gmra.mxu0 %vm8139_vm13, %v6538_v45  ;;  %1231 = vst [vmem:[#allocation3 + $0x158] sm:$0xff] %v1211_v55 }
 0x1a3   : > { %2047 = vmatpush.bf16.msra.mxu2 %v5001_v50  ;;  %2075 = vmatpush.bf16.msra.mxu0 %v5005_v43  ;;  %v6751_v2 = vpop.permute.xlu1 %1438  ;;  %v6753_v0 = vpop.permute.xlu0 %1428 }
 0x1a4   : > { %v1450_v52 = vrot.slane %v6751_v2, 4  ;;  %v1445_v46 = vrot.slane %v6753_v0, 4  ;;  %v1109_v5 = vpop.permute.xlu2 %1108 }
 0x1a5   : > { %v1119_v39 = vrot.slane %v1109_v5, 4 }
 0x1a6   : > { %v1465_v56 = vsel %vm612_vm6, %v1449_v47, %v1450_v52  ;;  %v1457_v20 = vsel %vm612_vm6, %v1444_v21, %v1445_v46 }
 0x1a7   : > { %v1466_v62 = vsel %vm1453_vm12, %v6511_v36, %v1465_v56  ;;  %v1458_v27 = vsel %vm1453_vm12, %v6573_v19, %v1457_v20  ;;  %v5104_v26 = vld [vmem:[#allocation3 + $0x1d8] sm:$0xf]  ;;  %v1135_v47 = vsel %vm612_vm6, %v1118_v51, %v1119_v39 }
 0x1a8   : > { %1483 = vst [vmem:[#allocation3 + $0x230] sm:$0xff] %v1466_v62  ;;  %v5617_v7 = vld [vmem:[#allocation3 + $0xec] sm:$0xf0]  ;;  %v4970_v11 = vld [vmem:[#allocation3 + $0xf0] sm:$0xf0]  ;;  %v5105_v22 = vor.u32 %v5650_v6, %v5104_v26  ;;  %v1136_v21 = vsel %vm1121_vm7, %v6699_v1, %v1135_v47  ;;  %v8159_v1 = vrot.slane %v6575_v25, 4 }
 0x1a9   : > { %1479 = vst [vmem:[#allocation3 + $0x210] sm:$0xff] %v1458_v27  ;;  %v4969_v44 = vor.u32 %v5617_v7, %v4968_v14  ;;  %v4973_v36 = vor.u32 %v5613_v4, %v4970_v11  ;;  %v8160_v11 = vrot.slane %v6564_v23, 4 }
 0x1aa   : > { %2100 = vmatpush.bf16.msrb.mxu3 %v5105_v22  ;;  %1152 = vst [vmem:[#allocation3 + $0x138] sm:$0xff] %v1136_v21 }
 0x1ab   : > { %2048 = vmatpush.bf16.msra.mxu2 %v4969_v44  ;;  %2076 = vmatpush.bf16.msra.mxu0 %v4973_v36  ;;  %v1265_v19 = vpop.permute.xlu1 %1264  ;;  %v6776_v49 = vpop.permute.xlu0 %940  ;;  %v4936_v44 = vld [vmem:[#allocation3 + $0x90] sm:$0xf]  ;;  %v5605_v36 = vld [vmem:[#allocation3 + $0x94] sm:$0xf] }
 0x1ac   : > { %v1280_v13 = vrot.slane %v1265_v19, 4  ;;  %v952_v51 = vrot.slane %v6776_v49, 4  ;;  %v933_v38 = vpop.permute.xlu2 %932  ;;  %v5642_v19 = vld [vmem:[#allocation3 + $0x1b4] sm:$0xf0] }
 0x1ad   : > { %v948_v42 = vrot.slane %v933_v38, 4 }
 0x1ae   : > { %v1293_v35 = vsel %vm612_vm6, %v8158_v54, %v1280_v13  ;;  %v967_v55 = vsel %vm612_vm6, %v8159_v1, %v952_v51  ;;  %v5074_v13 = vld [vmem:[#allocation3 + $0x1b8] sm:$0xf0] }
 0x1af   : > { %v1294_v50 = vsel %vm1287_vm11, %v6579_v12, %v1293_v35  ;;  %v968_v43 = vsel %vm955_vm14, %v6575_v25, %v967_v55  ;;  %v5657_v5 = vld [vmem:[#allocation3 + $0x22c] sm:$0xf0]  ;;  %v5130_v39 = vld [vmem:[#allocation3 + $0x230] sm:$0xf0]  ;;  %v961_v56 = vsel %vm612_vm6, %v947_v53, %v948_v42  ;;  %v5646_v12 = vld [vmem:[#allocation3 + $0x1dc] sm:$0xf] }
 0x1b0   : > { %1314 = vst [vmem:[#allocation3 + $0x198] sm:$0xff] %v1294_v50  ;;  %v5128_v20 = vld [vmem:[#allocation3 + $0x210] sm:$0xf]  ;;  %v5653_v14 = vld [vmem:[#allocation3 + $0x214] sm:$0xf]  ;;  %v962_v62 = vsel %vm955_vm14, %v6672_v32, %v961_v56  ;;  %v8161_v32 = vrot.slane %v6545_v8, 4 }
 0x1b1   : > { %985 = vst [vmem:[#allocation3 + $0xb0] sm:$0xff] %v968_v43  ;;  %v5129_v27 = vor.u32 %v5657_v5, %v5128_v20  ;;  %v5133_v4 = vor.u32 %v5653_v14, %v5130_v39  ;;  %v5106_v53 = vld [vmem:[#allocation3 + $0x1f8] sm:$0xf0] }
 0x1b2   : > { %982 = vst [vmem:[#allocation3 + $0x98] sm:$0xff] %v962_v62  ;;  %v5109_v7 = vor.u32 %v5646_v12, %v5106_v53  ;;  %v8162_v53 = vrot.slane %v6602_v3, 4 }
 0x1b3   : > { %2065 = vmatpush.bf16.msrb.mxu1 %v5129_v27  ;;  %v858_v26 = vpop.permute.xlu1 %857  ;;  %v6796_v25 = vpop.permute.xlu0 %847 }
 0x1b4   : > { %v869_v6 = vrot.slane %v858_v26, 4  ;;  %v864_v47 = vrot.slane %v6796_v25, 4 }
 0x1b6   : > { %v884_v22 = vsel %vm612_vm6, %v8160_v11, %v869_v6  ;;  %v876_v21 = vsel %vm612_vm6, %v8161_v32, %v864_v47  ;;  %5146 = vmatmul.msk.bf16.vlgmr.msrb.gmra.mxu1 %vm8139_vm13, %v6538_v45  ;;  %v860_v38 = vpop.permute.xlu2 %859 }
 0x1b7   : > { %2093 = vmatpush.bf16.msra.mxu1 %v5133_v4  ;;  %v885_v42 = vsel %vm872_vm15, %v6564_v23, %v884_v22  ;;  %v877_v54 = vsel %vm872_vm15, %v6545_v8, %v876_v21  ;;  %v5072_v35 = vld [vmem:[#allocation3 + $0x198] sm:$0xf]  ;;  %v5638_v1 = vld [vmem:[#allocation3 + $0x19c] sm:$0xf]  ;;  %v870_v55 = vrot.slane %v860_v38, 4 }
 0x1b8   : > { %902 = vst [vmem:[#allocation3 + $0x70] sm:$0xff] %v885_v42  ;;  %v5609_v50 = vld [vmem:[#allocation3 + $0xac] sm:$0xf0]  ;;  %v4938_v43 = vld [vmem:[#allocation3 + $0xb0] sm:$0xf0]  ;;  %v5073_v5 = vor.u32 %v5642_v19, %v5072_v35  ;;  %v5077_v39 = vor.u32 %v5638_v1, %v5074_v13 }
 0x1b9   : > { %898 = vst [vmem:[#allocation3 + $0x50] sm:$0xff] %v877_v54  ;;  %v4937_v56 = vor.u32 %v5609_v50, %v4936_v44  ;;  %v4941_v20 = vor.u32 %v5605_v36, %v4938_v43  ;;  %v886_v14 = vsel %vm612_vm6, %v869_v6, %v870_v55  ;;  %v5593_v19 = vld [vmem:[#allocation3 + $0x2c] sm:$0xf0]  ;;  %v5589_v35 = vld [vmem:[#allocation3 + $0x14] sm:$0xf]  ;;  %v8163_v50 = vrot.slane %v6619_v48, 4 }
 0x1ba   : > { %2101 = vmatpush.bf16.msrb.mxu3 %v5073_v5  ;;  %v887_v23 = vsel %vm872_vm15, %v858_v26, %v886_v14 }
 0x1bb   : > { %2128 = vmatpush.bf16.msrb.mxu1 %v5109_v7  ;;  %2049 = vmatpush.bf16.msra.mxu2 %v4937_v56  ;;  %v1099_v8 = vpop.permute.xlu1 %1098  ;;  %v1192_v62 = vpop.permute.xlu0 %1191  ;;  %903 = vst [vmem:[#allocation3 + $0x78] sm:$0xff] %v887_v23  ;;  %v5040_v56 = vld [vmem:[#allocation3 + $0x158] sm:$0xf] }
 0x1bc   : > { %2077 = vmatpush.bf16.msra.mxu0 %v4941_v20  ;;  %v1114_v27 = vrot.slane %v1099_v8, 4  ;;  %v1202_v4 = vrot.slane %v1192_v62, 4  ;;  %v5630_v20 = vld [vmem:[#allocation3 + $0x15c] sm:$0xf] }
 0x1be   : > { %v1127_v12 = vsel %vm612_vm6, %v1113_v28, %v1114_v27  ;;  %v1218_v7 = vsel %vm612_vm6, %v8162_v53, %v1202_v4  ;;  %v4874_v28 = vld [vmem:[#allocation3 + $0x30] sm:$0xf0]  ;;  %v5626_v53 = vld [vmem:[#allocation3 + $0x134] sm:$0xf0] }
 0x1bf   : > { %2129 = vmatpush.bf16.msrb.mxu1 %v5077_v39  ;;  %v1128_v6 = vsel %vm1121_vm7, %v6701_v10, %v1127_v12  ;;  %v1219_v26 = vsel %vm1204_vm9, %v6602_v3, %v1218_v7  ;;  %v5601_v11 = vld [vmem:[#allocation3 + $0x6c] sm:$0xf0]  ;;  %v4906_v22 = vld [vmem:[#allocation3 + $0x70] sm:$0xf0]  ;;  %v4877_v3 = vor.u32 %v5589_v35, %v4874_v28  ;;  %v5010_v7 = vld [vmem:[#allocation3 + $0x138] sm:$0xf0] }
 0x1c0   : > { %1148 = vst [vmem:[#allocation3 + $0x118] sm:$0xff] %v1128_v6  ;;  %v4904_v32 = vld [vmem:[#allocation3 + $0x50] sm:$0xf]  ;;  %v5597_v21 = vld [vmem:[#allocation3 + $0x54] sm:$0xf] }
 0x1c1   : > { %1235 = vst [vmem:[#allocation3 + $0x178] sm:$0xff] %v1219_v26  ;;  %v4905_v44 = vor.u32 %v5601_v11, %v4904_v32  ;;  %v4909_v36 = vor.u32 %v5597_v21, %v4906_v22  ;;  %v4872_v10 = vld [vmem:[#allocation3 + $0x10] sm:$0xf] }
 0x1c2   : > { %v4873_v1 = vor.u32 %v5593_v19, %v4872_v10 }
 0x1c3   : > { %2050 = vmatpush.bf16.msra.mxu2 %v4905_v44  ;;  %2078 = vmatpush.bf16.msra.mxu0 %v4909_v36  ;;  %v1026_v13 = vpop.permute.xlu1 %1025  ;;  %v1016_v38 = vpop.permute.xlu0 %1015 }
 0x1c4   : > { %v1036_v42 = vrot.slane %v1026_v13, 4  ;;  %v1031_v54 = vrot.slane %v1016_v38, 4 }
 0x1c6   : > { %v1052_v55 = vsel %vm612_vm6, %v1035_v63, %v1036_v42  ;;  %v1044_v43 = vsel %vm612_vm6, %v8163_v50, %v1031_v54  ;;  %5147 = vmatmul.msk.bf16.vlgmr.msra.gmra.mxu1 %vm8139_vm13, %v6538_v45 }
 0x1c7   : > { %v1053_v5 = vsel %vm1038_vm10, %v6725_v37, %v1052_v55  ;;  %v1045_v39 = vsel %vm1038_vm10, %v6619_v48, %v1044_v43  ;;  %2051 = vmatpush.bf16.msra.mxu2 %v4873_v1  ;;  %2079 = vmatpush.bf16.msra.mxu0 %v4877_v3  ;;  %v5008_v62 = vld [vmem:[#allocation3 + $0x118] sm:$0xf]  ;;  %v5622_v27 = vld [vmem:[#allocation3 + $0x11c] sm:$0xf] }
 0x1c8   : > { %1069 = vst [vmem:[#allocation3 + $0xf8] sm:$0xff] %v1053_v5  ;;  %v5634_v14 = vld [vmem:[#allocation3 + $0x174] sm:$0xf0]  ;;  %v5042_v63 = vld [vmem:[#allocation3 + $0x178] sm:$0xf0]  ;;  %v5009_v6 = vor.u32 %v5626_v53, %v5008_v62  ;;  %v5013_v26 = vor.u32 %v5622_v27, %v5010_v7 }
 0x1c9   : > { %1065 = vst [vmem:[#allocation3 + $0xd8] sm:$0xff] %v1045_v39  ;;  %v5041_v23 = vor.u32 %v5634_v14, %v5040_v56  ;;  %v5045_v8 = vor.u32 %v5630_v20, %v5042_v63  ;;  %v4944_v1 = vld [vmem:[#allocation3 + $0x98] sm:$0xf]  ;;  %v5606_v3 = vld [vmem:[#allocation3 + $0x9c] sm:$0xf] }
 0x1ca   : > { %2052 = vmatmul.bf16.vlgmr.msra.gmra.mxu2 %v6674_v16  ;;  %2080 = vmatmul.bf16.vlgmr.msra.gmra.mxu0 %v6674_v16  ;;  %v5602_v56 = vld [vmem:[#allocation3 + $0x74] sm:$0xf0]  ;;  %v4882_v63 = vld [vmem:[#allocation3 + $0x38] sm:$0xf0] }
 0x1cb   : > { %2102 = vmatpush.bf16.msrb.mxu3 %v5041_v23  ;;  %2130 = vmatpush.bf16.msrb.mxu1 %v5045_v8  ;;  %v850_v37 = vpop.permute.xlu1 %849  ;;  %v943_v48 = vpop.permute.xlu0 %942  ;;  %v4880_v8 = vld [vmem:[#allocation3 + $0x18] sm:$0xf] }
 0x1cc   : > { %v865_v4 = vrot.slane %v850_v37, 4  ;;  %v953_v12 = vrot.slane %v943_v48, 4 }
 0x1ce   : > { %v878_v11 = vsel %vm612_vm6, %v864_v47, %v865_v4  ;;  %v969_v22 = vsel %vm612_vm6, %v952_v51, %v953_v12  ;;  %v5590_v4 = vld [vmem:[#allocation3 + $0x1c] sm:$0xf] }
 0x1cf   : > { %v879_v32 = vsel %vm872_vm15, %v6796_v25, %v878_v11  ;;  %v970_v21 = vsel %vm955_vm14, %v6776_v49, %v969_v22  ;;  %2103 = vmatpush.bf16.msrb.mxu3 %v5009_v6  ;;  %2131 = vmatpush.bf16.msrb.mxu1 %v5013_v26  ;;  %v5618_v44 = vld [vmem:[#allocation3 + $0xf4] sm:$0xf0]  ;;  %v4978_v36 = vld [vmem:[#allocation3 + $0xf8] sm:$0xf0]  ;;  %v4885_v53 = vor.u32 %v5590_v4, %v4882_v63 }
 0x1d0   : > { %899 = vst [vmem:[#allocation3 + $0x58] sm:$0xff] %v879_v32  ;;  %v4976_v19 = vld [vmem:[#allocation3 + $0xd8] sm:$0xf]  ;;  %v5614_v28 = vld [vmem:[#allocation3 + $0xdc] sm:$0xf] }
 0x1d1   : > { %986 = vst [vmem:[#allocation3 + $0xb8] sm:$0xff] %v970_v21  ;;  %v4977_v13 = vor.u32 %v5618_v44, %v4976_v19  ;;  %v4981_v47 = vor.u32 %v5614_v28, %v4978_v36 }
 0x1d3   : > { %2104 = vmatpush.bf16.msrb.mxu3 %v4977_v13  ;;  %2132 = vmatpush.bf16.msrb.mxu1 %v4981_v47  ;;  %v1441_v38 = vpop.permute.xlu1 %1440  ;;  %v1431_v51 = vpop.permute.xlu0 %1430 }
 0x1d4   : > { %v1451_v42 = vrot.slane %v1441_v38, 4  ;;  %v1446_v54 = vrot.slane %v1431_v51, 4 }
 0x1d6   : > { %v1467_v49 = vsel %vm612_vm6, %v1450_v52, %v1451_v42  ;;  %v1459_v25 = vsel %vm612_vm6, %v1445_v46, %v1446_v54  ;;  %v4914_v46 = vld [vmem:[#allocation3 + $0x78] sm:$0xf0] }
 0x1d7   : > { %v1468_v10 = vsel %vm1453_vm12, %v6751_v2, %v1467_v49  ;;  %v1460_v35 = vsel %vm1453_vm12, %v6753_v0, %v1459_v25  ;;  %v4912_v39 = vld [vmem:[#allocation3 + $0x58] sm:$0xf]  ;;  %v5598_v52 = vld [vmem:[#allocation3 + $0x5c] sm:$0xf] }
 0x1d8   : > { %1484 = vst [vmem:[#allocation3 + $0x238] sm:$0xff] %v1468_v10  ;;  %v5610_v55 = vld [vmem:[#allocation3 + $0xb4] sm:$0xf0]  ;;  %v4946_v50 = vld [vmem:[#allocation3 + $0xb8] sm:$0xf0]  ;;  %v4913_v20 = vor.u32 %v5602_v56, %v4912_v39  ;;  %v4917_v14 = vor.u32 %v5598_v52, %v4914_v46 }
 0x1d9   : > { %1480 = vst [vmem:[#allocation3 + $0x218] sm:$0xff] %v1460_v35  ;;  %v4945_v43 = vor.u32 %v5610_v55, %v4944_v1  ;;  %v4949_v5 = vor.u32 %v5606_v3, %v4946_v50  ;;  %v5594_v2 = vld [vmem:[#allocation3 + $0x34] sm:$0xf0] }
 0x1da   : > { %v4881_v37 = vor.u32 %v5594_v2, %v4880_v8 }
 0x1db   : > { %2105 = vmatpush.bf16.msrb.mxu3 %v4945_v43  ;;  %2133 = vmatpush.bf16.msrb.mxu1 %v4949_v5 }
 0x1df   : > { %2106 = vmatpush.bf16.msrb.mxu3 %v4913_v20  ;;  %2134 = vmatpush.bf16.msrb.mxu1 %v4917_v14  ;;  %v5658_v0 = vld [vmem:[#allocation3 + $0x234] sm:$0xf0]  ;;  %v5138_v23 = vld [vmem:[#allocation3 + $0x238] sm:$0xf0] }
 0x1e0   : > { %v5136_v62 = vld [vmem:[#allocation3 + $0x218] sm:$0xf]  ;;  %v5654_v27 = vld [vmem:[#allocation3 + $0x21c] sm:$0xf]  ;;  %v1955_v26 = vpop.f32.mrf.mxu2 }
 0x1e1   : > { %v5137_v48 = vor.u32 %v5658_v0, %v5136_v62  ;;  %v5141_v12 = vor.u32 %v5654_v27, %v5138_v23  ;;  %v1983_v7 = vpop.f32.mrf.mxu3 }
 0x1e3   : > { %2107 = vmatpush.bf16.msrb.mxu3 %v4881_v37  ;;  %2121 = vmatpush.bf16.msrb.mxu2 %v5137_v48 }
 0x1e4   : > { %2135 = vmatpush.bf16.msrb.mxu1 %v4885_v53  ;;  %2149 = vmatpush.bf16.msrb.mxu0 %v5141_v12 }
 0x1e6   : > { %2108 = vmatmul.bf16.vlgmr.msrb.gmra.mxu3 %v6674_v16  ;;  %5148 = vmatmul.msk.bf16.vlgmr.msrb.gmra.mxu2 %vm8139_vm13, %v6538_v45 }
 0x1e7   : > { %2136 = vmatmul.bf16.vlgmr.msrb.gmra.mxu1 %v6674_v16  ;;  %5149 = vmatmul.msk.bf16.vlgmr.msrb.gmra.mxu0 %vm8139_vm13, %v6538_v45 }
 0x1e8   : > { %v1957_v22 = vpop.f32.mrf.mxu2 }
 0x1e9   : > { %v1985_v6 = vpop.f32.mrf.mxu3 }
 0x1ee   : > { %v6865_v44 = vpop.permute.xlu2 %2160  ;;  %v6867_v36 = vpop.permute.xlu1 %2188 }
 0x1f6   : > { %v6877_v3 = vpop.permute.xlu2 %2193 }
 0x1fa   : > { %v6871_v42 = vpop.permute.xlu0 %2165 }
 0x200   : > { %v2011_v11 = vpop.f32.mrf.mxu3 }
 0x208   : > { %v2013_v28 = vpop.f32.mrf.mxu3 }
 0x20e   : > { %v1997_v16 = vpop.f32.mrf.mxu1 }
 0x20f   : > { %v1941_v32 = vpop.f32.mrf.mxu0  ;;  %v2012_v38 = vadd.f32 %v2011_v11, %v1997_v16 }
 0x210   : > { %v1956_v21 = vadd.f32 %v1955_v26, %v1941_v32 }
 0x211   : > { %v2170_v10 = vmul.f32 %v6865_v44, %v2012_v38 }
 0x212   : > { %v2168_v19 = vmul.f32 %v6865_v44, %v1956_v21 }
 0x213   : > { %v2198_v46 = vadd.f32 %v6867_v36, %v2170_v10 }
 0x214   : > { %v2196_v13 = vadd.f32 %v6867_v36, %v2168_v19 }
 0x216   : > { %v1969_v47 = vpop.f32.mrf.mxu2  ;;  %v2228_v54 = vmul.f32 0.02, %v2196_v13  ;;  %vm2212_vm1 = vcmp.gt.f32.partialorder %v2196_v13, 0.0  ;;  %v1999_v8 = vpop.f32.mrf.mxu1 }
 0x217   : > { %v1984_v45 = vadd.f32 %v1983_v7, %v1969_v47  ;;  %v1943_v51 = vpop.f32.mrf.mxu0  ;;  %v2014_v7 = vadd.f32 %v2013_v28, %v1999_v8 }
 0x218   : > { %v1958_v25 = vadd.f32 %v1957_v22, %v1943_v51  ;;  %v2244_v55 = vsel %vm2212_vm1, %v2196_v13, %v2228_v54 }
 0x219   : > { %v2169_v49 = vmul.f32 %v6865_v44, %v1984_v45  ;;  %v2424_v56 = vmul.f32 %v5998_v57, %v2244_v55  ;;  %v2260_v63 = vmul.f32 %v5965_v33, %v2244_v55  ;;  %v2178_v51 = vmul.f32 %v6871_v42, %v2014_v7 }
 0x21a   : > { %v2176_v1 = vmul.f32 %v6871_v42, %v1958_v25 }
 0x21b   : > { %v2197_v35 = vadd.f32 %v6867_v36, %v2169_v49 }
 0x21c   : > { %v2204_v43 = vadd.f32 %v6877_v3, %v2176_v1  ;;  %v2206_v1 = vadd.f32 %v6877_v3, %v2178_v51 }
 0x21d   : > { %v2229_v50 = vmul.f32 0.02, %v2197_v35  ;;  %vm2213_vm2 = vcmp.gt.f32.partialorder %v2197_v35, 0.0 }
 0x21e   : > { %v1971_v5 = vpop.f32.mrf.mxu2  ;;  %v2236_v37 = vmul.f32 0.02, %v2204_v43  ;;  %vm2220_vm3 = vcmp.gt.f32.partialorder %v2204_v43, 0.0 }
 0x21f   : > { %v1986_v39 = vadd.f32 %v1985_v6, %v1971_v5  ;;  %v2245_v52 = vsel %vm2213_vm2, %v2197_v35, %v2229_v50  ;;  %v2039_v14 = vpop.f32.mrf.mxu0  ;;  %v2230_v6 = vmul.f32 0.02, %v2198_v46  ;;  %vm2214_vm2 = vcmp.gt.f32.partialorder %v2198_v46, 0.0 }
 0x220   : > { %v2025_v20 = vpop.f32.mrf.mxu3  ;;  %v2350_v2 = vpack.c.bf16 %v2245_v52, %v2244_v55  ;;  %v2425_v0 = vmul.f32 %v6001_v59, %v2245_v52  ;;  %v2261_v23 = vmul.f32 %v5968_v34, %v2245_v52  ;;  %v2252_v22 = vsel %vm2220_vm3, %v2204_v43, %v2236_v37 }
 0x221   : > { %v2177_v62 = vmul.f32 %v6871_v42, %v1986_v39  ;;  %v2040_v27 = vadd.f32 %v2039_v14, %v2025_v20  ;;  %v2268_v16 = vmul.f32 %v5965_v33, %v2252_v22  ;;  %v2246_v38 = vsel %vm2214_vm2, %v2198_v46, %v2230_v6 }
 0x222   : > { %2366 = vrot.lane.b32.xlu1 %v2350_v2, %s5809_s21  ;;  %v2440_v48 = vpack.c.bf16 %v2425_v0, %v2424_v56  ;;  %v2276_v4 = vpack.c.bf16 %v2261_v23, %v2260_v63  ;;  %v2432_v39 = vmul.f32 %v5998_v57, %v2252_v22  ;;  %v2262_v52 = vmul.f32 %v5956_v30, %v2246_v38 }
 0x223   : > { %v2205_v12 = vadd.f32 %v6877_v3, %v2177_v62  ;;  %v2171_v53 = vmul.f32 %v6865_v44, %v2040_v27  ;;  %v2426_v56 = vmul.f32 %v6004_v60, %v2246_v38  ;;  %v2238_v46 = vmul.f32 0.02, %v2206_v1 }
 0x224   : > { %2456 = vrot.lane.b32.xlu0 %v2440_v48, %s5809_s21  ;;  %2292 = vrot.lane.b32.xlu2 %v2276_v4, %s5809_s21  ;;  %vm2222_vm3 = vcmp.gt.f32.partialorder %v2206_v1, 0.0 }
 0x225   : > { %v2237_v26 = vmul.f32 0.02, %v2205_v12  ;;  %v2199_v11 = vadd.f32 %v6867_v36, %v2171_v53  ;;  %vm2221_vm1 = vcmp.gt.f32.partialorder %v2205_v12, 0.0  ;;  %v2254_v23 = vsel %vm2222_vm3, %v2206_v1, %v2238_v46 }
 0x226   : > { %v2270_v27 = vmul.f32 %v5956_v30, %v2254_v23  ;;  %v2434_v37 = vmul.f32 %v6004_v60, %v2254_v23 }
 0x227   : > { %v2231_v32 = vmul.f32 0.02, %v2199_v11  ;;  %vm2215_vm13 = vcmp.gt.f32.partialorder %v2199_v11, 0.0  ;;  %v2253_v21 = vsel %vm2221_vm1, %v2205_v12, %v2237_v26  ;;  %v2041_v13 = vpop.f32.mrf.mxu0 }
 0x228   : > { %v2027_v19 = vpop.f32.mrf.mxu3  ;;  %v2269_v28 = vmul.f32 %v5968_v34, %v2253_v21  ;;  %v2354_v49 = vpack.c.bf16 %v2253_v21, %v2252_v22  ;;  %v2433_v55 = vmul.f32 %v6001_v59, %v2253_v21 }
 0x229   : > { %v2042_v47 = vadd.f32 %v2041_v13, %v2027_v19  ;;  %v2247_v45 = vsel %vm2215_vm13, %v2199_v11, %v2231_v32 }
 0x22a   : > { %v2351_v54 = vpack.c.bf16 %v2247_v45, %v2246_v38  ;;  %v2280_v25 = vpack.c.bf16 %v2269_v28, %v2268_v16  ;;  %v2263_v50 = vmul.f32 %v5959_v31, %v2247_v45  ;;  %v2427_v5 = vmul.f32 %v6007_v61, %v2247_v45 }
 0x22b   : > { %v2179_v10 = vmul.f32 %v6871_v42, %v2042_v47  ;;  %v2444_v20 = vpack.c.bf16 %v2433_v55, %v2432_v39 }
 0x22c   : > { %2368 = vrot.lane.b32.xlu2 %v2351_v54, %s5809_s21  ;;  %2374 = vrot.lane.b32.xlu0 %v2354_v49, %s5809_s21  ;;  %v2277_v14 = vpack.c.bf16 %v2263_v50, %v2262_v52  ;;  %v2441_v2 = vpack.c.bf16 %v2427_v5, %v2426_v56 }
 0x22d   : > { %v2207_v35 = vadd.f32 %v6877_v3, %v2179_v10  ;;  %2300 = vrot.lane.b32.xlu1 %v2280_v25, %s5809_s21 }
 0x22f   : > { %v2239_v43 = vmul.f32 0.02, %v2207_v35  ;;  %vm2223_vm13 = vcmp.gt.f32.partialorder %v2207_v35, 0.0 }
 0x231   : > { %v2255_v0 = vsel %vm2223_vm13, %v2207_v35, %v2239_v43 }
 0x232   : > { %v2271_v8 = vmul.f32 %v5959_v31, %v2255_v0  ;;  %v2435_v62 = vmul.f32 %v6007_v61, %v2255_v0  ;;  %v2355_v12 = vpack.c.bf16 %v2255_v0, %v2254_v23 }
 0x233   : > { %v2067_v63 = vpop.f32.mrf.mxu1 }
 0x234   : > { %2464 = vrot.lane.b32.xlu2 %v2444_v20, %s5809_s21  ;;  %2294 = vrot.lane.b32.xlu0 %v2277_v14, %s5809_s21  ;;  %v2281_v48 = vpack.c.bf16 %v2271_v8, %v2270_v27  ;;  %v2445_v4 = vpack.c.bf16 %v2435_v62, %v2434_v37 }
 0x235   : > { %2458 = vrot.lane.b32.xlu1 %v2441_v2, %s5809_s21 }
 0x23b   : > { %v2069_v53 = vpop.f32.mrf.mxu1 }
 0x23c   : > { %2302 = vrot.lane.b32.xlu2 %v2281_v48, %s5809_s21  ;;  %2466 = vrot.lane.b32.xlu0 %v2445_v4, %s5809_s21 }
 0x23d   : > { %2376 = vrot.lane.b32.xlu1 %v2355_v12, %s5809_s21 }
 0x243   : > { %v2095_v7 = vpop.f32.mrf.mxu1 }
 0x247   : > { %v2081_v6 = vpop.f32.mrf.mxu0 }
 0x248   : > { %v2096_v26 = vadd.f32 %v2095_v7, %v2081_v6 }
 0x24a   : > { %v2173_v11 = vmul.f32 %v6865_v44, %v2096_v26 }
 0x24b   : > { %v2097_v21 = vpop.f32.mrf.mxu1 }
 0x24c   : > { %v2201_v22 = vadd.f32 %v6867_v36, %v2173_v11 }
 0x24d   : > { %v2053_v32 = vpop.f32.mrf.mxu2 }
 0x24e   : > { %v2068_v19 = vadd.f32 %v2067_v63, %v2053_v32  ;;  %v2233_v13 = vmul.f32 0.02, %v2201_v22  ;;  %vm2217_vm1 = vcmp.gt.f32.partialorder %v2201_v22, 0.0 }
 0x24f   : > { %v2083_v16 = vpop.f32.mrf.mxu0 }
 0x250   : > { %v2172_v28 = vmul.f32 %v6865_v44, %v2068_v19  ;;  %v2098_v47 = vadd.f32 %v2097_v21, %v2083_v16  ;;  %v2249_v51 = vsel %vm2217_vm1, %v2201_v22, %v2233_v13 }
 0x251   : > { %v2429_v1 = vmul.f32 %v6030_v17, %v2249_v51  ;;  %v2265_v5 = vmul.f32 %v5953_v29, %v2249_v51 }
 0x252   : > { %v2200_v38 = vadd.f32 %v6867_v36, %v2172_v28  ;;  %v2181_v45 = vmul.f32 %v6871_v42, %v2098_v47 }
 0x254   : > { %v2232_v54 = vmul.f32 0.02, %v2200_v38  ;;  %v2209_v49 = vadd.f32 %v6877_v3, %v2181_v45  ;;  %vm2216_vm2 = vcmp.gt.f32.partialorder %v2200_v38, 0.0 }
 0x255   : > { %v2055_v25 = vpop.f32.mrf.mxu2 }
 0x256   : > { %v2070_v10 = vadd.f32 %v2069_v53, %v2055_v25  ;;  %v2248_v35 = vsel %vm2216_vm2, %v2200_v38, %v2232_v54  ;;  %v2241_v39 = vmul.f32 0.02, %v2209_v49  ;;  %vm2225_vm13 = vcmp.gt.f32.partialorder %v2209_v49, 0.0 }
 0x257   : > { %v2352_v55 = vpack.c.bf16 %v2249_v51, %v2248_v35  ;;  %v2428_v50 = vmul.f32 %v6027_v18, %v2248_v35  ;;  %v2264_v43 = vmul.f32 %v5945_v24, %v2248_v35 }
 0x258   : > { %v2180_v52 = vmul.f32 %v6871_v42, %v2070_v10  ;;  %v2257_v2 = vsel %vm2225_vm13, %v2209_v49, %v2241_v39 }
 0x259   : > { %2370 = vrot.lane.b32.xlu1 %v2352_v55, %s5809_s21  ;;  %v2442_v56 = vpack.c.bf16 %v2429_v1, %v2428_v50  ;;  %v2278_v46 = vpack.c.bf16 %v2265_v5, %v2264_v43  ;;  %v2437_v23 = vmul.f32 %v6030_v17, %v2257_v2  ;;  %v2273_v62 = vmul.f32 %v5953_v29, %v2257_v2 }
 0x25a   : > { %v2208_v20 = vadd.f32 %v6877_v3, %v2180_v52 }
 0x25b   : > { %2460 = vrot.lane.b32.xlu2 %v2442_v56, %s5809_s21  ;;  %2296 = vrot.lane.b32.xlu0 %v2278_v46, %s5809_s21 }
 0x25c   : > { %v2240_v14 = vmul.f32 0.02, %v2208_v20  ;;  %vm2224_vm3 = vcmp.gt.f32.partialorder %v2208_v20, 0.0 }
 0x25e   : > { %v2256_v0 = vsel %vm2224_vm3, %v2208_v20, %v2240_v14 }
 0x25f   : > { %v2436_v63 = vmul.f32 %v6027_v18, %v2256_v0  ;;  %v2272_v8 = vmul.f32 %v5945_v24, %v2256_v0  ;;  %v2356_v27 = vpack.c.bf16 %v2257_v2, %v2256_v0 }
 0x261   : > { %v2446_v37 = vpack.c.bf16 %v2437_v23, %v2436_v63  ;;  %v2282_v48 = vpack.c.bf16 %v2273_v62, %v2272_v8 }
 0x263   : > { %2378 = vrot.lane.b32.xlu2 %v2356_v27, %s5809_s21  ;;  %2468 = vrot.lane.b32.xlu0 %v2446_v37, %s5809_s21 }
 0x264   : > { %v2137_v4 = vpop.f32.mrf.mxu1  ;;  %v2151_v12 = vpop.f32.mrf.mxu0  ;;  %2304 = vrot.lane.b32.xlu1 %v2282_v48, %s5809_s21 }
 0x265   : > { %v2152_v53 = vadd.f32 %v2151_v12, %v2137_v4 }
 0x267   : > { %v2175_v7 = vmul.f32 %v6865_v44, %v2152_v53 }
 0x269   : > { %v2203_v6 = vadd.f32 %v6867_v36, %v2175_v7  ;;  %v2109_v26 = vpop.f32.mrf.mxu3  ;;  %v2123_v11 = vpop.f32.mrf.mxu2 }
 0x26a   : > { %v2124_v22 = vadd.f32 %v2123_v11, %v2109_v26 }
 0x26b   : > { %v2235_v32 = vmul.f32 0.02, %v2203_v6  ;;  %vm2219_vm1 = vcmp.gt.f32.partialorder %v2203_v6, 0.0 }
 0x26c   : > { %v2174_v21 = vmul.f32 %v6865_v44, %v2124_v22  ;;  %v2139_v19 = vpop.f32.mrf.mxu1  ;;  %v2153_v13 = vpop.f32.mrf.mxu0 }
 0x26d   : > { %v2154_v16 = vadd.f32 %v2153_v13, %v2139_v19  ;;  %v2251_v38 = vsel %vm2219_vm1, %v2203_v6, %v2235_v32  ;;  %vm8164_vm1 = vcmask 130048  }
 0x26e   : > { %v2202_v28 = vadd.f32 %v6867_v36, %v2174_v21  ;;  %v2431_v35 = vmul.f32 %v6062_v41, %v2251_v38  ;;  %v2267_v36 = vmul.f32 %v6050_v9, %v2251_v38 }
 0x26f   : > { %v2183_v47 = vmul.f32 %v6871_v42, %v2154_v16 }
 0x270   : > { %v2234_v45 = vmul.f32 0.02, %v2202_v28  ;;  %vm2218_vm2 = vcmp.gt.f32.partialorder %v2202_v28, 0.0 }
 0x271   : > { %v2211_v51 = vadd.f32 %v6877_v3, %v2183_v47  ;;  %v2111_v54 = vpop.f32.mrf.mxu3  ;;  %v2125_v49 = vpop.f32.mrf.mxu2 }
 0x272   : > { %v2126_v25 = vadd.f32 %v2125_v49, %v2111_v54  ;;  %v2250_v10 = vsel %vm2218_vm2, %v2202_v28, %v2234_v45  ;;  %vm8165_vm2 = vmmov %vm8164_vm1 }
 0x273   : > { %v2353_v44 = vpack.c.bf16 %v2251_v38, %v2250_v10  ;;  %v2430_v1 = vmul.f32 %v6059_v40, %v2250_v10  ;;  %v2266_v55 = vmul.f32 %v6047_v15, %v2250_v10  ;;  %v2243_v50 = vmul.f32 0.02, %v2211_v51 }
 0x274   : > { %v2182_v43 = vmul.f32 %v6871_v42, %v2126_v25  ;;  %vm2227_vm13 = vcmp.gt.f32.partialorder %v2211_v51, 0.0 }
 0x275   : > { %2372 = vrot.lane.b32.xlu1 %v2353_v44, %s5809_s21  ;;  %v2443_v5 = vpack.c.bf16 %v2431_v35, %v2430_v1  ;;  %v2279_v39 = vpack.c.bf16 %v2267_v36, %v2266_v55  ;;  %v2259_v46 = vsel %vm2227_vm13, %v2211_v51, %v2243_v50  ;;  %vm8170_vm13 = vmmov %vm8164_vm1 }
 0x276   : > { %v2210_v52 = vadd.f32 %v6877_v3, %v2182_v43  ;;  %v2439_v2 = vmul.f32 %v6062_v41, %v2259_v46  ;;  %v2275_v0 = vmul.f32 %v6050_v9, %v2259_v46 }
 0x277   : > { %2462 = vrot.lane.b32.xlu2 %v2443_v5, %s5809_s21  ;;  %2298 = vrot.lane.b32.xlu0 %v2279_v39, %s5809_s21 }
 0x278   : > { %v2242_v56 = vmul.f32 0.02, %v2210_v52  ;;  %vm2226_vm3 = vcmp.gt.f32.partialorder %v2210_v52, 0.0 }
 0x27a   : > { %v2258_v20 = vsel %vm2226_vm3, %v2210_v52, %v2242_v56  ;;  %vm8171_vm3 = vmmov %vm8164_vm1 }
 0x27b   : > { %v2438_v14 = vmul.f32 %v6059_v40, %v2258_v20  ;;  %v2274_v42 = vmul.f32 %v6047_v15, %v2258_v20  ;;  %v2357_v23 = vpack.c.bf16 %v2259_v46, %v2258_v20 }
 0x27d   : > { %v2447_v8 = vpack.c.bf16 %v2439_v2, %v2438_v14  ;;  %v2283_v3 = vpack.c.bf16 %v2275_v0, %v2274_v42 }
 0x27e   : > { %v2293_v63 = vpop.permute.xlu2 %2292 }
 0x27f   : > { %v2308_v62 = vrot.slane %v2293_v63, 4  ;;  %2380 = vrot.lane.b32.xlu2 %v2357_v23, %s5809_s21  ;;  %2470 = vrot.lane.b32.xlu0 %v2447_v8, %s5809_s21 }
 0x280   : > { %2306 = vrot.lane.b32.xlu1 %v2283_v3, %s5809_s21 }
 0x281   : > { %v2316_v27 = vsel %vm610_vm4, %v2308_v62, %v2293_v63 }
 0x282   : > { %2340 = vst.msk [vmem:[#allocation2] sm:$0xff] %vm6092_vm5, %v2316_v27 }
 0x286   : > { %v6964_v37 = vpop.permute.xlu2 %2368 }
 0x287   : > { %v2383_v23 = vrot.slane %v6964_v37, 4 }
 0x289   : > { %v2940_v48 = vld [vmem:[#allocation2] sm:$0xff] }
 0x28a   : > { %2522 = vst [vmem:[#allocation3] sm:$0xff] %v2940_v48 }
 0x28e   : > { %v2465_v4 = vpop.permute.xlu2 %2464 }
 0x28f   : > { %v2476_v12 = vrot.slane %v2465_v4, 4 }
 0x291   : > { %v2487_v53 = vsel %vm610_vm4, %v2476_v12, %v2465_v4 }
 0x292   : > { %2509 = vst.msk [vmem:[#allocation2 + $0xb4] sm:$0xff] %vm6092_vm5, %v2487_v53 }
 0x294   : > { %v2367_v7 = vpop.permute.xlu1 %2366 }
 0x295   : > { %v2382_v6 = vrot.slane %v2367_v7, 4 }
 0x296   : > { %v6969_v26 = vpop.permute.xlu0 %2456  ;;  %v6981_v21 = vpop.permute.xlu2 %2302 }
 0x297   : > { %v2390_v11 = vsel %vm610_vm4, %v2382_v6, %v2367_v7  ;;  %v2472_v22 = vrot.slane %v6969_v26, 4  ;;  %v2313_v47 = vrot.slane %v6981_v21, 4  ;;  %v2391_v8 = vsel %vm612_vm6, %v2382_v6, %v2383_v23 }
 0x298   : > { %2414 = vst.msk [vmem:[#allocation2 + $0x48] sm:$0xff] %vm6092_vm5, %v2390_v11  ;;  %v2392_v27 = vsel %vm610_vm4, %v2391_v8, %v6964_v37 }
 0x299   : > { %v2480_v32 = vsel %vm610_vm4, %v2472_v22, %v6969_v26  ;;  %v3109_v63 = vld [vmem:[#allocation2 + $0xb4] sm:$0xff] }
 0x29a   : > { %2504 = vst.msk [vmem:[#allocation2 + $0x90] sm:$0xff] %vm6092_vm5, %v2480_v32 }
 0x29e   : > { %v2375_v19 = vpop.permute.xlu0 %2374 }
 0x29f   : > { %v2301_v13 = vpop.permute.xlu1 %2300  ;;  %v2386_v16 = vrot.slane %v2375_v19, 4  ;;  %v2530_v28 = vld [vmem:[#allocation2 + $0x48] sm:$0xff] }
 0x2a0   : > { %v2312_v38 = vrot.slane %v2301_v13, 4  ;;  %2550 = vrot.lane.b32.xlu2 %v2530_v28, %s5819_s29  ;;  %3042 = vrot.lane.b32.xlu1 %v2530_v28, %s5813_s23 }
 0x2a1   : > { %v2397_v45 = vsel %vm610_vm4, %v2386_v16, %v2375_v19  ;;  %v2858_v51 = vld [vmem:[#allocation2 + $0x90] sm:$0xff] }
 0x2a2   : > { %v2323_v54 = vsel %vm610_vm4, %v2312_v38, %v2301_v13  ;;  %v2324_v49 = vsel %vm612_vm6, %v2312_v38, %v2313_v47  ;;  %2419 = vst.msk [vmem:[#allocation2 + $0x6c] sm:$0xff] %vm6092_vm5, %v2397_v45  ;;  %2878 = vrot.lane.b32.xlu0 %v2858_v51, %s5815_s25 }
 0x2a3   : > { %v6996_v25 = vsel %vm610_vm4, %v2324_v49, %v6981_v21  ;;  %2345 = vst.msk [vmem:[#allocation2 + $0x24] sm:$0xff] %vm6092_vm5, %v2323_v54 }
 0x2a4   : > { %2346 = vst [vmem:[#allocation2 + $0x2c] sm:$0xff] %v6996_v25 }
 0x2a6   : > { %v2295_v10 = vpop.permute.xlu0 %2294 }
 0x2a7   : > { %v7001_v35 = vpop.permute.xlu1 %2458  ;;  %v2309_v44 = vrot.slane %v2295_v10, 4 }
 0x2a8   : > { %2960 = vrot.lane.b32.xlu2 %v2940_v48, %s5814_s24  ;;  %2796 = vrot.lane.b32.xlu1 %v2530_v28, %s5812_s22  ;;  %v2473_v6 = vrot.slane %v7001_v35, 4 }
 0x2a9   : > { %v2317_v1 = vsel %vm612_vm6, %v2308_v62, %v2309_v44  ;;  %v3027_v55 = vld [vmem:[#allocation2 + $0x6c] sm:$0xff] }
 0x2aa   : > { %v2318_v36 = vsel %vm610_vm4, %v2317_v1, %v2295_v10  ;;  %3052 = vrot.lane.b32.xlu0 %v3027_v55, %s5813_s23  ;;  %v2945_v50 = vld [vmem:[#allocation2 + $0x24] sm:$0xff] }
 0x2ab   : > { %2341 = vst [vmem:[#allocation2 + $0x8] sm:$0xff] %v2318_v36  ;;  %v2519_v43 = vld [vmem:[#allocation2 + $0x2c] sm:$0xff] }
 0x2ac   : > { %2526 = vst [vmem:[#allocation3 + $0x20] sm:$0xff] %v2945_v50 }
 0x2ad   : > { %2527 = vst [vmem:[#allocation3 + $0x28] sm:$0xff] %v2519_v43 }
 0x2ae   : > { %v2467_v5 = vpop.permute.xlu0 %2466 }
 0x2af   : > { %v2377_v39 = vpop.permute.xlu1 %2376  ;;  %v2477_v52 = vrot.slane %v2467_v5, 4 }
 0x2b0   : > { %v2387_v56 = vrot.slane %v2377_v39, 4  ;;  %2714 = vrot.lane.b32.xlu2 %v2940_v48, %s5817_s27  ;;  %3124 = vrot.lane.b32.xlu1 %v2858_v51, %s5816_s26 }
 0x2b1   : > { %v2488_v46 = vsel %vm612_vm6, %v2476_v12, %v2477_v52 }
 0x2b2   : > { %v2398_v20 = vsel %vm612_vm6, %v2386_v16, %v2387_v56  ;;  %v7013_v14 = vsel %vm610_vm4, %v2488_v46, %v2467_v5  ;;  %2806 = vrot.lane.b32.xlu0 %v3027_v55, %s5812_s22  ;;  %v2515_v2 = vld [vmem:[#allocation2 + $0x8] sm:$0xff]  ;;  %v2481_v16 = vsel %vm612_vm6, %v2472_v22, %v2473_v6 }
 0x2b3   : > { %v2399_v42 = vsel %vm610_vm4, %v2398_v20, %v2377_v39  ;;  %2523 = vst [vmem:[#allocation3 + $0x8] sm:$0xff] %v2515_v2 }
 0x2b5   : > { %v7017_v0 = vpop.permute.xlu2 %2460 }
 0x2b6   : > { %v2474_v19 = vrot.slane %v7017_v0, 4 }
 0x2b8   : > { %2632 = vrot.lane.b32.xlu2 %v2858_v51, %s5818_s28  ;;  %2560 = vrot.lane.b32.xlu1 %v3027_v55, %s5819_s29  ;;  %v2482_v51 = vsel %vm610_vm4, %v2481_v16, %v7001_v35 }
 0x2ba   : > { %3134 = vrot.lane.b32.xlu0 %v3109_v63, %s5816_s26 }
 0x2bd   : > { %v2379_v3 = vpop.permute.xlu2 %2378 }
 0x2be   : > { %v2388_v62 = vrot.slane %v2379_v3, 4 }
 0x2c0   : > { %2888 = vrot.lane.b32.xlu2 %v3109_v63, %s5815_s25  ;;  %2970 = vrot.lane.b32.xlu1 %v2945_v50, %s5814_s24  ;;  %v2400_v48 = vsel %vm612_vm6, %v2387_v56, %v2388_v62 }
 0x2c1   : > { %v7030_v4 = vsel %vm610_vm4, %v2400_v48, %v2379_v3  ;;  %v2483_v3 = vsel %vm612_vm6, %v2473_v6, %v2474_v19 }
 0x2c2   : > { %2552 = vrot.lane.b32.xlu0 %v2392_v27, %s5819_s29  ;;  %v2484_v48 = vsel %vm610_vm4, %v2483_v3, %v7017_v0 }
 0x2c8   : > { %3044 = vrot.lane.b32.xlu2 %v2392_v27, %s5813_s23  ;;  %2724 = vrot.lane.b32.xlu1 %v2945_v50, %s5817_s27 }
 0x2ca   : > { %2962 = vrot.lane.b32.xlu0 %v2318_v36, %s5814_s24 }
 0x2cb   : > { %v7036_v53 = vpop.permute.xlu1 %2370 }
 0x2cc   : > { %v2384_v21 = vrot.slane %v7036_v53, 4 }
 0x2cd   : > { %v2297_v12 = vpop.permute.xlu0 %2296 }
 0x2ce   : > { %v2310_v7 = vrot.slane %v2297_v12, 4 }
 0x2d0   : > { %2798 = vrot.lane.b32.xlu2 %v2392_v27, %s5812_s22  ;;  %2642 = vrot.lane.b32.xlu1 %v3109_v63, %s5818_s28  ;;  %v2319_v37 = vsel %vm612_vm6, %v2309_v44, %v2310_v7 }
 0x2d1   : > { %v7043_v11 = vsel %vm610_vm4, %v2319_v37, %v2297_v12  ;;  %v2463_v32 = vpop.permute.xlu2 %2462 }
 0x2d2   : > { %2716 = vrot.lane.b32.xlu0 %v2318_v36, %s5817_s27  ;;  %2524 = vst [vmem:[#allocation3 + $0x10] sm:$0xff] %v7043_v11  ;;  %v2475_v13 = vrot.slane %v2463_v32, 4 }
 0x2d4   : > { %v2485_v28 = vsel %vm612_vm6, %v2474_v19, %v2475_v13  ;;  %2508 = vst.msk [vmem:[#allocation2 + $0xb0] sm:$0xf] %vm363_vm0, %v2475_v13 }
 0x2d5   : > { %v7054_v38 = vsel %vm610_vm4, %v2485_v28, %v2463_v32  ;;  %v2469_v45 = vpop.permute.xlu0 %2468 }
 0x2d6   : > { %v2305_v54 = vpop.permute.xlu1 %2304  ;;  %v2478_v49 = vrot.slane %v2469_v45, 4 }
 0x2d7   : > { %v2314_v10 = vrot.slane %v2305_v54, 4 }
 0x2d8   : > { %3126 = vrot.lane.b32.xlu2 %v2482_v51, %s5816_s26  ;;  %2880 = vrot.lane.b32.xlu1 %v2482_v51, %s5815_s25  ;;  %v2490_v26 = vsel %vm612_vm6, %v2477_v52, %v2478_v49 }
 0x2d9   : > { %v2326_v22 = vsel %vm612_vm6, %v2313_v47, %v2314_v10  ;;  %v7065_v44 = vsel %vm610_vm4, %v2490_v26, %v2469_v45  ;;  %v2381_v1 = vpop.permute.xlu2 %2380  ;;  %v2393_v47 = vsel %vm612_vm6, %v2383_v23, %v2384_v21 }
 0x2da   : > { %2634 = vrot.lane.b32.xlu0 %v2482_v51, %s5818_s28  ;;  %v2327_v35 = vsel %vm610_vm4, %v2326_v22, %v2305_v54  ;;  %v2389_v55 = vrot.slane %v2381_v1, 4  ;;  %v2394_v5 = vsel %vm610_vm4, %v2393_v47, %v7036_v53 }
 0x2db   : > { %2347 = vst [vmem:[#allocation2 + $0x34] sm:$0xff] %v2327_v35 }
 0x2dc   : > { %2528 = vst [vmem:[#allocation3 + $0x30] sm:$0xff] %v2327_v35  ;;  %v2402_v36 = vsel %vm612_vm6, %v2388_v62, %v2389_v55 }
 0x2dd   : > { %v7071_v50 = vsel %vm610_vm4, %v2402_v36, %v2381_v1  ;;  %2423 = vst.msk [vmem:[#allocation2 + $0x8c] sm:$0xf] %vm363_vm0, %v2389_v55 }
 0x2e0   : > { %2562 = vrot.lane.b32.xlu2 %v2399_v42, %s5819_s29  ;;  %3054 = vrot.lane.b32.xlu1 %v2399_v42, %s5813_s23 }
 0x2e2   : > { %2890 = vrot.lane.b32.xlu0 %v7013_v14, %s5815_s25 }
 0x2e4   : > { %v3031_v47 = vld [vmem:[#allocation2 + $0x8c] sm:$0xf] }
 0x2e7   : > { %v7082_v43 = vpop.permute.xlu1 %2372 }
 0x2e8   : > { %2972 = vrot.lane.b32.xlu2 %v6996_v25, %s5814_s24  ;;  %2808 = vrot.lane.b32.xlu1 %v2399_v42, %s5812_s22  ;;  %v2385_v39 = vrot.slane %v7082_v43, 4 }
 0x2e9   : > { %v2299_v52 = vpop.permute.xlu0 %2298 }
 0x2ea   : > { %3046 = vrot.lane.b32.xlu0 %v2394_v5, %s5813_s23  ;;  %2418 = vst.msk [vmem:[#allocation2 + $0x68] sm:$0xf] %vm363_vm0, %v2385_v39  ;;  %v2311_v56 = vrot.slane %v2299_v52, 4  ;;  %v2395_v54 = vsel %vm612_vm6, %v2384_v21, %v2385_v39 }
 0x2eb   : > { %v2396_v22 = vsel %vm610_vm4, %v2395_v54, %v7082_v43  ;;  %v2862_v54 = vld [vmem:[#allocation2 + $0xb0] sm:$0xf] }
 0x2ec   : > { %v2321_v46 = vsel %vm612_vm6, %v2310_v7, %v2311_v56  ;;  %2344 = vst.msk [vmem:[#allocation2 + $0x20] sm:$0xf] %vm363_vm0, %v2311_v56 }
 0x2ed   : > { %v7095_v20 = vsel %vm610_vm4, %v2321_v46, %v2299_v52 }
 0x2ee   : > { %2525 = vst [vmem:[#allocation3 + $0x18] sm:$0xff] %v7095_v20 }
 0x2f0   : > { %2726 = vrot.lane.b32.xlu2 %v6996_v25, %s5817_s27  ;;  %3136 = vrot.lane.b32.xlu1 %v7013_v14, %s5816_s26 }
 0x2f1   : > { %v2471_v2 = vpop.permute.xlu0 %2470  ;;  %v3026_v13 = vld [vmem:[#allocation2 + $0x68] sm:$0xf] }
 0x2f2   : > { %2964 = vrot.lane.b32.xlu0 %v7043_v11, %s5814_s24  ;;  %v2307_v42 = vpop.permute.xlu1 %2306  ;;  %v2479_v63 = vrot.slane %v2471_v2, 4 }
 0x2f3   : > { %v2315_v23 = vrot.slane %v2307_v42, 4 }
 0x2f4   : > { %v2492_v8 = vsel %vm612_vm6, %v2478_v49, %v2479_v63  ;;  %2513 = vst.msk [vmem:[#allocation2 + $0xd4] sm:$0xf] %vm363_vm0, %v2479_v63 }
 0x2f5   : > { %v2328_v62 = vsel %vm612_vm6, %v2314_v10, %v2315_v23  ;;  %2349 = vst.msk [vmem:[#allocation2 + $0x44] sm:$0xf] %vm363_vm0, %v2315_v23  ;;  %v7110_v25 = vsel %vm610_vm4, %v2492_v8, %v2471_v2 }
 0x2f6   : > { %v7113_v27 = vsel %vm610_vm4, %v2328_v62, %v2307_v42 }
 0x2f7   : > { %2529 = vst [vmem:[#allocation3 + $0x38] sm:$0xff] %v7113_v27 }
 0x2f8   : > { %2554 = vrot.lane.b32.xlu1 %v2394_v5, %s5819_s29  ;;  %2644 = vrot.lane.b32.xlu2 %v7013_v14, %s5818_s28 }
 0x2fa   : > { %v7121_v12 = vpop.permute.xlu2 %2550  ;;  %2882 = vrot.lane.b32.xlu0 %v2484_v48, %s5815_s25 }
 0x2fb   : > { %v2570_v46 = vrot.slane %v7121_v12, 4 }
 0x2fc   : > { %v2949_v8 = vld [vmem:[#allocation2 + $0x44] sm:$0xf] }
 0x300   : > { %3128 = vrot.lane.b32.xlu1 %v2484_v48, %s5816_s26  ;;  %2800 = vrot.lane.b32.xlu2 %v2394_v5, %s5812_s22 }
 0x302   : > { %v7126_v7 = vpop.permute.xlu2 %2960  ;;  %2636 = vrot.lane.b32.xlu0 %v2484_v48, %s5818_s28 }
 0x308   : > { %3056 = vrot.lane.b32.xlu1 %v7030_v4, %s5813_s23  ;;  %2718 = vrot.lane.b32.xlu2 %v7043_v11, %s5817_s27  ;;  %v2944_v11 = vld [vmem:[#allocation2 + $0x20] sm:$0xf] }
 0x30a   : > { %v7133_v14 = vpop.permute.xlu2 %2714  ;;  %2810 = vrot.lane.b32.xlu0 %v7030_v4, %s5812_s22 }
 0x310   : > { %2974 = vrot.lane.b32.xlu1 %v2327_v35, %s5814_s24  ;;  %2564 = vrot.lane.b32.xlu2 %v7030_v4, %s5819_s29 }
 0x312   : > { %v3043_v0 = vpop.permute.xlu1 %3042  ;;  %v7140_v6 = vpop.permute.xlu2 %2632  ;;  %2728 = vrot.lane.b32.xlu0 %v2327_v35, %s5817_s27 }
 0x313   : > { %v3062_v45 = vrot.slane %v3043_v0, 4 }
 0x314   : > { %v7143_v37 = vpop.permute.xlu0 %2878 }
 0x318   : > { %3138 = vrot.lane.b32.xlu2 %v7065_v44, %s5816_s26  ;;  %2892 = vrot.lane.b32.xlu1 %v7065_v44, %s5815_s25 }
 0x31a   : > { %v2797_v32 = vpop.permute.xlu1 %2796  ;;  %v7149_v19 = vpop.permute.xlu2 %2888  ;;  %2968 = vrot.lane.b32.xlu0 %v2944_v11, %s5814_s24 }
 0x31b   : > { %v2816_v1 = vrot.slane %v2797_v32, 4 }
 0x31c   : > { %v7152_v4 = vpop.permute.xlu0 %3052 }
 0x320   : > { %3050 = vrot.lane.b32.xlu2 %v3026_v13, %s5813_s23  ;;  %2646 = vrot.lane.b32.xlu1 %v7065_v44, %s5818_s28  ;;  %v2980_v13 = vrot.slane %v7126_v7, 4 }
 0x322   : > { %v3125_v16 = vpop.permute.xlu1 %3124  ;;  %v7157_v28 = vpop.permute.xlu2 %3044  ;;  %2884 = vrot.lane.b32.xlu0 %v7054_v38, %s5815_s25 }
 0x323   : > { %v3063_v51 = vrot.slane %v7157_v28, 4  ;;  %v3144_v39 = vrot.slane %v3125_v16, 4 }
 0x324   : > { %v7165_v49 = vpop.permute.xlu0 %2806 }
 0x325   : > { %v3072_v10 = vsel %vm612_vm6, %v3062_v45, %v3063_v51 }
 0x326   : > { %v3073_v26 = vsel %vm1370_vm8, %v3043_v0, %v3072_v10 }
 0x327   : > { %3096 = vst [vmem:[#allocation3 + $0x1c0] sm:$0xff] %v3073_v26 }
 0x328   : > { %2802 = vrot.lane.b32.xlu2 %v2396_v22, %s5812_s22  ;;  %3048 = vrot.lane.b32.xlu1 %v2396_v22, %s5813_s23 }
 0x32a   : > { %v7175_v44 = vpop.permute.xlu2 %2798  ;;  %v2561_v53 = vpop.permute.xlu1 %2560  ;;  %2720 = vrot.lane.b32.xlu0 %v7095_v20, %s5817_s27 }
 0x32b   : > { %v2817_v35 = vrot.slane %v7175_v44, 4  ;;  %v2575_v0 = vrot.slane %v2561_v53, 4 }
 0x32c   : > { %v7180_v55 = vpop.permute.xlu0 %3134 }
 0x32d   : > { %v2826_v36 = vsel %vm612_vm6, %v2816_v1, %v2817_v35 }
 0x32e   : > { %v2827_v21 = vsel %vm1121_vm7, %v2797_v32, %v2826_v36 }
 0x32f   : > { %2850 = vst [vmem:[#allocation3 + $0x100] sm:$0xff] %v2827_v21  ;;  %v2734_v21 = vrot.slane %v7133_v14, 4 }
 0x330   : > { %2556 = vrot.lane.b32.xlu2 %v2396_v22, %s5819_s29  ;;  %2638 = vrot.lane.b32.xlu1 %v7054_v38, %s5818_s28 }
 0x332   : > { %v7189_v43 = vpop.permute.xlu2 %3126  ;;  %v2971_v5 = vpop.permute.xlu1 %2970  ;;  %3060 = vrot.lane.b32.xlu0 %v3031_v47, %s5813_s23 }
 0x333   : > { %v3145_v52 = vrot.slane %v7189_v43, 4 }
 0x334   : > { %v7193_v56 = vpop.permute.xlu0 %2552 }
 0x335   : > { %v3154_v2 = vsel %vm612_vm6, %v3144_v39, %v3145_v52  ;;  %v2571_v42 = vrot.slane %v7193_v56, 4 }
 0x336   : > { %v3155_v63 = vsel %vm1453_vm12, %v3125_v16, %v3154_v2  ;;  %v2867_v2 = vld [vmem:[#allocation2 + $0xd4] sm:$0xf] }
 0x337   : > { %3178 = vst [vmem:[#allocation3 + $0x200] sm:$0xff] %v3155_v63  ;;  %v2580_v23 = vsel %vm612_vm6, %v2570_v46, %v2571_v42 }
 0x338   : > { %v2581_v3 = vsel %vm872_vm15, %v7121_v12, %v2580_v23  ;;  %2978 = vrot.lane.b32.xlu1 %v2949_v8, %s5814_s24  ;;  %2966 = vrot.lane.b32.xlu2 %v7095_v20, %s5814_s24 }
 0x339   : > { %2604 = vst [vmem:[#allocation3 + $0x40] sm:$0xff] %v2581_v3 }
 0x33a   : > { %v7209_v62 = vpop.permute.xlu2 %2562  ;;  %v2725_v48 = vpop.permute.xlu1 %2724  ;;  %2812 = vrot.lane.b32.xlu0 %v7071_v50, %s5812_s22 }
 0x33b   : > { %v2576_v11 = vrot.slane %v7209_v62, 4  ;;  %v2739_v3 = vrot.slane %v2725_v48, 4 }
 0x33c   : > { %v7214_v32 = vpop.permute.xlu0 %2962 }
 0x33d   : > { %v2588_v12 = vsel %vm612_vm6, %v2575_v0, %v2576_v11  ;;  %v2981_v20 = vrot.slane %v7214_v32, 4 }
 0x33e   : > { %v2589_v16 = vsel %vm872_vm15, %v2561_v53, %v2588_v12  ;;  %v2985_v53 = vrot.slane %v2971_v5, 4  ;;  %v2652_v12 = vrot.slane %v7140_v6, 4 }
 0x33f   : > { %2608 = vst [vmem:[#allocation3 + $0x60] sm:$0xff] %v2589_v16  ;;  %v2990_v45 = vsel %vm612_vm6, %v2980_v13, %v2981_v20 }
 0x340   : > { %v2991_v10 = vsel %vm1287_vm11, %v7126_v7, %v2990_v45  ;;  %2886 = vrot.lane.b32.xlu1 %v2862_v54, %s5815_s25  ;;  %3058 = vrot.lane.b32.xlu2 %v7071_v50, %s5813_s23 }
 0x341   : > { %3014 = vst [vmem:[#allocation3 + $0x180] sm:$0xff] %v2991_v10 }
 0x342   : > { %v7230_v26 = vpop.permute.xlu2 %2972  ;;  %v2643_v22 = vpop.permute.xlu1 %2642  ;;  %2976 = vrot.lane.b32.xlu0 %v7113_v27, %s5814_s24 }
 0x343   : > { %v2986_v1 = vrot.slane %v7230_v26, 4 }
 0x344   : > { %v7235_v36 = vpop.permute.xlu0 %2716 }
 0x345   : > { %v2998_v7 = vsel %vm612_vm6, %v2985_v53, %v2986_v1  ;;  %v2735_v47 = vrot.slane %v7235_v36, 4 }
 0x346   : > { %v2999_v39 = vsel %vm1287_vm11, %v2971_v5, %v2998_v7  ;;  %v2898_v5 = vrot.slane %v7143_v37, 4 }
 0x347   : > { %3018 = vst [vmem:[#allocation3 + $0x1a0] sm:$0xff] %v2999_v39  ;;  %v2744_v46 = vsel %vm612_vm6, %v2734_v21, %v2735_v47  ;;  %v3067_v39 = vrot.slane %v7152_v4, 4 }
 0x348   : > { %v2745_v63 = vsel %vm1038_vm10, %v7133_v14, %v2744_v46  ;;  %2896 = vrot.lane.b32.xlu2 %v2867_v2, %s5815_s25  ;;  %2894 = vrot.lane.b32.xlu1 %v7110_v25, %s5815_s25  ;;  %v2657_v46 = vrot.slane %v2643_v22, 4 }
 0x349   : > { %2768 = vst [vmem:[#allocation3 + $0xc0] sm:$0xff] %v2745_v63 }
 0x34a   : > { %v7251_v23 = vpop.permute.xlu2 %2726  ;;  %v7253_v8 = vpop.permute.xlu1 %2880  ;;  %2566 = vrot.lane.b32.xlu0 %v7071_v50, %s5819_s29 }
 0x34b   : > { %v8147_v0 = vrot.slane %v7251_v23, 4  ;;  %v2899_v14 = vrot.slane %v7253_v8, 4 }
 0x34c   : > { %v7260_v13 = vpop.permute.xlu0 %2634 }
 0x34d   : > { %v2752_v16 = vsel %vm612_vm6, %v2739_v3, %v8147_v0  ;;  %v2908_v45 = vsel %vm612_vm6, %v2898_v5, %v2899_v14  ;;  %v2653_v50 = vrot.slane %v7260_v13, 4 }
 0x34e   : > { %v2753_v54 = vsel %vm1038_vm10, %v2725_v48, %v2752_v16  ;;  %v2909_v10 = vsel %vm1204_vm9, %v7143_v37, %v2908_v45  ;;  %v2780_v48 = vld [vmem:[#allocation2 + $0x68] sm:$0xf] }
 0x34f   : > { %2772 = vst [vmem:[#allocation3 + $0xe0] sm:$0xff] %v2753_v54  ;;  %v2662_v53 = vsel %vm612_vm6, %v2652_v12, %v2653_v50  ;;  %v2785_v54 = vld [vmem:[#allocation2 + $0x8c] sm:$0xf] }
 0x350   : > { %2932 = vst [vmem:[#allocation3 + $0x140] sm:$0xff] %v2909_v10  ;;  %v2663_v21 = vsel %vm955_vm14, %v7140_v6, %v2662_v53  ;;  %3130 = vrot.lane.b32.xlu2 %v7054_v38, %s5816_s26  ;;  %2730 = vrot.lane.b32.xlu1 %v7113_v27, %s5817_s27  ;;  %v2903_v38 = vrot.slane %v7149_v19, 4  ;;  %v5683_v0 = vld [vmem:[#allocation3 + $0xc4] sm:$0xf] }
 0x351   : > { %2686 = vst [vmem:[#allocation3 + $0x80] sm:$0xff] %v2663_v21 }
 0x352   : > { %v7282_v7 = vpop.permute.xlu1 %3054  ;;  %v7284_v37 = vpop.permute.xlu2 %2644  ;;  %2804 = vrot.lane.b32.xlu0 %v2780_v48, %s5812_s22 }
 0x353   : > { %v3068_v2 = vrot.slane %v7282_v7, 4  ;;  %v8140_v6 = vrot.slane %v7284_v37, 4 }
 0x354   : > { %v7290_v63 = vpop.permute.xlu0 %2890 }
 0x355   : > { %v3080_v27 = vsel %vm612_vm6, %v3067_v39, %v3068_v2  ;;  %v2670_v5 = vsel %vm612_vm6, %v2657_v46, %v8140_v6  ;;  %v8144_v3 = vrot.slane %v7290_v63, 4 }
 0x356   : > { %v3081_v12 = vsel %vm1370_vm8, %v7152_v4, %v3080_v27  ;;  %v2671_v16 = vsel %vm955_vm14, %v2643_v22, %v2670_v5  ;;  %v2821_v22 = vrot.slane %v7165_v49, 4 }
 0x357   : > { %3100 = vst [vmem:[#allocation3 + $0x1e0] sm:$0xff] %v3081_v12  ;;  %v2916_v45 = vsel %vm612_vm6, %v2903_v38, %v8144_v3  ;;  %v5376_v38 = vld [vmem:[#allocation3 + $0x1c0] sm:$0xf] }
 0x358   : > { %2690 = vst [vmem:[#allocation3 + $0xa0] sm:$0xff] %v2671_v16  ;;  %v2917_v10 = vsel %vm1204_vm9, %v7149_v19, %v2916_v45  ;;  %2814 = vrot.lane.b32.xlu1 %v2785_v54, %s5812_s22  ;;  %2648 = vrot.lane.b32.xlu2 %v7110_v25, %s5818_s28  ;;  %v5715_v16 = vld [vmem:[#allocation3 + $0x1c4] sm:$0xf] }
 0x359   : > { %2936 = vst [vmem:[#allocation3 + $0x160] sm:$0xff] %v2917_v10  ;;  %v2703_v10 = vld [vmem:[#allocation2 + $0x44] sm:$0xf] }
 0x35a   : > { %v7311_v53 = vpop.permute.xlu1 %2808  ;;  %v7313_v4 = vpop.permute.xlu2 %2800  ;;  %3140 = vrot.lane.b32.xlu0 %v7110_v25, %s5816_s26 }
 0x35b   : > { %v2822_v21 = vrot.slane %v7311_v53, 4  ;;  %v8148_v48 = vrot.slane %v7313_v4, 4 }
 0x35c   : > { %v7320_v19 = vpop.permute.xlu0 %3046 }
 0x35d   : > { %v2834_v39 = vsel %vm612_vm6, %v2821_v22, %v2822_v21  ;;  %v2828_v46 = vsel %vm612_vm6, %v2817_v35, %v8148_v48  ;;  %v8142_v25 = vrot.slane %v7320_v19, 4  ;;  %v2698_v35 = vld [vmem:[#allocation2 + $0x20] sm:$0xf] }
 0x35e   : > { %v2835_v27 = vsel %vm1121_vm7, %v7165_v49, %v2834_v39  ;;  %v2829_v5 = vsel %vm1121_vm7, %v7175_v44, %v2828_v46  ;;  %v5719_v12 = vld [vmem:[#allocation3 + $0x1dc] sm:$0xf0]  ;;  %v5378_v45 = vld [vmem:[#allocation3 + $0x1e0] sm:$0xf0]  ;;  %v2616_v46 = vld [vmem:[#allocation2 + $0xb0] sm:$0xf] }
 0x35f   : > { %2854 = vst [vmem:[#allocation3 + $0x120] sm:$0xff] %v2835_v27  ;;  %v3074_v54 = vsel %vm612_vm6, %v3063_v51, %v8142_v25  ;;  %v5377_v22 = vor.u32 %v5719_v12, %v5376_v38  ;;  %v5381_v6 = vor.u32 %v5715_v16, %v5378_v45  ;;  %v5711_v44 = vld [vmem:[#allocation3 + $0x19c] sm:$0xf0]  ;;  %v5346_v39 = vld [vmem:[#allocation3 + $0x1a0] sm:$0xf0]  ;;  %v3149_v51 = vrot.slane %v7180_v55, 4 }
 0x360   : > { %2851 = vst [vmem:[#allocation3 + $0x108] sm:$0xff] %v2829_v5  ;;  %v3075_v49 = vsel %vm1370_vm8, %v7157_v28, %v3074_v54  ;;  %2722 = vrot.lane.b32.xlu1 %v2698_v35, %s5817_s27  ;;  %2732 = vrot.lane.b32.xlu2 %v2703_v10, %s5817_s27  ;;  %v5344_v5 = vld [vmem:[#allocation3 + $0x180] sm:$0xf]  ;;  %v5707_v28 = vld [vmem:[#allocation3 + $0x184] sm:$0xf] }
 0x361   : > { %3097 = vst [vmem:[#allocation3 + $0x1c8] sm:$0xff] %v3075_v49  ;;  %3628 = vmatpush.bf16.msra.mxu2 %v5377_v22  ;;  %3654 = vmatpush.bf16.msra.mxu0 %v5381_v6  ;;  %v5345_v45 = vor.u32 %v5711_v44, %v5344_v5  ;;  %v5349_v54 = vor.u32 %v5707_v28, %v5346_v39  ;;  %v5703_v6 = vld [vmem:[#allocation3 + $0x15c] sm:$0xf0]  ;;  %v5314_v10 = vld [vmem:[#allocation3 + $0x160] sm:$0xf0] }
 0x362   : > { %v7345_v27 = vpop.permute.xlu1 %3136  ;;  %v7347_v38 = vpop.permute.xlu2 %2718  ;;  %2640 = vrot.lane.b32.xlu0 %v2616_v46, %s5818_s28  ;;  %v5312_v5 = vld [vmem:[#allocation3 + $0x140] sm:$0xf]  ;;  %v5699_v28 = vld [vmem:[#allocation3 + $0x144] sm:$0xf] }
 0x363   : > { %v3150_v12 = vrot.slane %v7345_v27, 4  ;;  %v8141_v16 = vrot.slane %v7347_v38, 4  ;;  %v5313_v25 = vor.u32 %v5703_v6, %v5312_v5 }
 0x364   : > { %v7352_v35 = vpop.permute.xlu0 %2964 }
 0x365   : > { %v3162_v22 = vsel %vm612_vm6, %v3149_v51, %v3150_v12  ;;  %v2746_v49 = vsel %vm612_vm6, %v2735_v47, %v8141_v16  ;;  %v8143_v46 = vrot.slane %v7352_v35, 4  ;;  %3629 = vmatpush.bf16.msra.mxu2 %v5345_v45  ;;  %3655 = vmatpush.bf16.msra.mxu0 %v5349_v54  ;;  %v2621_v47 = vld [vmem:[#allocation2 + $0xd4] sm:$0xf]  ;;  %v2534_v16 = vld [vmem:[#allocation2 + $0x68] sm:$0xf]  ;;  %v5317_v45 = vor.u32 %v5699_v28, %v5314_v10 }
 0x366   : > { %v3163_v44 = vsel %vm1453_vm12, %v7180_v55, %v3162_v22  ;;  %v2747_v39 = vsel %vm1038_vm10, %v7235_v36, %v2746_v49  ;;  %v5695_v36 = vld [vmem:[#allocation3 + $0x11c] sm:$0xf0]  ;;  %v5282_v54 = vld [vmem:[#allocation3 + $0x120] sm:$0xf0]  ;;  %v2539_v22 = vld [vmem:[#allocation2 + $0x8c] sm:$0xf] }
 0x367   : > { %3182 = vst [vmem:[#allocation3 + $0x220] sm:$0xff] %v3163_v44  ;;  %v2992_v51 = vsel %vm612_vm6, %v2981_v20, %v8143_v46  ;;  %v7379_v20 = vld [vmem:[%s8124_s4] sm:$0xff]  ;;  %v5691_v49 = vld [vmem:[#allocation3 + $0x104] sm:$0xf]  ;;  %v5687_v28 = vld [vmem:[#allocation3 + $0xdc] sm:$0xf0] }
 0x368   : > { %2769 = vst [vmem:[#allocation3 + $0xc8] sm:$0xff] %v2747_v39  ;;  %v2993_v55 = vsel %vm1287_vm11, %v7214_v32, %v2992_v51  ;;  %2650 = vrot.lane.b32.xlu1 %v2621_v47, %s5818_s28  ;;  %2558 = vrot.lane.b32.xlu2 %v2534_v16, %s5819_s29  ;;  %v5280_v32 = vld [vmem:[#allocation3 + $0x100] sm:$0xf]  ;;  %v5285_v39 = vor.u32 %v5691_v49, %v5282_v54  ;;  %v3261_v47 = vunpack.c.h.b16 %v7379_v20  ;;  %v3108_v54 = vld [vmem:[#allocation2 + $0xb0] sm:$0xf] }
 0x369   : > { %3015 = vst [vmem:[#allocation3 + $0x188] sm:$0xff] %v2993_v55  ;;  %3630 = vmatpush.bf16.msra.mxu2 %v5313_v25  ;;  %3656 = vmatpush.bf16.msra.mxu0 %v5317_v45  ;;  %v5281_v25 = vor.u32 %v5695_v36, %v5280_v32  ;;  %v5408_v51 = vld [vmem:[#allocation3 + $0x200] sm:$0xf]  ;;  %v5723_v32 = vld [vmem:[#allocation3 + $0x204] sm:$0xf] }
 0x36a   : > { %v7381_v6 = vpop.permute.xlu1 %2554  ;;  %v7383_v10 = vpop.permute.xlu2 %2564  ;;  %2568 = vrot.lane.b32.xlu0 %v2539_v22, %s5819_s29  ;;  %v5250_v22 = vld [vmem:[#allocation3 + $0xe0] sm:$0xf0] }
 0x36b   : > { %v8145_v16 = vrot.slane %v7381_v6, 4  ;;  %v8146_v44 = vrot.slane %v7383_v10, 4 }
 0x36c   : > { %v7388_v5 = vpop.permute.xlu0 %2882 }
 0x36d   : > { %v2582_v45 = vsel %vm612_vm6, %v2571_v42, %v8145_v16  ;;  %v2590_v55 = vsel %vm612_vm6, %v2576_v11, %v8146_v44  ;;  %v2900_v36 = vrot.slane %v7388_v5, 4  ;;  %3631 = vmatpush.bf16.msra.mxu2 %v5281_v25  ;;  %3657 = vmatpush.bf16.msra.mxu0 %v5285_v39  ;;  %v5248_v42 = vld [vmem:[#allocation3 + $0xc0] sm:$0xf]  ;;  %v3113_v25 = vld [vmem:[#allocation2 + $0xd4] sm:$0xf] }
 0x36e   : > { %v2583_v49 = vsel %vm872_vm15, %v7193_v56, %v2582_v45  ;;  %v2591_v46 = vsel %vm872_vm15, %v7209_v62, %v2590_v55  ;;  %v5727_v3 = vld [vmem:[#allocation3 + $0x21c] sm:$0xf0]  ;;  %v5410_v16 = vld [vmem:[#allocation3 + $0x220] sm:$0xf0]  ;;  %v5249_v39 = vor.u32 %v5687_v28, %v5248_v42  ;;  %v5253_v62 = vor.u32 %v5683_v0, %v5250_v22  ;;  %v3836_v45 = vld [vmem:[%s8125_s5] sm:$0xff] }
 0x36f   : > { %2605 = vst [vmem:[#allocation3 + $0x48] sm:$0xff] %v2583_v49  ;;  %v2910_v11 = vsel %vm612_vm6, %v2899_v14, %v2900_v36  ;;  %v5409_v44 = vor.u32 %v5727_v3, %v5408_v51  ;;  %v5413_v48 = vor.u32 %v5723_v32, %v5410_v16  ;;  %v5679_v55 = vld [vmem:[#allocation3 + $0x9c] sm:$0xf0]  ;;  %v7418_v14 = vpack.c.b16 %v3261_v47, %v3261_v47  ;;  %v5218_v3 = vld [vmem:[#allocation3 + $0xa0] sm:$0xf0]  ;;  %v3850_v42 = vld [vmem:[%s8126_s6] sm:$0xff] }
 0x370   : > { %2609 = vst [vmem:[#allocation3 + $0x68] sm:$0xff] %v2591_v46  ;;  %v2911_v56 = vsel %vm1204_vm9, %v7253_v8, %v2910_v11  ;;  %3132 = vrot.lane.b32.xlu1 %v3108_v54, %s5816_s26  ;;  %3142 = vrot.lane.b32.xlu2 %v3113_v25, %s5816_s26  ;;  %v5216_v16 = vld [vmem:[#allocation3 + $0x80] sm:$0xf]  ;;  %v5675_v54 = vld [vmem:[#allocation3 + $0x84] sm:$0xf] }
 0x371   : > { %2933 = vst [vmem:[#allocation3 + $0x148] sm:$0xff] %v2911_v56  ;;  %3632 = vmatpush.bf16.msra.mxu2 %v5249_v39  ;;  %3648 = vmatpush.bf16.msra.mxu3 %v5409_v44  ;;  %v5217_v51 = vor.u32 %v5679_v55, %v5216_v16  ;;  %v5221_v22 = vor.u32 %v5675_v54, %v5218_v3  ;;  %v5671_v32 = vld [vmem:[#allocation3 + $0x5c] sm:$0xf0]  ;;  %v5186_v11 = vld [vmem:[#allocation3 + $0x60] sm:$0xf0] }
 0x372   : > { %3658 = vmatpush.bf16.msra.mxu0 %v5253_v62  ;;  %3674 = vmatpush.bf16.msra.mxu1 %v5413_v48  ;;  %v7420_v46 = vpop.permute.xlu1 %3128  ;;  %v7422_v8 = vpop.permute.xlu2 %3138  ;;  %v5184_v39 = vld [vmem:[#allocation3 + $0x40] sm:$0xf]  ;;  %v5667_v62 = vld [vmem:[#allocation3 + $0x44] sm:$0xf] }
 0x373   : > { %v3146_v0 = vrot.slane %v7420_v46, 4  ;;  %v8149_v28 = vrot.slane %v7422_v8, 4  ;;  %3839 = vperm.xlu0 %5783, %v3836_v45   ;;  %v5185_v56 = vor.u32 %v5671_v32, %v5184_v39  ;;  %v5663_v55 = vld [vmem:[#allocation3 + $0x1c] sm:$0xf0]  ;;  %v5154_v3 = vld [vmem:[#allocation3 + $0x20] sm:$0xf0] }
 0x374   : > { %v7426_v47 = vpop.permute.xlu0 %2636  ;;  %5438 = vmatmul.msk.bf16.vlgmr.msra.gmra.mxu3 %vm8164_vm1, %v7418_v14  ;;  %v5659_v32 = vld [vmem:[#allocation3 + $0x4] sm:$0xf] }
 0x375   : > { %v3156_v48 = vsel %vm612_vm6, %v3145_v52, %v3146_v0  ;;  %v3164_v44 = vsel %vm612_vm6, %v3150_v12, %v8149_v28  ;;  %v2654_v49 = vrot.slane %v7426_v47, 4  ;;  %3633 = vmatpush.bf16.msra.mxu2 %v5217_v51  ;;  %5439 = vmatmul.msk.bf16.vlgmr.msra.gmra.mxu1 %vm8165_vm2, %v7418_v14  ;;  %vm8182_vm2 = vmmov %vm8164_vm1 }
 0x376   : > { %v3157_v52 = vsel %vm1453_vm12, %v7189_v43, %v3156_v48  ;;  %v3165_v25 = vsel %vm1453_vm12, %v7345_v27, %v3164_v44  ;;  %3659 = vmatpush.bf16.msra.mxu0 %v5221_v22  ;;  %v5189_v43 = vor.u32 %v5667_v62, %v5186_v11  ;;  %v3260_v27 = vunpack.c.l.b16 %v7379_v20 }
 0x377   : > { %3179 = vst [vmem:[#allocation3 + $0x208] sm:$0xff] %v3157_v52  ;;  %v2664_v12 = vsel %vm612_vm6, %v2653_v50, %v2654_v49  ;;  %v5152_v50 = vld [vmem:[#allocation3] sm:$0xf] }
 0x378   : > { %3183 = vst [vmem:[#allocation3 + $0x228] sm:$0xff] %v3165_v25  ;;  %v2665_v45 = vsel %vm955_vm14, %v7260_v13, %v2664_v12  ;;  %3853 = vperm.xlu1 %5784, %v3850_v42   ;;  %v5153_v22 = vor.u32 %v5663_v55, %v5152_v50  ;;  %v5157_v13 = vor.u32 %v5659_v32, %v5154_v3  ;;  %v8166_v3 = vrot.slane %v7313_v4, 4  ;;  %v5384_v32 = vld [vmem:[#allocation3 + $0x1c8] sm:$0xf] }
 0x379   : > { %2687 = vst [vmem:[#allocation3 + $0x88] sm:$0xff] %v2665_v45  ;;  %3634 = vmatpush.bf16.msra.mxu2 %v5185_v56  ;;  %v7465_v44 = vpack.c.b16 %v3260_v27, %v3260_v27 }
 0x37a   : > { %3660 = vmatpush.bf16.msra.mxu0 %v5189_v43  ;;  %v7458_v16 = vpop.permute.xlu1 %3056  ;;  %v7460_v51 = vpop.permute.xlu2 %3050 }
 0x37b   : > { %v3069_v54 = vrot.slane %v7458_v16, 4  ;;  %v3066_v28 = vrot.slane %v7460_v51, 4 }
 0x37c   : > { %v7463_v48 = vpop.permute.xlu0 %2810 }
 0x37d   : > { %v3082_v20 = vsel %vm612_vm6, %v3068_v2, %v3069_v54  ;;  %v2823_v42 = vrot.slane %v7463_v48, 4  ;;  %3635 = vmatpush.bf16.msra.mxu2 %v5153_v22 }
 0x37e   : > { %v3083_v11 = vsel %vm1370_vm8, %v7282_v7, %v3082_v20  ;;  %3661 = vmatpush.bf16.msra.mxu0 %v5157_v13  ;;  %v5416_v52 = vld [vmem:[#allocation3 + $0x208] sm:$0xf]  ;;  %v5724_v25 = vld [vmem:[#allocation3 + $0x20c] sm:$0xf] }
 0x37f   : > { %3101 = vst [vmem:[#allocation3 + $0x1e8] sm:$0xff] %v3083_v11  ;;  %v2836_v39 = vsel %vm612_vm6, %v2822_v21, %v2823_v42  ;;  %v5728_v12 = vld [vmem:[#allocation3 + $0x224] sm:$0xf0]  ;;  %v5418_v56 = vld [vmem:[#allocation3 + $0x228] sm:$0xf0] }
 0x380   : > { %v2837_v2 = vsel %vm1121_vm7, %v7311_v53, %v2836_v39  ;;  %3636 = vmatmul.bf16.vlgmr.msra.gmra.mxu2 %v7465_v44  ;;  %v5417_v62 = vor.u32 %v5728_v12, %v5416_v52  ;;  %v5421_v45 = vor.u32 %v5724_v25, %v5418_v56  ;;  %v5716_v52 = vld [vmem:[#allocation3 + $0x1cc] sm:$0xf] }
 0x381   : > { %2855 = vst [vmem:[#allocation3 + $0x128] sm:$0xff] %v2837_v2  ;;  %3662 = vmatmul.bf16.vlgmr.msra.gmra.mxu0 %v7465_v44 }
 0x382   : > { %3700 = vmatpush.bf16.msrb.mxu2 %v5417_v62  ;;  %3726 = vmatpush.bf16.msrb.mxu0 %v5421_v45  ;;  %v7484_v7 = vpop.permute.xlu1 %2974  ;;  %v7486_v43 = vpop.permute.xlu2 %2802 }
 0x383   : > { %v2987_v21 = vrot.slane %v7484_v7, 4  ;;  %v8150_v55 = vrot.slane %v7486_v43, 4 }
 0x384   : > { %v7490_v27 = vpop.permute.xlu0 %2728 }
 0x385   : > { %v3000_v53 = vsel %vm612_vm6, %v2986_v1, %v2987_v21  ;;  %v2830_v50 = vsel %vm612_vm6, %v8166_v3, %v8150_v55  ;;  %v8152_v22 = vrot.slane %v7490_v27, 4  ;;  %v8167_v1 = vrot.slane %v7251_v23, 4 }
 0x386   : > { %v3001_v13 = vsel %vm1287_vm11, %v7230_v26, %v3000_v53  ;;  %v2831_v20 = vsel %vm1121_vm7, %v7313_v4, %v2830_v50  ;;  %v5720_v11 = vld [vmem:[#allocation3 + $0x1e4] sm:$0xf0]  ;;  %v5386_v25 = vld [vmem:[#allocation3 + $0x1e8] sm:$0xf0]  ;;  %v8168_v3 = vrot.slane %v7381_v6, 4 }
 0x387   : > { %3019 = vst [vmem:[#allocation3 + $0x1a8] sm:$0xff] %v3001_v13  ;;  %v2754_v39 = vsel %vm612_vm6, %v8167_v1, %v8152_v22  ;;  %v5385_v12 = vor.u32 %v5720_v11, %v5384_v32  ;;  %v5389_v56 = vor.u32 %v5716_v52, %v5386_v25  ;;  %v5352_v13 = vld [vmem:[#allocation3 + $0x188] sm:$0xf]  ;;  %v5708_v25 = vld [vmem:[#allocation3 + $0x18c] sm:$0xf] }
 0x388   : > { %2852 = vst [vmem:[#allocation3 + $0x110] sm:$0xff] %v2831_v20  ;;  %v2755_v2 = vsel %vm1038_vm10, %v7251_v23, %v2754_v39  ;;  %v8169_v23 = vrot.slane %v7290_v63, 4 }
 0x389   : > { %2773 = vst [vmem:[#allocation3 + $0xe8] sm:$0xff] %v2755_v2  ;;  %3680 = vmatpush.bf16.msrb.mxu3 %v5385_v12  ;;  %3706 = vmatpush.bf16.msrb.mxu1 %v5389_v56 }
 0x38a   : > { %v7514_v26 = vpop.permute.xlu2 %2556  ;;  %v7516_v4 = vpop.permute.xlu1 %2892 }
 0x38b   : > { %v8151_v62 = vrot.slane %v7514_v26, 4  ;;  %v2905_v45 = vrot.slane %v7516_v4, 4 }
 0x38c   : > { %v2969_v53 = vpop.permute.xlu0 %2968 }
 0x38d   : > { %v2584_v50 = vsel %vm612_vm6, %v8168_v3, %v8151_v62  ;;  %v2918_v32 = vsel %vm612_vm6, %v8169_v23, %v2905_v45  ;;  %v8172_v23 = vrot.slane %v7284_v37, 4  ;;  %v5692_v62 = vld [vmem:[#allocation3 + $0x10c] sm:$0xf] }
 0x38e   : > { %v2585_v20 = vsel %vm872_vm15, %v7381_v6, %v2584_v50  ;;  %v2919_v11 = vsel %vm1204_vm9, %v7290_v63, %v2918_v32  ;;  %v5712_v52 = vld [vmem:[#allocation3 + $0x1a4] sm:$0xf0]  ;;  %v5354_v1 = vld [vmem:[#allocation3 + $0x1a8] sm:$0xf0]  ;;  %v2984_v6 = vrot.slane %v2969_v53, 4 }
 0x38f   : > { %2606 = vst [vmem:[#allocation3 + $0x50] sm:$0xff] %v2585_v20  ;;  %v5353_v39 = vor.u32 %v5712_v52, %v5352_v13  ;;  %v5357_v12 = vor.u32 %v5708_v25, %v5354_v1  ;;  %v8173_v13 = vrot.slane %v7352_v35, 4 }
 0x390   : > { %2937 = vst [vmem:[#allocation3 + $0x168] sm:$0xff] %v2919_v11  ;;  %5440 = vmatmul.msk.bf16.vlgmr.msrb.gmra.mxu2 %vm8170_vm13, %v7418_v14  ;;  %v5688_v51 = vld [vmem:[#allocation3 + $0xe4] sm:$0xf0]  ;;  %vm8183_vm13 = vmmov %vm8164_vm1 }
 0x391   : > { %3681 = vmatpush.bf16.msrb.mxu3 %v5353_v39  ;;  %3707 = vmatpush.bf16.msrb.mxu1 %v5357_v12  ;;  %v5320_v39 = vld [vmem:[#allocation3 + $0x148] sm:$0xf]  ;;  %v5700_v12 = vld [vmem:[#allocation3 + $0x14c] sm:$0xf] }
 0x392   : > { %v7536_v56 = vpop.permute.xlu1 %2646  ;;  %v2967_v2 = vpop.permute.xlu2 %2966  ;;  %5441 = vmatmul.msk.bf16.vlgmr.msrb.gmra.mxu0 %vm8171_vm3, %v7418_v14  ;;  %vm8184_vm3 = vmmov %vm8164_vm1 }
 0x393   : > { %v2659_v63 = vrot.slane %v7536_v56, 4  ;;  %v2983_v3 = vrot.slane %v2967_v2, 4 }
 0x394   : > { %v7541_v50 = vpop.permute.xlu0 %2884 }
 0x395   : > { %v2672_v32 = vsel %vm612_vm6, %v8172_v23, %v2659_v63  ;;  %v2994_v20 = vsel %vm612_vm6, %v8173_v13, %v2983_v3  ;;  %v2996_v11 = vsel %vm612_vm6, %v2983_v3, %v2984_v6  ;;  %v2901_v52 = vrot.slane %v7541_v50, 4 }
 0x396   : > { %v2673_v53 = vsel %vm955_vm14, %v7284_v37, %v2672_v32  ;;  %v2995_v25 = vsel %vm1287_vm11, %v7352_v35, %v2994_v20  ;;  %v2997_v1 = vsel %vm1287_vm11, %v2967_v2, %v2996_v11  ;;  %v5696_v35 = vld [vmem:[#allocation3 + $0x124] sm:$0xf0]  ;;  %v5290_v2 = vld [vmem:[#allocation3 + $0x128] sm:$0xf0] }
 0x397   : > { %2691 = vst [vmem:[#allocation3 + $0xa8] sm:$0xff] %v2673_v53  ;;  %v2912_v23 = vsel %vm612_vm6, %v2900_v36, %v2901_v52  ;;  %v5704_v6 = vld [vmem:[#allocation3 + $0x164] sm:$0xf0]  ;;  %v5322_v3 = vld [vmem:[#allocation3 + $0x168] sm:$0xf0] }
 0x398   : > { %3016 = vst [vmem:[#allocation3 + $0x190] sm:$0xff] %v2995_v25  ;;  %v2913_v37 = vsel %vm1204_vm9, %v7388_v5, %v2912_v23  ;;  %v5321_v32 = vor.u32 %v5704_v6, %v5320_v39  ;;  %v5325_v13 = vor.u32 %v5700_v12, %v5322_v3  ;;  %v5288_v53 = vld [vmem:[#allocation3 + $0x108] sm:$0xf]  ;;  %v5293_v5 = vor.u32 %v5692_v62, %v5290_v2  ;;  %v5258_v3 = vld [vmem:[#allocation3 + $0xe8] sm:$0xf0] }
 0x399   : > { %3017 = vst [vmem:[#allocation3 + $0x198] sm:$0xff] %v2997_v1  ;;  %v5289_v22 = vor.u32 %v5696_v35, %v5288_v53  ;;  %v8174_v39 = vrot.slane %v7320_v19, 4  ;;  %v5684_v35 = vld [vmem:[#allocation3 + $0xcc] sm:$0xf] }
 0x39a   : > { %2934 = vst [vmem:[#allocation3 + $0x150] sm:$0xff] %v2913_v37  ;;  %3682 = vmatpush.bf16.msrb.mxu3 %v5321_v32  ;;  %3708 = vmatpush.bf16.msrb.mxu1 %v5325_v13  ;;  %v3049_v20 = vpop.permute.xlu1 %3048  ;;  %v3059_v11 = vpop.permute.xlu2 %3058  ;;  %v5256_v13 = vld [vmem:[#allocation3 + $0xc8] sm:$0xf] }
 0x39b   : > { %v3065_v36 = vrot.slane %v3049_v20, 4  ;;  %v3070_v55 = vrot.slane %v3059_v11, 4  ;;  %v5257_v2 = vor.u32 %v5688_v51, %v5256_v13  ;;  %v5668_v51 = vld [vmem:[#allocation3 + $0x4c] sm:$0xf] }
 0x39c   : > { %v7566_v25 = vpop.permute.xlu0 %2720 }
 0x39d   : > { %v3076_v1 = vsel %vm612_vm6, %v8174_v39, %v3065_v36  ;;  %v3078_v12 = vsel %vm612_vm6, %v3065_v36, %v3066_v28  ;;  %v3084_v23 = vsel %vm612_vm6, %v3069_v54, %v3070_v55  ;;  %v2737_v6 = vrot.slane %v7566_v25, 4  ;;  %v5224_v39 = vld [vmem:[#allocation3 + $0x88] sm:$0xf] }
 0x39e   : > { %v3077_v37 = vsel %vm1370_vm8, %v7320_v19, %v3076_v1  ;;  %v3079_v32 = vsel %vm1370_vm8, %v3049_v20, %v3078_v12  ;;  %v3085_v62 = vsel %vm1370_vm8, %v7458_v16, %v3084_v23  ;;  %3683 = vmatpush.bf16.msrb.mxu3 %v5289_v22  ;;  %3709 = vmatpush.bf16.msrb.mxu1 %v5293_v5  ;;  %v8175_v28 = vrot.slane %v7347_v38, 4  ;;  %v5680_v53 = vld [vmem:[#allocation3 + $0xa4] sm:$0xf0]  ;;  %v5226_v16 = vld [vmem:[#allocation3 + $0xa8] sm:$0xf0] }
 0x39f   : > { %3098 = vst [vmem:[#allocation3 + $0x1d0] sm:$0xff] %v3077_v37  ;;  %v5261_v20 = vor.u32 %v5684_v35, %v5258_v3  ;;  %v5676_v1 = vld [vmem:[#allocation3 + $0x8c] sm:$0xf]  ;;  %v5225_v23 = vor.u32 %v5680_v53, %v5224_v39 }
 0x3a0   : > { %v2748_v54 = vsel %vm612_vm6, %v8175_v28, %v2737_v6  ;;  %3099 = vst [vmem:[#allocation3 + $0x1d8] sm:$0xff] %v3079_v32  ;;  %v5229_v37 = vor.u32 %v5676_v1, %v5226_v16  ;;  %v5194_v28 = vld [vmem:[#allocation3 + $0x68] sm:$0xf0] }
 0x3a1   : > { %v2749_v19 = vsel %vm1038_vm10, %v7347_v38, %v2748_v54  ;;  %3102 = vst [vmem:[#allocation3 + $0x1f0] sm:$0xff] %v3085_v62  ;;  %v5192_v38 = vld [vmem:[#allocation3 + $0x48] sm:$0xf]  ;;  %v5197_v53 = vor.u32 %v5668_v51, %v5194_v28 }
 0x3a2   : > { %2770 = vst [vmem:[#allocation3 + $0xd0] sm:$0xff] %v2749_v19  ;;  %3684 = vmatpush.bf16.msrb.mxu3 %v5257_v2  ;;  %3710 = vmatpush.bf16.msrb.mxu1 %v5261_v20  ;;  %v7588_v22 = vpop.permute.xlu1 %2638  ;;  %v7590_v36 = vpop.permute.xlu2 %2896  ;;  %v5672_v62 = vld [vmem:[#allocation3 + $0x64] sm:$0xf0] }
 0x3a3   : > { %v8153_v5 = vrot.slane %v7588_v22, 4  ;;  %v5193_v20 = vor.u32 %v5672_v62, %v5192_v38 }
 0x3a4   : > { %v3061_v12 = vpop.permute.xlu0 %3060 }
 0x3a5   : > { %v2666_v3 = vsel %vm612_vm6, %v2654_v49, %v8153_v5  ;;  %v3071_v32 = vrot.slane %v3061_v12, 4  ;;  %v5160_v12 = vld [vmem:[#allocation3 + $0x8] sm:$0xf]  ;;  %v5660_v5 = vld [vmem:[#allocation3 + $0xc] sm:$0xf] }
 0x3a6   : > { %v2667_v54 = vsel %vm955_vm14, %v7426_v47, %v2666_v3  ;;  %3685 = vmatpush.bf16.msrb.mxu3 %v5225_v23  ;;  %3711 = vmatpush.bf16.msrb.mxu1 %v5229_v37  ;;  %v5392_v13 = vld [vmem:[#allocation3 + $0x1d0] sm:$0xf]  ;;  %v5717_v35 = vld [vmem:[#allocation3 + $0x1d4] sm:$0xf]  ;;  %v5664_v37 = vld [vmem:[#allocation3 + $0x24] sm:$0xf0] }
 0x3a7   : > { %2688 = vst [vmem:[#allocation3 + $0x90] sm:$0xff] %v2667_v54  ;;  %v3086_v19 = vsel %vm612_vm6, %v3070_v55, %v3071_v32  ;;  %v5161_v51 = vor.u32 %v5664_v37, %v5160_v12  ;;  %v2907_v12 = vrot.slane %v7590_v36, 4  ;;  %v8176_v36 = vrot.slane %v7383_v10, 4 }
 0x3a8   : > { %v3087_v2 = vsel %vm1370_vm8, %v3059_v11, %v3086_v19  ;;  %v5721_v16 = vld [vmem:[#allocation3 + $0x1ec] sm:$0xf0]  ;;  %v5394_v39 = vld [vmem:[#allocation3 + $0x1f0] sm:$0xf0]  ;;  %v5162_v11 = vld [vmem:[#allocation3 + $0x28] sm:$0xf0] }
 0x3a9   : > { %3103 = vst [vmem:[#allocation3 + $0x1f8] sm:$0xff] %v3087_v2  ;;  %v5393_v49 = vor.u32 %v5721_v16, %v5392_v13  ;;  %v5397_v1 = vor.u32 %v5717_v35, %v5394_v39  ;;  %v5165_v3 = vor.u32 %v5660_v5, %v5162_v11 }
 0x3aa   : > { %3686 = vmatpush.bf16.msrb.mxu3 %v5193_v20  ;;  %3712 = vmatpush.bf16.msrb.mxu1 %v5197_v53  ;;  %v2979_v47 = vpop.permute.xlu1 %2978  ;;  %v7602_v23 = vpop.permute.xlu2 %3130 }
 0x3ab   : > { %3732 = vmatpush.bf16.msra.mxu2 %v5393_v49  ;;  %3758 = vmatpush.bf16.msra.mxu0 %v5397_v1  ;;  %v3147_v55 = vrot.slane %v7602_v23, 4  ;;  %v2989_v2 = vrot.slane %v2979_v47, 4 }
 0x3ac   : > { %v7605_v38 = vpop.permute.xlu0 %2812 }
 0x3ad   : > { %v3158_v32 = vsel %vm612_vm6, %v3146_v0, %v3147_v55  ;;  %v2824_v62 = vrot.slane %v7605_v38, 4 }
 0x3ae   : > { %v3159_v28 = vsel %vm1453_vm12, %v7420_v46, %v3158_v32  ;;  %3687 = vmatpush.bf16.msrb.mxu3 %v5161_v51  ;;  %3713 = vmatpush.bf16.msrb.mxu1 %v5165_v3  ;;  %v5360_v32 = vld [vmem:[#allocation3 + $0x190] sm:$0xf] }
 0x3af   : > { %3180 = vst [vmem:[#allocation3 + $0x210] sm:$0xff] %v3159_v28  ;;  %v2838_v5 = vsel %vm612_vm6, %v2823_v42, %v2824_v62  ;;  %v5709_v28 = vld [vmem:[#allocation3 + $0x194] sm:$0xf] }
 0x3b0   : > { %v2839_v54 = vsel %vm1121_vm7, %v7463_v48, %v2838_v5 }
 0x3b1   : > { %2856 = vst [vmem:[#allocation3 + $0x130] sm:$0xff] %v2839_v54  ;;  %3688 = vmatmul.bf16.vlgmr.msrb.gmra.mxu3 %v7465_v44  ;;  %3714 = vmatmul.bf16.vlgmr.msrb.gmra.mxu1 %v7465_v44 }
 0x3b2   : > { %v2887_v0 = vpop.permute.xlu1 %2886  ;;  %v7624_v13 = vpop.permute.xlu2 %2648 }
 0x3b3   : > { %v2902_v46 = vrot.slane %v2887_v0, 4  ;;  %v2660_v35 = vrot.slane %v7624_v13, 4 }
 0x3b4   : > { %v2977_v19 = vpop.permute.xlu0 %2976 }
 0x3b5   : > { %v2914_v42 = vsel %vm612_vm6, %v2901_v52, %v2902_v46  ;;  %v2674_v48 = vsel %vm612_vm6, %v2659_v63, %v2660_v35  ;;  %v2988_v20 = vrot.slane %v2977_v19, 4 }
 0x3b6   : > { %v2915_v53 = vsel %vm1204_vm9, %v7541_v50, %v2914_v42  ;;  %v2675_v16 = vsel %vm955_vm14, %v7536_v56, %v2674_v48 }
 0x3b7   : > { %2935 = vst [vmem:[#allocation3 + $0x158] sm:$0xff] %v2915_v53  ;;  %v3002_v39 = vsel %vm612_vm6, %v2987_v21, %v2988_v20  ;;  %v3004_v52 = vsel %vm612_vm6, %v2988_v20, %v2989_v2  ;;  %v8177_v53 = vrot.slane %v7490_v27, 4 }
 0x3b8   : > { %2692 = vst [vmem:[#allocation3 + $0xb0] sm:$0xff] %v2675_v16  ;;  %v3003_v49 = vsel %vm1287_vm11, %v7484_v7, %v3002_v39  ;;  %v3005_v63 = vsel %vm1287_vm11, %v2977_v19, %v3004_v52 }
 0x3b9   : > { %3020 = vst [vmem:[#allocation3 + $0x1b0] sm:$0xff] %v3003_v49 }
 0x3ba   : > { %3021 = vst [vmem:[#allocation3 + $0x1b8] sm:$0xff] %v3005_v63  ;;  %v2895_v1 = vpop.permute.xlu1 %2894  ;;  %v2733_v50 = vpop.permute.xlu2 %2732  ;;  %v5328_v63 = vld [vmem:[#allocation3 + $0x150] sm:$0xf] }
 0x3bb   : > { %v2906_v56 = vrot.slane %v2895_v1, 4  ;;  %v2743_v2 = vrot.slane %v2733_v50, 4 }
 0x3bc   : > { %v7647_v47 = vpop.permute.xlu0 %2566 }
 0x3bd   : > { %v2920_v21 = vsel %vm612_vm6, %v2905_v45, %v2906_v56  ;;  %v2922_v37 = vsel %vm612_vm6, %v2906_v56, %v2907_v12  ;;  %v2578_v11 = vrot.slane %v7647_v47, 4 }
 0x3be   : > { %v2921_v7 = vsel %vm1204_vm9, %v7516_v4, %v2920_v21  ;;  %v2923_v51 = vsel %vm1204_vm9, %v2895_v1, %v2922_v37  ;;  %v5701_v21 = vld [vmem:[#allocation3 + $0x154] sm:$0xf] }
 0x3bf   : > { %2938 = vst [vmem:[#allocation3 + $0x170] sm:$0xff] %v2921_v7  ;;  %v2592_v3 = vsel %vm612_vm6, %v8176_v36, %v2578_v11  ;;  %v8179_v7 = vrot.slane %v7486_v43, 4 }
 0x3c0   : > { %2939 = vst [vmem:[#allocation3 + $0x178] sm:$0xff] %v2923_v51  ;;  %v2593_v45 = vsel %vm872_vm15, %v7383_v10, %v2592_v3  ;;  %v5713_v5 = vld [vmem:[#allocation3 + $0x1ac] sm:$0xf0]  ;;  %v5362_v54 = vld [vmem:[#allocation3 + $0x1b0] sm:$0xf0]  ;;  %v8178_v10 = vrot.slane %v7514_v26, 4 }
 0x3c1   : > { %2610 = vst [vmem:[#allocation3 + $0x70] sm:$0xff] %v2593_v45  ;;  %v5361_v0 = vor.u32 %v5713_v5, %v5360_v32  ;;  %v5365_v4 = vor.u32 %v5709_v28, %v5362_v54  ;;  %v5298_v28 = vld [vmem:[#allocation3 + $0x130] sm:$0xf0]  ;;  %v5296_v5 = vld [vmem:[#allocation3 + $0x110] sm:$0xf] }
 0x3c2   : > { %v2731_v46 = vpop.permute.xlu1 %2730  ;;  %v2559_v19 = vpop.permute.xlu2 %2558  ;;  %v5693_v54 = vld [vmem:[#allocation3 + $0x114] sm:$0xf] }
 0x3c3   : > { %v2742_v42 = vrot.slane %v2731_v46, 4  ;;  %v2574_v48 = vrot.slane %v2559_v19, 4  ;;  %3733 = vmatpush.bf16.msra.mxu2 %v5361_v0  ;;  %3759 = vmatpush.bf16.msra.mxu0 %v5365_v4 }
 0x3c4   : > { %v2805_v20 = vpop.permute.xlu0 %2804 }
 0x3c5   : > { %v2756_v16 = vsel %vm612_vm6, %v8177_v53, %v2742_v42  ;;  %v2758_v39 = vsel %vm612_vm6, %v2742_v42, %v2743_v2  ;;  %v2586_v52 = vsel %vm612_vm6, %v8178_v10, %v2574_v48  ;;  %v2820_v49 = vrot.slane %v2805_v20, 4  ;;  %v5264_v48 = vld [vmem:[#allocation3 + $0xd0] sm:$0xf] }
 0x3c6   : > { %v2757_v1 = vsel %vm1038_vm10, %v7490_v27, %v2756_v16  ;;  %v2759_v50 = vsel %vm1038_vm10, %v2731_v46, %v2758_v39  ;;  %v2587_v12 = vsel %vm872_vm15, %v7514_v26, %v2586_v52  ;;  %v5705_v56 = vld [vmem:[#allocation3 + $0x16c] sm:$0xf0]  ;;  %v5330_v37 = vld [vmem:[#allocation3 + $0x170] sm:$0xf0]  ;;  %v5301_v46 = vor.u32 %v5693_v54, %v5298_v28  ;;  %v5722_v54 = vld [vmem:[#allocation3 + $0x1f4] sm:$0xf0] }
 0x3c7   : > { %2774 = vst [vmem:[#allocation3 + $0xf0] sm:$0xff] %v2757_v1  ;;  %v2832_v51 = vsel %vm612_vm6, %v8179_v7, %v2820_v49  ;;  %v5329_v36 = vor.u32 %v5705_v56, %v5328_v63  ;;  %v5333_v3 = vor.u32 %v5701_v21, %v5330_v37  ;;  %v5697_v27 = vld [vmem:[#allocation3 + $0x12c] sm:$0xf0]  ;;  %v5685_v16 = vld [vmem:[#allocation3 + $0xd4] sm:$0xf]  ;;  %v8180_v10 = vrot.slane %v7422_v8, 4 }
 0x3c8   : > { %2775 = vst [vmem:[#allocation3 + $0xf8] sm:$0xff] %v2759_v50  ;;  %v2833_v32 = vsel %vm1121_vm7, %v7486_v43, %v2832_v51  ;;  %v5297_v4 = vor.u32 %v5697_v27, %v5296_v5  ;;  %v5234_v56 = vld [vmem:[#allocation3 + $0xb0] sm:$0xf0]  ;;  %v5232_v21 = vld [vmem:[#allocation3 + $0x90] sm:$0xf] }
 0x3c9   : > { %2607 = vst [vmem:[#allocation3 + $0x58] sm:$0xff] %v2587_v12  ;;  %3734 = vmatpush.bf16.msra.mxu2 %v5329_v36  ;;  %3760 = vmatpush.bf16.msra.mxu0 %v5333_v3  ;;  %v5681_v12 = vld [vmem:[#allocation3 + $0xac] sm:$0xf0]  ;;  %v5677_v37 = vld [vmem:[#allocation3 + $0x94] sm:$0xf] }
 0x3ca   : > { %2853 = vst [vmem:[#allocation3 + $0x118] sm:$0xff] %v2833_v32  ;;  %v2815_v26 = vpop.permute.xlu1 %2814  ;;  %v3143_v45 = vpop.permute.xlu2 %3142  ;;  %v5233_v51 = vor.u32 %v5681_v12, %v5232_v21  ;;  %v5237_v36 = vor.u32 %v5677_v37, %v5234_v56  ;;  %v5673_v32 = vld [vmem:[#allocation3 + $0x6c] sm:$0xf0]  ;;  %v5202_v27 = vld [vmem:[#allocation3 + $0x70] sm:$0xf0] }
 0x3cb   : > { %v2825_v0 = vrot.slane %v2815_v26, 4  ;;  %v3153_v42 = vrot.slane %v3143_v45, 4  ;;  %v5200_v45 = vld [vmem:[#allocation3 + $0x50] sm:$0xf]  ;;  %v5669_v5 = vld [vmem:[#allocation3 + $0x54] sm:$0xf] }
 0x3cc   : > { %v3141_v19 = vpop.permute.xlu0 %3140  ;;  %v5714_v21 = vld [vmem:[#allocation3 + $0x1b4] sm:$0xf0]  ;;  %v5370_v37 = vld [vmem:[#allocation3 + $0x1b8] sm:$0xf0] }
 0x3cd   : > { %v2840_v2 = vsel %vm612_vm6, %v2824_v62, %v2825_v0  ;;  %v3152_v43 = vrot.slane %v3141_v19, 4  ;;  %3735 = vmatpush.bf16.msra.mxu2 %v5297_v4  ;;  %3761 = vmatpush.bf16.msra.mxu0 %v5301_v46  ;;  %v5665_v0 = vld [vmem:[#allocation3 + $0x2c] sm:$0xf0]  ;;  %v5170_v4 = vld [vmem:[#allocation3 + $0x30] sm:$0xf0]  ;;  %v8181_v46 = vrot.slane %v7588_v22, 4 }
 0x3ce   : > { %v2841_v20 = vsel %vm1121_vm7, %v7605_v38, %v2840_v2  ;;  %v5689_v53 = vld [vmem:[#allocation3 + $0xec] sm:$0xf0]  ;;  %v5266_v39 = vld [vmem:[#allocation3 + $0xf0] sm:$0xf0]  ;;  %v5201_v2 = vor.u32 %v5673_v32, %v5200_v45  ;;  %v5710_v32 = vld [vmem:[#allocation3 + $0x19c] sm:$0xf] }
 0x3cf   : > { %2857 = vst [vmem:[#allocation3 + $0x138] sm:$0xff] %v2841_v20  ;;  %v3166_v52 = vsel %vm612_vm6, %v8180_v10, %v3152_v43  ;;  %v3168_v49 = vsel %vm612_vm6, %v3152_v43, %v3153_v42  ;;  %v5265_v63 = vor.u32 %v5689_v53, %v5264_v48  ;;  %v5269_v62 = vor.u32 %v5685_v16, %v5266_v39  ;;  %v5424_v43 = vld [vmem:[#allocation3 + $0x210] sm:$0xf]  ;;  %v5725_v53 = vld [vmem:[#allocation3 + $0x214] sm:$0xf] }
 0x3d0   : > { %v3167_v1 = vsel %vm1453_vm12, %v7422_v8, %v3166_v52  ;;  %v3169_v50 = vsel %vm1453_vm12, %v3141_v19, %v3168_v49  ;;  %v5205_v42 = vor.u32 %v5669_v5, %v5202_v27  ;;  %v5400_v10 = vld [vmem:[#allocation3 + $0x1d8] sm:$0xf]  ;;  %v5718_v52 = vld [vmem:[#allocation3 + $0x1dc] sm:$0xf] }
 0x3d1   : > { %3184 = vst [vmem:[#allocation3 + $0x230] sm:$0xff] %v3167_v1  ;;  %3736 = vmatpush.bf16.msra.mxu2 %v5265_v63  ;;  %3762 = vmatpush.bf16.msra.mxu0 %v5269_v62  ;;  %v5401_v63 = vor.u32 %v5722_v54, %v5400_v10  ;;  %v5168_v1 = vld [vmem:[#allocation3 + $0x10] sm:$0xf]  ;;  %v5336_v5 = vld [vmem:[#allocation3 + $0x158] sm:$0xf] }
 0x3d2   : > { %3185 = vst [vmem:[#allocation3 + $0x238] sm:$0xff] %v3169_v50  ;;  %v2723_v38 = vpop.permute.xlu1 %2722  ;;  %v5661_v50 = vld [vmem:[#allocation3 + $0x14] sm:$0xf]  ;;  %v5169_v56 = vor.u32 %v5665_v0, %v5168_v1  ;;  %v5702_v54 = vld [vmem:[#allocation3 + $0x15c] sm:$0xf] }
 0x3d3   : > { %v2738_v7 = vrot.slane %v2723_v38, 4 }
 0x3d4   : > { %v2641_v3 = vpop.permute.xlu0 %2640 }
 0x3d5   : > { %v2750_v8 = vsel %vm612_vm6, %v2737_v6, %v2738_v7  ;;  %v2656_v28 = vrot.slane %v2641_v3, 4  ;;  %3737 = vmatpush.bf16.msra.mxu2 %v5233_v51  ;;  %3763 = vmatpush.bf16.msra.mxu0 %v5237_v36  ;;  %v5402_v6 = vld [vmem:[#allocation3 + $0x1f8] sm:$0xf0]  ;;  %v5368_v3 = vld [vmem:[#allocation3 + $0x198] sm:$0xf] }
 0x3d6   : > { %v2751_v26 = vsel %vm1038_vm10, %v7566_v25, %v2750_v8  ;;  %v5405_v62 = vor.u32 %v5718_v52, %v5402_v6  ;;  %v5373_v8 = vor.u32 %v5710_v32, %v5370_v37 }
 0x3d7   : > { %2771 = vst [vmem:[#allocation3 + $0xd8] sm:$0xff] %v2751_v26  ;;  %v2668_v19 = vsel %vm612_vm6, %v8181_v46, %v2656_v28  ;;  %v5338_v26 = vld [vmem:[#allocation3 + $0x178] sm:$0xf0]  ;;  %v5698_v46 = vld [vmem:[#allocation3 + $0x134] sm:$0xf0] }
 0x3d8   : > { %v2669_v48 = vsel %vm955_vm14, %v7588_v22, %v2668_v19  ;;  %v5729_v20 = vld [vmem:[#allocation3 + $0x22c] sm:$0xf0]  ;;  %v5426_v25 = vld [vmem:[#allocation3 + $0x230] sm:$0xf0]  ;;  %v5173_v22 = vor.u32 %v5661_v50, %v5170_v4  ;;  %v5306_v19 = vld [vmem:[#allocation3 + $0x138] sm:$0xf0] }
 0x3d9   : > { %2689 = vst [vmem:[#allocation3 + $0x98] sm:$0xff] %v2669_v48  ;;  %3738 = vmatpush.bf16.msra.mxu2 %v5201_v2  ;;  %3764 = vmatpush.bf16.msra.mxu0 %v5205_v42  ;;  %v5425_v16 = vor.u32 %v5729_v20, %v5424_v43  ;;  %v5429_v39 = vor.u32 %v5725_v53, %v5426_v25  ;;  %v5304_v42 = vld [vmem:[#allocation3 + $0x118] sm:$0xf]  ;;  %v5694_v43 = vld [vmem:[#allocation3 + $0x11c] sm:$0xf] }
 0x3da   : > { %v2651_v49 = vpop.permute.xlu1 %2650  ;;  %v5305_v6 = vor.u32 %v5698_v46, %v5304_v42  ;;  %v5309_v48 = vor.u32 %v5694_v43, %v5306_v19  ;;  %v5690_v25 = vld [vmem:[#allocation3 + $0xf4] sm:$0xf0] }
 0x3db   : > { %v2661_v12 = vrot.slane %v2651_v49, 4  ;;  %3752 = vmatpush.bf16.msra.mxu3 %v5425_v16  ;;  %3778 = vmatpush.bf16.msra.mxu1 %v5429_v39  ;;  %v5274_v16 = vld [vmem:[#allocation3 + $0xf8] sm:$0xf0] }
 0x3dc   : > { %v2569_v38 = vpop.permute.xlu0 %2568 }
 0x3dd   : > { %v2676_v7 = vsel %vm612_vm6, %v2660_v35, %v2661_v12  ;;  %v2579_v51 = vrot.slane %v2569_v38, 4  ;;  %3739 = vmatpush.bf16.msra.mxu2 %v5169_v56  ;;  %3765 = vmatpush.bf16.msra.mxu0 %v5173_v22  ;;  %v5369_v35 = vor.u32 %v5714_v21, %v5368_v3 }
 0x3de   : > { %v2677_v36 = vsel %vm955_vm14, %v7624_v13, %v2676_v7  ;;  %5442 = vmatmul.msk.bf16.vlgmr.msra.gmra.mxu3 %vm8164_vm1, %v7418_v14  ;;  %5443 = vmatmul.msk.bf16.vlgmr.msra.gmra.mxu1 %vm8182_vm2, %v7418_v14  ;;  %v5706_v13 = vld [vmem:[#allocation3 + $0x174] sm:$0xf0]  ;;  %v5686_v53 = vld [vmem:[#allocation3 + $0xdc] sm:$0xf] }
 0x3df   : > { %3784 = vmatpush.bf16.msrb.mxu3 %v5401_v63  ;;  %3810 = vmatpush.bf16.msrb.mxu1 %v5405_v62  ;;  %2693 = vst [vmem:[#allocation3 + $0xb8] sm:$0xff] %v2677_v36  ;;  %v2594_v27 = vsel %vm612_vm6, %v2578_v11, %v2579_v51  ;;  %v5337_v4 = vor.u32 %v5706_v13, %v5336_v5  ;;  %v5272_v20 = vld [vmem:[#allocation3 + $0xd8] sm:$0xf]  ;;  %v5670_v51 = vld [vmem:[#allocation3 + $0x5c] sm:$0xf] }
 0x3e0   : > { %v2595_v28 = vsel %vm872_vm15, %v7647_v47, %v2594_v27  ;;  %3740 = vmatmul.bf16.vlgmr.msra.gmra.mxu2 %v7465_v44  ;;  %3766 = vmatmul.bf16.vlgmr.msra.gmra.mxu0 %v7465_v44  ;;  %v5341_v11 = vor.u32 %v5702_v54, %v5338_v26  ;;  %v5273_v39 = vor.u32 %v5690_v25, %v5272_v20  ;;  %v5240_v49 = vld [vmem:[#allocation3 + $0x98] sm:$0xf]  ;;  %v5678_v62 = vld [vmem:[#allocation3 + $0x9c] sm:$0xf] }
 0x3e1   : > { %2611 = vst [vmem:[#allocation3 + $0x78] sm:$0xff] %v2595_v28  ;;  %v5277_v10 = vor.u32 %v5686_v53, %v5274_v16  ;;  %v5730_v63 = vld [vmem:[#allocation3 + $0x234] sm:$0xf0]  ;;  %v5662_v28 = vld [vmem:[#allocation3 + $0x1c] sm:$0xf] }
 0x3e2   : > { %v3133_v45 = vpop.permute.xlu1 %3132  ;;  %v5208_v7 = vld [vmem:[#allocation3 + $0x58] sm:$0xf] }
 0x3e3   : > { %3785 = vmatpush.bf16.msrb.mxu3 %v5369_v35  ;;  %3811 = vmatpush.bf16.msrb.mxu1 %v5373_v8  ;;  %v3148_v0 = vrot.slane %v3133_v45, 4  ;;  %v5666_v27 = vld [vmem:[#allocation3 + $0x34] sm:$0xf0]  ;;  %v5178_v35 = vld [vmem:[#allocation3 + $0x38] sm:$0xf0] }
 0x3e4   : > { %v5176_v8 = vld [vmem:[#allocation3 + $0x18] sm:$0xf]  ;;  %v5181_v26 = vor.u32 %v5662_v28, %v5178_v35 }
 0x3e5   : > { %v3160_v47 = vsel %vm612_vm6, %v3147_v55, %v3148_v0  ;;  %v5177_v13 = vor.u32 %v5666_v27, %v5176_v8 }
 0x3e6   : > { %v3161_v2 = vsel %vm1453_vm12, %v7602_v23, %v3160_v47  ;;  %v5682_v52 = vld [vmem:[#allocation3 + $0xb4] sm:$0xf0]  ;;  %v5242_v55 = vld [vmem:[#allocation3 + $0xb8] sm:$0xf0] }
 0x3e7   : > { %3786 = vmatpush.bf16.msrb.mxu3 %v5337_v4  ;;  %3812 = vmatpush.bf16.msrb.mxu1 %v5341_v11  ;;  %3181 = vst [vmem:[#allocation3 + $0x218] sm:$0xff] %v3161_v2  ;;  %v5434_v23 = vld [vmem:[#allocation3 + $0x238] sm:$0xf0]  ;;  %v5241_v12 = vor.u32 %v5682_v52, %v5240_v49  ;;  %v5245_v56 = vor.u32 %v5678_v62, %v5242_v55  ;;  %v7730_v11 = vpop.permute.xlu0 %3839 }
 0x3e8   : > { %v5674_v21 = vld [vmem:[#allocation3 + $0x74] sm:$0xf0]  ;;  %v5210_v37 = vld [vmem:[#allocation3 + $0x78] sm:$0xf0] }
 0x3e9   : > { %v5209_v3 = vor.u32 %v5674_v21, %v5208_v7  ;;  %v5213_v32 = vor.u32 %v5670_v51, %v5210_v37 }
 0x3ea   : > { %v7733_v19 = vpop.permute.xlu1 %3853 }
 0x3eb   : > { %3787 = vmatpush.bf16.msrb.mxu3 %v5305_v6  ;;  %3813 = vmatpush.bf16.msrb.mxu1 %v5309_v48 }
 0x3ee   : > { %v5432_v1 = vld [vmem:[#allocation3 + $0x218] sm:$0xf]  ;;  %v5726_v50 = vld [vmem:[#allocation3 + $0x21c] sm:$0xf] }
 0x3ef   : > { %3788 = vmatpush.bf16.msrb.mxu3 %v5273_v39  ;;  %3814 = vmatpush.bf16.msrb.mxu1 %v5277_v10  ;;  %v5433_v22 = vor.u32 %v5730_v63, %v5432_v1  ;;  %v5437_v38 = vor.u32 %v5726_v50, %v5434_v23 }
 0x3f1   : > { %3804 = vmatpush.bf16.msrb.mxu2 %v5433_v22  ;;  %3830 = vmatpush.bf16.msrb.mxu0 %v5437_v38 }
 0x3f2   : > { %v3676_v36 = vpop.f32.mrf.mxu1 }
 0x3f3   : > { %3789 = vmatpush.bf16.msrb.mxu3 %v5241_v12  ;;  %3815 = vmatpush.bf16.msrb.mxu1 %v5245_v56 }
 0x3f4   : > { %5444 = vmatmul.msk.bf16.vlgmr.msrb.gmra.mxu2 %vm8183_vm13, %v7418_v14  ;;  %5445 = vmatmul.msk.bf16.vlgmr.msrb.gmra.mxu0 %vm8184_vm3, %v7418_v14 }
 0x3f7   : > { %3790 = vmatpush.bf16.msrb.mxu3 %v5209_v3  ;;  %3816 = vmatpush.bf16.msrb.mxu1 %v5213_v32  ;;  %v3650_v45 = vpop.f32.mrf.mxu3 }
 0x3fa   : > { %v3678_v5 = vpop.f32.mrf.mxu1 }
 0x3fb   : > { %3791 = vmatpush.bf16.msrb.mxu3 %v5177_v13  ;;  %3817 = vmatpush.bf16.msrb.mxu1 %v5181_v26 }
 0x3fe   : > { %3792 = vmatmul.bf16.vlgmr.msrb.gmra.mxu3 %v7465_v44  ;;  %3818 = vmatmul.bf16.vlgmr.msrb.gmra.mxu1 %v7465_v44  ;;  %v3663_v54 = vpop.f32.mrf.mxu0 }
 0x3ff   : > { %v3677_v0 = vadd.f32 %v3676_v36, %v3663_v54  ;;  %v3652_v4 = vpop.f32.mrf.mxu3 }
 0x401   : > { %v3843_v46 = vmul.f32 %v7730_v11, %v3677_v0 }
 0x403   : > { %v3857_v14 = vadd.f32 %v7733_v19, %v3843_v46  ;;  %v3637_v47 = vpop.f32.mrf.mxu2 }
 0x404   : > { %v3651_v2 = vadd.f32 %v3650_v45, %v3637_v47 }
 0x405   : > { %v3873_v42 = vmul.f32 0.02, %v3857_v14  ;;  %vm3865_vm1 = vcmp.gt.f32.partialorder %v3857_v14, 0.0 }
 0x406   : > { %v3842_v43 = vmul.f32 %v7730_v11, %v3651_v2  ;;  %v3665_v6 = vpop.f32.mrf.mxu0 }
 0x407   : > { %v3881_v48 = vsel %vm3865_vm1, %v3857_v14, %v3873_v42 }
 0x408   : > { %v3856_v44 = vadd.f32 %v7733_v19, %v3842_v43  ;;  %v3971_v10 = vmul.f32 %v6001_v59, %v3881_v48  ;;  %v3889_v63 = vmul.f32 %v5968_v34, %v3881_v48 }
 0x40a   : > { %vm3864_vm2 = vcmp.gt.f32.partialorder %v3856_v44, 0.0  ;;  %v3872_v20 = vmul.f32 0.02, %v3856_v44 }
 0x40b   : > { %v3639_v53 = vpop.f32.mrf.mxu2 }
 0x40c   : > { %v3880_v25 = vsel %vm3864_vm2, %v3856_v44, %v3872_v20 }
 0x40d   : > { %v3933_v16 = vpack.c.bf16 %v3881_v48, %v3880_v25  ;;  %v3970_v39 = vmul.f32 %v5998_v57, %v3880_v25  ;;  %v3888_v49 = vmul.f32 %v5965_v33, %v3880_v25 }
 0x40f   : > { %3941 = vrot.lane.b32.xlu1 %v3933_v16, %s5809_s21  ;;  %v3978_v52 = vpack.c.bf16 %v3971_v10, %v3970_v39  ;;  %v3728_v55 = vpop.f32.mrf.mxu0  ;;  %v3896_v62 = vpack.c.bf16 %v3889_v63, %v3888_v49 }
 0x411   : > { %3986 = vrot.lane.b32.xlu2 %v3978_v52, %s5809_s21 }
 0x413   : > { %v3702_v23 = vpop.f32.mrf.mxu2 }
 0x417   : > { %v3730_v1 = vpop.f32.mrf.mxu0 }
 0x419   : > { %3904 = vrot.lane.b32.xlu2 %v3896_v62, %s5809_s21 }
 0x41b   : > { %v3704_v50 = vpop.f32.mrf.mxu2 }
 0x42e   : > { %v3715_v12 = vpop.f32.mrf.mxu1 }
 0x42f   : > { %v3729_v57 = vadd.f32 %v3728_v55, %v3715_v12 }
 0x431   : > { %v3845_v59 = vmul.f32 %v7730_v11, %v3729_v57 }
 0x433   : > { %v3859_v56 = vadd.f32 %v7733_v19, %v3845_v59 }
 0x434   : > { %v3689_v22 = vpop.f32.mrf.mxu3 }
 0x435   : > { %v3703_v38 = vadd.f32 %v3702_v23, %v3689_v22  ;;  %v3875_v37 = vmul.f32 0.02, %v3859_v56  ;;  %vm3867_vm13 = vcmp.gt.f32.partialorder %v3859_v56, 0.0 }
 0x436   : > { %v3717_v21 = vpop.f32.mrf.mxu1 }
 0x437   : > { %v3844_v33 = vmul.f32 %v7730_v11, %v3703_v38  ;;  %v3883_v7 = vsel %vm3867_vm13, %v3859_v56, %v3875_v37 }
 0x438   : > { %v3973_v35 = vmul.f32 %v6007_v61, %v3883_v7  ;;  %v3891_v13 = vmul.f32 %v5959_v31, %v3883_v7 }
 0x439   : > { %v3858_v34 = vadd.f32 %v7733_v19, %v3844_v33 }
 0x43b   : > { %vm3866_vm3 = vcmp.gt.f32.partialorder %v3858_v34, 0.0  ;;  %v3874_v51 = vmul.f32 0.02, %v3858_v34 }
 0x43c   : > { %v3691_v36 = vpop.f32.mrf.mxu3 }
 0x43d   : > { %v3882_v3 = vsel %vm3866_vm3, %v3858_v34, %v3874_v51 }
 0x43e   : > { %v3934_v32 = vpack.c.bf16 %v3883_v7, %v3882_v3  ;;  %v3972_v27 = vmul.f32 %v6004_v60, %v3882_v3  ;;  %v3890_v28 = vmul.f32 %v5956_v30, %v3882_v3 }
 0x440   : > { %3943 = vrot.lane.b32.xlu2 %v3934_v32, %s5809_s21  ;;  %v3979_v8 = vpack.c.bf16 %v3973_v35, %v3972_v27  ;;  %v3897_v26 = vpack.c.bf16 %v3891_v13, %v3890_v28 }
 0x442   : > { %3988 = vrot.lane.b32.xlu0 %v3979_v8, %s5809_s21 }
 0x44a   : > { %3906 = vrot.lane.b32.xlu0 %v3897_v26, %s5809_s21 }
 0x45b   : > { %v3780_v45 = vpop.f32.mrf.mxu1 }
 0x45d   : > { %v3767_v5 = vpop.f32.mrf.mxu0 }
 0x45e   : > { %v3781_v54 = vadd.f32 %v3780_v45, %v3767_v5 }
 0x460   : > { %v3847_v0 = vmul.f32 %v7730_v11, %v3781_v54 }
 0x461   : > { %v3754_v60 = vpop.f32.mrf.mxu3 }
 0x462   : > { %v3861_v61 = vadd.f32 %v7733_v19, %v3847_v0 }
 0x463   : > { %v3741_v4 = vpop.f32.mrf.mxu2  ;;  %v3782_v46 = vpop.f32.mrf.mxu1 }
 0x464   : > { %v3755_v14 = vadd.f32 %v3754_v60, %v3741_v4  ;;  %v3877_v2 = vmul.f32 0.02, %v3861_v61  ;;  %vm3869_vm1 = vcmp.gt.f32.partialorder %v3861_v61, 0.0 }
 0x465   : > { %v3769_v47 = vpop.f32.mrf.mxu0 }
 0x466   : > { %v3846_v30 = vmul.f32 %v7730_v11, %v3755_v14  ;;  %v3885_v43 = vsel %vm3869_vm1, %v3861_v61, %v3877_v2 }
 0x467   : > { %v3893_v39 = vmul.f32 %v5953_v29, %v3885_v43 }
 0x468   : > { %v3860_v31 = vadd.f32 %v7733_v19, %v3846_v30 }
 0x469   : > { %v3756_v42 = vpop.f32.mrf.mxu3 }
 0x46a   : > { %vm3868_vm2 = vcmp.gt.f32.partialorder %v3860_v31, 0.0  ;;  %v3876_v6 = vmul.f32 0.02, %v3860_v31 }
 0x46b   : > { %v7760_v44 = vpop.permute.xlu2 %3986  ;;  %v3743_v48 = vpop.f32.mrf.mxu2 }
 0x46c   : > { %v3884_v20 = vsel %vm3868_vm2, %v3860_v31, %v3876_v6  ;;  %v3994_v53 = vrot.slane %v7760_v44, 4 }
 0x46d   : > { %v3935_v25 = vpack.c.bf16 %v3885_v43, %v3884_v20  ;;  %v3892_v16 = vmul.f32 %v5945_v24, %v3884_v20  ;;  %v3974_v55 = vmul.f32 %v6027_v18, %v3884_v20  ;;  %v3975_v24 = vmul.f32 %v6030_v17, %v3885_v43 }
 0x46e   : > { %v3998_v10 = vsel %vm610_vm4, %v3994_v53, %v7760_v44 }
 0x46f   : > { %4010 = vst.msk [vmem:[#allocation2 + $0x90] sm:$0xff] %vm6092_vm5, %v3998_v10  ;;  %3945 = vrot.lane.b32.xlu1 %v3935_v25, %s5809_s21  ;;  %v3898_v52 = vpack.c.bf16 %v3893_v39, %v3892_v16  ;;  %v3980_v23 = vpack.c.bf16 %v3975_v24, %v3974_v55 }
 0x471   : > { %3908 = vrot.lane.b32.xlu0 %v3898_v52, %s5809_s21  ;;  %v3832_v29 = vpop.f32.mrf.mxu0 }
 0x473   : > { %v7774_v49 = vpop.permute.xlu2 %3904 }
 0x474   : > { %v3912_v63 = vrot.slane %v7774_v49, 4 }
 0x476   : > { %v3916_v62 = vsel %vm610_vm4, %v3912_v63, %v7774_v49  ;;  %v4310_v5 = vld [vmem:[#allocation2 + $0x90] sm:$0xff] }
 0x477   : > { %3928 = vst.msk [vmem:[#allocation2] sm:$0xff] %vm6092_vm5, %v3916_v62  ;;  %3990 = vrot.lane.b32.xlu1 %v3980_v23, %s5809_s21  ;;  %v3806_v18 = vpop.f32.mrf.mxu2 }
 0x479   : > { %v3834_v12 = vpop.f32.mrf.mxu0 }
 0x47b   : > { %v3819_v1 = vpop.f32.mrf.mxu1 }
 0x47c   : > { %v3833_v50 = vadd.f32 %v3832_v29, %v3819_v1 }
 0x47e   : > { %v3849_v17 = vmul.f32 %v7730_v11, %v3833_v50  ;;  %v4015_v57 = vld [vmem:[#allocation2] sm:$0xff] }
 0x47f   : > { %4019 = vst [vmem:[#allocation3] sm:$0xff] %v4015_v57  ;;  %v3808_v37 = vpop.f32.mrf.mxu2 }
 0x480   : > { %v3863_v59 = vadd.f32 %v7733_v19, %v3849_v17 }
 0x481   : > { %v3793_v56 = vpop.f32.mrf.mxu3  ;;  %v3942_v21 = vpop.permute.xlu1 %3941 }
 0x482   : > { %v3807_v22 = vadd.f32 %v3806_v18, %v3793_v56  ;;  %v3879_v38 = vmul.f32 0.02, %v3863_v59  ;;  %vm3871_vm13 = vcmp.gt.f32.partialorder %v3863_v59, 0.0  ;;  %v3949_v34 = vrot.slane %v3942_v21, 4 }
 0x483   : > { %v3821_v7 = vpop.f32.mrf.mxu1 }
 0x484   : > { %v3848_v33 = vmul.f32 %v7730_v11, %v3807_v22  ;;  %v3953_v36 = vsel %vm610_vm4, %v3949_v34, %v3942_v21  ;;  %v3887_v3 = vsel %vm3871_vm13, %v3863_v59, %v3879_v38 }
 0x485   : > { %3965 = vst.msk [vmem:[#allocation2 + $0x48] sm:$0xff] %vm6092_vm5, %v3953_v36  ;;  %v3895_v8 = vmul.f32 %v6050_v9, %v3887_v3  ;;  %v3977_v26 = vmul.f32 %v6062_v41, %v3887_v3  ;;  %vm4756_vm5 = vcmask 1042434  }
 0x486   : > { %v3862_v51 = vadd.f32 %v7733_v19, %v3848_v33 }
 0x488   : > { %vm3870_vm3 = vcmp.gt.f32.partialorder %v3862_v51, 0.0  ;;  %v3878_v32 = vmul.f32 0.02, %v3862_v51 }
 0x489   : > { %v3795_v27 = vpop.f32.mrf.mxu3 }
 0x48a   : > { %v3886_v35 = vsel %vm3870_vm3, %v3862_v51, %v3878_v32 }
 0x48b   : > { %v3936_v28 = vpack.c.bf16 %v3887_v3, %v3886_v35  ;;  %v3894_v13 = vmul.f32 %v6047_v15, %v3886_v35  ;;  %v3976_v11 = vmul.f32 %v6059_v40, %v3886_v35 }
 0x48c   : > { %v4269_v58 = vld [vmem:[#allocation2 + $0x48] sm:$0xff] }
 0x48d   : > { %3947 = vrot.lane.b32.xlu1 %v3936_v28, %s5809_s21  ;;  %v3899_v19 = vpack.c.bf16 %v3895_v8, %v3894_v13  ;;  %v3981_v45 = vpack.c.bf16 %v3977_v26, %v3976_v11 }
 0x48f   : > { %3910 = vrot.lane.b32.xlu0 %v3899_v19, %s5809_s21  ;;  %3992 = vrot.lane.b32.xlu2 %v3981_v45, %s5809_s21 }
 0x495   : > { %4279 = vrot.lane.b32.xlu1 %v4269_v58, %s5813_s23 }
 0x497   : > { %4156 = vrot.lane.b32.xlu0 %v4269_v58, %s5812_s22  ;;  %4320 = vrot.lane.b32.xlu2 %v4310_v5, %s5816_s26 }
 0x49a   : > { %v3944_v15 = vpop.permute.xlu2 %3943 }
 0x49b   : > { %v3950_v9 = vrot.slane %v3944_v15, 4 }
 0x49d   : > { %4033 = vrot.lane.b32.xlu1 %v4269_v58, %s5819_s29  ;;  %v3954_v40 = vsel %vm612_vm6, %v3949_v34, %v3950_v9 }
 0x49e   : > { %v3955_v41 = vsel %vm610_vm4, %v3954_v40, %v3944_v15 }
 0x49f   : > { %4074 = vrot.lane.b32.xlu0 %v4310_v5, %s5818_s28  ;;  %4238 = vrot.lane.b32.xlu2 %v4015_v57, %s5814_s24 }
 0x4a5   : > { %4158 = vrot.lane.b32.xlu1 %v3955_v41, %s5812_s22 }
 0x4a7   : > { %4197 = vrot.lane.b32.xlu2 %v4310_v5, %s5815_s25 }
 0x4af   : > { %4115 = vrot.lane.b32.xlu2 %v4015_v57, %s5817_s27 }
 0x4b4   : > { %v3989_v54 = vpop.permute.xlu0 %3988 }
 0x4b5   : > { %v3995_v0 = vrot.slane %v3989_v54, 4 }
 0x4b7   : > { %4281 = vrot.lane.b32.xlu2 %v3955_v41, %s5813_s23  ;;  %v3999_v60 = vsel %vm612_vm6, %v3994_v53, %v3995_v0 }
 0x4b8   : > { %v4000_v61 = vsel %vm610_vm4, %v3999_v60, %v3989_v54 }
 0x4b9   : > { %4322 = vrot.lane.b32.xlu0 %v4000_v61, %s5816_s26  ;;  %4076 = vrot.lane.b32.xlu1 %v4000_v61, %s5818_s28 }
 0x4bc   : > { %v3907_v4 = vpop.permute.xlu0 %3906 }
 0x4bd   : > { %v3913_v46 = vrot.slane %v3907_v4, 4 }
 0x4bf   : > { %4035 = vrot.lane.b32.xlu2 %v3955_v41, %s5819_s29  ;;  %v3917_v14 = vsel %vm612_vm6, %v3912_v63, %v3913_v46 }
 0x4c0   : > { %v3918_v47 = vsel %vm610_vm4, %v3917_v14, %v3907_v4  ;;  %v4701_v4 = vld [vmem:[#allocation4] sm:$0x1] }
 0x4c1   : > { %3929 = vst [vmem:[#allocation2 + $0x8] sm:$0xff] %v3918_v47  ;;  %4240 = vrot.lane.b32.xlu0 %v3918_v47, %s5814_s24 }
 0x4c2   : > { %4020 = vst [vmem:[#allocation3 + $0x8] sm:$0xff] %v3918_v47 }
 0x4c9   : > { %4199 = vrot.lane.b32.xlu0 %v4000_v61, %s5815_s25 }
 0x4d1   : > { %4117 = vrot.lane.b32.xlu0 %v3918_v47, %s5817_s27 }
 0x4e1   : > { %v3946_v2 = vpop.permute.xlu1 %3945 }
 0x4e2   : > { %v3951_v30 = vrot.slane %v3946_v2, 4 }
 0x4e3   : > { %v3909_v31 = vpop.permute.xlu0 %3908 }
 0x4e4   : > { %v3956_v42 = vsel %vm612_vm6, %v3950_v9, %v3951_v30  ;;  %v3914_v43 = vrot.slane %v3909_v31, 4 }
 0x4e5   : > { %v3957_v6 = vsel %vm610_vm4, %v3956_v42, %v3946_v2 }
 0x4e6   : > { %v3919_v44 = vsel %vm612_vm6, %v3913_v46, %v3914_v43  ;;  %4283 = vrot.lane.b32.xlu2 %v3957_v6, %s5813_s23 }
 0x4e7   : > { %v3920_v48 = vsel %vm610_vm4, %v3919_v44, %v3909_v31 }
 0x4e8   : > { %3930 = vst [vmem:[#allocation2 + $0x10] sm:$0xff] %v3920_v48 }
 0x4e9   : > { %v3993_v20 = vpop.permute.xlu2 %3992  ;;  %4021 = vst [vmem:[#allocation3 + $0x10] sm:$0xff] %v3920_v48  ;;  %v3991_v25 = vpop.permute.xlu1 %3990 }
 0x4ea   : > { %v3997_v53 = vrot.slane %v3993_v20, 4  ;;  %v3996_v16 = vrot.slane %v3991_v25, 4 }
 0x4ec   : > { %4014 = vst.msk [vmem:[#allocation2 + $0xb0] sm:$0xf] %vm363_vm0, %v3997_v53  ;;  %v4001_v39 = vsel %vm612_vm6, %v3995_v0, %v3996_v16  ;;  %v4003_v10 = vsel %vm612_vm6, %v3996_v16, %v3997_v53 }
 0x4ed   : > { %v4002_v52 = vsel %vm610_vm4, %v4001_v39, %v3991_v25  ;;  %v7835_v55 = vsel %vm610_vm4, %v4003_v10, %v3993_v20 }
 0x4ee   : > { %4201 = vrot.lane.b32.xlu0 %v4002_v52, %s5815_s25  ;;  %4324 = vrot.lane.b32.xlu1 %v4002_v52, %s5816_s26 }
 0x4ef   : > { %4160 = vrot.lane.b32.xlu2 %v3957_v6, %s5812_s22 }
 0x4f1   : > { %v7839_v49 = vpop.permute.xlu2 %4320 }
 0x4f2   : > { %v4330_v54 = vrot.slane %v7839_v49, 4 }
 0x4f3   : > { %v4314_v23 = vld [vmem:[#allocation2 + $0xb0] sm:$0xf] }
 0x4f4   : > { %v4191_v32 = vld [vmem:[#allocation2 + $0xb0] sm:$0xf] }
 0x4f5   : > { %v4068_v9 = vld [vmem:[#allocation2 + $0xb0] sm:$0xf] }
 0x4f6   : > { %4078 = vrot.lane.b32.xlu0 %v4002_v52, %s5818_s28  ;;  %4242 = vrot.lane.b32.xlu1 %v3920_v48, %s5814_s24 }
 0x4f7   : > { %4037 = vrot.lane.b32.xlu2 %v3957_v6, %s5819_s29 }
 0x4f9   : > { %v7844_v24 = vpop.permute.xlu2 %4238 }
 0x4fa   : > { %v4248_v20 = vrot.slane %v7844_v24, 4 }
 0x4fe   : > { %4119 = vrot.lane.b32.xlu1 %v3920_v48, %s5817_s27  ;;  %v4716_v48 = vld [vmem:[#allocation5] sm:$0x1] }
 0x4ff   : > { %v3948_v29 = vpop.permute.xlu1 %3947  ;;  %4328 = vrot.lane.b32.xlu2 %v4314_v23, %s5816_s26 }
 0x500   : > { %v3952_v63 = vrot.slane %v3948_v29, 4 }
 0x501   : > { %v3911_v62 = vpop.permute.xlu0 %3910  ;;  %v7848_v1 = vpop.permute.xlu2 %4197 }
 0x502   : > { %v3958_v18 = vsel %vm612_vm6, %v3951_v30, %v3952_v63  ;;  %3969 = vst.msk [vmem:[#allocation2 + $0x68] sm:$0xf] %vm363_vm0, %v3952_v63  ;;  %v3915_v50 = vrot.slane %v3911_v62, 4 }
 0x503   : > { %v3959_v12 = vsel %vm610_vm4, %v3958_v18, %v3948_v29 }
 0x504   : > { %v3921_v17 = vsel %vm612_vm6, %v3914_v43, %v3915_v50  ;;  %3932 = vst.msk [vmem:[#allocation2 + $0x20] sm:$0xf] %vm363_vm0, %v3915_v50  ;;  %vm4568_vm0 = vcmask 588800  }
 0x505   : > { %v3922_v57 = vsel %vm610_vm4, %v3921_v17, %v3911_v62  ;;  %vm4754_vm4 = vcmask 1040384  }
 0x506   : > { %4022 = vst [vmem:[#allocation3 + $0x18] sm:$0xff] %v3922_v57  ;;  %4285 = vrot.lane.b32.xlu1 %v3959_v12, %s5813_s23 }
 0x507   : > { %v4280_v59 = vpop.permute.xlu1 %4279 }
 0x508   : > { %v4289_v33 = vrot.slane %v4280_v59, 4 }
 0x509   : > { %v7858_v56 = vpop.permute.xlu2 %4115  ;;  %v4273_v22 = vld [vmem:[#allocation2 + $0x68] sm:$0xf]  ;;  %v4157_v51 = vpop.permute.xlu0 %4156 }
 0x50a   : > { %4287 = vrot.lane.b32.xlu0 %v4273_v22, %s5813_s23  ;;  %v4166_v27 = vrot.slane %v4157_v51, 4  ;;  %v4150_v58 = vld [vmem:[#allocation2 + $0x68] sm:$0xf]  ;;  %s4829_s23 = sshll.u32 %s8186_s18, 3 }
 0x50b   : > { %v4232_v38 = vld [vmem:[#allocation2 + $0x20] sm:$0xf]  ;;  %v4027_v5 = vld [vmem:[#allocation2 + $0x68] sm:$0xf] }
 0x50c   : > { %4246 = vrot.lane.b32.xlu2 %v4232_v38, %s5814_s24  ;;  %v4109_v46 = vld [vmem:[#allocation2 + $0x20] sm:$0xf] }
 0x50e   : > { %4326 = vrot.lane.b32.xlu1 %v7835_v55, %s5816_s26  ;;  %s361_s26 = scalar_lea.vmem %s8129_s10, %s4829_s23 }
 0x50f   : > { %v4034_v21 = vpop.permute.xlu1 %4033 }
 0x510   : > { %v4043_v28 = vrot.slane %v4034_v21, 4 }
 0x511   : > { %v7864_v37 = vpop.permute.xlu2 %4281  ;;  %v4075_v15 = vpop.permute.xlu0 %4074 }
 0x512   : > { %v4290_v34 = vrot.slane %v7864_v37, 4  ;;  %4162 = vrot.lane.b32.xlu0 %v3959_v12, %s5812_s22  ;;  %v4084_v0 = vrot.slane %v4075_v15, 4 }
 0x514   : > { %v4294_v7 = vsel %vm612_vm6, %v4289_v33, %v4290_v34  ;;  %4121 = vrot.lane.b32.xlu2 %v3922_v57, %s5817_s27 }
 0x515   : > { %v4295_v36 = vsel %vm1370_vm8, %v4280_v59, %v4294_v7 }
 0x516   : > { %4306 = vst [vmem:[#allocation3 + $0xe0] sm:$0xff] %v4295_v36  ;;  %4205 = vrot.lane.b32.xlu1 %v4191_v32, %s5815_s25 }
 0x517   : > { %v7873_v3 = vpop.permute.xlu1 %4158 }
 0x518   : > { %v4167_v35 = vrot.slane %v7873_v3, 4 }
 0x519   : > { %v7877_v8 = vpop.permute.xlu2 %4035 }
 0x51a   : > { %v4044_v13 = vrot.slane %v7877_v8, 4  ;;  %4244 = vrot.lane.b32.xlu0 %v3922_v57, %s5814_s24  ;;  %v4171_v11 = vsel %vm612_vm6, %v4166_v27, %v4167_v35 }
 0x51b   : > { %v4172_v26 = vsel %vm1121_vm7, %v4157_v51, %v4171_v11 }
 0x51c   : > { %v4048_v19 = vsel %vm612_vm6, %v4043_v28, %v4044_v13  ;;  %4183 = vst [vmem:[#allocation3 + $0x80] sm:$0xff] %v4172_v26  ;;  %4039 = vrot.lane.b32.xlu2 %v3959_v12, %s5819_s29 }
 0x51d   : > { %v4049_v45 = vsel %vm872_vm15, %v4034_v21, %v4048_v19  ;;  %v5759_v63 = vld [vmem:[#allocation3 + $0xdc] sm:$0xf0]  ;;  %v5546_v50 = vld [vmem:[#allocation3 + $0xe0] sm:$0xf0] }
 0x51e   : > { %4060 = vst [vmem:[#allocation3 + $0x20] sm:$0xff] %v4049_v45  ;;  %4203 = vrot.lane.b32.xlu1 %v7835_v55, %s5815_s25 }
 0x522   : > { %4164 = vrot.lane.b32.xlu0 %v4150_v58, %s5812_s22 }
 0x523   : > { %v5512_v7 = vld [vmem:[#allocation3 + $0x80] sm:$0xf] }
 0x524   : > { %4041 = vrot.lane.b32.xlu2 %v4027_v5, %s5819_s29 }
 0x526   : > { %4080 = vrot.lane.b32.xlu1 %v7835_v55, %s5818_s28  ;;  %v4207_v55 = vrot.slane %v7848_v1, 4 }
 0x52a   : > { %4082 = vrot.lane.b32.xlu0 %v4068_v9, %s5818_s28 }
 0x52b   : > { %v7897_v40 = vpop.permute.xlu0 %4322  ;;  %v7899_v41 = vpop.permute.xlu1 %4076 }
 0x52c   : > { %v4331_v60 = vrot.slane %v7897_v40, 4  ;;  %v4085_v61 = vrot.slane %v7899_v41, 4 }
 0x52e   : > { %v4335_v14 = vsel %vm612_vm6, %v4330_v54, %v4331_v60  ;;  %v4089_v47 = vsel %vm612_vm6, %v4084_v0, %v4085_v61  ;;  %4123 = vrot.lane.b32.xlu1 %v4109_v46, %s5817_s27  ;;  %v5735_v0 = vld [vmem:[#allocation3 + $0x1c] sm:$0xf0] }
 0x52f   : > { %v4336_v2 = vsel %vm1453_vm12, %v7839_v49, %v4335_v14  ;;  %v4090_v30 = vsel %vm955_vm14, %v4075_v15, %v4089_v47  ;;  %v5448_v14 = vld [vmem:[#allocation3] sm:$0xf] }
 0x530   : > { %4347 = vst [vmem:[#allocation3 + $0x100] sm:$0xff] %v4336_v2  ;;  %v4488_v31 = vunpack.c.l.b16 %v4336_v2  ;;  %v4489_v42 = vunpack.c.h.b16 %v4336_v2  ;;  %v5449_v47 = vor.u32 %v5735_v0, %v5448_v14 }
 0x531   : > { %4101 = vst [vmem:[#allocation3 + $0x40] sm:$0xff] %v4090_v30 }
 0x532   : > { %4704 = vperm.xlu0 %5783, %v4701_v4   ;;  %v4528_v43 = vpack.c.b16 %v4488_v31, %v4488_v31  ;;  %v4529_v6 = vpack.c.b16 %v4489_v42, %v4489_v42  ;;  %v5450_v4 = vld [vmem:[#allocation3 + $0x20] sm:$0xf0]  ;;  %v7976_v31 = vld [vmem:[%s8127_s7] sm:$0x1] }
 0x533   : > { %v7914_v44 = vpop.permute.xlu0 %4240 }
 0x534   : > { %v4249_v53 = vrot.slane %v7914_v44, 4  ;;  %v4574_v25 = vsel %vm612_vm6, %v4528_v43, 0  ;;  %v4577_v16 = vsel %vm612_vm6, %v4529_v6, 0 }
 0x535   : > { %4600 = vmatpush.bf16.msra.mxu2 %v4574_v25  ;;  %4613 = vmatpush.bf16.msra.mxu3 %v4577_v16 }
 0x536   : > { %v4253_v39 = vsel %vm612_vm6, %v4248_v20, %v4249_v53  ;;  %4719 = vperm.xlu1 %5784, %v4716_v48  }
 0x537   : > { %v4254_v10 = vsel %vm1287_vm11, %v7844_v24, %v4253_v39 }
 0x538   : > { %4265 = vst [vmem:[#allocation3 + $0xc0] sm:$0xff] %v4254_v10  ;;  %v5480_v19 = vld [vmem:[#allocation3 + $0x40] sm:$0xf]  ;;  %v5739_v58 = vld [vmem:[#allocation3 + $0x44] sm:$0xf] }
 0x53b   : > { %v7925_v52 = vpop.permute.xlu0 %4199 }
 0x53c   : > { %v4208_v49 = vrot.slane %v7925_v52, 4 }
 0x53e   : > { %v4212_v29 = vsel %vm612_vm6, %v4207_v55, %v4208_v49 }
 0x53f   : > { %v4213_v23 = vsel %vm1204_vm9, %v7848_v1, %v4212_v29  ;;  %v5544_v62 = vld [vmem:[#allocation3 + $0xc0] sm:$0xf]  ;;  %v5755_v18 = vld [vmem:[#allocation3 + $0xc4] sm:$0xf]  ;;  %v4125_v1 = vrot.slane %v7858_v56, 4 }
 0x540   : > { %4224 = vst [vmem:[#allocation3 + $0xa0] sm:$0xff] %v4213_v23  ;;  %v7934_v24 = vpop.permute.xlu2 %4283  ;;  %v5545_v12 = vor.u32 %v5759_v63, %v5544_v62  ;;  %v5549_v17 = vor.u32 %v5755_v18, %v5546_v50 }
 0x541   : > { %v4291_v57 = vrot.slane %v7934_v24, 4 }
 0x542   : > { %4601 = vmatpush.bf16.msra.mxu2 %v5545_v12  ;;  %4614 = vmatpush.bf16.msra.mxu3 %v5549_v17 }
 0x543   : > { %v4296_v59 = vsel %vm612_vm6, %v4290_v34, %v4291_v57  ;;  %v7942_v22 = vpop.permute.xlu0 %4117  ;;  %v5747_v34 = vld [vmem:[#allocation3 + $0x84] sm:$0xf] }
 0x544   : > { %v4297_v38 = vsel %vm1370_vm8, %v7864_v37, %v4296_v59  ;;  %v4126_v21 = vrot.slane %v7942_v22, 4 }
 0x545   : > { %4307 = vst [vmem:[#allocation3 + $0xe8] sm:$0xff] %v4297_v38 }
 0x546   : > { %v4130_v33 = vsel %vm612_vm6, %v4125_v1, %v4126_v21 }
 0x547   : > { %v4131_v51 = vsel %vm1038_vm10, %v7858_v56, %v4130_v33  ;;  %v5751_v36 = vld [vmem:[#allocation3 + $0x9c] sm:$0xf0]  ;;  %v5514_v32 = vld [vmem:[#allocation3 + $0xa0] sm:$0xf0] }
 0x548   : > { %4142 = vst [vmem:[#allocation3 + $0x60] sm:$0xff] %v4131_v51  ;;  %v5513_v27 = vor.u32 %v5751_v36, %v5512_v7  ;;  %v5517_v28 = vor.u32 %v5747_v34, %v5514_v32 }
 0x549   : > { %v7953_v11 = vpop.permute.xlu2 %4160 }
 0x54a   : > { %v4168_v37 = vrot.slane %v7953_v11, 4  ;;  %4602 = vmatpush.bf16.msra.mxu2 %v5513_v27  ;;  %4615 = vmatpush.bf16.msra.mxu3 %v5517_v28 }
 0x54c   : > { %v4173_v26 = vsel %vm612_vm6, %v4167_v35, %v4168_v37  ;;  %v5731_v35 = vld [vmem:[#allocation3 + $0x4] sm:$0xf]  ;;  %v5760_v7 = vld [vmem:[#allocation3 + $0xe4] sm:$0xf0]  ;;  %v5554_v51 = vld [vmem:[#allocation3 + $0xe8] sm:$0xf0] }
 0x54d   : > { %v4174_v56 = vsel %vm1121_vm7, %v7873_v3, %v4173_v26  ;;  %v5453_v2 = vor.u32 %v5731_v35, %v5450_v4 }
 0x54e   : > { %4184 = vst [vmem:[#allocation3 + $0x88] sm:$0xff] %v4174_v56 }
 0x54f   : > { %v5743_v45 = vld [vmem:[#allocation3 + $0x5c] sm:$0xf0]  ;;  %v5482_v5 = vld [vmem:[#allocation3 + $0x60] sm:$0xf0] }
 0x550   : > { %v5481_v15 = vor.u32 %v5743_v45, %v5480_v19  ;;  %v5485_v9 = vor.u32 %v5739_v58, %v5482_v5 }
 0x551   : > { %v7963_v54 = vpop.permute.xlu2 %4037 }
 0x552   : > { %v4045_v46 = vrot.slane %v7963_v54, 4  ;;  %4603 = vmatpush.bf16.msra.mxu2 %v5481_v15  ;;  %4616 = vmatpush.bf16.msra.mxu3 %v5485_v9 }
 0x554   : > { %v4050_v3 = vsel %vm612_vm6, %v4044_v13, %v4045_v46 }
 0x555   : > { %v4051_v30 = vsel %vm872_vm15, %v7877_v8, %v4050_v3  ;;  %v5520_v5 = vld [vmem:[#allocation3 + $0x88] sm:$0xf]  ;;  %v5748_v15 = vld [vmem:[#allocation3 + $0x8c] sm:$0xf] }
 0x556   : > { %4061 = vst [vmem:[#allocation3 + $0x28] sm:$0xff] %v4051_v30  ;;  %4604 = vmatpush.bf16.msra.mxu2 %v5449_v47  ;;  %4617 = vmatpush.bf16.msra.mxu3 %v5453_v2 }
 0x559   : > { %5574 = vmatmul.msk.bf16.vlgmr.msra.gmra.mxu2 %vm4568_vm0, %v7976_v31  ;;  %5575 = vmatmul.msk.bf16.vlgmr.msra.gmra.mxu3 %vm4568_vm0, %v7976_v31  ;;  %v7982_v13 = vpop.permute.xlu2 %4328 }
 0x560   : > { %v7984_v42 = vpop.permute.xlu0 %4201  ;;  %v7986_v8 = vpop.permute.xlu1 %4324 }
 0x561   : > { %v4209_v43 = vrot.slane %v7984_v42, 4  ;;  %v4332_v6 = vrot.slane %v7986_v8, 4 }
 0x563   : > { %v4214_v48 = vsel %vm612_vm6, %v4208_v49, %v4209_v43  ;;  %v4337_v20 = vsel %vm612_vm6, %v4331_v60, %v4332_v6 }
 0x564   : > { %v4215_v25 = vsel %vm1204_vm9, %v7925_v52, %v4214_v48  ;;  %v4338_v16 = vsel %vm1453_vm12, %v7897_v40, %v4337_v20 }
 0x565   : > { %4225 = vst [vmem:[#allocation3 + $0xa8] sm:$0xff] %v4215_v25  ;;  %v4490_v10 = vunpack.c.l.b16 %v4338_v16  ;;  %v4491_v55 = vunpack.c.h.b16 %v4338_v16 }
 0x566   : > { %v8004_v39 = vpop.permute.xlu2 %4246  ;;  %4348 = vst [vmem:[#allocation3 + $0x108] sm:$0xff] %v4338_v16 }
 0x567   : > { %v4530_v29 = vpack.c.b16 %v4490_v10, %v4490_v10  ;;  %v4531_v49 = vpack.c.b16 %v4491_v55, %v4491_v55  ;;  %v5458_v55 = vld [vmem:[#allocation3 + $0x28] sm:$0xf0] }
 0x568   : > { %v8006_v63 = vpop.permute.xlu0 %4078  ;;  %v8008_v23 = vpop.permute.xlu1 %4242 }
 0x569   : > { %v4086_v60 = vrot.slane %v8006_v63, 4  ;;  %v4250_v62 = vrot.slane %v8008_v23, 4  ;;  %v4580_v52 = vsel %vm612_vm6, %v4530_v29, 0  ;;  %v4583_v40 = vsel %vm612_vm6, %v4531_v49, 0 }
 0x56a   : > { %4626 = vmatpush.bf16.msra.mxu0 %v4580_v52  ;;  %4639 = vmatpush.bf16.msra.mxu1 %v4583_v40  ;;  %v4334_v49 = vrot.slane %v7982_v13, 4 }
 0x56b   : > { %v4091_v18 = vsel %vm612_vm6, %v4085_v61, %v4086_v60  ;;  %v4255_v50 = vsel %vm612_vm6, %v4249_v53, %v4250_v62 }
 0x56c   : > { %v4092_v12 = vsel %vm955_vm14, %v7899_v41, %v4091_v18  ;;  %v4256_v17 = vsel %vm1287_vm11, %v7914_v44, %v4255_v50  ;;  %v5522_v56 = vld [vmem:[#allocation3 + $0xa8] sm:$0xf0]  ;;  %v5456_v18 = vld [vmem:[#allocation3 + $0x8] sm:$0xf] }
 0x56d   : > { %4102 = vst [vmem:[#allocation3 + $0x48] sm:$0xff] %v4092_v12  ;;  %v5525_v4 = vor.u32 %v5748_v15, %v5522_v56  ;;  %v5732_v50 = vld [vmem:[#allocation3 + $0xc] sm:$0xf] }
 0x56e   : > { %v8028_v59 = vpop.permute.xlu2 %4121  ;;  %4266 = vst [vmem:[#allocation3 + $0xc8] sm:$0xff] %v4256_v17 }
 0x56f   : > { %v4128_v38 = vrot.slane %v8028_v59, 4 }
 0x570   : > { %v4120_v1 = vpop.permute.xlu1 %4119 }
 0x571   : > { %v4127_v61 = vrot.slane %v4120_v1, 4 }
 0x573   : > { %v4132_v33 = vsel %vm612_vm6, %v4126_v21, %v4127_v61  ;;  %v4134_v53 = vsel %vm612_vm6, %v4127_v61, %v4128_v38  ;;  %v5752_v21 = vld [vmem:[#allocation3 + $0xa4] sm:$0xf0] }
 0x574   : > { %v4133_v41 = vsel %vm1038_vm10, %v7942_v22, %v4132_v33  ;;  %v4135_v44 = vsel %vm1038_vm10, %v4120_v1, %v4134_v53  ;;  %v5521_v0 = vor.u32 %v5752_v21, %v5520_v5  ;;  %v5488_v3 = vld [vmem:[#allocation3 + $0x48] sm:$0xf]  ;;  %v5461_v1 = vor.u32 %v5732_v50, %v5458_v55 }
 0x575   : > { %4143 = vst [vmem:[#allocation3 + $0x68] sm:$0xff] %v4133_v41  ;;  %v5552_v34 = vld [vmem:[#allocation3 + $0xc8] sm:$0xf]  ;;  %v5756_v32 = vld [vmem:[#allocation3 + $0xcc] sm:$0xf] }
 0x576   : > { %v4040_v36 = vpop.permute.xlu2 %4039  ;;  %4144 = vst [vmem:[#allocation3 + $0x70] sm:$0xff] %v4135_v44  ;;  %v5553_v28 = vor.u32 %v5760_v7, %v5552_v34  ;;  %v5557_v26 = vor.u32 %v5756_v32, %v5554_v51 }
 0x577   : > { %v4046_v27 = vrot.slane %v4040_v36, 4 }
 0x578   : > { %4627 = vmatpush.bf16.msra.mxu0 %v5553_v28  ;;  %4640 = vmatpush.bf16.msra.mxu1 %v5557_v26  ;;  %v4286_v22 = vpop.permute.xlu1 %4285 }
 0x579   : > { %v4052_v19 = vsel %vm612_vm6, %v4045_v46, %v4046_v27  ;;  %v4292_v58 = vrot.slane %v4286_v22, 4 }
 0x57a   : > { %v4053_v45 = vsel %vm872_vm15, %v7963_v54, %v4052_v19  ;;  %v5740_v54 = vld [vmem:[#allocation3 + $0x4c] sm:$0xf] }
 0x57b   : > { %4062 = vst [vmem:[#allocation3 + $0x30] sm:$0xff] %v4053_v45  ;;  %v4298_v35 = vsel %vm612_vm6, %v4291_v57, %v4292_v58  ;;  %v5736_v57 = vld [vmem:[#allocation3 + $0x24] sm:$0xf0] }
 0x57c   : > { %v4288_v9 = vpop.permute.xlu0 %4287  ;;  %v4299_v46 = vsel %vm1370_vm8, %v7934_v24, %v4298_v35  ;;  %4628 = vmatpush.bf16.msra.mxu0 %v5521_v0  ;;  %4641 = vmatpush.bf16.msra.mxu1 %v5525_v4  ;;  %v5744_v47 = vld [vmem:[#allocation3 + $0x64] sm:$0xf0]  ;;  %v5490_v2 = vld [vmem:[#allocation3 + $0x68] sm:$0xf0]  ;;  %v5457_v17 = vor.u32 %v5736_v57, %v5456_v18 }
 0x57d   : > { %v4293_v14 = vrot.slane %v4288_v9, 4  ;;  %4308 = vst [vmem:[#allocation3 + $0xf0] sm:$0xff] %v4299_v46  ;;  %v5489_v20 = vor.u32 %v5744_v47, %v5488_v3  ;;  %v5493_v25 = vor.u32 %v5740_v54, %v5490_v2 }
 0x57e   : > { %v4042_v48 = vpop.permute.xlu2 %4041 }
 0x57f   : > { %v4300_v30 = vsel %vm612_vm6, %v4292_v58, %v4293_v14  ;;  %v4047_v10 = vrot.slane %v4042_v48, 4 }
 0x580   : > { %v4301_v16 = vsel %vm1370_vm8, %v4286_v22, %v4300_v30  ;;  %4629 = vmatpush.bf16.msra.mxu0 %v5489_v20  ;;  %4642 = vmatpush.bf16.msra.mxu1 %v5493_v25  ;;  %v4327_v24 = vpop.permute.xlu1 %4326  ;;  %v4252_v22 = vrot.slane %v8004_v39, 4  ;;  %vm4762_vm8 = vcmask 1046534  }
 0x581   : > { %4309 = vst [vmem:[#allocation3 + $0xf8] sm:$0xff] %v4301_v16  ;;  %v4054_v29 = vsel %vm612_vm6, %v4046_v27, %v4047_v10  ;;  %v4333_v40 = vrot.slane %v4327_v24, 4 }
 0x582   : > { %v4055_v52 = vsel %vm872_vm15, %v4040_v36, %v4054_v29 }
 0x583   : > { %4063 = vst [vmem:[#allocation3 + $0x38] sm:$0xff] %v4055_v52  ;;  %v4339_v33 = vsel %vm612_vm6, %v4332_v6, %v4333_v40  ;;  %v4341_v53 = vsel %vm612_vm6, %v4333_v40, %v4334_v49 }
 0x584   : > { %v4163_v12 = vpop.permute.xlu0 %4162  ;;  %v4340_v41 = vsel %vm1453_vm12, %v7986_v8, %v4339_v33  ;;  %v4342_v13 = vsel %vm1453_vm12, %v4327_v24, %v4341_v53  ;;  %4630 = vmatpush.bf16.msra.mxu0 %v5457_v17  ;;  %4643 = vmatpush.bf16.msra.mxu1 %v5461_v1  ;;  %v5761_v47 = vld [vmem:[#allocation3 + $0xec] sm:$0xf0]  ;;  %v5562_v54 = vld [vmem:[#allocation3 + $0xf0] sm:$0xf0] }
 0x585   : > { %v4169_v61 = vrot.slane %v4163_v12, 4  ;;  %4349 = vst [vmem:[#allocation3 + $0x110] sm:$0xff] %v4340_v41  ;;  %v4492_v7 = vunpack.c.l.b16 %v4340_v41  ;;  %v4493_v51 = vunpack.c.h.b16 %v4340_v41  ;;  %v4494_v36 = vunpack.c.l.b16 %v4342_v13 }
 0x586   : > { %4350 = vst [vmem:[#allocation3 + $0x118] sm:$0xff] %v4342_v13  ;;  %v4495_v34 = vunpack.c.h.b16 %v4342_v13 }
 0x587   : > { %v4175_v44 = vsel %vm612_vm6, %v4168_v37, %v4169_v61  ;;  %5576 = vmatmul.msk.bf16.vlgmr.msra.gmra.mxu0 %vm4568_vm0, %v7976_v31  ;;  %5577 = vmatmul.msk.bf16.vlgmr.msra.gmra.mxu1 %vm4568_vm0, %v7976_v31  ;;  %v4532_v8 = vpack.c.b16 %v4492_v7, %v4492_v7  ;;  %v4533_v32 = vpack.c.b16 %v4493_v51, %v4493_v51 }
 0x588   : > { %v4176_v6 = vsel %vm1121_vm7, %v7953_v11, %v4175_v44  ;;  %v4534_v27 = vpack.c.b16 %v4494_v36, %v4494_v36  ;;  %v4206_v37 = vpop.permute.xlu1 %4205  ;;  %v4535_v28 = vpack.c.b16 %v4495_v34, %v4495_v34  ;;  %v5762_v30 = vld [vmem:[#allocation3 + $0xf4] sm:$0xf0]  ;;  %v5570_v48 = vld [vmem:[#allocation3 + $0xf8] sm:$0xf0] }
 0x589   : > { %4185 = vst [vmem:[#allocation3 + $0x90] sm:$0xff] %v4176_v6  ;;  %v4586_v26 = vsel %vm612_vm6, %v4532_v8, 0  ;;  %v4589_v21 = vsel %vm612_vm6, %v4533_v32, 0  ;;  %v4211_v4 = vrot.slane %v4206_v37, 4  ;;  %v5745_v32 = vld [vmem:[#allocation3 + $0x6c] sm:$0xf0] }
 0x58a   : > { %v4592_v11 = vsel %vm612_vm6, %v4534_v27, 0  ;;  %4652 = vmatpush.bf16.msrb.mxu2 %v4586_v26  ;;  %4665 = vmatpush.bf16.msrb.mxu3 %v4589_v21  ;;  %v4595_v19 = vsel %vm612_vm6, %v4535_v28, 0  ;;  %v5498_v26 = vld [vmem:[#allocation3 + $0x70] sm:$0xf0] }
 0x58b   : > { %4678 = vmatpush.bf16.msrb.mxu0 %v4592_v11  ;;  %4691 = vmatpush.bf16.msrb.mxu1 %v4595_v19  ;;  %v5466_v19 = vld [vmem:[#allocation3 + $0x30] sm:$0xf0] }
 0x58c   : > { %v4245_v56 = vpop.permute.xlu0 %4244 }
 0x58d   : > { %v4251_v45 = vrot.slane %v4245_v56, 4 }
 0x58f   : > { %v4257_v58 = vsel %vm612_vm6, %v4250_v62, %v4251_v45  ;;  %v4259_v5 = vsel %vm612_vm6, %v4251_v45, %v4252_v22  ;;  %v5464_v22 = vld [vmem:[#allocation3 + $0x10] sm:$0xf]  ;;  %v5733_v45 = vld [vmem:[#allocation3 + $0x14] sm:$0xf] }
 0x590   : > { %v4258_v15 = vsel %vm1287_vm11, %v8008_v23, %v4257_v58  ;;  %v4260_v9 = vsel %vm1287_vm11, %v4245_v56, %v4259_v5  ;;  %v4204_v0 = vpop.permute.xlu1 %4203  ;;  %v5528_v50 = vld [vmem:[#allocation3 + $0x90] sm:$0xf]  ;;  %v5749_v1 = vld [vmem:[#allocation3 + $0x94] sm:$0xf]  ;;  %v5469_v5 = vor.u32 %v5733_v45, %v5466_v19 }
 0x591   : > { %4267 = vst [vmem:[#allocation3 + $0xd0] sm:$0xff] %v4258_v15  ;;  %v4210_v14 = vrot.slane %v4204_v0, 4  ;;  %v5737_v56 = vld [vmem:[#allocation3 + $0x2c] sm:$0xf0] }
 0x592   : > { %4268 = vst [vmem:[#allocation3 + $0xd8] sm:$0xff] %v4260_v9  ;;  %v5465_v58 = vor.u32 %v5737_v56, %v5464_v22 }
 0x593   : > { %v4216_v3 = vsel %vm612_vm6, %v4209_v43, %v4210_v14  ;;  %v4218_v62 = vsel %vm612_vm6, %v4210_v14, %v4211_v4  ;;  %v5738_v14 = vld [vmem:[#allocation3 + $0x34] sm:$0xf0] }
 0x594   : > { %v4165_v39 = vpop.permute.xlu0 %4164  ;;  %v4217_v46 = vsel %vm1204_vm9, %v7984_v42, %v4216_v3  ;;  %v4219_v23 = vsel %vm1204_vm9, %v4204_v0, %v4218_v62  ;;  %v5734_v3 = vld [vmem:[#allocation3 + $0x1c] sm:$0xf]  ;;  %vm4758_vm9 = vcmask 1041408  }
 0x595   : > { %v4170_v35 = vrot.slane %v4165_v39, 4  ;;  %4226 = vst [vmem:[#allocation3 + $0xb0] sm:$0xff] %v4217_v46  ;;  %v5474_v39 = vld [vmem:[#allocation3 + $0x38] sm:$0xf0] }
 0x596   : > { %4227 = vst [vmem:[#allocation3 + $0xb8] sm:$0xff] %v4219_v23  ;;  %v5477_v46 = vor.u32 %v5734_v3, %v5474_v39 }
 0x597   : > { %v4177_v2 = vsel %vm612_vm6, %v4169_v61, %v4170_v35  ;;  %v5472_v35 = vld [vmem:[#allocation3 + $0x18] sm:$0xf] }
 0x598   : > { %v4178_v20 = vsel %vm1121_vm7, %v4163_v12, %v4177_v2  ;;  %v5560_v25 = vld [vmem:[#allocation3 + $0xd0] sm:$0xf]  ;;  %v5757_v16 = vld [vmem:[#allocation3 + $0xd4] sm:$0xf]  ;;  %v4081_v24 = vpop.permute.xlu1 %4080  ;;  %v5473_v62 = vor.u32 %v5738_v14, %v5472_v35  ;;  %vm4760_vm7 = vcmask 1044484  }
 0x599   : > { %4186 = vst [vmem:[#allocation3 + $0x98] sm:$0xff] %v4178_v20  ;;  %v5561_v43 = vor.u32 %v5761_v47, %v5560_v25  ;;  %v5565_v10 = vor.u32 %v5757_v16, %v5562_v54  ;;  %v5568_v57 = vld [vmem:[#allocation3 + $0xd8] sm:$0xf]  ;;  %v5758_v55 = vld [vmem:[#allocation3 + $0xdc] sm:$0xf]  ;;  %v4087_v49 = vrot.slane %v4081_v24, 4 }
 0x59a   : > { %v5569_v42 = vor.u32 %v5762_v30, %v5568_v57  ;;  %v5573_v29 = vor.u32 %v5758_v55, %v5570_v48 }
 0x59b   : > { %4653 = vmatpush.bf16.msrb.mxu2 %v5561_v43  ;;  %4666 = vmatpush.bf16.msrb.mxu3 %v5565_v10  ;;  %v4093_v18 = vsel %vm612_vm6, %v4086_v60, %v4087_v49 }
 0x59c   : > { %v4083_v52 = vpop.permute.xlu0 %4082  ;;  %4679 = vmatpush.bf16.msrb.mxu0 %v5569_v42  ;;  %4692 = vmatpush.bf16.msrb.mxu1 %v5573_v29  ;;  %v4094_v12 = vsel %vm955_vm14, %v8006_v63, %v4093_v18  ;;  %v5753_v17 = vld [vmem:[#allocation3 + $0xac] sm:$0xf0]  ;;  %v5530_v61 = vld [vmem:[#allocation3 + $0xb0] sm:$0xf0] }
 0x59d   : > { %v4088_v40 = vrot.slane %v4083_v52, 4  ;;  %4103 = vst [vmem:[#allocation3 + $0x50] sm:$0xff] %v4094_v12  ;;  %v5529_v53 = vor.u32 %v5753_v17, %v5528_v50  ;;  %v5533_v41 = vor.u32 %v5749_v1, %v5530_v61  ;;  %v5754_v13 = vld [vmem:[#allocation3 + $0xb4] sm:$0xf0]  ;;  %v5538_v44 = vld [vmem:[#allocation3 + $0xb8] sm:$0xf0] }
 0x59f   : > { %v4095_v33 = vsel %vm612_vm6, %v4087_v49, %v4088_v40  ;;  %4654 = vmatpush.bf16.msrb.mxu2 %v5529_v53  ;;  %4667 = vmatpush.bf16.msrb.mxu3 %v5533_v41 }
 0x5a0   : > { %v4096_v7 = vsel %vm955_vm14, %v4081_v24, %v4095_v33  ;;  %v5536_v51 = vld [vmem:[#allocation3 + $0x98] sm:$0xf]  ;;  %v5750_v36 = vld [vmem:[#allocation3 + $0x9c] sm:$0xf]  ;;  %v4124_v63 = vpop.permute.xlu1 %4123 }
 0x5a1   : > { %4104 = vst [vmem:[#allocation3 + $0x58] sm:$0xff] %v4096_v7  ;;  %v5537_v60 = vor.u32 %v5754_v13, %v5536_v51  ;;  %v5541_v6 = vor.u32 %v5750_v36, %v5538_v44  ;;  %v4129_v34 = vrot.slane %v4124_v63, 4 }
 0x5a3   : > { %4680 = vmatpush.bf16.msrb.mxu0 %v5537_v60  ;;  %4693 = vmatpush.bf16.msrb.mxu1 %v5541_v6  ;;  %v4136_v8 = vsel %vm612_vm6, %v4128_v38, %v4129_v34 }
 0x5a4   : > { %v4137_v27 = vsel %vm1038_vm10, %v8028_v59, %v4136_v8  ;;  %v5496_v37 = vld [vmem:[#allocation3 + $0x50] sm:$0xf]  ;;  %v5741_v28 = vld [vmem:[#allocation3 + $0x54] sm:$0xf]  ;;  %v4705_v23 = vpop.permute.xlu0 %4704  ;;  %vm4764_vm10 = vcmask 1045508  }
 0x5a5   : > { %4145 = vst [vmem:[#allocation3 + $0x78] sm:$0xff] %v4137_v27  ;;  %v5497_v21 = vor.u32 %v5745_v32, %v5496_v37  ;;  %v5501_v11 = vor.u32 %v5741_v28, %v5498_v26  ;;  %v4707_v54 = vperm.slane %v4705_v23, 0 }
 0x5a7   : > { %4655 = vmatpush.bf16.msrb.mxu2 %v5497_v21  ;;  %4668 = vmatpush.bf16.msrb.mxu3 %v5501_v11 }
 0x5a8   : > { %v5504_v38 = vld [vmem:[#allocation3 + $0x58] sm:$0xf]  ;;  %v5742_v9 = vld [vmem:[#allocation3 + $0x5c] sm:$0xf]  ;;  %v4720_v47 = vpop.permute.xlu1 %4719 }
 0x5a9   : > { %v4722_v48 = vperm.slane %v4720_v47, 0 }
 0x5ab   : > { %4656 = vmatpush.bf16.msrb.mxu2 %v5465_v58  ;;  %4669 = vmatpush.bf16.msrb.mxu3 %v5469_v5 }
 0x5ac   : > { %v5746_v15 = vld [vmem:[#allocation3 + $0x74] sm:$0xf0]  ;;  %v5506_v59 = vld [vmem:[#allocation3 + $0x78] sm:$0xf0] }
 0x5ad   : > { %v5505_v0 = vor.u32 %v5746_v15, %v5504_v38  ;;  %v5509_v4 = vor.u32 %v5742_v9, %v5506_v59 }
 0x5ae   : > { %5578 = vmatmul.msk.bf16.vlgmr.msrb.gmra.mxu2 %vm4568_vm0, %v7976_v31  ;;  %5579 = vmatmul.msk.bf16.vlgmr.msrb.gmra.mxu3 %vm4568_vm0, %v7976_v31 }
 0x5af   : > { %4681 = vmatpush.bf16.msrb.mxu0 %v5505_v0  ;;  %4694 = vmatpush.bf16.msrb.mxu1 %v5509_v4 }
 0x5b3   : > { %4682 = vmatpush.bf16.msrb.mxu0 %v5473_v62  ;;  %4695 = vmatpush.bf16.msrb.mxu1 %v5477_v46 }
 0x5b6   : > { %5580 = vmatmul.msk.bf16.vlgmr.msrb.gmra.mxu0 %vm4568_vm0, %v7976_v31  ;;  %5581 = vmatmul.msk.bf16.vlgmr.msrb.gmra.mxu1 %vm4568_vm0, %v7976_v31 }
 0x5dc   : > { %v4606_v2 = vpop.f32.mrf.mxu2  ;;  %v4619_v30 = vpop.f32.mrf.mxu3 }
 0x5dd   : > { %v4708_v20 = vmul.f32 %v4707_v54, %v4606_v2  ;;  %v4709_v25 = vmul.f32 %v4707_v54, %v4619_v30 }
 0x5df   : > { %v4724_v16 = vadd.f32 %v4722_v48, %v4709_v25  ;;  %v4723_v43 = vadd.f32 %v4722_v48, %v4708_v20 }
 0x5e1   : > { %5785 = vtanh.f32 %v4724_v16 }
 0x5e2   : > { %5787 = vtanh.f32 %v4723_v43 }
 0x5e4   : > { %v4608_v10 = vpop.f32.mrf.mxu2  ;;  %v4621_v57 = vpop.f32.mrf.mxu3 }
 0x5e7   : > { %v5786_v55 = vpop.eup %5785 }
 0x5e8   : > { %v4747_v42 = vrot.slane %v5786_v55, 7  ;;  %v5788_v29 = vpop.eup %5787 }
 0x5ea   : > { %v4755_v24 = vsel %vm4754_vm4, %v5788_v29, %v4747_v42 }
 0x604   : > { %v4632_v31 = vpop.f32.mrf.mxu0  ;;  %v4645_v49 = vpop.f32.mrf.mxu1 }
 0x605   : > { %v4710_v18 = vmul.f32 %v4707_v54, %v4632_v31  ;;  %v4711_v50 = vmul.f32 %v4707_v54, %v4645_v49 }
 0x607   : > { %v4725_v12 = vadd.f32 %v4722_v48, %v4710_v18  ;;  %v4726_v17 = vadd.f32 %v4722_v48, %v4711_v50 }
 0x609   : > { %5789 = vtanh.f32 %v4725_v12 }
 0x60a   : > { %5791 = vtanh.f32 %v4726_v17 }
 0x60c   : > { %v4634_v52 = vpop.f32.mrf.mxu0  ;;  %v4647_v40 = vpop.f32.mrf.mxu1 }
 0x60f   : > { %v5790_v63 = vpop.eup %5789 }
 0x610   : > { %v5792_v34 = vpop.eup %5791  ;;  %v4748_v26 = vrot.slane %v5790_v63, 6 }
 0x611   : > { %v4749_v21 = vrot.slane %v5792_v34, 5 }
 0x613   : > { %v4757_v5 = vsel %vm4756_vm5, %v4748_v26, %v4749_v21 }
 0x614   : > { %v4759_v59 = vsel %vm4758_vm9, %v4755_v24, %v4757_v5 }
 0x631   : > { %v4658_v1 = vpop.f32.mrf.mxu2  ;;  %v4671_v61 = vpop.f32.mrf.mxu3 }
 0x632   : > { %v4712_v33 = vmul.f32 %v4707_v54, %v4658_v1  ;;  %v4713_v53 = vmul.f32 %v4707_v54, %v4671_v61 }
 0x633   : > { %v4684_v41 = vpop.f32.mrf.mxu0  ;;  %v4697_v13 = vpop.f32.mrf.mxu1 }
 0x634   : > { %v4727_v44 = vadd.f32 %v4722_v48, %v4712_v33  ;;  %v4728_v7 = vadd.f32 %v4722_v48, %v4713_v53  ;;  %v4714_v51 = vmul.f32 %v4707_v54, %v4684_v41  ;;  %v4715_v36 = vmul.f32 %v4707_v54, %v4697_v13 }
 0x636   : > { %5793 = vtanh.f32 %v4727_v44  ;;  %v4729_v60 = vadd.f32 %v4722_v48, %v4714_v51  ;;  %v4730_v6 = vadd.f32 %v4722_v48, %v4715_v36 }
 0x637   : > { %5795 = vtanh.f32 %v4728_v7 }
 0x638   : > { %5797 = vtanh.f32 %v4729_v60 }
 0x639   : > { %5799 = vtanh.f32 %v4730_v6  ;;  %v4660_v8 = vpop.f32.mrf.mxu2  ;;  %v4673_v32 = vpop.f32.mrf.mxu3 }
 0x63b   : > { %v4686_v27 = vpop.f32.mrf.mxu0  ;;  %v4699_v37 = vpop.f32.mrf.mxu1 }
 0x63c   : > { %v5794_v28 = vpop.eup %5793 }
 0x63d   : > { %v5796_v11 = vpop.eup %5795  ;;  %v4750_v19 = vrot.slane %v5794_v28, 4 }
 0x63e   : > { %v5798_v56 = vpop.eup %5797  ;;  %v4751_v22 = vrot.slane %v5796_v11, 3 }
 0x63f   : > { %v5800_v45 = vpop.eup %5799  ;;  %v4752_v58 = vrot.slane %v5798_v56, 2 }
 0x640   : > { %v4753_v38 = vrot.slane %v5800_v45, 1  ;;  %v4761_v15 = vsel %vm4760_vm7, %v4750_v19, %v4751_v22 }
 0x642   : > { %v4763_v9 = vsel %vm4762_vm8, %v4752_v58, %v4753_v38 }
 0x643   : > { %v4765_v0 = vsel %vm4764_vm10, %v4761_v15, %v4763_v9 }
 0x644   : > { %v4766_v4 = vsel %vm612_vm6, %v4759_v59, %v4765_v0 }
 0x645   : > { %4768 = vst [vmem:[%s361_s26] sm:$0xff] %v4766_v4 }
 0x646 PF: > { %s24_s17 = sadd.s32 1, %s5807_s17  }
 0x647   : > { %p21_p4 = scmp.ge.s32.totalorder %s24_s17, 4  }
 0x649   :  { %23 = sbr.rel (!%p21_p4) target bundleno = 4 (0x4), region = 90 }

</bundles_post_ra>
